<compile_context>
chip_gen: v5e
topology: v5e:2x2
jax: 0.10.0
libtpu: 0.0.40
codegen_flags: <defaults>
</compile_context>

<pallas_src>
import functools
import math

import jax
import jax.numpy as jnp
from jax.experimental import pallas as pl
from jax.experimental.pallas import tpu as pltpu

# ----------------------------- model hyperparams -----------------------------
N_CLS = 4          # number of classnames
N_CTX = 4          # learnable context tokens
SEQ_LEN = 16       # tokenized prompt length (1 SOT + N_CTX + name + EOT + pad)
TXT_DIM = 128      # ctx_dim == ln_final.weight.shape[0]
TXT_HEADS = 4
TXT_LAYERS = 2
EMBED_DIM = 128    # joint embedding dim (text_projection / visual proj output)

IMG_B, IMG_C, IMG_HW = 2, 3, 32
PATCH = 16
VIS_DIM = 128
VIS_HEADS = 4
VIS_LAYERS = 2

S_VIS = (IMG_HW // PATCH) ** 2 + 1       # tokens per image (cls + patches) = 5
N_TOWER = N_CLS * SEQ_LEN                # shared residual row count = 64
PATCH_K = IMG_C * PATCH * PATCH          # flattened patch pixels = 768

# The merged-tower kernel needs matching dims (true for this toy config; real
# CLIP would use two tower calls or pad the smaller tower).
assert TXT_DIM == VIS_DIM and TXT_HEADS == VIS_HEADS and TXT_LAYERS == VIS_LAYERS
assert IMG_B * S_VIS <= N_TOWER
assert N_TOWER % 8 == 0 and TXT_DIM % 128 == 0


# ------------------------------- in-kernel helpers ----------------------------
def _ln_f32(x, g, b):
    """LayerNorm in f32 (VPU); g/b broadcast from (1, D)."""
    mu = jnp.mean(x, axis=-1, keepdims=True)
    xc = x - mu
    var = jnp.mean(xc * xc, axis=-1, keepdims=True)
    return xc * jax.lax.rsqrt(var + 1e-5) * g + b


# --------------------- merged text+vision transformer tower -------------------
def _towers_kernel(xtxt_ref, vispre_ref, conv1_ref, visemb_ref, mask_ref,
                   preg_ref, preb_ref,
                   ln1g_ref, ln1b_ref, wqkv_ref, bqkv_ref, wout_ref, bout_ref,
                   ln2g_ref, ln2b_ref, wfc1_ref, bfc1_ref, wfc2_ref, bfc2_ref,
                   lnfg_ref, lnfb_ref, o_ref, *, n_heads):
    """grid = (tower, layer).  tower 0 = text, tower 1 = vision.
    o_ref (1, N, D) is the per-tower residual stream, resident in VMEM across
    the (arbitrary) layer axis."""
    tower = pl.program_id(0)
    layer = pl.program_id(1)
    n_layers = pl.num_programs(1)
    N, D = o_ref.shape[1], o_ref.shape[2]
    Dh = D // n_heads
    scale = 1.0 / math.sqrt(Dh)

    # ---- layer 0: materialize the residual stream ----
    @pl.when(layer == 0)
    def _():
        @pl.when(tower == 0)
        def _():
            # text: prompts + positional embedding (assembled in XLA; tiny)
            o_ref[0] = xtxt_ref[...]

        @pl.when(tower == 1)
        def _():
            # vision: fused patch-embed matmul (conv1 as matmul) + cls token +
            # positional embedding + ln_pre.  vispre holds patch pixels placed
            # at their residual rows (cls & pad rows zero); visemb holds
            # class_embedding+pos[0] at cls rows and pos[1:] at patch rows.
            x0 = jnp.dot(vispre_ref[...].astype(jnp.bfloat16), conv1_ref[...],
                         preferred_element_type=jnp.float32) + visemb_ref[...]
            o_ref[0] = _ln_f32(x0, preg_ref[0], preb_ref[0])

    x = o_ref[0]                                   # (N, D) f32 residual
    mask = mask_ref[0]                             # (N, N) additive mask

    # ---------------- attention sublayer ----------------
    h = _ln_f32(x, ln1g_ref[0, 0], ln1b_ref[0, 0])
    qkv = jnp.dot(h.astype(jnp.bfloat16), wqkv_ref[0, 0],
                  preferred_element_type=jnp.float32) + bqkv_ref[0, 0]   # (N, 3D)
    q = qkv[:, :D] * scale                         # fold 1/sqrt(Dh) into q
    k = qkv[:, D:2 * D]
    v = qkv[:, 2 * D:]
    w_out = wout_ref[0, 0]                         # (D, D) bf16
    attn = bout_ref[0, 0]                          # (1, D) bias; accumulate on top
    for hh in range(n_heads):                      # static unroll, lane slices
        sl = slice(hh * Dh, (hh + 1) * Dh)
        qh = q[:, sl].astype(jnp.bfloat16)
        kh = k[:, sl].astype(jnp.bfloat16)
        vh = v[:, sl].astype(jnp.bfloat16)
        s = jax.lax.dot_general(qh, kh, (((1,), (1,)), ((), ())),
                                preferred_element_type=jnp.float32) + mask
        s = s - jnp.max(s, axis=-1, keepdims=True)            # softmax (f32)
        p = jnp.exp(s)
        p = p * pl.reciprocal(jnp.sum(p, axis=-1, keepdims=True), approx=True)
        ho = jnp.dot(p.astype(jnp.bfloat16), vh,
                     preferred_element_type=jnp.float32)       # (N, Dh)
        # accumulate through this head's slice of the out-projection instead of
        # concatenating heads (keeps everything lane-dense on MXU/VPU).
        attn = attn + jnp.dot(ho.astype(jnp.bfloat16), w_out[sl, :],
                              preferred_element_type=jnp.float32)
    x = x + attn

    # ---------------- MLP sublayer (QuickGELU) ----------------
    h = _ln_f32(x, ln2g_ref[0, 0], ln2b_ref[0, 0])
    h = jnp.dot(h.astype(jnp.bfloat16), wfc1_ref[0, 0],
                preferred_element_type=jnp.float32) + bfc1_ref[0, 0]
    h = h * jax.nn.sigmoid(1.702 * h)              # QuickGELU (f32)
    h = jnp.dot(h.astype(jnp.bfloat16), wfc2_ref[0, 0],
                preferred_element_type=jnp.float32) + bfc2_ref[0, 0]
    x = x + h

    # Last layer: fold in the final LayerNorm (ln_final / ln_post).
    @pl.when(layer == n_layers - 1)
    def _():
        o_ref[0] = _ln_f32(x, lnfg_ref[0], lnfb_ref[0])

    @pl.when(layer < n_layers - 1)
    def _():
        o_ref[0] = x


def run_towers(x_txt, vis_pre, conv1_w, vis_emb, masks, blocks,
               pre_g, pre_b, fin_g, fin_b, *, n_heads):
    """Both CLIP towers in ONE pallas_call, grid = (2 towers, L layers)."""
    N, D = x_txt.shape
    KP = vis_pre.shape[1]
    L = blocks["w_qkv"].shape[1]
    D3 = blocks["w_qkv"].shape[-1]
    D4 = blocks["w_fc1"].shape[-1]
    assert D % n_heads == 0

    def whole(shape):
        return pl.BlockSpec(tuple(shape), lambda t, l: (0,) * len(shape))

    def per_tower(shape):
        return pl.BlockSpec((1,) + tuple(shape),
                            lambda t, l: (t,) + (0,) * len(shape))

    def per_layer(shape):
        return pl.BlockSpec((1, 1) + tuple(shape),
                            lambda t, l: (t, l) + (0,) * len(shape))

    in_specs = [
        whole((N, D)),                              # text embedded tokens
        whole((N, KP)),                             # vision patch pixels (padded)
        whole((KP, D)),                             # conv1 weight (bf16)
        whole((N, D)),                              # cls+pos additive embedding
        per_tower((N, N)),                          # per-tower additive mask
        per_tower((1, D)), per_tower((1, D)),       # ln_pre (vision only)
        per_layer((1, D)), per_layer((1, D)),       # ln1 g/b
        per_layer((D, D3)), per_layer((1, D3)),     # W_qkv / b_qkv
        per_layer((D, D)), per_layer((1, D)),       # W_out / b_out
        per_layer((1, D)), per_layer((1, D)),       # ln2 g/b
        per_layer((D, D4)), per_layer((1, D4)),     # W_fc1 / b_fc1
        per_layer((D4, D)), per_layer((1, D)),      # W_fc2 / b_fc2
        per_tower((1, D)), per_tower((1, D)),       # final LN (ln_final / ln_post)
    ]
    # VMEM working set is <2 MiB here; no vmem_limit_bytes needed on v5e/v6e/v7x.
    # At real CLIP-B sizes keep this per-layer blocking and set vmem_limit_bytes.
    return pl.pallas_call(
        functools.partial(_towers_kernel, n_heads=n_heads),
        out_shape=jax.ShapeDtypeStruct((2, N, D), jnp.float32),
        grid=(2, L),
        in_specs=in_specs,
        out_specs=per_tower((N, D)),                # resident residual stream
        compiler_params=pltpu.CompilerParams(
            dimension_semantics=("parallel", "arbitrary")),
    )(x_txt, vis_pre, conv1_w, vis_emb, masks, pre_g, pre_b,
      blocks["ln1_g"], blocks["ln1_b"], blocks["w_qkv"], blocks["b_qkv"],
      blocks["w_out"], blocks["b_out"], blocks["ln2_g"], blocks["ln2_b"],
      blocks["w_fc1"], blocks["b_fc1"], blocks["w_fc2"], blocks["b_fc2"],
      fin_g, fin_b)


# ------ fused tail: EOT/cls gathers + projections + L2 norm + logits ----------
def _tail_kernel(tower_ref, selt_ref, wt_ref, selv_ref, wv_ref, s_ref, o_ref):
    txt_full = tower_ref[0]                        # (N, D) text tower output
    vis_full = tower_ref[1]                        # (N, D) vision tower output
    # One-hot MXU gathers replace the XLA take_along_axis / cls-row slicing.
    eot = jnp.dot(selt_ref[...], txt_full, preferred_element_type=jnp.float32)
    cls = jnp.dot(selv_ref[...], vis_full, preferred_element_type=jnp.float32)
    txt = jnp.dot(eot.astype(jnp.bfloat16), wt_ref[...],
                  preferred_element_type=jnp.float32)          # (C, E)
    img = jnp.dot(cls.astype(jnp.bfloat16), wv_ref[...],
                  preferred_element_type=jnp.float32)          # (B, E)
    # L2-normalize (matches x / x.norm(); no eps, faithful to CLIP)
    txt = txt * jax.lax.rsqrt(jnp.sum(txt * txt, axis=-1, keepdims=True))
    img = img * jax.lax.rsqrt(jnp.sum(img * img, axis=-1, keepdims=True))
    logits = jax.lax.dot_general(img, txt, (((1,), (1,)), ((), ())),
                                 preferred_element_type=jnp.float32)
    o_ref[...] = s_ref[0, 0] * logits              # logit_scale from SMEM


def tail_logits(tower_out, sel_txt, text_projection, sel_vis, visual_proj,
                logit_scale_exp):
    T, N, D = tower_out.shape
    C = sel_txt.shape[0]
    B = sel_vis.shape[0]
    E = text_projection.shape[1]
    return pl.pallas_call(
        _tail_kernel,
        out_shape=jax.ShapeDtypeStruct((B, C), jnp.float32),
        grid=(1,),
        in_specs=[pl.BlockSpec((T, N, D), lambda i: (0, 0, 0)),
                  pl.BlockSpec((C, N), lambda i: (0, 0)),
                  pl.BlockSpec((D, E), lambda i: (0, 0)),
                  pl.BlockSpec((B, N), lambda i: (0, 0)),
                  pl.BlockSpec((D, E), lambda i: (0, 0)),
                  pl.BlockSpec(memory_space=pltpu.MemorySpace.SMEM)],
        out_specs=pl.BlockSpec((B, C), lambda i: (0, 0)),
    )(tower_out, sel_txt, text_projection, sel_vis, visual_proj,
      jnp.reshape(logit_scale_exp, (1, 1)).astype(jnp.float32))


# --------------------------------- JAX glue -----------------------------------
def clip_test_time_tuning_forward(image, params):
    """ClipTestTimeTuning.forward -> inference(image, ...): returns logits."""
    pp, tp, vp = params["prompt"], params["text"], params["visual"]

    # ---- PromptLearner (ctx_position='end', learned_cls=False) + pos emb ----
    ctx = jnp.broadcast_to(pp["ctx"][None, :, :], (N_CLS, N_CTX, TXT_DIM))
    prompts = jnp.concatenate([pp["token_prefix"], ctx, pp["token_suffix"]], axis=1)
    x_txt = (prompts + tp["pos_emb"][None, :, :]).reshape(N_TOWER, TXT_DIM)

    # ---- vision im2col (conv1 as matmul happens inside the tower kernel) ----
    B, C, H, W = image.shape
    gh, gw = H // PATCH, W // PATCH
    patches = image.reshape(B, C, gh, PATCH, gw, PATCH).transpose(0, 2, 4, 1, 3, 5)
    patches = patches.reshape(B, gh * gw, C * PATCH * PATCH)
    vis_pre = jnp.pad(patches, ((0, 0), (1, 0), (0, 0)))        # zero cls row
    vis_pre = vis_pre.reshape(B * S_VIS, PATCH_K)
    vis_pre = jnp.pad(vis_pre, ((0, N_TOWER - B * S_VIS), (0, 0)))
    emb_one = jnp.concatenate(
        [(vp["class_embedding"] + vp["pos_emb"][0])[None, :], vp["pos_emb"][1:]],
        axis=0)                                                 # (S_VIS, D)
    vis_emb = jnp.pad(jnp.tile(emb_one, (B, 1)),
                      ((0, N_TOWER - B * S_VIS), (0, 0)))

    # ---- both towers in one fused kernel ----
    tower_out = run_towers(x_txt, vis_pre, vp["conv1_w"], vis_emb,
                           params["masks"], params["towers"],
                           params["pre_ln_g"], params["pre_ln_b"],
                           params["final_ln_g"], params["final_ln_b"],
                           n_heads=TXT_HEADS)

    # ---- tail: EOT gather (one-hot, in-kernel), projections, norms, logits ----
    eot_idx = jnp.argmax(pp["tokenized_prompts"], axis=-1)      # (n_cls,)
    sel_txt = jax.nn.one_hot(jnp.arange(N_CLS) * SEQ_LEN + eot_idx,
                             N_TOWER, dtype=jnp.float32)
    # NOTE: torch.stack([t_feat], 0).mean(0) in get_text_features is an identity
    # for the single-prompt case and is folded away.
    # TODO(synk): the `self.l2_norm_cal` diagnostics branch in inference() only
    # records scalar statistics on the module and does not affect the returned
    # logits; it is skipped here.
    return tail_logits(tower_out, sel_txt, tp["text_projection"],
                       params["sel_vis"], vp["proj"],
                       jnp.exp(params["logit_scale"]))


# ------------------------------- parameter init -------------------------------
def _block_params(key, dim):
    ks = jax.random.split(key, 4)
    return {
        "ln1_g": jnp.ones((dim,), jnp.float32),
        "ln1_b": jnp.zeros((dim,), jnp.float32),
        "w_qkv": 0.02 * jax.random.normal(ks[0], (dim, 3 * dim), jnp.float32),
        "b_qkv": jnp.zeros((3 * dim,), jnp.float32),
        "w_out": 0.02 * jax.random.normal(ks[1], (dim, dim), jnp.float32),
        "b_out": jnp.zeros((dim,), jnp.float32),
        "ln2_g": jnp.ones((dim,), jnp.float32),
        "ln2_b": jnp.zeros((dim,), jnp.float32),
        "w_fc1": 0.02 * jax.random.normal(ks[2], (dim, 4 * dim), jnp.float32),
        "b_fc1": jnp.zeros((4 * dim,), jnp.float32),
        "w_fc2": 0.02 * jax.random.normal(ks[3], (4 * dim, dim), jnp.float32),
        "b_fc2": jnp.zeros((dim,), jnp.float32),
    }


def _stack_towers(text_blocks, vis_blocks):
    """Stack per-layer params with leading (tower, layer) axes; pre-cast matmul
    weights to bf16 once (biases / LN params stay f32, shaped (2, L, 1, n))."""
    L = len(text_blocks)

    def cat(name):
        t = jnp.stack([b[name] for b in text_blocks], axis=0)
        v = jnp.stack([b[name] for b in vis_blocks], axis=0)
        return jnp.stack([t, v], axis=0)            # (2, L, ...)

    out = {}
    for name in ("w_qkv", "w_out", "w_fc1", "w_fc2"):
        out[name] = cat(name).astype(jnp.bfloat16)
    for name in ("b_qkv", "b_out", "b_fc1", "b_fc2",
                 "ln1_g", "ln1_b", "ln2_g", "ln2_b"):
        arr = cat(name)
        out[name] = arr.reshape(2, L, 1, arr.shape[-1])
    return out


def _build_masks():
    """(2, N, N) additive masks: [0]=text (causal + block-diag over prompts),
    [1]=vision (block-diag over images; pad rows attend only to themselves)."""
    N = N_TOWER
    r = jnp.arange(N)
    seq_id = r // SEQ_LEN
    pos = r % SEQ_LEN
    txt_ok = (seq_id[:, None] == seq_id[None, :]) & (pos[:, None] >= pos[None, :])
    txt_mask = jnp.where(txt_ok, 0.0, -1e30)
    n_real = IMG_B * S_VIS
    vis_id = jnp.where(r < n_real, r // S_VIS, r)
    vis_mask = jnp.where(vis_id[:, None] == vis_id[None, :], 0.0, -1e30)
    return jnp.stack([txt_mask, vis_mask], axis=0).astype(jnp.float32)


def init_params(key):
    keys = iter(jax.random.split(key, 32))

    # ---- synthetic tokenized prompts: [SOT, ctx*N_CTX, name tokens, EOT, pad]
    name_lens = [1, 2, 3, 1]
    tok = []
    for nl in name_lens:
        row = [49406] + [343] * N_CTX + [500 + i for i in range(nl)] + [49407]
        row = row + [0] * (SEQ_LEN - len(row))
        tok.append(row)
    tokenized_prompts = jnp.array(tok, jnp.int32)                 # (n_cls, S)

    prompt = {
        "ctx": 0.02 * jax.random.normal(next(keys), (N_CTX, TXT_DIM), jnp.float32),
        "token_prefix": 0.02 * jax.random.normal(next(keys), (N_CLS, 1, TXT_DIM), jnp.float32),
        "token_suffix": 0.02 * jax.random.normal(
            next(keys), (N_CLS, SEQ_LEN - 1 - N_CTX, TXT_DIM), jnp.float32),
        "tokenized_prompts": tokenized_prompts,
    }

    text = {
        "pos_emb": 0.01 * jax.random.normal(next(keys), (SEQ_LEN, TXT_DIM), jnp.float32),
        "text_projection": (0.02 * jax.random.normal(
            next(keys), (TXT_DIM, EMBED_DIM), jnp.float32)).astype(jnp.bfloat16),
    }

    visual = {
        # conv1 weight (width, C, P, P) flattened to (C*P*P, width) for matmul
        "conv1_w": (0.02 * jax.random.normal(
            next(keys), (PATCH_K, VIS_DIM), jnp.float32)).astype(jnp.bfloat16),
        "class_embedding": 0.02 * jax.random.normal(next(keys), (VIS_DIM,), jnp.float32),
        "pos_emb": 0.01 * jax.random.normal(next(keys), (S_VIS, VIS_DIM), jnp.float32),
        "proj": (0.02 * jax.random.normal(
            next(keys), (VIS_DIM, EMBED_DIM), jnp.float32)).astype(jnp.bfloat16),
    }

    text_blocks = [_block_params(next(keys), TXT_DIM) for _ in range(TXT_LAYERS)]
    vis_blocks = [_block_params(next(keys), VIS_DIM) for _ in range(VIS_LAYERS)]

    ones = jnp.ones((1, TXT_DIM), jnp.float32)
    zeros = jnp.zeros((1, TXT_DIM), jnp.float32)

    return {
        "prompt": prompt,
        "text": text,
        "visual": visual,
        "towers": _stack_towers(text_blocks, vis_blocks),
        "pre_ln_g": jnp.stack([ones, ones], axis=0),    # [unused text slot, ln_pre]
        "pre_ln_b": jnp.stack([zeros, zeros], axis=0),
        "final_ln_g": jnp.stack([ones, ones], axis=0),  # [ln_final, ln_post]
        "final_ln_b": jnp.stack([zeros, zeros], axis=0),
        "masks": _build_masks(),
        "sel_vis": jax.nn.one_hot(jnp.arange(IMG_B) * S_VIS, N_TOWER,
                                  dtype=jnp.float32),   # cls-row selector
        "logit_scale": jnp.array(math.log(1.0 / 0.07), jnp.float32),  # CLIP default
    }


# ------------------------------------ main ------------------------------------
if __name__ == "__main__":
    params = init_params(jax.random.PRNGKey(0))
    image = jax.random.normal(jax.random.PRNGKey(1),
                              (IMG_B, IMG_C, IMG_HW, IMG_HW), jnp.float32)

    fwd = jax.jit(clip_test_time_tuning_forward)
    logits = fwd(image, params)
    jax.block_until_ready(logits)

    assert logits.shape == (IMG_B, N_CLS)
    assert bool(jnp.all(jnp.isfinite(logits)))
    print("KERNEL_OK")
</pallas_src>

<mosaic_0001>
module attributes {stable_mosaic.version = 11 : i64} {
  func.func @_towers_kernel(%arg0: i32, %arg1: i32, %arg2: memref<64x128xf32, #tpu.memory_space<vmem>>, %arg3: memref<64x768xf32, #tpu.memory_space<vmem>>, %arg4: memref<768x128xbf16, #tpu.memory_space<vmem>>, %arg5: memref<64x128xf32, #tpu.memory_space<vmem>>, %arg6: memref<1x64x64xf32, #tpu.memory_space<vmem>>, %arg7: memref<1x1x128xf32, #tpu.memory_space<vmem>>, %arg8: memref<1x1x128xf32, #tpu.memory_space<vmem>>, %arg9: memref<1x1x1x128xf32, #tpu.memory_space<vmem>>, %arg10: memref<1x1x1x128xf32, #tpu.memory_space<vmem>>, %arg11: memref<1x1x128x384xbf16, #tpu.memory_space<vmem>>, %arg12: memref<1x1x1x384xf32, #tpu.memory_space<vmem>>, %arg13: memref<1x1x128x128xbf16, #tpu.memory_space<vmem>>, %arg14: memref<1x1x1x128xf32, #tpu.memory_space<vmem>>, %arg15: memref<1x1x1x128xf32, #tpu.memory_space<vmem>>, %arg16: memref<1x1x1x128xf32, #tpu.memory_space<vmem>>, %arg17: memref<1x1x128x512xbf16, #tpu.memory_space<vmem>>, %arg18: memref<1x1x1x512xf32, #tpu.memory_space<vmem>>, %arg19: memref<1x1x512x128xbf16, #tpu.memory_space<vmem>>, %arg20: memref<1x1x1x128xf32, #tpu.memory_space<vmem>>, %arg21: memref<1x1x128xf32, #tpu.memory_space<vmem>>, %arg22: memref<1x1x128xf32, #tpu.memory_space<vmem>>, %arg23: memref<1x64x128xf32, #tpu.memory_space<vmem>>) attributes {dimension_semantics = [#tpu.dimension_semantics<parallel>, #tpu.dimension_semantics<arbitrary>], iteration_bounds = array<i64: 2, 2>, scalar_prefetch = 0 : i64, scratch_operands = 0 : i64, tpu.core_type = #tpu.core_type<tc>, window_params = [{pipeline_mode = #tpu.pipeline_mode<synchronous>, transform_indices = @transform_0, window_bounds = array<i64: 64, 128>}, {pipeline_mode = #tpu.pipeline_mode<synchronous>, transform_indices = @transform_1, window_bounds = array<i64: 64, 768>}, {pipeline_mode = #tpu.pipeline_mode<synchronous>, transform_indices = @transform_2, window_bounds = array<i64: 768, 128>}, {pipeline_mode = #tpu.pipeline_mode<synchronous>, transform_indices = @transform_3, window_bounds = array<i64: 64, 128>}, {transform_indices = @transform_4, window_bounds = array<i64: 1, 64, 64>}, {transform_indices = @transform_5, window_bounds = array<i64: 1, 1, 128>}, {transform_indices = @transform_6, window_bounds = array<i64: 1, 1, 128>}, {transform_indices = @transform_7, window_bounds = array<i64: 1, 1, 1, 128>}, {transform_indices = @transform_8, window_bounds = array<i64: 1, 1, 1, 128>}, {transform_indices = @transform_9, window_bounds = array<i64: 1, 1, 128, 384>}, {transform_indices = @transform_10, window_bounds = array<i64: 1, 1, 1, 384>}, {transform_indices = @transform_11, window_bounds = array<i64: 1, 1, 128, 128>}, {transform_indices = @transform_12, window_bounds = array<i64: 1, 1, 1, 128>}, {transform_indices = @transform_13, window_bounds = array<i64: 1, 1, 1, 128>}, {transform_indices = @transform_14, window_bounds = array<i64: 1, 1, 1, 128>}, {transform_indices = @transform_15, window_bounds = array<i64: 1, 1, 128, 512>}, {transform_indices = @transform_16, window_bounds = array<i64: 1, 1, 1, 512>}, {transform_indices = @transform_17, window_bounds = array<i64: 1, 1, 512, 128>}, {transform_indices = @transform_18, window_bounds = array<i64: 1, 1, 1, 128>}, {transform_indices = @transform_19, window_bounds = array<i64: 1, 1, 128>}, {transform_indices = @transform_20, window_bounds = array<i64: 1, 1, 128>}, {transform_indices = @transform_21, window_bounds = array<i64: 1, 64, 128>}]} {
    %c0_i32 = arith.constant 0 : i32
    %0 = arith.cmpi eq, %arg1, %c0_i32 : i32
    %1 = arith.extui %0 : i1 to i32
    %c0_i32_0 = arith.constant 0 : i32
    %2 = arith.cmpi ne, %1, %c0_i32_0 : i32
    scf.if %2 {
      %c0_i32_92 = arith.constant 0 : i32
      %201 = arith.cmpi eq, %arg0, %c0_i32_92 : i32
      %202 = arith.extui %201 : i1 to i32
      %c0_i32_93 = arith.constant 0 : i32
      %203 = arith.cmpi ne, %202, %c0_i32_93 : i32
      scf.if %203 {
        %c0_96 = arith.constant 0 : index
        %c0_97 = arith.constant 0 : index
        %207 = vector.load %arg2[%c0_96, %c0_97] : memref<64x128xf32, #tpu.memory_space<vmem>>, vector<64x128xf32>
        %c0_98 = arith.constant 0 : index
        %c0_99 = arith.constant 0 : index
        %c0_100 = arith.constant 0 : index
        %208 = vector.load %arg23[%c0_98, %c0_99, %c0_100] : memref<1x64x128xf32, #tpu.memory_space<vmem>>, vector<1x64x128xf32>
        %209 = vector.shape_cast %208 : vector<1x64x128xf32> to vector<64x128xf32>
        %210 = vector.shape_cast %207 : vector<64x128xf32> to vector<1x64x128xf32>
        tpu.vector_store %arg23[%c0_98, %c0_99, %c0_100], %210 {strides = array<i32>} : memref<1x64x128xf32, #tpu.memory_space<vmem>>, vector<1x64x128xf32>,
      } else {
      }
      %c1_i32_94 = arith.constant 1 : i32
      %204 = arith.cmpi eq, %arg0, %c1_i32_94 : i32
      %205 = arith.extui %204 : i1 to i32
      %c0_i32_95 = arith.constant 0 : i32
      %206 = arith.cmpi ne, %205, %c0_i32_95 : i32
      scf.if %206 {
        %c0_96 = arith.constant 0 : index
        %c0_97 = arith.constant 0 : index
        %207 = vector.load %arg3[%c0_96, %c0_97] : memref<64x768xf32, #tpu.memory_space<vmem>>, vector<64x768xf32>
        %208 = arith.truncf %207 : vector<64x768xf32> to vector<64x768xbf16>
        %c0_98 = arith.constant 0 : index
        %c0_99 = arith.constant 0 : index
        %209 = vector.load %arg4[%c0_98, %c0_99] : memref<768x128xbf16, #tpu.memory_space<vmem>>, vector<768x128xbf16>
        %cst_100 = arith.constant dense<0.000000e+00> : vector<64x128xf32>
        %210 = tpu.matmul %208, %209, %cst_100 {dimension_numbers = #tpu.dot_dimension_numbers<[1], [0], [0], [1], [0, 0, 1, 1], [], []>} : vector<64x768xbf16>, vector<768x128xbf16>, vector<64x128xf32> -> vector<64x128xf32>
        %c0_101 = arith.constant 0 : index
        %c0_102 = arith.constant 0 : index
        %211 = vector.load %arg5[%c0_101, %c0_102] : memref<64x128xf32, #tpu.memory_space<vmem>>, vector<64x128xf32>
        %212 = arith.addf %210, %211 : vector<64x128xf32>
        %c0_103 = arith.constant 0 : index
        %c0_104 = arith.constant 0 : index
        %c0_105 = arith.constant 0 : index
        %213 = vector.load %arg7[%c0_103, %c0_104, %c0_105] : memref<1x1x128xf32, #tpu.memory_space<vmem>>, vector<1x1x128xf32>
        %214 = vector.shape_cast %213 : vector<1x1x128xf32> to vector<1x128xf32>
        %c0_106 = arith.constant 0 : index
        %c0_107 = arith.constant 0 : index
        %c0_108 = arith.constant 0 : index
        %215 = vector.load %arg8[%c0_106, %c0_107, %c0_108] : memref<1x1x128xf32, #tpu.memory_space<vmem>>, vector<1x1x128xf32>
        %216 = vector.shape_cast %215 : vector<1x1x128xf32> to vector<1x128xf32>
        %cst_109 = arith.constant dense<0.000000e+00> : vector<64xf32>
        %217 = vector.multi_reduction <add>, %212, %cst_109 [1] : vector<64x128xf32> to vector<64xf32>
        %218 = vector.shape_cast %217 : vector<64xf32> to vector<64x1xf32>
        %cst_110 = arith.constant 1.280000e+02 : f32
        %219 = vector.broadcast %cst_110 : f32 to vector<64x1xf32>
        %220 = arith.divf %218, %219 : vector<64x1xf32>
        %221 = vector.broadcast %220 : vector<64x1xf32> to vector<64x128xf32>
        %222 = arith.subf %212, %221 : vector<64x128xf32>
        %223 = arith.mulf %222, %222 : vector<64x128xf32>
        %cst_111 = arith.constant dense<0.000000e+00> : vector<64xf32>
        %224 = vector.multi_reduction <add>, %223, %cst_111 [1] : vector<64x128xf32> to vector<64xf32>
        %225 = vector.shape_cast %224 : vector<64xf32> to vector<64x1xf32>
        %cst_112 = arith.constant 1.280000e+02 : f32
        %226 = vector.broadcast %cst_112 : f32 to vector<64x1xf32>
        %227 = arith.divf %225, %226 : vector<64x1xf32>
        %cst_113 = arith.constant 9.99999974E-6 : f32
        %228 = vector.broadcast %cst_113 : f32 to vector<64x1xf32>
        %229 = arith.addf %227, %228 : vector<64x1xf32>
        %230 = math.rsqrt %229 : vector<64x1xf32>
        %231 = vector.broadcast %230 : vector<64x1xf32> to vector<64x128xf32>
        %232 = arith.mulf %222, %231 : vector<64x128xf32>
        %233 = vector.broadcast %214 : vector<1x128xf32> to vector<64x128xf32>
        %234 = arith.mulf %232, %233 : vector<64x128xf32>
        %235 = vector.broadcast %216 : vector<1x128xf32> to vector<64x128xf32>
        %236 = arith.addf %234, %235 : vector<64x128xf32>
        %c0_114 = arith.constant 0 : index
        %c0_115 = arith.constant 0 : index
        %c0_116 = arith.constant 0 : index
        %237 = vector.load %arg23[%c0_114, %c0_115, %c0_116] : memref<1x64x128xf32, #tpu.memory_space<vmem>>, vector<1x64x128xf32>
        %238 = vector.shape_cast %237 : vector<1x64x128xf32> to vector<64x128xf32>
        %239 = vector.shape_cast %236 : vector<64x128xf32> to vector<1x64x128xf32>
        tpu.vector_store %arg23[%c0_114, %c0_115, %c0_116], %239 {strides = array<i32>} : memref<1x64x128xf32, #tpu.memory_space<vmem>>, vector<1x64x128xf32>,
      } else {
      }
    } else {
    }
    %c0 = arith.constant 0 : index
    %c0_1 = arith.constant 0 : index
    %c0_2 = arith.constant 0 : index
    %3 = vector.load %arg23[%c0, %c0_1, %c0_2] : memref<1x64x128xf32, #tpu.memory_space<vmem>>, vector<1x64x128xf32>
    %4 = vector.shape_cast %3 : vector<1x64x128xf32> to vector<64x128xf32>
    %c0_3 = arith.constant 0 : index
    %c0_4 = arith.constant 0 : index
    %c0_5 = arith.constant 0 : index
    %5 = vector.load %arg6[%c0_3, %c0_4, %c0_5] : memref<1x64x64xf32, #tpu.memory_space<vmem>>, vector<1x64x64xf32>
    %6 = vector.shape_cast %5 : vector<1x64x64xf32> to vector<64x64xf32>
    %c0_6 = arith.constant 0 : index
    %c0_7 = arith.constant 0 : index
    %c0_8 = arith.constant 0 : index
    %c0_9 = arith.constant 0 : index
    %7 = vector.load %arg9[%c0_6, %c0_7, %c0_8, %c0_9] : memref<1x1x1x128xf32, #tpu.memory_space<vmem>>, vector<1x1x1x128xf32>
    %8 = vector.shape_cast %7 : vector<1x1x1x128xf32> to vector<1x128xf32>
    %c0_10 = arith.constant 0 : index
    %c0_11 = arith.constant 0 : index
    %c0_12 = arith.constant 0 : index
    %c0_13 = arith.constant 0 : index
    %9 = vector.load %arg10[%c0_10, %c0_11, %c0_12, %c0_13] : memref<1x1x1x128xf32, #tpu.memory_space<vmem>>, vector<1x1x1x128xf32>
    %10 = vector.shape_cast %9 : vector<1x1x1x128xf32> to vector<1x128xf32>
    %cst = arith.constant dense<0.000000e+00> : vector<64xf32>
    %11 = vector.multi_reduction <add>, %4, %cst [1] : vector<64x128xf32> to vector<64xf32>
    %12 = vector.shape_cast %11 : vector<64xf32> to vector<64x1xf32>
    %cst_14 = arith.constant 1.280000e+02 : f32
    %13 = vector.broadcast %cst_14 : f32 to vector<64x1xf32>
    %14 = arith.divf %12, %13 : vector<64x1xf32>
    %15 = vector.broadcast %14 : vector<64x1xf32> to vector<64x128xf32>
    %16 = arith.subf %4, %15 : vector<64x128xf32>
    %17 = arith.mulf %16, %16 : vector<64x128xf32>
    %cst_15 = arith.constant dense<0.000000e+00> : vector<64xf32>
    %18 = vector.multi_reduction <add>, %17, %cst_15 [1] : vector<64x128xf32> to vector<64xf32>
    %19 = vector.shape_cast %18 : vector<64xf32> to vector<64x1xf32>
    %cst_16 = arith.constant 1.280000e+02 : f32
    %20 = vector.broadcast %cst_16 : f32 to vector<64x1xf32>
    %21 = arith.divf %19, %20 : vector<64x1xf32>
    %cst_17 = arith.constant 9.99999974E-6 : f32
    %22 = vector.broadcast %cst_17 : f32 to vector<64x1xf32>
    %23 = arith.addf %21, %22 : vector<64x1xf32>
    %24 = math.rsqrt %23 : vector<64x1xf32>
    %25 = vector.broadcast %24 : vector<64x1xf32> to vector<64x128xf32>
    %26 = arith.mulf %16, %25 : vector<64x128xf32>
    %27 = vector.broadcast %8 : vector<1x128xf32> to vector<64x128xf32>
    %28 = arith.mulf %26, %27 : vector<64x128xf32>
    %29 = vector.broadcast %10 : vector<1x128xf32> to vector<64x128xf32>
    %30 = arith.addf %28, %29 : vector<64x128xf32>
    %31 = arith.truncf %30 : vector<64x128xf32> to vector<64x128xbf16>
    %c0_18 = arith.constant 0 : index
    %c0_19 = arith.constant 0 : index
    %c0_20 = arith.constant 0 : index
    %c0_21 = arith.constant 0 : index
    %32 = vector.load %arg11[%c0_18, %c0_19, %c0_20, %c0_21] : memref<1x1x128x384xbf16, #tpu.memory_space<vmem>>, vector<1x1x128x384xbf16>
    %33 = vector.shape_cast %32 : vector<1x1x128x384xbf16> to vector<128x384xbf16>
    %cst_22 = arith.constant dense<0.000000e+00> : vector<64x384xf32>
    %34 = tpu.matmul %31, %33, %cst_22 {dimension_numbers = #tpu.dot_dimension_numbers<[1], [0], [0], [1], [0, 0, 1, 1], [], []>} : vector<64x128xbf16>, vector<128x384xbf16>, vector<64x384xf32> -> vector<64x384xf32>
    %c0_23 = arith.constant 0 : index
    %c0_24 = arith.constant 0 : index
    %c0_25 = arith.constant 0 : index
    %c0_26 = arith.constant 0 : index
    %35 = vector.load %arg12[%c0_23, %c0_24, %c0_25, %c0_26] : memref<1x1x1x384xf32, #tpu.memory_space<vmem>>, vector<1x1x1x384xf32>
    %36 = vector.shape_cast %35 : vector<1x1x1x384xf32> to vector<1x384xf32>
    %37 = vector.broadcast %36 : vector<1x384xf32> to vector<64x384xf32>
    %38 = arith.addf %34, %37 : vector<64x384xf32>
    %39 = vector.extract_strided_slice %38 {offsets = [0, 0], sizes = [64, 128], strides = [1, 1]} : vector<64x384xf32> to vector<64x128xf32>
    %cst_27 = arith.constant 0.176776692 : f32
    %40 = vector.broadcast %cst_27 : f32 to vector<64x128xf32>
    %41 = arith.mulf %39, %40 : vector<64x128xf32>
    %42 = vector.extract_strided_slice %38 {offsets = [0, 128], sizes = [64, 128], strides = [1, 1]} : vector<64x384xf32> to vector<64x128xf32>
    %43 = vector.extract_strided_slice %38 {offsets = [0, 256], sizes = [64, 128], strides = [1, 1]} : vector<64x384xf32> to vector<64x128xf32>
    %c0_28 = arith.constant 0 : index
    %c0_29 = arith.constant 0 : index
    %c0_30 = arith.constant 0 : index
    %c0_31 = arith.constant 0 : index
    %44 = vector.load %arg13[%c0_28, %c0_29, %c0_30, %c0_31] : memref<1x1x128x128xbf16, #tpu.memory_space<vmem>>, vector<1x1x128x128xbf16>
    %45 = vector.shape_cast %44 : vector<1x1x128x128xbf16> to vector<128x128xbf16>
    %c0_32 = arith.constant 0 : index
    %c0_33 = arith.constant 0 : index
    %c0_34 = arith.constant 0 : index
    %c0_35 = arith.constant 0 : index
    %46 = vector.load %arg14[%c0_32, %c0_33, %c0_34, %c0_35] : memref<1x1x1x128xf32, #tpu.memory_space<vmem>>, vector<1x1x1x128xf32>
    %47 = vector.shape_cast %46 : vector<1x1x1x128xf32> to vector<1x128xf32>
    %48 = vector.extract_strided_slice %41 {offsets = [0, 0], sizes = [64, 32], strides = [1, 1]} : vector<64x128xf32> to vector<64x32xf32>
    %49 = arith.truncf %48 : vector<64x32xf32> to vector<64x32xbf16>
    %50 = vector.extract_strided_slice %42 {offsets = [0, 0], sizes = [64, 32], strides = [1, 1]} : vector<64x128xf32> to vector<64x32xf32>
    %51 = arith.truncf %50 : vector<64x32xf32> to vector<64x32xbf16>
    %52 = vector.extract_strided_slice %43 {offsets = [0, 0], sizes = [64, 32], strides = [1, 1]} : vector<64x128xf32> to vector<64x32xf32>
    %53 = arith.truncf %52 : vector<64x32xf32> to vector<64x32xbf16>
    %cst_36 = arith.constant dense<0.000000e+00> : vector<64x64xf32>
    %54 = tpu.matmul %49, %51, %cst_36 {dimension_numbers = #tpu.dot_dimension_numbers<[1], [1], [0], [0], [0, 0, 1, 0], [], []>} : vector<64x32xbf16>, vector<64x32xbf16>, vector<64x64xf32> -> vector<64x64xf32>
    %55 = arith.addf %54, %6 : vector<64x64xf32>
    %cst_37 = arith.constant dense<0xFF800000> : vector<64xf32>
    %56 = vector.multi_reduction <maximumf>, %55, %cst_37 [1] : vector<64x64xf32> to vector<64xf32>
    %57 = vector.shape_cast %56 : vector<64xf32> to vector<64x1xf32>
    %58 = vector.broadcast %57 : vector<64x1xf32> to vector<64x64xf32>
    %59 = arith.subf %55, %58 : vector<64x64xf32>
    %60 = math.exp %59 : vector<64x64xf32>
    %cst_38 = arith.constant dense<0.000000e+00> : vector<64xf32>
    %61 = vector.multi_reduction <add>, %60, %cst_38 [1] : vector<64x64xf32> to vector<64xf32>
    %62 = vector.shape_cast %61 : vector<64xf32> to vector<64x1xf32>
    %63 = tpu.reciprocal %62 {approx = true} : vector<64x1xf32> -> vector<64x1xf32>
    %64 = vector.broadcast %63 : vector<64x1xf32> to vector<64x64xf32>
    %65 = arith.mulf %60, %64 : vector<64x64xf32>
    %66 = arith.truncf %65 : vector<64x64xf32> to vector<64x64xbf16>
    %cst_39 = arith.constant dense<0.000000e+00> : vector<64x32xf32>
    %67 = tpu.matmul %66, %53, %cst_39 {dimension_numbers = #tpu.dot_dimension_numbers<[1], [0], [0], [1], [0, 0, 1, 1], [], []>} : vector<64x64xbf16>, vector<64x32xbf16>, vector<64x32xf32> -> vector<64x32xf32>
    %68 = arith.truncf %67 : vector<64x32xf32> to vector<64x32xbf16>
    %69 = vector.extract_strided_slice %45 {offsets = [0, 0], sizes = [32, 128], strides = [1, 1]} : vector<128x128xbf16> to vector<32x128xbf16>
    %cst_40 = arith.constant dense<0.000000e+00> : vector<64x128xf32>
    %70 = tpu.matmul %68, %69, %cst_40 {dimension_numbers = #tpu.dot_dimension_numbers<[1], [0], [0], [1], [0, 0, 1, 1], [], []>} : vector<64x32xbf16>, vector<32x128xbf16>, vector<64x128xf32> -> vector<64x128xf32>
    %71 = vector.broadcast %47 : vector<1x128xf32> to vector<64x128xf32>
    %72 = arith.addf %71, %70 : vector<64x128xf32>
    %73 = vector.extract_strided_slice %41 {offsets = [0, 32], sizes = [64, 32], strides = [1, 1]} : vector<64x128xf32> to vector<64x32xf32>
    %74 = arith.truncf %73 : vector<64x32xf32> to vector<64x32xbf16>
    %75 = vector.extract_strided_slice %42 {offsets = [0, 32], sizes = [64, 32], strides = [1, 1]} : vector<64x128xf32> to vector<64x32xf32>
    %76 = arith.truncf %75 : vector<64x32xf32> to vector<64x32xbf16>
    %77 = vector.extract_strided_slice %43 {offsets = [0, 32], sizes = [64, 32], strides = [1, 1]} : vector<64x128xf32> to vector<64x32xf32>
    %78 = arith.truncf %77 : vector<64x32xf32> to vector<64x32xbf16>
    %cst_41 = arith.constant dense<0.000000e+00> : vector<64x64xf32>
    %79 = tpu.matmul %74, %76, %cst_41 {dimension_numbers = #tpu.dot_dimension_numbers<[1], [1], [0], [0], [0, 0, 1, 0], [], []>} : vector<64x32xbf16>, vector<64x32xbf16>, vector<64x64xf32> -> vector<64x64xf32>
    %80 = arith.addf %79, %6 : vector<64x64xf32>
    %cst_42 = arith.constant dense<0xFF800000> : vector<64xf32>
    %81 = vector.multi_reduction <maximumf>, %80, %cst_42 [1] : vector<64x64xf32> to vector<64xf32>
    %82 = vector.shape_cast %81 : vector<64xf32> to vector<64x1xf32>
    %83 = vector.broadcast %82 : vector<64x1xf32> to vector<64x64xf32>
    %84 = arith.subf %80, %83 : vector<64x64xf32>
    %85 = math.exp %84 : vector<64x64xf32>
    %cst_43 = arith.constant dense<0.000000e+00> : vector<64xf32>
    %86 = vector.multi_reduction <add>, %85, %cst_43 [1] : vector<64x64xf32> to vector<64xf32>
    %87 = vector.shape_cast %86 : vector<64xf32> to vector<64x1xf32>
    %88 = tpu.reciprocal %87 {approx = true} : vector<64x1xf32> -> vector<64x1xf32>
    %89 = vector.broadcast %88 : vector<64x1xf32> to vector<64x64xf32>
    %90 = arith.mulf %85, %89 : vector<64x64xf32>
    %91 = arith.truncf %90 : vector<64x64xf32> to vector<64x64xbf16>
    %cst_44 = arith.constant dense<0.000000e+00> : vector<64x32xf32>
    %92 = tpu.matmul %91, %78, %cst_44 {dimension_numbers = #tpu.dot_dimension_numbers<[1], [0], [0], [1], [0, 0, 1, 1], [], []>} : vector<64x64xbf16>, vector<64x32xbf16>, vector<64x32xf32> -> vector<64x32xf32>
    %93 = arith.truncf %92 : vector<64x32xf32> to vector<64x32xbf16>
    %94 = vector.extract_strided_slice %45 {offsets = [32, 0], sizes = [32, 128], strides = [1, 1]} : vector<128x128xbf16> to vector<32x128xbf16>
    %cst_45 = arith.constant dense<0.000000e+00> : vector<64x128xf32>
    %95 = tpu.matmul %93, %94, %cst_45 {dimension_numbers = #tpu.dot_dimension_numbers<[1], [0], [0], [1], [0, 0, 1, 1], [], []>} : vector<64x32xbf16>, vector<32x128xbf16>, vector<64x128xf32> -> vector<64x128xf32>
    %96 = arith.addf %72, %95 : vector<64x128xf32>
    %97 = vector.extract_strided_slice %41 {offsets = [0, 64], sizes = [64, 32], strides = [1, 1]} : vector<64x128xf32> to vector<64x32xf32>
    %98 = arith.truncf %97 : vector<64x32xf32> to vector<64x32xbf16>
    %99 = vector.extract_strided_slice %42 {offsets = [0, 64], sizes = [64, 32], strides = [1, 1]} : vector<64x128xf32> to vector<64x32xf32>
    %100 = arith.truncf %99 : vector<64x32xf32> to vector<64x32xbf16>
    %101 = vector.extract_strided_slice %43 {offsets = [0, 64], sizes = [64, 32], strides = [1, 1]} : vector<64x128xf32> to vector<64x32xf32>
    %102 = arith.truncf %101 : vector<64x32xf32> to vector<64x32xbf16>
    %cst_46 = arith.constant dense<0.000000e+00> : vector<64x64xf32>
    %103 = tpu.matmul %98, %100, %cst_46 {dimension_numbers = #tpu.dot_dimension_numbers<[1], [1], [0], [0], [0, 0, 1, 0], [], []>} : vector<64x32xbf16>, vector<64x32xbf16>, vector<64x64xf32> -> vector<64x64xf32>
    %104 = arith.addf %103, %6 : vector<64x64xf32>
    %cst_47 = arith.constant dense<0xFF800000> : vector<64xf32>
    %105 = vector.multi_reduction <maximumf>, %104, %cst_47 [1] : vector<64x64xf32> to vector<64xf32>
    %106 = vector.shape_cast %105 : vector<64xf32> to vector<64x1xf32>
    %107 = vector.broadcast %106 : vector<64x1xf32> to vector<64x64xf32>
    %108 = arith.subf %104, %107 : vector<64x64xf32>
    %109 = math.exp %108 : vector<64x64xf32>
    %cst_48 = arith.constant dense<0.000000e+00> : vector<64xf32>
    %110 = vector.multi_reduction <add>, %109, %cst_48 [1] : vector<64x64xf32> to vector<64xf32>
    %111 = vector.shape_cast %110 : vector<64xf32> to vector<64x1xf32>
    %112 = tpu.reciprocal %111 {approx = true} : vector<64x1xf32> -> vector<64x1xf32>
    %113 = vector.broadcast %112 : vector<64x1xf32> to vector<64x64xf32>
    %114 = arith.mulf %109, %113 : vector<64x64xf32>
    %115 = arith.truncf %114 : vector<64x64xf32> to vector<64x64xbf16>
    %cst_49 = arith.constant dense<0.000000e+00> : vector<64x32xf32>
    %116 = tpu.matmul %115, %102, %cst_49 {dimension_numbers = #tpu.dot_dimension_numbers<[1], [0], [0], [1], [0, 0, 1, 1], [], []>} : vector<64x64xbf16>, vector<64x32xbf16>, vector<64x32xf32> -> vector<64x32xf32>
    %117 = arith.truncf %116 : vector<64x32xf32> to vector<64x32xbf16>
    %118 = vector.extract_strided_slice %45 {offsets = [64, 0], sizes = [32, 128], strides = [1, 1]} : vector<128x128xbf16> to vector<32x128xbf16>
    %cst_50 = arith.constant dense<0.000000e+00> : vector<64x128xf32>
    %119 = tpu.matmul %117, %118, %cst_50 {dimension_numbers = #tpu.dot_dimension_numbers<[1], [0], [0], [1], [0, 0, 1, 1], [], []>} : vector<64x32xbf16>, vector<32x128xbf16>, vector<64x128xf32> -> vector<64x128xf32>
    %120 = arith.addf %96, %119 : vector<64x128xf32>
    %121 = vector.extract_strided_slice %41 {offsets = [0, 96], sizes = [64, 32], strides = [1, 1]} : vector<64x128xf32> to vector<64x32xf32>
    %122 = arith.truncf %121 : vector<64x32xf32> to vector<64x32xbf16>
    %123 = vector.extract_strided_slice %42 {offsets = [0, 96], sizes = [64, 32], strides = [1, 1]} : vector<64x128xf32> to vector<64x32xf32>
    %124 = arith.truncf %123 : vector<64x32xf32> to vector<64x32xbf16>
    %125 = vector.extract_strided_slice %43 {offsets = [0, 96], sizes = [64, 32], strides = [1, 1]} : vector<64x128xf32> to vector<64x32xf32>
    %126 = arith.truncf %125 : vector<64x32xf32> to vector<64x32xbf16>
    %cst_51 = arith.constant dense<0.000000e+00> : vector<64x64xf32>
    %127 = tpu.matmul %122, %124, %cst_51 {dimension_numbers = #tpu.dot_dimension_numbers<[1], [1], [0], [0], [0, 0, 1, 0], [], []>} : vector<64x32xbf16>, vector<64x32xbf16>, vector<64x64xf32> -> vector<64x64xf32>
    %128 = arith.addf %127, %6 : vector<64x64xf32>
    %cst_52 = arith.constant dense<0xFF800000> : vector<64xf32>
    %129 = vector.multi_reduction <maximumf>, %128, %cst_52 [1] : vector<64x64xf32> to vector<64xf32>
    %130 = vector.shape_cast %129 : vector<64xf32> to vector<64x1xf32>
    %131 = vector.broadcast %130 : vector<64x1xf32> to vector<64x64xf32>
    %132 = arith.subf %128, %131 : vector<64x64xf32>
    %133 = math.exp %132 : vector<64x64xf32>
    %cst_53 = arith.constant dense<0.000000e+00> : vector<64xf32>
    %134 = vector.multi_reduction <add>, %133, %cst_53 [1] : vector<64x64xf32> to vector<64xf32>
    %135 = vector.shape_cast %134 : vector<64xf32> to vector<64x1xf32>
    %136 = tpu.reciprocal %135 {approx = true} : vector<64x1xf32> -> vector<64x1xf32>
    %137 = vector.broadcast %136 : vector<64x1xf32> to vector<64x64xf32>
    %138 = arith.mulf %133, %137 : vector<64x64xf32>
    %139 = arith.truncf %138 : vector<64x64xf32> to vector<64x64xbf16>
    %cst_54 = arith.constant dense<0.000000e+00> : vector<64x32xf32>
    %140 = tpu.matmul %139, %126, %cst_54 {dimension_numbers = #tpu.dot_dimension_numbers<[1], [0], [0], [1], [0, 0, 1, 1], [], []>} : vector<64x64xbf16>, vector<64x32xbf16>, vector<64x32xf32> -> vector<64x32xf32>
    %141 = arith.truncf %140 : vector<64x32xf32> to vector<64x32xbf16>
    %142 = vector.extract_strided_slice %45 {offsets = [96, 0], sizes = [32, 128], strides = [1, 1]} : vector<128x128xbf16> to vector<32x128xbf16>
    %cst_55 = arith.constant dense<0.000000e+00> : vector<64x128xf32>
    %143 = tpu.matmul %141, %142, %cst_55 {dimension_numbers = #tpu.dot_dimension_numbers<[1], [0], [0], [1], [0, 0, 1, 1], [], []>} : vector<64x32xbf16>, vector<32x128xbf16>, vector<64x128xf32> -> vector<64x128xf32>
    %144 = arith.addf %120, %143 : vector<64x128xf32>
    %145 = arith.addf %4, %144 : vector<64x128xf32>
    %c0_56 = arith.constant 0 : index
    %c0_57 = arith.constant 0 : index
    %c0_58 = arith.constant 0 : index
    %c0_59 = arith.constant 0 : index
    %146 = vector.load %arg15[%c0_56, %c0_57, %c0_58, %c0_59] : memref<1x1x1x128xf32, #tpu.memory_space<vmem>>, vector<1x1x1x128xf32>
    %147 = vector.shape_cast %146 : vector<1x1x1x128xf32> to vector<1x128xf32>
    %c0_60 = arith.constant 0 : index
    %c0_61 = arith.constant 0 : index
    %c0_62 = arith.constant 0 : index
    %c0_63 = arith.constant 0 : index
    %148 = vector.load %arg16[%c0_60, %c0_61, %c0_62, %c0_63] : memref<1x1x1x128xf32, #tpu.memory_space<vmem>>, vector<1x1x1x128xf32>
    %149 = vector.shape_cast %148 : vector<1x1x1x128xf32> to vector<1x128xf32>
    %cst_64 = arith.constant dense<0.000000e+00> : vector<64xf32>
    %150 = vector.multi_reduction <add>, %145, %cst_64 [1] : vector<64x128xf32> to vector<64xf32>
    %151 = vector.shape_cast %150 : vector<64xf32> to vector<64x1xf32>
    %cst_65 = arith.constant 1.280000e+02 : f32
    %152 = vector.broadcast %cst_65 : f32 to vector<64x1xf32>
    %153 = arith.divf %151, %152 : vector<64x1xf32>
    %154 = vector.broadcast %153 : vector<64x1xf32> to vector<64x128xf32>
    %155 = arith.subf %145, %154 : vector<64x128xf32>
    %156 = arith.mulf %155, %155 : vector<64x128xf32>
    %cst_66 = arith.constant dense<0.000000e+00> : vector<64xf32>
    %157 = vector.multi_reduction <add>, %156, %cst_66 [1] : vector<64x128xf32> to vector<64xf32>
    %158 = vector.shape_cast %157 : vector<64xf32> to vector<64x1xf32>
    %cst_67 = arith.constant 1.280000e+02 : f32
    %159 = vector.broadcast %cst_67 : f32 to vector<64x1xf32>
    %160 = arith.divf %158, %159 : vector<64x1xf32>
    %cst_68 = arith.constant 9.99999974E-6 : f32
    %161 = vector.broadcast %cst_68 : f32 to vector<64x1xf32>
    %162 = arith.addf %160, %161 : vector<64x1xf32>
    %163 = math.rsqrt %162 : vector<64x1xf32>
    %164 = vector.broadcast %163 : vector<64x1xf32> to vector<64x128xf32>
    %165 = arith.mulf %155, %164 : vector<64x128xf32>
    %166 = vector.broadcast %147 : vector<1x128xf32> to vector<64x128xf32>
    %167 = arith.mulf %165, %166 : vector<64x128xf32>
    %168 = vector.broadcast %149 : vector<1x128xf32> to vector<64x128xf32>
    %169 = arith.addf %167, %168 : vector<64x128xf32>
    %170 = arith.truncf %169 : vector<64x128xf32> to vector<64x128xbf16>
    %c0_69 = arith.constant 0 : index
    %c0_70 = arith.constant 0 : index
    %c0_71 = arith.constant 0 : index
    %c0_72 = arith.constant 0 : index
    %171 = vector.load %arg17[%c0_69, %c0_70, %c0_71, %c0_72] : memref<1x1x128x512xbf16, #tpu.memory_space<vmem>>, vector<1x1x128x512xbf16>
    %172 = vector.shape_cast %171 : vector<1x1x128x512xbf16> to vector<128x512xbf16>
    %cst_73 = arith.constant dense<0.000000e+00> : vector<64x512xf32>
    %173 = tpu.matmul %170, %172, %cst_73 {dimension_numbers = #tpu.dot_dimension_numbers<[1], [0], [0], [1], [0, 0, 1, 1], [], []>} : vector<64x128xbf16>, vector<128x512xbf16>, vector<64x512xf32> -> vector<64x512xf32>
    %c0_74 = arith.constant 0 : index
    %c0_75 = arith.constant 0 : index
    %c0_76 = arith.constant 0 : index
    %c0_77 = arith.constant 0 : index
    %174 = vector.load %arg18[%c0_74, %c0_75, %c0_76, %c0_77] : memref<1x1x1x512xf32, #tpu.memory_space<vmem>>, vector<1x1x1x512xf32>
    %175 = vector.shape_cast %174 : vector<1x1x1x512xf32> to vector<1x512xf32>
    %176 = vector.broadcast %175 : vector<1x512xf32> to vector<64x512xf32>
    %177 = arith.addf %173, %176 : vector<64x512xf32>
    %cst_78 = arith.constant 1.702000e+00 : f32
    %178 = vector.broadcast %cst_78 : f32 to vector<64x512xf32>
    %179 = arith.mulf %178, %177 : vector<64x512xf32>
    %180 = arith.negf %179 : vector<64x512xf32>
    %181 = math.exp %180 : vector<64x512xf32>
    %cst_79 = arith.constant 1.000000e+00 : f32
    %182 = vector.broadcast %cst_79 : f32 to vector<64x512xf32>
    %183 = arith.addf %182, %181 : vector<64x512xf32>
    %184 = arith.divf %182, %183 : vector<64x512xf32>
    %185 = arith.mulf %177, %184 : vector<64x512xf32>
    %186 = arith.truncf %185 : vector<64x512xf32> to vector<64x512xbf16>
    %c0_80 = arith.constant 0 : index
    %c0_81 = arith.constant 0 : index
    %c0_82 = arith.constant 0 : index
    %c0_83 = arith.constant 0 : index
    %187 = vector.load %arg19[%c0_80, %c0_81, %c0_82, %c0_83] : memref<1x1x512x128xbf16, #tpu.memory_space<vmem>>, vector<1x1x512x128xbf16>
    %188 = vector.shape_cast %187 : vector<1x1x512x128xbf16> to vector<512x128xbf16>
    %cst_84 = arith.constant dense<0.000000e+00> : vector<64x128xf32>
    %189 = tpu.matmul %186, %188, %cst_84 {dimension_numbers = #tpu.dot_dimension_numbers<[1], [0], [0], [1], [0, 0, 1, 1], [], []>} : vector<64x512xbf16>, vector<512x128xbf16>, vector<64x128xf32> -> vector<64x128xf32>
    %c0_85 = arith.constant 0 : index
    %c0_86 = arith.constant 0 : index
    %c0_87 = arith.constant 0 : index
    %c0_88 = arith.constant 0 : index
    %190 = vector.load %arg20[%c0_85, %c0_86, %c0_87, %c0_88] : memref<1x1x1x128xf32, #tpu.memory_space<vmem>>, vector<1x1x1x128xf32>
    %191 = vector.shape_cast %190 : vector<1x1x1x128xf32> to vector<1x128xf32>
    %192 = vector.broadcast %191 : vector<1x128xf32> to vector<64x128xf32>
    %193 = arith.addf %189, %192 : vector<64x128xf32>
    %194 = arith.addf %145, %193 : vector<64x128xf32>
    %c1_i32 = arith.constant 1 : i32
    %195 = arith.cmpi eq, %arg1, %c1_i32 : i32
    %196 = arith.extui %195 : i1 to i32
    %c0_i32_89 = arith.constant 0 : i32
    %197 = arith.cmpi ne, %196, %c0_i32_89 : i32
    scf.if %197 {
      %c0_92 = arith.constant 0 : index
      %c0_93 = arith.constant 0 : index
      %c0_94 = arith.constant 0 : index
      %201 = vector.load %arg21[%c0_92, %c0_93, %c0_94] : memref<1x1x128xf32, #tpu.memory_space<vmem>>, vector<1x1x128xf32>
      %202 = vector.shape_cast %201 : vector<1x1x128xf32> to vector<1x128xf32>
      %c0_95 = arith.constant 0 : index
      %c0_96 = arith.constant 0 : index
      %c0_97 = arith.constant 0 : index
      %203 = vector.load %arg22[%c0_95, %c0_96, %c0_97] : memref<1x1x128xf32, #tpu.memory_space<vmem>>, vector<1x1x128xf32>
      %204 = vector.shape_cast %203 : vector<1x1x128xf32> to vector<1x128xf32>
      %cst_98 = arith.constant dense<0.000000e+00> : vector<64xf32>
      %205 = vector.multi_reduction <add>, %194, %cst_98 [1] : vector<64x128xf32> to vector<64xf32>
      %206 = vector.shape_cast %205 : vector<64xf32> to vector<64x1xf32>
      %cst_99 = arith.constant 1.280000e+02 : f32
      %207 = vector.broadcast %cst_99 : f32 to vector<64x1xf32>
      %208 = arith.divf %206, %207 : vector<64x1xf32>
      %209 = vector.broadcast %208 : vector<64x1xf32> to vector<64x128xf32>
      %210 = arith.subf %194, %209 : vector<64x128xf32>
      %211 = arith.mulf %210, %210 : vector<64x128xf32>
      %cst_100 = arith.constant dense<0.000000e+00> : vector<64xf32>
      %212 = vector.multi_reduction <add>, %211, %cst_100 [1] : vector<64x128xf32> to vector<64xf32>
      %213 = vector.shape_cast %212 : vector<64xf32> to vector<64x1xf32>
      %cst_101 = arith.constant 1.280000e+02 : f32
      %214 = vector.broadcast %cst_101 : f32 to vector<64x1xf32>
      %215 = arith.divf %213, %214 : vector<64x1xf32>
      %cst_102 = arith.constant 9.99999974E-6 : f32
      %216 = vector.broadcast %cst_102 : f32 to vector<64x1xf32>
      %217 = arith.addf %215, %216 : vector<64x1xf32>
      %218 = math.rsqrt %217 : vector<64x1xf32>
      %219 = vector.broadcast %218 : vector<64x1xf32> to vector<64x128xf32>
      %220 = arith.mulf %210, %219 : vector<64x128xf32>
      %221 = vector.broadcast %202 : vector<1x128xf32> to vector<64x128xf32>
      %222 = arith.mulf %220, %221 : vector<64x128xf32>
      %223 = vector.broadcast %204 : vector<1x128xf32> to vector<64x128xf32>
      %224 = arith.addf %222, %223 : vector<64x128xf32>
      %c0_103 = arith.constant 0 : index
      %c0_104 = arith.constant 0 : index
      %c0_105 = arith.constant 0 : index
      %225 = vector.load %arg23[%c0_103, %c0_104, %c0_105] : memref<1x64x128xf32, #tpu.memory_space<vmem>>, vector<1x64x128xf32>
      %226 = vector.shape_cast %225 : vector<1x64x128xf32> to vector<64x128xf32>
      %227 = vector.shape_cast %224 : vector<64x128xf32> to vector<1x64x128xf32>
      tpu.vector_store %arg23[%c0_103, %c0_104, %c0_105], %227 {strides = array<i32>} : memref<1x64x128xf32, #tpu.memory_space<vmem>>, vector<1x64x128xf32>,
    } else {
    }
    %c1_i32_90 = arith.constant 1 : i32
    %198 = arith.cmpi slt, %arg1, %c1_i32_90 : i32
    %199 = arith.extui %198 : i1 to i32
    %c0_i32_91 = arith.constant 0 : i32
    %200 = arith.cmpi ne, %199, %c0_i32_91 : i32
    scf.if %200 {
      %c0_92 = arith.constant 0 : index
      %c0_93 = arith.constant 0 : index
      %c0_94 = arith.constant 0 : index
      %201 = vector.load %arg23[%c0_92, %c0_93, %c0_94] : memref<1x64x128xf32, #tpu.memory_space<vmem>>, vector<1x64x128xf32>
      %202 = vector.shape_cast %201 : vector<1x64x128xf32> to vector<64x128xf32>
      %203 = vector.shape_cast %194 : vector<64x128xf32> to vector<1x64x128xf32>
      tpu.vector_store %arg23[%c0_92, %c0_93, %c0_94], %203 {strides = array<i32>} : memref<1x64x128xf32, #tpu.memory_space<vmem>>, vector<1x64x128xf32>,
    } else {
    }
    return
  }
  func.func @transform_0(%arg0: i32, %arg1: i32) -> (i32, i32) {
    %c0_i32 = arith.constant 0 : i32
    %c0_i32_0 = arith.constant 0 : i32
    %c0_i32_1 = arith.constant 0 : i32
    return %c0_i32, %c0_i32_0 : i32, i32
  }
  func.func @transform_1(%arg0: i32, %arg1: i32) -> (i32, i32) {
    %c0_i32 = arith.constant 0 : i32
    %c0_i32_0 = arith.constant 0 : i32
    %c0_i32_1 = arith.constant 0 : i32
    return %c0_i32, %c0_i32_0 : i32, i32
  }
  func.func @transform_2(%arg0: i32, %arg1: i32) -> (i32, i32) {
    %c0_i32 = arith.constant 0 : i32
    %c0_i32_0 = arith.constant 0 : i32
    %c0_i32_1 = arith.constant 0 : i32
    return %c0_i32, %c0_i32_0 : i32, i32
  }
  func.func @transform_3(%arg0: i32, %arg1: i32) -> (i32, i32) {
    %c0_i32 = arith.constant 0 : i32
    %c0_i32_0 = arith.constant 0 : i32
    %c0_i32_1 = arith.constant 0 : i32
    return %c0_i32, %c0_i32_0 : i32, i32
  }
  func.func @transform_4(%arg0: i32, %arg1: i32) -> (i32, i32, i32) {
    %c0_i32 = arith.constant 0 : i32
    %c0_i32_0 = arith.constant 0 : i32
    %c0_i32_1 = arith.constant 0 : i32
    return %arg0, %c0_i32, %c0_i32_0 : i32, i32, i32
  }
  func.func @transform_5(%arg0: i32, %arg1: i32) -> (i32, i32, i32) {
    %c0_i32 = arith.constant 0 : i32
    %c0_i32_0 = arith.constant 0 : i32
    %c0_i32_1 = arith.constant 0 : i32
    return %arg0, %c0_i32, %c0_i32_0 : i32, i32, i32
  }
  func.func @transform_6(%arg0: i32, %arg1: i32) -> (i32, i32, i32) {
    %c0_i32 = arith.constant 0 : i32
    %c0_i32_0 = arith.constant 0 : i32
    %c0_i32_1 = arith.constant 0 : i32
    return %arg0, %c0_i32, %c0_i32_0 : i32, i32, i32
  }
  func.func @transform_7(%arg0: i32, %arg1: i32) -> (i32, i32, i32, i32) {
    %c0_i32 = arith.constant 0 : i32
    %c0_i32_0 = arith.constant 0 : i32
    %c0_i32_1 = arith.constant 0 : i32
    return %arg0, %arg1, %c0_i32, %c0_i32_0 : i32, i32, i32, i32
  }
  func.func @transform_8(%arg0: i32, %arg1: i32) -> (i32, i32, i32, i32) {
    %c0_i32 = arith.constant 0 : i32
    %c0_i32_0 = arith.constant 0 : i32
    %c0_i32_1 = arith.constant 0 : i32
    return %arg0, %arg1, %c0_i32, %c0_i32_0 : i32, i32, i32, i32
  }
  func.func @transform_9(%arg0: i32, %arg1: i32) -> (i32, i32, i32, i32) {
    %c0_i32 = arith.constant 0 : i32
    %c0_i32_0 = arith.constant 0 : i32
    %c0_i32_1 = arith.constant 0 : i32
    return %arg0, %arg1, %c0_i32, %c0_i32_0 : i32, i32, i32, i32
  }
  func.func @transform_10(%arg0: i32, %arg1: i32) -> (i32, i32, i32, i32) {
    %c0_i32 = arith.constant 0 : i32
    %c0_i32_0 = arith.constant 0 : i32
    %c0_i32_1 = arith.constant 0 : i32
    return %arg0, %arg1, %c0_i32, %c0_i32_0 : i32, i32, i32, i32
  }
  func.func @transform_11(%arg0: i32, %arg1: i32) -> (i32, i32, i32, i32) {
    %c0_i32 = arith.constant 0 : i32
    %c0_i32_0 = arith.constant 0 : i32
    %c0_i32_1 = arith.constant 0 : i32
    return %arg0, %arg1, %c0_i32, %c0_i32_0 : i32, i32, i32, i32
  }
  func.func @transform_12(%arg0: i32, %arg1: i32) -> (i32, i32, i32, i32) {
    %c0_i32 = arith.constant 0 : i32
    %c0_i32_0 = arith.constant 0 : i32
    %c0_i32_1 = arith.constant 0 : i32
    return %arg0, %arg1, %c0_i32, %c0_i32_0 : i32, i32, i32, i32
  }
  func.func @transform_13(%arg0: i32, %arg1: i32) -> (i32, i32, i32, i32) {
    %c0_i32 = arith.constant 0 : i32
    %c0_i32_0 = arith.constant 0 : i32
    %c0_i32_1 = arith.constant 0 : i32
    return %arg0, %arg1, %c0_i32, %c0_i32_0 : i32, i32, i32, i32
  }
  func.func @transform_14(%arg0: i32, %arg1: i32) -> (i32, i32, i32, i32) {
    %c0_i32 = arith.constant 0 : i32
    %c0_i32_0 = arith.constant 0 : i32
    %c0_i32_1 = arith.constant 0 : i32
    return %arg0, %arg1, %c0_i32, %c0_i32_0 : i32, i32, i32, i32
  }
  func.func @transform_15(%arg0: i32, %arg1: i32) -> (i32, i32, i32, i32) {
    %c0_i32 = arith.constant 0 : i32
    %c0_i32_0 = arith.constant 0 : i32
    %c0_i32_1 = arith.constant 0 : i32
    return %arg0, %arg1, %c0_i32, %c0_i32_0 : i32, i32, i32, i32
  }
  func.func @transform_16(%arg0: i32, %arg1: i32) -> (i32, i32, i32, i32) {
    %c0_i32 = arith.constant 0 : i32
    %c0_i32_0 = arith.constant 0 : i32
    %c0_i32_1 = arith.constant 0 : i32
    return %arg0, %arg1, %c0_i32, %c0_i32_0 : i32, i32, i32, i32
  }
  func.func @transform_17(%arg0: i32, %arg1: i32) -> (i32, i32, i32, i32) {
    %c0_i32 = arith.constant 0 : i32
    %c0_i32_0 = arith.constant 0 : i32
    %c0_i32_1 = arith.constant 0 : i32
    return %arg0, %arg1, %c0_i32, %c0_i32_0 : i32, i32, i32, i32
  }
  func.func @transform_18(%arg0: i32, %arg1: i32) -> (i32, i32, i32, i32) {
    %c0_i32 = arith.constant 0 : i32
    %c0_i32_0 = arith.constant 0 : i32
    %c0_i32_1 = arith.constant 0 : i32
    return %arg0, %arg1, %c0_i32, %c0_i32_0 : i32, i32, i32, i32
  }
  func.func @transform_19(%arg0: i32, %arg1: i32) -> (i32, i32, i32) {
    %c0_i32 = arith.constant 0 : i32
    %c0_i32_0 = arith.constant 0 : i32
    %c0_i32_1 = arith.constant 0 : i32
    return %arg0, %c0_i32, %c0_i32_0 : i32, i32, i32
  }
  func.func @transform_20(%arg0: i32, %arg1: i32) -> (i32, i32, i32) {
    %c0_i32 = arith.constant 0 : i32
    %c0_i32_0 = arith.constant 0 : i32
    %c0_i32_1 = arith.constant 0 : i32
    return %arg0, %c0_i32, %c0_i32_0 : i32, i32, i32
  }
  func.func @transform_21(%arg0: i32, %arg1: i32) -> (i32, i32, i32) {
    %c0_i32 = arith.constant 0 : i32
    %c0_i32_0 = arith.constant 0 : i32
    %c0_i32_1 = arith.constant 0 : i32
    return %arg0, %c0_i32, %c0_i32_0 : i32, i32, i32
  }
}

module attributes {stable_mosaic.version = 11 : i64} {
  func.func @_tail_kernel(%arg0: i32, %arg1: memref<2x64x128xf32, #tpu.memory_space<vmem>>, %arg2: memref<4x64xf32, #tpu.memory_space<vmem>>, %arg3: memref<128x128xbf16, #tpu.memory_space<vmem>>, %arg4: memref<2x64xf32, #tpu.memory_space<vmem>>, %arg5: memref<128x128xbf16, #tpu.memory_space<vmem>>, %arg6: memref<1x1xf32, #tpu.memory_space<smem>>, %arg7: memref<2x4xf32, #tpu.memory_space<vmem>>) attributes {dimension_semantics = [#tpu.dimension_semantics<arbitrary>], iteration_bounds = array<i64: 1>, scalar_prefetch = 0 : i64, scratch_operands = 0 : i64, tpu.core_type = #tpu.core_type<tc>, window_params = [{pipeline_mode = #tpu.pipeline_mode<synchronous>, transform_indices = @transform_0, window_bounds = array<i64: 2, 64, 128>}, {pipeline_mode = #tpu.pipeline_mode<synchronous>, transform_indices = @transform_1, window_bounds = array<i64: 4, 64>}, {pipeline_mode = #tpu.pipeline_mode<synchronous>, transform_indices = @transform_2, window_bounds = array<i64: 128, 128>}, {pipeline_mode = #tpu.pipeline_mode<synchronous>, transform_indices = @transform_3, window_bounds = array<i64: 2, 64>}, {pipeline_mode = #tpu.pipeline_mode<synchronous>, transform_indices = @transform_4, window_bounds = array<i64: 128, 128>}, {transform_indices = @transform_5, window_bounds = array<i64: 1, 1>}, {pipeline_mode = #tpu.pipeline_mode<synchronous>, transform_indices = @transform_6, window_bounds = array<i64: 2, 4>}]} {
    %c0 = arith.constant 0 : index
    %c0_0 = arith.constant 0 : index
    %c0_1 = arith.constant 0 : index
    %0 = vector.load %arg1[%c0, %c0_0, %c0_1] : memref<2x64x128xf32, #tpu.memory_space<vmem>>, vector<1x64x128xf32>
    %1 = vector.shape_cast %0 : vector<1x64x128xf32> to vector<64x128xf32>
    %c1 = arith.constant 1 : index
    %c0_2 = arith.constant 0 : index
    %c0_3 = arith.constant 0 : index
    %2 = vector.load %arg1[%c1, %c0_2, %c0_3] : memref<2x64x128xf32, #tpu.memory_space<vmem>>, vector<1x64x128xf32>
    %3 = vector.shape_cast %2 : vector<1x64x128xf32> to vector<64x128xf32>
    %c0_4 = arith.constant 0 : index
    %c0_5 = arith.constant 0 : index
    %4 = vector.load %arg2[%c0_4, %c0_5] : memref<4x64xf32, #tpu.memory_space<vmem>>, vector<4x64xf32>
    %cst = arith.constant dense<0.000000e+00> : vector<4x128xf32>
    %5 = tpu.matmul %4, %1, %cst {dimension_numbers = #tpu.dot_dimension_numbers<[1], [0], [0], [1], [0, 0, 1, 1], [], []>} : vector<4x64xf32>, vector<64x128xf32>, vector<4x128xf32> -> vector<4x128xf32>
    %c0_6 = arith.constant 0 : index
    %c0_7 = arith.constant 0 : index
    %6 = vector.load %arg4[%c0_6, %c0_7] : memref<2x64xf32, #tpu.memory_space<vmem>>, vector<2x64xf32>
    %cst_8 = arith.constant dense<0.000000e+00> : vector<2x128xf32>
    %7 = tpu.matmul %6, %3, %cst_8 {dimension_numbers = #tpu.dot_dimension_numbers<[1], [0], [0], [1], [0, 0, 1, 1], [], []>} : vector<2x64xf32>, vector<64x128xf32>, vector<2x128xf32> -> vector<2x128xf32>
    %8 = arith.truncf %5 : vector<4x128xf32> to vector<4x128xbf16>
    %c0_9 = arith.constant 0 : index
    %c0_10 = arith.constant 0 : index
    %9 = vector.load %arg3[%c0_9, %c0_10] : memref<128x128xbf16, #tpu.memory_space<vmem>>, vector<128x128xbf16>
    %cst_11 = arith.constant dense<0.000000e+00> : vector<4x128xf32>
    %10 = tpu.matmul %8, %9, %cst_11 {dimension_numbers = #tpu.dot_dimension_numbers<[1], [0], [0], [1], [0, 0, 1, 1], [], []>} : vector<4x128xbf16>, vector<128x128xbf16>, vector<4x128xf32> -> vector<4x128xf32>
    %11 = arith.truncf %7 : vector<2x128xf32> to vector<2x128xbf16>
    %c0_12 = arith.constant 0 : index
    %c0_13 = arith.constant 0 : index
    %12 = vector.load %arg5[%c0_12, %c0_13] : memref<128x128xbf16, #tpu.memory_space<vmem>>, vector<128x128xbf16>
    %cst_14 = arith.constant dense<0.000000e+00> : vector<2x128xf32>
    %13 = tpu.matmul %11, %12, %cst_14 {dimension_numbers = #tpu.dot_dimension_numbers<[1], [0], [0], [1], [0, 0, 1, 1], [], []>} : vector<2x128xbf16>, vector<128x128xbf16>, vector<2x128xf32> -> vector<2x128xf32>
    %14 = arith.mulf %10, %10 : vector<4x128xf32>
    %cst_15 = arith.constant dense<0.000000e+00> : vector<4xf32>
    %15 = vector.multi_reduction <add>, %14, %cst_15 [1] : vector<4x128xf32> to vector<4xf32>
    %16 = vector.shape_cast %15 : vector<4xf32> to vector<4x1xf32>
    %17 = math.rsqrt %16 : vector<4x1xf32>
    %18 = vector.broadcast %17 : vector<4x1xf32> to vector<4x128xf32>
    %19 = arith.mulf %10, %18 : vector<4x128xf32>
    %20 = arith.mulf %13, %13 : vector<2x128xf32>
    %cst_16 = arith.constant dense<0.000000e+00> : vector<2xf32>
    %21 = vector.multi_reduction <add>, %20, %cst_16 [1] : vector<2x128xf32> to vector<2xf32>
    %22 = vector.shape_cast %21 : vector<2xf32> to vector<2x1xf32>
    %23 = math.rsqrt %22 : vector<2x1xf32>
    %24 = vector.broadcast %23 : vector<2x1xf32> to vector<2x128xf32>
    %25 = arith.mulf %13, %24 : vector<2x128xf32>
    %cst_17 = arith.constant dense<0.000000e+00> : vector<2x4xf32>
    %26 = tpu.matmul %25, %19, %cst_17 {dimension_numbers = #tpu.dot_dimension_numbers<[1], [1], [0], [0], [0, 0, 1, 0], [], []>} : vector<2x128xf32>, vector<4x128xf32>, vector<2x4xf32> -> vector<2x4xf32>
    %c0_18 = arith.constant 0 : index
    %c0_19 = arith.constant 0 : index
    %27 = memref.load %arg6[%c0_18, %c0_19] : memref<1x1xf32, #tpu.memory_space<smem>>
    %28 = vector.broadcast %27 : f32 to vector<2x4xf32>
    %29 = arith.mulf %28, %26 : vector<2x4xf32>
    %c0_20 = arith.constant 0 : index
    %c0_21 = arith.constant 0 : index
    %30 = vector.load %arg7[%c0_20, %c0_21] : memref<2x4xf32, #tpu.memory_space<vmem>>, vector<2x4xf32>
    tpu.vector_store %arg7[%c0_20, %c0_21], %29 {strides = array<i32>} : memref<2x4xf32, #tpu.memory_space<vmem>>, vector<2x4xf32>,
    return
  }
  func.func @transform_0(%arg0: i32) -> (i32, i32, i32) {
    %c0_i32 = arith.constant 0 : i32
    %c0_i32_0 = arith.constant 0 : i32
    %c0_i32_1 = arith.constant 0 : i32
    %c0_i32_2 = arith.constant 0 : i32
    return %c0_i32, %c0_i32_0, %c0_i32_1 : i32, i32, i32
  }
  func.func @transform_1(%arg0: i32) -> (i32, i32) {
    %c0_i32 = arith.constant 0 : i32
    %c0_i32_0 = arith.constant 0 : i32
    %c0_i32_1 = arith.constant 0 : i32
    return %c0_i32, %c0_i32_0 : i32, i32
  }
  func.func @transform_2(%arg0: i32) -> (i32, i32) {
    %c0_i32 = arith.constant 0 : i32
    %c0_i32_0 = arith.constant 0 : i32
    %c0_i32_1 = arith.constant 0 : i32
    return %c0_i32, %c0_i32_0 : i32, i32
  }
  func.func @transform_3(%arg0: i32) -> (i32, i32) {
    %c0_i32 = arith.constant 0 : i32
    %c0_i32_0 = arith.constant 0 : i32
    %c0_i32_1 = arith.constant 0 : i32
    return %c0_i32, %c0_i32_0 : i32, i32
  }
  func.func @transform_4(%arg0: i32) -> (i32, i32) {
    %c0_i32 = arith.constant 0 : i32
    %c0_i32_0 = arith.constant 0 : i32
    %c0_i32_1 = arith.constant 0 : i32
    return %c0_i32, %c0_i32_0 : i32, i32
  }
  func.func @transform_5(%arg0: i32) -> (i32, i32) {
    %c0_i32 = arith.constant 0 : i32
    %c0_i32_0 = arith.constant 0 : i32
    %c0_i32_1 = arith.constant 0 : i32
    return %c0_i32, %c0_i32_0 : i32, i32
  }
  func.func @transform_6(%arg0: i32) -> (i32, i32) {
    %c0_i32 = arith.constant 0 : i32
    %c0_i32_0 = arith.constant 0 : i32
    %c0_i32_1 = arith.constant 0 : i32
    return %c0_i32, %c0_i32_0 : i32, i32
  }
}

</mosaic_0001>

<bundles_post_ra>
// kernel: tile.9
= control target key start
LH: loop header
LB: loop body
LE: loop exit
PB: predicated region body
PF: predicated region fallthrough
CT: control target
= control target key end

     0   :  { %s32_s0 = inlined_call_operand.vmem [shape: f32[2,5,128], index: 0, kind: input, shape index: {}]   ;;  %s33_s1 = inlined_call_operand.vmem [shape: f32[10,128], index: 1, kind: output, shape index: {}]  }
   0x1   :  { %v2_v0 = vld [vmem:[%s32_s0] sm:$0x1f]   ;;  %v8_v1 = vld [vmem:[%s32_s0 + $0x8] sm:$0x1f]  }
   0x2   :  { %3 = vst [vmem:[%s33_s1] sm:$0x1f] %v2_v0  }
   0x3   :  { %9 = vst [vmem:[%s33_s1 + $0x5] sm:$0x1f] %v8_v1  }

// kernel: clip_test_time_tuning_forward.3
= control target key start
LH: loop header
LB: loop body
LE: loop exit
PB: predicated region body
PF: predicated region fallthrough
CT: control target
= control target key end

     0   :  { %12 = vsyncpa [#allocation4], 0  ;;  %s613_s0 = inlined_call_operand.vmem [shape: f32[2,64,128], index: 0, kind: input, shape index: {}]   ;;  %s614_s1 = inlined_call_operand.vmem [shape: f32[4,64], index: 1, kind: input, shape index: {}]   ;;  %s615_s2 = inlined_call_operand.vmem [shape: bf16[128,128], index: 2, kind: input, shape index: {}]   ;;  %s616_s3 = inlined_call_operand.vmem [shape: f32[2,64], index: 3, kind: input, shape index: {}]   ;;  %s617_s4 = inlined_call_operand.hbm [shape: bf16[128,128], index: 4, kind: input, shape index: {}]   ;;  %s618_s5 = inlined_call_operand.<no memory space> [shape: f32[1,1], index: 5, kind: input, shape index: {}]   ;;  %s619_s6 = inlined_call_operand.hbm [shape: f32[2,4], index: 6, kind: output, shape index: {}]  }
   0x1   :  { %13 = vsyncpa [#allocation5], 0  ;;  %s26_s23 = sshll.u32 %s617_s4, 4  ;;  %s487_s24 = smov [#allocation3]   ;;  %s27_s23 = int_to_ptr.hbm [resolvable:$true] %s26_s23 }
   0x2   :  { %s28_s25 = sshll.u32 %s487_s24, 4  ;;  %s488_s26 = smov 64   ;;  %s29_s25 = int_to_ptr.vmem [resolvable:$true] %s28_s25 }
   0x3   :  { %s489_s27 = smov 4  }
   0x4   :  { %34 = dma.hbm_to_vmem [thread:$0]  %s27_s23, 1024, %s29_s25, [#allocation4], %s488_s26, %s488_s26, %s489_s27  }
   0x5   :  { %483 = dma.done.wait [#allocation4], 1024  }
   0x6   :  { %484 = vsyncadd [#allocation4], 4294966272  ;;  %v48_v0 = vld [vmem:[%s613_s0 + $0x38] sm:$0xff]  ;;  %v47_v2 = vld [vmem:[%s613_s0 + $0x30] sm:$0xff]  ;;  %vm59_vm0 = vcmask 523264   ;;  %vm264_vm1 = vcmask 1043456  }
   0x7   :  { %v344_v1 = vld [vmem:[%s613_s0 + $0x78] sm:$0xff]  ;;  %71 = vmatpush.msra.mxu0 %v48_v0  ;;  %v343_v3 = vld [vmem:[%s613_s0 + $0x70] sm:$0xff]  ;;  %v46_v4 = vld [vmem:[%s613_s0 + $0x28] sm:$0xff]  ;;  %vm280_vm2 = vcmask 1041408   ;;  %v316_v0 = vstv %s618_s5  ;;  %s490_s28 = smov [#allocation6]   ;;  %s327_s8 = sshll.u32 %s619_s6, 4  ;;  %s328_s8 = int_to_ptr.hbm [resolvable:$true] %s327_s8 }
   0x8   :  { %95 = vmatpush.msra.mxu1 %v344_v1  ;;  %v342_v5 = vld [vmem:[%s613_s0 + $0x68] sm:$0xff]  ;;  %v45_v6 = vld [vmem:[%s613_s0 + $0x20] sm:$0xff]  ;;  %v44_v8 = vld [vmem:[%s613_s0 + $0x18] sm:$0xff]  ;;  %s325_s29 = sshll.u32 %s490_s28, 4  ;;  %vm318_vm9 = vcmask 25600   ;;  %s326_s29 = int_to_ptr.vmem [resolvable:$true] %s325_s29 }
   0x9   :  { %72 = vmatpush.msra.mxu0 %v47_v2  ;;  %v341_v7 = vld [vmem:[%s613_s0 + $0x60] sm:$0xff]  ;;  %v340_v9 = vld [vmem:[%s613_s0 + $0x58] sm:$0xff]  ;;  %v43_v12 = vld [vmem:[%s613_s0 + $0x10] sm:$0xff] }
   0xa   :  { %96 = vmatpush.msra.mxu1 %v343_v3  ;;  %v418_v10 = vld [vmem:[%s615_s2 + $0x38] sm:$0xff]  ;;  %v339_v13 = vld [vmem:[%s613_s0 + $0x50] sm:$0xff]  ;;  %v42_v16 = vld [vmem:[%s613_s0 + $0x8] sm:$0xff] }
   0xb   :  { %73 = vmatpush.msra.mxu0 %v46_v4  ;;  %v426_v11 = vld [vmem:[#allocation3 + $0x38] sm:$0xff]  ;;  %172 = vmatpush.bf16.msra.mxu2 %v418_v10  ;;  %v417_v14 = vld [vmem:[%s615_s2 + $0x30] sm:$0xff]  ;;  %v338_v17 = vld [vmem:[%s613_s0 + $0x48] sm:$0xff] }
   0xc   :  { %97 = vmatpush.msra.mxu1 %v342_v5  ;;  %250 = vmatpush.bf16.msra.mxu3 %v426_v11  ;;  %v425_v15 = vld [vmem:[#allocation3 + $0x30] sm:$0xff]  ;;  %v41_v18 = vld [vmem:[%s613_s0] sm:$0xff]  ;;  %v416_v22 = vld [vmem:[%s615_s2 + $0x28] sm:$0xff] }
   0xd   :  { %74 = vmatpush.msra.mxu0 %v45_v6  ;;  %v337_v19 = vld [vmem:[%s613_s0 + $0x40] sm:$0xff]  ;;  %v424_v23 = vld [vmem:[#allocation3 + $0x28] sm:$0xff]  ;;  %v414_v26 = vld [vmem:[%s615_s2 + $0x18] sm:$0xff] }
   0xe   :  { %98 = vmatpush.msra.mxu1 %v341_v7  ;;  %v58_v20 = vld [vmem:[%s614_s1] sm:$0xf]  ;;  %v422_v27 = vld [vmem:[#allocation3 + $0x18] sm:$0xff]  ;;  %v413_v28 = vld [vmem:[%s615_s2 + $0x10] sm:$0xff] }
   0xf   :  { %75 = vmatpush.msra.mxu0 %v44_v8  ;;  %173 = vmatpush.bf16.msra.mxu2 %v417_v14  ;;  %v83_v21 = vld [vmem:[%s616_s3] sm:$0x3]  ;;  %v421_v29 = vld [vmem:[#allocation3 + $0x10] sm:$0xff]  ;;  %v412_v30 = vld [vmem:[%s615_s2 + $0x8] sm:$0xff] }
  0x10   :  { %99 = vmatpush.msra.mxu1 %v340_v9  ;;  %251 = vmatpush.bf16.msra.mxu3 %v425_v15  ;;  %v415_v24 = vld [vmem:[%s615_s2 + $0x20] sm:$0xff]  ;;  %v420_v31 = vld [vmem:[#allocation3 + $0x8] sm:$0xff] }
  0x11   :  { %76 = vmatpush.msra.mxu0 %v43_v12  ;;  %v423_v25 = vld [vmem:[#allocation3 + $0x20] sm:$0xff] }
  0x12   :  { %100 = vmatpush.msra.mxu1 %v339_v13  ;;  %v411_v32 = vld [vmem:[%s615_s2] sm:$0xff] }
  0x13   :  { %77 = vmatpush.msra.mxu0 %v42_v16  ;;  %174 = vmatpush.bf16.msra.mxu2 %v416_v22  ;;  %v419_v33 = vld [vmem:[#allocation3] sm:$0xff] }
  0x14   :  { %101 = vmatpush.msra.mxu1 %v338_v17  ;;  %252 = vmatpush.bf16.msra.mxu3 %v424_v23 }
  0x15   :  { %78 = vmatpush.msra.mxu0 %v41_v18 }
  0x16   :  { %102 = vmatpush.msra.mxu1 %v337_v19  ;;  %345 = vmatmul.msk.f32.vlgmr.msra.gmra.mxu0 %vm59_vm0, %v58_v20 }
  0x17   :  { %346 = vmatmul.msk.f32.vlgmr.msra.gmra.mxu1 %vm59_vm0, %v83_v21  ;;  %175 = vmatpush.bf16.msra.mxu2 %v415_v24 }
  0x18   :  { %253 = vmatpush.bf16.msra.mxu3 %v423_v25 }
  0x1b   :  { %176 = vmatpush.bf16.msra.mxu2 %v414_v26 }
  0x1c   :  { %254 = vmatpush.bf16.msra.mxu3 %v422_v27 }
  0x1f   :  { %177 = vmatpush.bf16.msra.mxu2 %v413_v28 }
  0x20   :  { %255 = vmatpush.bf16.msra.mxu3 %v421_v29 }
  0x23   :  { %178 = vmatpush.bf16.msra.mxu2 %v412_v30 }
  0x24   :  { %256 = vmatpush.bf16.msra.mxu3 %v420_v31 }
  0x27   :  { %179 = vmatpush.bf16.msra.mxu2 %v411_v32 }
  0x28   :  { %257 = vmatpush.bf16.msra.mxu3 %v419_v33 }
  0x93   :  { %v80_v34 = vpop.f32.mrf.mxu0 }
  0x94   :  { %v104_v35 = vpop.f32.mrf.mxu1  ;;  %v107_v36 = vpack.c.bf16 %v80_v34, %v80_v34 }
  0x95   :  { %v185_v37 = vpack.c.bf16 %v104_v35, %v104_v35 }
  0x96   :  { %180 = vmatmul.bf16.vlgmr.msra.gmra.mxu2 %v107_v36 }
  0x97   :  { %258 = vmatmul.bf16.vlgmr.msra.gmra.mxu3 %v185_v37 }
 0x119   :  { %v181_v38 = vpop.f32.mrf.mxu2 }
 0x11a   :  { %v259_v39 = vpop.f32.mrf.mxu3  ;;  %v263_v40 = vmul.f32 %v181_v38, %v181_v38 }
 0x11b   :  { %v279_v42 = vmul.f32 %v259_v39, %v259_v39 }
 0x11c   :  { %v265_v41 = vsel %vm264_vm1, %v263_v40, 0.0 }
 0x11d   :  { %266 = vadd.xlane.f32.xlu0 %v265_v41  ;;  %v281_v45 = vsel %vm280_vm2, %v279_v42, 0.0 }
 0x121   :  { %v183_v43 = vpop.f32.mrf.mxu2 }
 0x122   :  { %v261_v44 = vpop.f32.mrf.mxu3 }
 0x125   :  { %282 = vadd.xlane.f32.xlu0 %v281_v45 }
 0x190   :  { %v267_v46 = vpop.xlane.xlu0 %266 }
 0x191   :  { %431 = vrsqrt.f32 %v267_v46  ;;  %vm274_vm4 = vweird.f32 %v267_v46 }
 0x197   :  { %v432_v47 = vpop.eup %431 }
 0x198   :  { %v269_v48 = vmul.f32 %v432_v47, %v267_v46  ;;  %v283_v49 = vpop.xlane.xlu0 %282  ;;  %vm275_vm3 = vweird.f32 %v432_v47 }
 0x199   :  { %433 = vrsqrt.f32 %v283_v49  ;;  %vm276_vm5 = vmor %vm274_vm4, %vm275_vm3  ;;  %vm290_vm7 = vweird.f32 %v283_v49 }
 0x19a   :  { %v270_v50 = vmul.f32 %v432_v47, %v269_v48 }
 0x19c   :  { %v271_v51 = vmul.f32 0.5, %v270_v50 }
 0x19e   :  { %v272_v52 = vsub.f32 1.5, %v271_v51 }
 0x19f   :  { %v434_v53 = vpop.eup %433 }
 0x1a0   :  { %v285_v54 = vmul.f32 %v434_v53, %v283_v49  ;;  %v273_v55 = vmul.f32 %v432_v47, %v272_v52  ;;  %vm291_vm6 = vweird.f32 %v434_v53 }
 0x1a1   :  { %vm292_vm8 = vmor %vm290_vm7, %vm291_vm6 }
 0x1a2   :  { %v286_v56 = vmul.f32 %v434_v53, %v285_v54  ;;  %v277_v57 = vsel %vm276_vm5, %v432_v47, %v273_v55 }
 0x1a3   :  { %v278_v58 = vmul.f32 %v277_v57, %v181_v38 }
 0x1a4   :  { %v287_v59 = vmul.f32 0.5, %v286_v56 }
 0x1a5   :  { %310 = vmatpush.xpose.msrb.mxu0 %v278_v58 }
 0x1a6   :  { %v288_v60 = vsub.f32 1.5, %v287_v59 }
 0x1a8   :  { %v289_v61 = vmul.f32 %v434_v53, %v288_v60 }
 0x1aa   :  { %v293_v62 = vsel %vm292_vm8, %v434_v53, %v289_v61 }
 0x1ab   :  { %v294_v63 = vmul.f32 %v293_v62, %v259_v39 }
 0x1ad   :  { %311 = vmatmul.f32.vlgmr.msrb.gmra.mxu0 %v294_v63 }
 0x22a   :  { %v312_v1 = vpop.f32.mrf.mxu0 }
 0x22b   :  { %v317_v2 = vmul.f32 %v316_v0, %v312_v1 }
 0x22d   :  { %319 = vst.msk [vmem:[#allocation6] sm:$0x3] %vm318_vm9, %v317_v2 }
 0x22e   :  { %330 = dma.vmem_to_hbm [thread:$0]  %s326_s29, 32, %s328_s8, [#allocation5]  }
 0x22f   :  { %485 = dma.done.wait [#allocation5], 32  }
 0x230   :  { %486 = vsyncadd [#allocation5], 4294967264 }
 0x231   :  { %335 = vsyncpa [#allocation4], 1 }
 0x232   :  { %336 = vsyncpa [#allocation5], 1 }

// kernel: clip_test_time_tuning_forward.2
= control target key start
LH: loop header
LB: loop body
LE: loop exit
PB: predicated region body
PF: predicated region fallthrough
CT: control target
= control target key end

     0   :  { %s9983_s0 = inlined_call_operand.vmem [shape: f32[64,128], index: 0, kind: input, shape index: {}]   ;;  %s9984_s1 = inlined_call_operand.vmem [shape: f32[64,768], index: 1, kind: input, shape index: {}]   ;;  %s9985_s2 = inlined_call_operand.vmem [shape: bf16[768,128], index: 2, kind: input, shape index: {}]   ;;  %s9986_s3 = inlined_call_operand.vmem [shape: f32[64,128], index: 3, kind: input, shape index: {}]   ;;  %s9987_s4 = inlined_call_operand.vmem [shape: f32[2,64,64], index: 4, kind: input, shape index: {}]   ;;  %s9988_s5 = inlined_call_operand.vmem [shape: f32[2,1,128], index: 5, kind: input, shape index: {}]   ;;  %s9989_s6 = inlined_call_operand.vmem [shape: f32[2,1,128], index: 6, kind: input, shape index: {}]   ;;  %s9990_s7 = inlined_call_operand.vmem [shape: f32[2,2,1,128], index: 7, kind: input, shape index: {}]   ;;  %s9991_s8 = inlined_call_operand.vmem [shape: f32[2,2,1,128], index: 8, kind: input, shape index: {}]   ;;  %s9992_s9 = inlined_call_operand.hbm [shape: bf16[2,2,128,384], index: 9, kind: input, shape index: {}]   ;;  %s9993_s10 = inlined_call_operand.vmem [shape: f32[2,2,1,384], index: 10, kind: input, shape index: {}]   ;;  %s9994_s11 = inlined_call_operand.vmem [shape: bf16[2,2,128,128], index: 11, kind: input, shape index: {}]   ;;  %s9995_s12 = inlined_call_operand.vmem [shape: f32[2,2,1,128], index: 12, kind: input, shape index: {}]   ;;  %s9996_s13 = inlined_call_operand.vmem [shape: f32[2,2,1,128], index: 13, kind: input, shape index: {}]   ;;  %s9997_s14 = inlined_call_operand.vmem [shape: f32[2,2,1,128], index: 14, kind: input, shape index: {}]   ;;  %s9998_s15 = inlined_call_operand.vmem [shape: bf16[2,2,128,512], index: 15, kind: input, shape index: {}]   ;;  %s9999_s16 = inlined_call_operand.vmem [shape: f32[2,2,1,512], index: 16, kind: input, shape index: {}]   ;;  %s10000_s17 = inlined_call_operand.vmem [shape: bf16[2,2,512,128], index: 17, kind: input, shape index: {}]   ;;  %s10001_s18 = inlined_call_operand.vmem [shape: f32[2,2,1,128], index: 18, kind: input, shape index: {}]   ;;  %s10002_s19 = inlined_call_operand.vmem [shape: f32[2,1,128], index: 19, kind: input, shape index: {}]   ;;  %s10003_s20 = inlined_call_operand.vmem [shape: f32[2,1,128], index: 20, kind: input, shape index: {}]   ;;  %s10004_s21 = inlined_call_operand.vmem [shape: f32[2,64,128], index: 21, kind: output, shape index: {}]  }
   0x1   :  { %10021 = sst [smem:[#allocation17_spill]] %s9983_s0 }
   0x2   :  { %10022 = sst [smem:[#allocation18_spill]] %s9984_s1 }
   0x3   :  { %10023 = sst [smem:[#allocation19_spill]] %s9985_s2 }
   0x4   :  { %10024 = sst [smem:[#allocation20_spill]] %s9986_s3 }
   0x5   :  { %10025 = sst [smem:[#allocation21_spill]] %s9987_s4 }
   0x6   :  { %10026 = sst [smem:[#allocation22_spill]] %s9988_s5 }
   0x7   :  { %10027 = sst [smem:[#allocation23_spill]] %s9992_s9 }
   0x8   :  { %10028 = sst [smem:[#allocation24_spill]] %s9993_s10 }
   0x9   :  { %10029 = sst [smem:[#allocation25_spill]] %s9994_s11 }
   0xa   :  { %10030 = sst [smem:[#allocation26_spill]] %s9995_s12 }
   0xb   :  { %10031 = sst [smem:[#allocation27_spill]] %s9996_s13 }
   0xc   :  { %10032 = sst [smem:[#allocation28_spill]] %s9997_s14 }
   0xd   :  { %10033 = sst [smem:[#allocation29_spill]] %s9998_s15 }
   0xe   :  { %10034 = sst [smem:[#allocation30_spill]] %s9999_s16 }
   0xf   :  { %10035 = sst [smem:[#allocation31_spill]] %s10000_s17 }
  0x10   :  { %10036 = sst [smem:[#allocation32_spill]] %s10001_s18 }
  0x11   :  { %10037 = sst [smem:[#allocation33_spill]] %s10002_s19 }
  0x12   :  { %10038 = sst [smem:[#allocation34_spill]] %s10003_s20 }
  0x13   :  { %10039 = sst [smem:[#allocation35_spill]] %s10004_s21 }
  0x14   :  { %26 = vsyncpa [#allocation3], 0 }
  0x15   :  { %28 = vsyncpa [#allocation3 + $0x1], 0  ;;  %s7196_s2 = smov 0   ;;  %s7198_s25 = smov 0  }
  0x16   :  { %s7200_s26 = smov 0   ;;  %s7202_s27 = smov 0  }
  0x17   :  { %s7204_s3 = smov 0   ;;  %s7206_s28 = smov 0  }
  0x18   :  { %s7208_s29 = smov 0   ;;  %s7210_s0 = smov 0  }
  0x19 LB: > { %10040 = sst [smem:[#allocation5_spill]] %s7053_s25  ;;  %s5689_s4 = sadd.s32 4294967295, %s7077_s0   ;;  %s7077_s0 = sphi %s7210_s0, %s34_s0   ;;  %s7073_s29 = sphi %s7208_s29, %s10174_s29   ;;  %s7069_s28 = sphi %s7206_s28, %s10173_s28   ;;  %s7065_s3 = sphi %s7204_s3, %s10172_s3   ;;  %s7061_s27 = sphi %s7202_s27, %s10171_s27   ;;  %s7057_s26 = sphi %s7200_s26, %s10170_s26   ;;  %s7053_s25 = sphi %s7198_s25, %s10169_s25   ;;  %s7049_s2 = sphi %s7196_s2, %s10168_s2  }
  0x1a   : > { %10041 = sst [smem:[#allocation6_spill]] %s7057_s26  ;;  %s43_s30 = sadd.s32 1, %s7069_s28 }
  0x1b   : > { %10042 = sst [smem:[#allocation7_spill]] %s7069_s28  ;;  %p44_p0 = scmp.ge.s32.totalorder %s43_s30, 2 }
  0x1c   : > { %10043 = sst [smem:[#allocation8_spill]] %s7073_s29  ;;  %s46_s5 = sadd.s32 1, %s7073_s29 }
  0x1d   : > { %10044 = sst [smem:[#allocation9_spill]] %s7077_s0  ;;  %s273_s22 = sadd.s32 1, %s7057_s26 }
  0x1e   : > { %p280_p1 = scmp.ne.s32.totalorder %s7057_s26, %s7053_s25  ;;  %s10176_s30 = smov (%p44_p0, %s43_s30), 0 }
  0x1f   : > { %10045 = sst [smem:[#allocation10_spill]] %s10176_s30  ;;  %s10178_s5 = smov (!%p44_p0, %s46_s5), %s7073_s29 }
  0x20   : > { %s269_s23 = ssub.s32 %s7069_s28, %s10176_s30  ;;  %p281_p2 = scmp.eq.s32.totalorder %s7077_s0, 0 }
  0x21   : > { %p48_p3 = scmp.ge.s32.totalorder %s10178_s5, 2  ;;  %p286_p4 = scmp.ne.s32.totalorder %s7053_s25, %s7049_s2 }
  0x22   : > { %p282_p5 = por %p281_p2, %p280_p1  ;;  %p287_p6 = scmp.eq.s32.totalorder %s5689_s4, 0 }
  0x23   : > { %s10180_s5 = smov (%p48_p3, %s10178_s5), 0  ;;  %p6567_p8 = scmp.lt.s32.totalorder %s7077_s0, 4 }
  0x24   : > { %10046 = sst [smem:[#allocation11_spill]] %s10180_s5  ;;  %p7249_p7 = por %p287_p6, %p286_p4 }
  0x25   : > { %s268_s24 = ssub.s32 %s7073_s29, %s10180_s5  ;;  %s692_s30 = sand.u32 1, %s7057_s26  }
  0x26   : > { %s270_s21 = sor.u32 %s269_s23, %s268_s24  ;;  %s6555_s20 = smul.u32 192, %s692_s30 }
  0x27   : > { %p271_p9 = scmp.eq.s32.totalorder %s270_s21, 0  ;;  %p7257_p10 = pnand %p6567_p8, %p282_p5 }
  0x28   : > { %s6556_s4 = smul.u32 48, %s7069_s28  ;;  %s696_s17 = scalar_lea.vmem [#allocation2], %s6555_s20 }
  0x29   : > { %s7262_s2 = scalar_select %p271_p9, %s7057_s26, %s273_s22  }
  0x2a   : > { %s6557_s18 = smul.u32 96, %s7073_s29  ;;  %s706_s16 = sshll.u32 %s696_s17, 4  ;;  %s707_s16 = int_to_ptr.vmem [resolvable:$true] %s706_s16 }
  0x2b   : > { %10049 = sst [smem:[#allocation12_spill]] %s7262_s2  ;;  %p5694_p11 = scmp.ge.s32.totalorder %s7077_s0, 1 }
  0x2c   : > { %s701_s5 = sadd.s32 %s6557_s18, %s6556_s4  ;;  %s10050_s9 = sld [smem:[#allocation23_spill]] }
  0x2d   : > { %s5693_s15 = sshll.u32 %s701_s5, 2  ;;  %p824_p12 = scmp.lt.s32.totalorder %s7077_s0, 5 }
  0x2e   : > { %s693_s11 = scalar_lea.sflag [#allocation3], %s692_s30  ;;  %s7079_s13 = smov 192  }
  0x2f   : > { %s7080_s22 = smov 12   ;;  %p825_p13 = pnand %p5694_p11, %p824_p12 }
  0x31   : > { %828 = sbr.rel (%p825_p13) target bundleno = 3617 (0xe21), region = 104 }
  0x32   : > { %s703_s24 = scalar_lea.hbm %s10050_s9, %s5693_s15 }
  0x33   : > { %s704_s21 = sshll.u32 %s703_s24, 4  ;;  %s705_s21 = int_to_ptr.hbm [resolvable:$true] %s704_s21 }
  0x34   : > { %6566 = dma.hbm_to_vmem [thread:$0]  (!%p7257_p10), %s705_s21, 3072, %s707_s16, %s693_s11, %s7079_s13, %s7079_s13, %s7080_s22  }
  0x36   : > { %s830_s17 = sand.u32 1, %s7053_s25  }
  0x37   : > { %s6558_s18 = smul.u32 192, %s830_s17  ;;  %s831_s20 = scalar_lea.sflag [#allocation3], %s830_s17 }
  0x39   : > { %s7274_s5 = scalar_lea.vmem [#allocation2], %s6558_s18 }
  0x3a   : > { %7044 = dma.done.wait (%p7249_p7), %s831_s20, 3072  }
  0x3b   : > { %7046 = vsyncadd (%p7249_p7), %s831_s20, 4294964224  ;;  %p996_p0 = scmp.lt.s32.totalorder %s7065_s3, 1  ;;  %p1009_p1 = scmp.lt.s32.totalorder %s7061_s27, 1 }
  0x3c   : > { %s10052_s23 = sld [smem:[#allocation21_spill]]  ;;  %p5716_p2 = scmp.ne.s32.totalorder %s7061_s27, 0 }
  0x3d   : > { %s7283_s11 = scalar_select %p996_p0, %s7065_s3, 1 }
  0x3e   : > { %s7286_s13 = scalar_select %p1009_p1, %s7061_s27, 1 }
  0x3f   : > { %s10011_s14 = sshll.u32 %s7283_s11, 6  ;;  %s5697_s18 = sshll.u32 %s7283_s11, 1 }
  0x40   : > { %s6559_s20 = smul.u32 3, %s7286_s13  ;;  %s7307_s9 = sadd.s32 %s5697_s18, %s7286_s13 }
  0x41   : > { %s6560_s15 = smul.u32 6, %s7283_s11  ;;  %s5699_s18 = sshll.u32 %s7286_s13, 4 }
  0x42   : > { %s7298_s24 = scalar_lea.vmem %s10052_s23, %s10011_s14  ;;  %s5700_s29 = sshll.u32 %s7283_s11, 5 }
  0x43   : > { %10053 = sst [smem:[#allocation13_spill]] %s7298_s24  ;;  %s7318_s22 = sadd.s32 %s6560_s15, %s6559_s20 }
  0x44   : > { %10054 = sst [smem:[#allocation14_spill]] %s7318_s22  ;;  %s1035_s28 = sadd.s32 %s5700_s29, %s5699_s18 }
  0x45   : > { %s5701_s19 = sshll.u32 %s1035_s28, 2  ;;  %s10058_s25 = sld [smem:[#allocation25_spill]] }
  0x46   : > { %s5705_s26 = sshll.u32 %s7286_s13, 6  ;;  %s5706_s2 = sshll.u32 %s7283_s11, 7 }
  0x47   : > { %s1065_s16 = sadd.s32 %s5706_s2, %s5705_s26  ;;  %s5708_s0 = sshll.u32 %s7286_s13, 2 }
  0x48   : > { %s5707_s28 = sshll.u32 %s1065_s16, 2  ;;  %s5709_s12 = sshll.u32 %s7283_s11, 3 }
  0x49   : > { %s10061_s23 = sld [smem:[#allocation29_spill]]  ;;  %s7352_s20 = sadd.s32 %s5709_s12, %s5708_s0 }
  0x4a   : > { %s10064_s18 = sld [smem:[#allocation31_spill]]  ;;  %s10068_s22 = sshll.u32 %s7283_s11, 6 }
  0x4b   : > { %s7337_s30 = scalar_lea.vmem %s10058_s25, %s5701_s19  ;;  %s10065_s26 = sld [smem:[#allocation32_spill]] }
  0x4c   : > { %10059 = sst [smem:[#allocation15_spill]] %s7337_s30  ;;  %p5717_p3 = scmp.ne.s32.totalorder (!%p5716_p2), %s7065_s3, 0 }
  0x4d   : > { %s10066_s4 = sld [smem:[#allocation33_spill]] }
  0x4e   : > { %s10069_s19 = sld [smem:[#allocation35_spill]] }
  0x4f   : > { %s7350_s21 = scalar_lea.vmem %s10061_s23, %s5707_s28 }
  0x50   : > { %10062 = sst [smem:[#allocation16_spill]] %s7350_s21  ;;  %s7361_s14 = scalar_lea.vmem %s10064_s18, %s5707_s28 }
  0x51   : > { %s1091_s2 = scalar_lea.vmem %s10065_s26, %s7307_s9  ;;  %s10067_s21 = sld [smem:[#allocation34_spill]] }
  0x53   : > { %s1094_s23 = scalar_lea.vmem %s10066_s4, %s7283_s11  ;;  %1107 = sbr.rel (%p5716_p2) target bundleno = 637 (0x27d), region = 112 }
  0x54   : > { %s7380_s15 = scalar_lea.vmem %s10069_s19, %s10068_s22 }
  0x57   : > { %s1097_s10 = scalar_lea.vmem %s10067_s21, %s7283_s11 }
  0x58   : > { %1111 = sbr.rel (%p5717_p3) target bundleno = 103 (0x67), region = 116  ;;  %s10070_s30 = sld [smem:[#allocation17_spill]] (!%p5717_p3) }
  0x5e   : > { %v1112_v0 = vld [vmem:[%s10070_s30] sm:$0xff]  ;;  %v1113_v1 = vld [vmem:[%s10070_s30 + $0x8] sm:$0xff]  ;;  %v1114_v2 = vld [vmem:[%s10070_s30 + $0x10] sm:$0xff] }
  0x5f   : > { %1120 = vst [vmem:[%s7380_s15] sm:$0xff] %v1112_v0  ;;  %v1115_v3 = vld [vmem:[%s10070_s30 + $0x18] sm:$0xff]  ;;  %v1116_v4 = vld [vmem:[%s10070_s30 + $0x20] sm:$0xff]  ;;  %v1117_v5 = vld [vmem:[%s10070_s30 + $0x28] sm:$0xff] }
  0x60   : > { %1121 = vst [vmem:[%s7380_s15 + $0x8] sm:$0xff] %v1113_v1  ;;  %v1118_v6 = vld [vmem:[%s10070_s30 + $0x30] sm:$0xff]  ;;  %v1119_v7 = vld [vmem:[%s10070_s30 + $0x38] sm:$0xff] }
  0x61   : > { %1122 = vst [vmem:[%s7380_s15 + $0x10] sm:$0xff] %v1114_v2 }
  0x62   : > { %1123 = vst [vmem:[%s7380_s15 + $0x18] sm:$0xff] %v1115_v3 }
  0x63   : > { %1124 = vst [vmem:[%s7380_s15 + $0x20] sm:$0xff] %v1116_v4 }
  0x64   : > { %1125 = vst [vmem:[%s7380_s15 + $0x28] sm:$0xff] %v1117_v5 }
  0x65   : > { %1126 = vst [vmem:[%s7380_s15 + $0x30] sm:$0xff] %v1118_v6 }
  0x66   : > { %1127 = vst [vmem:[%s7380_s15 + $0x38] sm:$0xff] %v1119_v7 }
  0x67 PF: > { %p5718_p4 = scmp.ne.s32.totalorder %s7065_s3, 1 }
  0x68   : > { %s10071_s22 = sld [smem:[#allocation19_spill]] (!%p5718_p4)  ;;  %s10077_s16 = scalar_lea.vmem (!%p5718_p4), %s9989_s6, %s7283_s11 }
  0x69   : > { %1131 = sbr.rel (%p5718_p4) target bundleno = 637 (0x27d), region = 120  ;;  %s10072_s21 = sld [smem:[#allocation18_spill]] (!%p5718_p4) }
  0x6a   : > { %s10073_s25 = sld [smem:[#allocation20_spill]] (!%p5718_p4) }
  0x6b   : > { %s10075_s17 = sld [smem:[#allocation22_spill]] (!%p5718_p4) }
  0x6e   : > { %v6388_v8 = vld [vmem:[%s10071_s22 + $0x38] sm:$0xff]  ;;  %v6387_v10 = vld [vmem:[%s10071_s22 + $0x30] sm:$0xff]  ;;  %v6386_v12 = vld [vmem:[%s10071_s22 + $0x28] sm:$0xff] }
  0x6f   : > { %v6396_v9 = vld [vmem:[%s10071_s22 + $0x78] sm:$0xff]  ;;  %6525 = vmatpush.bf16.msra.mxu2 %v6388_v8  ;;  %v6395_v11 = vld [vmem:[%s10071_s22 + $0x70] sm:$0xff]  ;;  %1596 = vmatpush.bf16.msra.mxu0 %v6388_v8  ;;  %v6394_v13 = vld [vmem:[%s10071_s22 + $0x68] sm:$0xff] }
  0x70   : > { %6533 = vmatpush.bf16.msra.mxu3 %v6396_v9  ;;  %1625 = vmatpush.bf16.msra.mxu1 %v6396_v9  ;;  %v6385_v14 = vld [vmem:[%s10071_s22 + $0x20] sm:$0xff]  ;;  %v6384_v16 = vld [vmem:[%s10071_s22 + $0x18] sm:$0xff]  ;;  %v6383_v18 = vld [vmem:[%s10071_s22 + $0x10] sm:$0xff]  ;;  %s10074_s1 = smov %s10073_s25 }
  0x71   : > { %v6393_v15 = vld [vmem:[%s10071_s22 + $0x60] sm:$0xff]  ;;  %v6392_v17 = vld [vmem:[%s10071_s22 + $0x58] sm:$0xff]  ;;  %v6391_v19 = vld [vmem:[%s10071_s22 + $0x50] sm:$0xff]  ;;  %s10076_s29 = scalar_lea.vmem %s10075_s17, %s7283_s11 }
  0x72   : > { %v6382_v20 = vld [vmem:[%s10071_s22 + $0x8] sm:$0xff]  ;;  %v6381_v22 = vld [vmem:[%s10071_s22] sm:$0xff]  ;;  %v1162_v25 = vld [vmem:[%s10072_s21 + $0xf0] sm:$0xff] }
  0x73   : > { %6526 = vmatpush.bf16.msra.mxu2 %v6387_v10  ;;  %1597 = vmatpush.bf16.msra.mxu0 %v6387_v10  ;;  %v6390_v21 = vld [vmem:[%s10071_s22 + $0x48] sm:$0xff]  ;;  %v6389_v23 = vld [vmem:[%s10071_s22 + $0x40] sm:$0xff]  ;;  %v1163_v27 = vld [vmem:[%s10072_s21 + $0xf8] sm:$0xff] }
  0x74   : > { %6534 = vmatpush.bf16.msra.mxu3 %v6395_v11  ;;  %1626 = vmatpush.bf16.msra.mxu1 %v6395_v11  ;;  %v1156_v24 = vld [vmem:[%s10072_s21 + $0xc0] sm:$0xff]  ;;  %v1157_v26 = vld [vmem:[%s10072_s21 + $0xc8] sm:$0xff]  ;;  %v6404_v28 = vld [vmem:[%s10071_s22 + $0xb8] sm:$0xff] }
  0x75   : > { %v1132_v29 = vld [vmem:[%s10072_s21] sm:$0xff]  ;;  %v1138_v30 = vld [vmem:[%s10072_s21 + $0x30] sm:$0xff]  ;;  %v6412_v31 = vld [vmem:[%s10071_s22 + $0xf8] sm:$0xff]  ;;  %v1192_v34 = vpack.c.bf16 %v1162_v25, %v1156_v24  ;;  %v1193_v35 = vpack.c.bf16 %v1163_v27, %v1157_v26 }
  0x76   : > { %v1133_v32 = vld [vmem:[%s10072_s21 + $0x8] sm:$0xff]  ;;  %v1139_v33 = vld [vmem:[%s10072_s21 + $0x38] sm:$0xff]  ;;  %v1180_v36 = vpack.c.bf16 %v1138_v30, %v1132_v29  ;;  %v6403_v40 = vld [vmem:[%s10071_s22 + $0xb0] sm:$0xff] }
  0x77   : > { %6527 = vmatpush.bf16.msra.mxu2 %v6386_v12  ;;  %1598 = vmatpush.bf16.msra.mxu0 %v6386_v12  ;;  %v6428_v37 = vld [vmem:[%s10071_s22 + $0x178] sm:$0xff]  ;;  %v1181_v39 = vpack.c.bf16 %v1139_v33, %v1133_v32  ;;  %v6411_v41 = vld [vmem:[%s10071_s22 + $0xf0] sm:$0xff]  ;;  %v6402_v44 = vld [vmem:[%s10071_s22 + $0xa8] sm:$0xff] }
  0x78   : > { %6535 = vmatpush.bf16.msra.mxu3 %v6394_v13  ;;  %1627 = vmatpush.bf16.msra.mxu1 %v6394_v13  ;;  %v6420_v38 = vld [vmem:[%s10071_s22 + $0x138] sm:$0xff]  ;;  %v6427_v42 = vld [vmem:[%s10071_s22 + $0x170] sm:$0xff]  ;;  %v6410_v45 = vld [vmem:[%s10071_s22 + $0xe8] sm:$0xff] }
  0x79   : > { %v6419_v43 = vld [vmem:[%s10071_s22 + $0x130] sm:$0xff]  ;;  %v6426_v46 = vld [vmem:[%s10071_s22 + $0x168] sm:$0xff]  ;;  %v6401_v48 = vld [vmem:[%s10071_s22 + $0xa0] sm:$0xff] }
  0x7a   : > { %v6418_v47 = vld [vmem:[%s10071_s22 + $0x128] sm:$0xff]  ;;  %v6409_v49 = vld [vmem:[%s10071_s22 + $0xe0] sm:$0xff]  ;;  %v1174_v52 = vld [vmem:[%s10072_s21 + $0x150] sm:$0xff] }
  0x7b   : > { %6528 = vmatpush.bf16.msra.mxu2 %v6385_v14  ;;  %1599 = vmatpush.bf16.msra.mxu0 %v6385_v14  ;;  %v6417_v50 = vld [vmem:[%s10071_s22 + $0x120] sm:$0xff]  ;;  %v1169_v53 = vld [vmem:[%s10072_s21 + $0x128] sm:$0xff]  ;;  %v1175_v54 = vld [vmem:[%s10072_s21 + $0x158] sm:$0xff] }
  0x7c   : > { %6536 = vmatpush.bf16.msra.mxu3 %v6393_v15  ;;  %1628 = vmatpush.bf16.msra.mxu1 %v6393_v15  ;;  %v1168_v51 = vld [vmem:[%s10072_s21 + $0x120] sm:$0xff]  ;;  %v6400_v56 = vld [vmem:[%s10071_s22 + $0x98] sm:$0xff]  ;;  %v1150_v58 = vld [vmem:[%s10072_s21 + $0x90] sm:$0xff]  ;;  %v1199_v63 = vpack.c.bf16 %v1175_v54, %v1169_v53 }
  0x7d   : > { %v6425_v55 = vld [vmem:[%s10071_s22 + $0x160] sm:$0xff]  ;;  %v6408_v59 = vld [vmem:[%s10071_s22 + $0xd8] sm:$0xff]  ;;  %v1145_v60 = vld [vmem:[%s10072_s21 + $0x68] sm:$0xff]  ;;  %v1198_v62 = vpack.c.bf16 %v1174_v52, %v1168_v51 }
  0x7e   : > { %v1144_v57 = vld [vmem:[%s10072_s21 + $0x60] sm:$0xff]  ;;  %v1151_v61 = vld [vmem:[%s10072_s21 + $0x98] sm:$0xff]  ;;  %v6399_v4 = vld [vmem:[%s10071_s22 + $0x90] sm:$0xff] }
  0x7f   : > { %6529 = vmatpush.bf16.msra.mxu2 %v6384_v16  ;;  %1600 = vmatpush.bf16.msra.mxu0 %v6384_v16  ;;  %v1186_v0 = vpack.c.bf16 %v1150_v58, %v1144_v57  ;;  %v6424_v1 = vld [vmem:[%s10071_s22 + $0x158] sm:$0xff]  ;;  %v1187_v3 = vpack.c.bf16 %v1151_v61, %v1145_v60  ;;  %v6407_v5 = vld [vmem:[%s10071_s22 + $0xd0] sm:$0xff]  ;;  %v6398_v8 = vld [vmem:[%s10071_s22 + $0x88] sm:$0xff] }
  0x80   : > { %6537 = vmatpush.bf16.msra.mxu3 %v6392_v17  ;;  %1629 = vmatpush.bf16.msra.mxu1 %v6392_v17  ;;  %v6416_v2 = vld [vmem:[%s10071_s22 + $0x118] sm:$0xff]  ;;  %v6423_v6 = vld [vmem:[%s10071_s22 + $0x150] sm:$0xff]  ;;  %v6406_v9 = vld [vmem:[%s10071_s22 + $0xc8] sm:$0xff] }
  0x81   : > { %v6415_v7 = vld [vmem:[%s10071_s22 + $0x110] sm:$0xff]  ;;  %v6422_v10 = vld [vmem:[%s10071_s22 + $0x148] sm:$0xff]  ;;  %v6397_v12 = vld [vmem:[%s10071_s22 + $0x80] sm:$0xff] }
  0x82   : > { %v6414_v11 = vld [vmem:[%s10071_s22 + $0x108] sm:$0xff]  ;;  %v6405_v13 = vld [vmem:[%s10071_s22 + $0xc0] sm:$0xff]  ;;  %v1134_v14 = vld [vmem:[%s10072_s21 + $0x10] sm:$0xff] }
  0x83   : > { %6530 = vmatpush.bf16.msra.mxu2 %v6383_v18  ;;  %1601 = vmatpush.bf16.msra.mxu0 %v6383_v18  ;;  %v1140_v15 = vld [vmem:[%s10072_s21 + $0x40] sm:$0xff]  ;;  %v1135_v16 = vld [vmem:[%s10072_s21 + $0x18] sm:$0xff]  ;;  %v1141_v17 = vld [vmem:[%s10072_s21 + $0x48] sm:$0xff] }
  0x84   : > { %6538 = vmatpush.bf16.msra.mxu3 %v6391_v19  ;;  %1630 = vmatpush.bf16.msra.mxu1 %v6391_v19  ;;  %v6421_v18 = vld [vmem:[%s10071_s22 + $0x140] sm:$0xff]  ;;  %v1182_v24 = vpack.c.bf16 %v1140_v15, %v1134_v14  ;;  %v1183_v25 = vpack.c.bf16 %v1141_v17, %v1135_v16  ;;  %v1147_v30 = vld [vmem:[%s10072_s21 + $0x78] sm:$0xff]  ;;  %v1154_v33 = vld [vmem:[%s10072_s21 + $0xb0] sm:$0xff] }
  0x85   : > { %v6413_v19 = vld [vmem:[%s10071_s22 + $0x100] sm:$0xff]  ;;  %v1170_v52 = vld [vmem:[%s10072_s21 + $0x130] sm:$0xff]  ;;  %v1171_v54 = vld [vmem:[%s10072_s21 + $0x138] sm:$0xff] }
  0x86   : > { %v1152_v29 = vld [vmem:[%s10072_s21 + $0xa0] sm:$0xff]  ;;  %v1178_v57 = vld [vmem:[%s10072_s21 + $0x170] sm:$0xff]  ;;  %v1173_v58 = vld [vmem:[%s10072_s21 + $0x148] sm:$0xff] }
  0x87   : > { %6531 = vmatpush.bf16.msra.mxu2 %v6382_v20  ;;  %1602 = vmatpush.bf16.msra.mxu0 %v6382_v20  ;;  %v1136_v20 = vld [vmem:[%s10072_s21 + $0x20] sm:$0xff] }
  0x88   : > { %6539 = vmatpush.bf16.msra.mxu3 %v6390_v21  ;;  %1631 = vmatpush.bf16.msra.mxu1 %v6390_v21  ;;  %v1142_v21 = vld [vmem:[%s10072_s21 + $0x50] sm:$0xff]  ;;  %v1148_v32 = vld [vmem:[%s10072_s21 + $0x80] sm:$0xff] }
  0x89   : > { %v1184_v26 = vpack.c.bf16 %v1142_v21, %v1136_v20  ;;  %v1176_v53 = vld [vmem:[%s10072_s21 + $0x160] sm:$0xff]  ;;  %v1301_v21 = vld [vmem:[%s10074_s1 + $0x8] sm:$0xff] }
  0x8a   : > { %v1200_v60 = vpack.c.bf16 %v1176_v53, %v1170_v52  ;;  %v1300_v14 = vld [vmem:[%s10073_s25] sm:$0xff] }
  0x8b   : > { %6532 = vmatpush.bf16.msra.mxu2 %v6381_v22  ;;  %1603 = vmatpush.bf16.msra.mxu0 %v6381_v22  ;;  %v1137_v22 = vld [vmem:[%s10072_s21 + $0x28] sm:$0xff] }
  0x8c   : > { %6540 = vmatpush.bf16.msra.mxu3 %v6389_v23  ;;  %1632 = vmatpush.bf16.msra.mxu1 %v6389_v23  ;;  %v1143_v23 = vld [vmem:[%s10072_s21 + $0x58] sm:$0xff] }
  0x8d   : > { %v1185_v27 = vpack.c.bf16 %v1143_v23, %v1137_v22 }
  0x8e   : > { %1614 = vmatmul.bf16.vlgmr.msra.gmra.mxu2 %v1192_v34  ;;  %1604 = vmatmul.bf16.vlgmr.msra.gmra.mxu0 %v1180_v36  ;;  %v1149_v34 = vld [vmem:[%s10072_s21 + $0x88] sm:$0xff] }
  0x8f   : > { %1654 = vmatpush.bf16.msrb.mxu2 %v6404_v28  ;;  %1643 = vmatmul.bf16.vlgmr.msra.gmra.mxu3 %v1193_v35  ;;  %v1146_v28 = vld [vmem:[%s10072_s21 + $0x70] sm:$0xff]  ;;  %v1155_v35 = vld [vmem:[%s10072_s21 + $0xb8] sm:$0xff] }
  0x90   : > { %1683 = vmatpush.bf16.msrb.mxu3 %v6412_v31  ;;  %1741 = vmatpush.bf16.msrb.mxu1 %v6428_v37  ;;  %v1153_v31 = vld [vmem:[%s10072_s21 + $0xa8] sm:$0xff]  ;;  %v1188_v36 = vpack.c.bf16 %v1152_v29, %v1146_v28 }
  0x91   : > { %1712 = vmatpush.bf16.msrb.mxu0 %v6420_v38  ;;  %1633 = vmatmul.bf16.vlgmr.msra.gmra.mxu1 %v1181_v39  ;;  %v1189_v37 = vpack.c.bf16 %v1153_v31, %v1147_v30  ;;  %v1190_v38 = vpack.c.bf16 %v1154_v33, %v1148_v32  ;;  %v1191_v39 = vpack.c.bf16 %v1155_v35, %v1149_v34  ;;  %v1302_v32 = vld [vmem:[%s10074_s1 + $0x10] sm:$0xff] }
  0x93   : > { %1655 = vmatpush.bf16.msrb.mxu2 %v6403_v40  ;;  %v1158_v40 = vld [vmem:[%s10072_s21 + $0xd0] sm:$0xff] }
  0x94   : > { %1684 = vmatpush.bf16.msrb.mxu3 %v6411_v41  ;;  %1742 = vmatpush.bf16.msrb.mxu1 %v6427_v42  ;;  %v1164_v41 = vld [vmem:[%s10072_s21 + $0x100] sm:$0xff]  ;;  %v1159_v42 = vld [vmem:[%s10072_s21 + $0xd8] sm:$0xff] }
  0x95   : > { %1713 = vmatpush.bf16.msrb.mxu0 %v6419_v43  ;;  %v1165_v43 = vld [vmem:[%s10072_s21 + $0x108] sm:$0xff] }
  0x97   : > { %1656 = vmatpush.bf16.msrb.mxu2 %v6402_v44  ;;  %v1160_v44 = vld [vmem:[%s10072_s21 + $0xe0] sm:$0xff] }
  0x98   : > { %1685 = vmatpush.bf16.msrb.mxu3 %v6410_v45  ;;  %1743 = vmatpush.bf16.msrb.mxu1 %v6426_v46  ;;  %v1166_v45 = vld [vmem:[%s10072_s21 + $0x110] sm:$0xff]  ;;  %v1161_v46 = vld [vmem:[%s10072_s21 + $0xe8] sm:$0xff] }
  0x99   : > { %1714 = vmatpush.bf16.msrb.mxu0 %v6418_v47  ;;  %v1167_v47 = vld [vmem:[%s10072_s21 + $0x118] sm:$0xff] }
  0x9a   : > { %v1197_v51 = vpack.c.bf16 %v1167_v47, %v1161_v46 }
  0x9b   : > { %1657 = vmatpush.bf16.msrb.mxu2 %v6401_v48  ;;  %v1194_v48 = vpack.c.bf16 %v1164_v41, %v1158_v40 }
  0x9c   : > { %1686 = vmatpush.bf16.msrb.mxu3 %v6409_v49  ;;  %1744 = vmatpush.bf16.msrb.mxu1 %v6425_v55  ;;  %v1195_v49 = vpack.c.bf16 %v1165_v43, %v1159_v42  ;;  %v1177_v55 = vld [vmem:[%s10072_s21 + $0x168] sm:$0xff]  ;;  %v1303_v43 = vld [vmem:[%s10074_s1 + $0x18] sm:$0xff] }
  0x9d   : > { %1715 = vmatpush.bf16.msrb.mxu0 %v6417_v50  ;;  %v1196_v50 = vpack.c.bf16 %v1166_v45, %v1160_v44  ;;  %v1201_v61 = vpack.c.bf16 %v1177_v55, %v1171_v54  ;;  %v1304_v54 = vld [vmem:[%s10074_s1 + $0x20] sm:$0xff] }
  0x9e   : > { %1619 = vmatmul.bf16.gmra.mxu2 %v1198_v62  ;;  %1609 = vmatmul.bf16.gmra.mxu0 %v1186_v0 }
  0x9f   : > { %1658 = vmatpush.bf16.msrb.mxu2 %v6400_v56  ;;  %1648 = vmatmul.bf16.gmra.mxu3 %v1199_v63  ;;  %v1172_v56 = vld [vmem:[%s10072_s21 + $0x140] sm:$0xff] }
  0xa0   : > { %1687 = vmatpush.bf16.msrb.mxu3 %v6408_v59  ;;  %1745 = vmatpush.bf16.msrb.mxu1 %v6424_v1  ;;  %v1179_v59 = vld [vmem:[%s10072_s21 + $0x178] sm:$0xff]  ;;  %v1202_v62 = vpack.c.bf16 %v1178_v57, %v1172_v56 }
  0xa1   : > { %1716 = vmatpush.bf16.msrb.mxu0 %v6416_v2  ;;  %1638 = vmatmul.bf16.gmra.mxu1 %v1187_v3  ;;  %v1203_v63 = vpack.c.bf16 %v1179_v59, %v1173_v58 }
  0xa3   : > { %1659 = vmatpush.bf16.msrb.mxu2 %v6399_v4 }
  0xa4   : > { %1688 = vmatpush.bf16.msrb.mxu3 %v6407_v5  ;;  %1746 = vmatpush.bf16.msrb.mxu1 %v6423_v6 }
  0xa5   : > { %1717 = vmatpush.bf16.msrb.mxu0 %v6415_v7 }
  0xa7   : > { %1660 = vmatpush.bf16.msrb.mxu2 %v6398_v8 }
  0xa8   : > { %1689 = vmatpush.bf16.msrb.mxu3 %v6406_v9  ;;  %1747 = vmatpush.bf16.msrb.mxu1 %v6422_v10 }
  0xa9   : > { %1718 = vmatpush.bf16.msrb.mxu0 %v6414_v11 }
  0xab   : > { %1661 = vmatpush.bf16.msrb.mxu2 %v6397_v12 }
  0xac   : > { %1690 = vmatpush.bf16.msrb.mxu3 %v6405_v13  ;;  %1748 = vmatpush.bf16.msrb.mxu1 %v6421_v18 }
  0xad   : > { %1719 = vmatpush.bf16.msrb.mxu0 %v6413_v19 }
  0xae   : > { %1662 = vmatmul.bf16.vlgmr.msrb.gmra.mxu2 %v1182_v24 }
  0xaf   : > { %1691 = vmatmul.bf16.vlgmr.msrb.gmra.mxu3 %v1183_v25 }
  0xb0   : > { %1720 = vmatmul.bf16.vlgmr.msrb.gmra.mxu0 %v1184_v26 }
  0xb1   : > { %1749 = vmatmul.bf16.vlgmr.msrb.gmra.mxu1 %v1185_v27 }
  0xbe   : > { %1667 = vmatmul.bf16.gmra.mxu2 %v1188_v36 }
  0xbf   : > { %1696 = vmatmul.bf16.gmra.mxu3 %v1189_v37 }
  0xc0   : > { %1725 = vmatmul.bf16.gmra.mxu0 %v1190_v38 }
  0xc1   : > { %1754 = vmatmul.bf16.gmra.mxu1 %v1191_v39 }
  0xce   : > { %1672 = vmatmul.bf16.gmra.mxu2 %v1194_v48 }
  0xcf   : > { %1701 = vmatmul.bf16.gmra.mxu3 %v1195_v49 }
  0xd0   : > { %1730 = vmatmul.bf16.gmra.mxu0 %v1196_v50 }
  0xd1   : > { %1759 = vmatmul.bf16.gmra.mxu1 %v1197_v51 }
  0xde   : > { %1677 = vmatmul.bf16.gmra.mxu2 %v1200_v60 }
  0xdf   : > { %1706 = vmatmul.bf16.gmra.mxu3 %v1201_v61 }
  0xe0   : > { %1735 = vmatmul.bf16.gmra.mxu0 %v1202_v62 }
  0xe1   : > { %1764 = vmatmul.bf16.gmra.mxu1 %v1203_v63 }
 0x10b   : > { %v1605_v0 = vpop.f32.mrf.mxu0 }
 0x10c   : > { %v1606_v17 = vadd.f32 %v1605_v0, %v1300_v14 }
 0x10e   : > { %v1634_v1 = vpop.f32.mrf.mxu1 }
 0x10f   : > { %v1635_v20 = vadd.f32 %v1634_v1, %v1606_v17  ;;  %v1305_v1 = vld [vmem:[%s10074_s1 + $0x28] sm:$0xff]  ;;  %v1306_v17 = vld [vmem:[%s10074_s1 + $0x30] sm:$0xff] }
 0x111   : > { %v1615_v2 = vpop.f32.mrf.mxu2 }
 0x112   : > { %v1644_v3 = vpop.f32.mrf.mxu3  ;;  %v1616_v58 = vadd.f32 %v1615_v2, %v1304_v54 }
 0x113   : > { %v1607_v4 = vpop.f32.mrf.mxu0 }
 0x114   : > { %v1608_v25 = vadd.f32 %v1607_v4, %v1301_v21  ;;  %v1645_v62 = vadd.f32 %v1644_v3, %v1616_v58 }
 0x116   : > { %v1636_v5 = vpop.f32.mrf.mxu1 }
 0x117   : > { %v1637_v30 = vadd.f32 %v1636_v5, %v1608_v25  ;;  %v1307_v25 = vld [vmem:[%s10074_s1 + $0x38] sm:$0xff] }
 0x119   : > { %v7705_v6 = vpop.f32.mrf.mxu2 }
 0x11a   : > { %v7707_v7 = vpop.f32.mrf.mxu3 }
 0x11b   : > { %v1610_v8 = vpop.f32.mrf.mxu0 }
 0x11c   : > { %v1611_v36 = vadd.f32 %v1610_v8, %v1302_v32 }
 0x11e   : > { %v1639_v9 = vpop.f32.mrf.mxu1 }
 0x11f   : > { %v1640_v41 = vadd.f32 %v1639_v9, %v1611_v36  ;;  %v1618_v9 = vadd.f32 %v7705_v6, %v1305_v1 }
 0x121   : > { %v7709_v10 = vpop.f32.mrf.mxu2 }
 0x122   : > { %v7711_v11 = vpop.f32.mrf.mxu3 }
 0x123   : > { %v1612_v12 = vpop.f32.mrf.mxu0 }
 0x124   : > { %v1613_v47 = vadd.f32 %v1612_v12, %v1303_v43 }
 0x126   : > { %v1641_v13 = vpop.f32.mrf.mxu1 }
 0x127   : > { %v1642_v52 = vadd.f32 %v1641_v13, %v1613_v47  ;;  %v1647_v13 = vadd.f32 %v7707_v7, %v1618_v9 }
 0x129   : > { %v7716_v15 = vpop.f32.mrf.mxu2 }
 0x12a   : > { %v7718_v16 = vpop.f32.mrf.mxu3 }
 0x12d   : > { %v1721_v18 = vpop.f32.mrf.mxu0 }
 0x12e   : > { %v1750_v19 = vpop.f32.mrf.mxu1 }
 0x131   : > { %v1663_v22 = vpop.f32.mrf.mxu2 }
 0x132   : > { %v1692_v23 = vpop.f32.mrf.mxu3  ;;  %v1664_v24 = vadd.f32 %v1663_v22, %v1635_v20  ;;  %v1621_v22 = vadd.f32 %v7709_v10, %v1306_v17 }
 0x134   : > { %v1693_v26 = vadd.f32 %v1692_v23, %v1664_v24  ;;  %v1650_v24 = vadd.f32 %v7711_v11, %v1621_v22 }
 0x135   : > { %v1723_v27 = vpop.f32.mrf.mxu0 }
 0x136   : > { %v1752_v28 = vpop.f32.mrf.mxu1  ;;  %v1722_v29 = vadd.f32 %v1721_v18, %v1693_v26 }
 0x138   : > { %v7723_v31 = vadd.f32 %v1750_v19, %v1722_v29 }
 0x139   : > { %v1665_v33 = vpop.f32.mrf.mxu2 }
 0x13a   : > { %v1694_v34 = vpop.f32.mrf.mxu3  ;;  %v1666_v35 = vadd.f32 %v1665_v33, %v1637_v30  ;;  %1772 = vadd.xlane.f32.xlu0 %v7723_v31  ;;  %v1623_v30 = vadd.f32 %v7716_v15, %v1307_v25 }
 0x13c   : > { %v1695_v37 = vadd.f32 %v1694_v34, %v1666_v35  ;;  %v1652_v10 = vadd.f32 %v7718_v16, %v1623_v30 }
 0x13d   : > { %v1726_v38 = vpop.f32.mrf.mxu0 }
 0x13e   : > { %v1755_v39 = vpop.f32.mrf.mxu1  ;;  %v1724_v40 = vadd.f32 %v1723_v27, %v1695_v37 }
 0x140   : > { %v7729_v42 = vadd.f32 %v1752_v28, %v1724_v40 }
 0x141   : > { %v1668_v44 = vpop.f32.mrf.mxu2 }
 0x142   : > { %v1697_v45 = vpop.f32.mrf.mxu3  ;;  %v1669_v46 = vadd.f32 %v1668_v44, %v1640_v41  ;;  %1774 = vadd.xlane.f32.xlu0 %v7729_v42  ;;  %v7081_v44 = vmov 128.0  }
 0x143   : > { %6641 = vrcp.f32 %v7081_v44 }
 0x144   : > { %v1698_v48 = vadd.f32 %v1697_v45, %v1669_v46 }
 0x145   : > { %v1728_v49 = vpop.f32.mrf.mxu0 }
 0x146   : > { %v1727_v50 = vadd.f32 %v1726_v38, %v1698_v48  ;;  %v1757_v51 = vpop.f32.mrf.mxu1 }
 0x148   : > { %v7735_v53 = vadd.f32 %v1755_v39, %v1727_v50 }
 0x149   : > { %v1670_v55 = vpop.f32.mrf.mxu2  ;;  %v6642_v45 = vpop.eup %6641 }
 0x14a   : > { %v1699_v56 = vpop.f32.mrf.mxu3  ;;  %v1671_v57 = vadd.f32 %v1670_v55, %v1642_v52  ;;  %1776 = vadd.xlane.f32.xlu1 %v7735_v53  ;;  %v1789_v15 = vmul.f32 128.0, %v6642_v45  ;;  %vm1793_vm0 = vweird.f32 %v6642_v45 }
 0x14c   : > { %v1700_v59 = vadd.f32 %v1699_v56, %v1671_v57  ;;  %v1790_v46 = vsub.f32 1.0, %v1789_v15 }
 0x14d   : > { %v1731_v61 = vpop.f32.mrf.mxu0 }
 0x14e   : > { %v1729_v60 = vadd.f32 %v1728_v49, %v1700_v59  ;;  %v1760_v63 = vpop.f32.mrf.mxu1  ;;  %v1791_v47 = vmul.f32 %v6642_v45, %v1790_v46 }
 0x150   : > { %v7741_v0 = vadd.f32 %v1757_v51, %v1729_v60  ;;  %v1792_v48 = vadd.f32 %v6642_v45, %v1791_v47 }
 0x151   : > { %v1673_v4 = vpop.f32.mrf.mxu2 }
 0x152   : > { %v1702_v5 = vpop.f32.mrf.mxu3  ;;  %v1674_v8 = vadd.f32 %v1673_v4, %v1645_v62  ;;  %1778 = vadd.xlane.f32.xlu1 %v7741_v0  ;;  %v7762_v16 = vsel %vm1793_vm0, %v6642_v45, %v1792_v48 }
 0x154   : > { %v1703_v12 = vadd.f32 %v1702_v5, %v1674_v8 }
 0x155   : > { %v1733_v14 = vpop.f32.mrf.mxu0 }
 0x156   : > { %v1732_v2 = vadd.f32 %v1731_v61, %v1703_v12  ;;  %v1762_v21 = vpop.f32.mrf.mxu1 }
 0x158   : > { %v7749_v3 = vadd.f32 %v1760_v63, %v1732_v2 }
 0x159   : > { %v1675_v18 = vpop.f32.mrf.mxu2 }
 0x15a   : > { %v1704_v19 = vpop.f32.mrf.mxu3  ;;  %v1676_v20 = vadd.f32 %v1675_v18, %v1647_v13  ;;  %1780 = vadd.xlane.f32.xlu2 %v7749_v3 }
 0x15c   : > { %v1705_v6 = vadd.f32 %v1704_v19, %v1676_v20 }
 0x15d   : > { %v1736_v29 = vpop.f32.mrf.mxu0 }
 0x15e   : > { %v1734_v23 = vadd.f32 %v1733_v14, %v1705_v6  ;;  %v1765_v33 = vpop.f32.mrf.mxu1 }
 0x160   : > { %v1763_v7 = vadd.f32 %v1762_v21, %v1734_v23 }
 0x161   : > { %v1678_v26 = vpop.f32.mrf.mxu2 }
 0x162   : > { %v1707_v27 = vpop.f32.mrf.mxu3  ;;  %v1679_v28 = vadd.f32 %v1678_v26, %v1650_v24  ;;  %1782 = vadd.xlane.f32.xlu2 %v1763_v7 }
 0x164   : > { %v1708_v32 = vadd.f32 %v1707_v27, %v1679_v28 }
 0x165   : > { %v1738_v39 = vpop.f32.mrf.mxu0 }
 0x166   : > { %v1737_v34 = vadd.f32 %v1736_v29, %v1708_v32  ;;  %v1767_v41 = vpop.f32.mrf.mxu1 }
 0x168   : > { %v1766_v35 = vadd.f32 %v1765_v33, %v1737_v34 }
 0x169   : > { %v1680_v36 = vpop.f32.mrf.mxu2 }
 0x16a   : > { %v1681_v11 = vadd.f32 %v1680_v36, %v1652_v10  ;;  %1784 = vadd.xlane.f32.xlu0 %v1766_v35  ;;  %v1709_v37 = vpop.f32.mrf.mxu3  ;;  %v7817_v36 = vld [vmem:[%s10076_s29] ss:$0 sm:$0xff] }
 0x16c   : > { %v1710_v38 = vadd.f32 %v1709_v37, %v1681_v11 }
 0x16e   : > { %v1739_v40 = vadd.f32 %v1738_v39, %v1710_v38  ;;  %v7824_v38 = vld [vmem:[%s10077_s16] ss:$0 sm:$0xff] }
 0x170   : > { %v1768_v43 = vadd.f32 %v1767_v41, %v1739_v40 }
 0x172   : > { %1786 = vadd.xlane.f32.xlu1 %v1768_v43 }
 0x1ad   : > { %v1773_v49 = vpop.xlane.xlu0 %1772 }
 0x1ae   : > { %v1795_v50 = vmul.f32 %v7762_v16, %v1773_v49 }
 0x1b0   : > { %v7766_v51 = vsub.f32 %v7723_v31, %v1795_v50 }
 0x1b2   : > { %v1811_v52 = vmul.f32 %v7766_v51, %v7766_v51 }
 0x1b4   : > { %1819 = vadd.xlane.f32.xlu2 %v1811_v52 }
 0x1b5   : > { %v1775_v54 = vpop.xlane.xlu0 %1774 }
 0x1b6   : > { %v1796_v55 = vmul.f32 %v7762_v16, %v1775_v54 }
 0x1b8   : > { %v7772_v56 = vsub.f32 %v7729_v42, %v1796_v55 }
 0x1ba   : > { %v1812_v57 = vmul.f32 %v7772_v56, %v7772_v56 }
 0x1bc   : > { %1821 = vadd.xlane.f32.xlu0 %v1812_v57 }
 0x1bd   : > { %v1777_v58 = vpop.xlane.xlu1 %1776 }
 0x1be   : > { %v1797_v59 = vmul.f32 %v7762_v16, %v1777_v58 }
 0x1c0   : > { %v7778_v31 = vsub.f32 %v7735_v53, %v1797_v59 }
 0x1c2   : > { %v1813_v60 = vmul.f32 %v7778_v31, %v7778_v31 }
 0x1c4   : > { %1823 = vadd.xlane.f32.xlu1 %v1813_v60 }
 0x1c5   : > { %v1779_v61 = vpop.xlane.xlu1 %1778 }
 0x1c6   : > { %v1798_v62 = vmul.f32 %v7762_v16, %v1779_v61 }
 0x1c8   : > { %v7784_v42 = vsub.f32 %v7741_v0, %v1798_v62 }
 0x1ca   : > { %v1814_v63 = vmul.f32 %v7784_v42, %v7784_v42 }
 0x1cc   : > { %1825 = vadd.xlane.f32.xlu2 %v1814_v63 }
 0x1cd   : > { %v1781_v1 = vpop.xlane.xlu2 %1780 }
 0x1ce   : > { %v1799_v4 = vmul.f32 %v7762_v16, %v1781_v1 }
 0x1d0   : > { %v7790_v53 = vsub.f32 %v7749_v3, %v1799_v4 }
 0x1d2   : > { %v1815_v5 = vmul.f32 %v7790_v53, %v7790_v53 }
 0x1d4   : > { %1827 = vadd.xlane.f32.xlu0 %v1815_v5 }
 0x1d5   : > { %v1783_v8 = vpop.xlane.xlu2 %1782 }
 0x1d6   : > { %v1800_v9 = vmul.f32 %v7762_v16, %v1783_v8 }
 0x1d8   : > { %v7795_v12 = vsub.f32 %v1763_v7, %v1800_v9 }
 0x1da   : > { %v1816_v0 = vmul.f32 %v7795_v12, %v7795_v12 }
 0x1dc   : > { %1829 = vadd.xlane.f32.xlu1 %v1816_v0 }
 0x1dd   : > { %v1785_v2 = vpop.xlane.xlu0 %1784 }
 0x1de   : > { %v1801_v13 = vmul.f32 %v7762_v16, %v1785_v2 }
 0x1e0   : > { %v7800_v14 = vsub.f32 %v1766_v35, %v1801_v13 }
 0x1e2   : > { %v1817_v3 = vmul.f32 %v7800_v14, %v7800_v14 }
 0x1e4   : > { %1831 = vadd.xlane.f32.xlu2 %v1817_v3 }
 0x1e5   : > { %v1787_v17 = vpop.xlane.xlu1 %1786 }
 0x1e6   : > { %v1802_v18 = vmul.f32 %v7762_v16, %v1787_v17 }
 0x1e8   : > { %v7805_v19 = vsub.f32 %v1768_v43, %v1802_v18 }
 0x1ea   : > { %v1818_v20 = vmul.f32 %v7805_v19, %v7805_v19 }
 0x1ec   : > { %1833 = vadd.xlane.f32.xlu0 %v1818_v20 }
 0x227   : > { %v1820_v21 = vpop.xlane.xlu2 %1819 }
 0x228   : > { %v1835_v22 = vmul.f32 %v1820_v21, %v7762_v16 }
 0x22a   : > { %v1843_v6 = vadd.f32 1e-05, %v1835_v22 }
 0x22c   : > { %6643 = vrsqrt.f32 %v1843_v6  ;;  %vm1857_vm2 = vweird.f32 %v1843_v6 }
 0x22f   : > { %v1822_v23 = vpop.xlane.xlu0 %1821 }
 0x230   : > { %v1836_v24 = vmul.f32 %v1822_v23, %v7762_v16 }
 0x232   : > { %v6644_v7 = vpop.eup %6643  ;;  %v1844_v25 = vadd.f32 1e-05, %v1836_v24 }
 0x233   : > { %v1852_v26 = vmul.f32 %v6644_v7, %v1843_v6  ;;  %vm1858_vm1 = vweird.f32 %v6644_v7 }
 0x234   : > { %6645 = vrsqrt.f32 %v1844_v25  ;;  %vm1859_vm3 = vmor %vm1857_vm2, %vm1858_vm1  ;;  %vm1867_vm5 = vweird.f32 %v1844_v25 }
 0x235   : > { %v1853_v27 = vmul.f32 %v6644_v7, %v1852_v26 }
 0x237   : > { %v1854_v28 = vmul.f32 0.5, %v1853_v27  ;;  %v1824_v29 = vpop.xlane.xlu1 %1823 }
 0x238   : > { %v1837_v30 = vmul.f32 %v1824_v29, %v7762_v16 }
 0x239   : > { %v1855_v32 = vsub.f32 1.5, %v1854_v28 }
 0x23a   : > { %v6646_v33 = vpop.eup %6645  ;;  %v1845_v34 = vadd.f32 1e-05, %v1837_v30 }
 0x23b   : > { %v1856_v10 = vmul.f32 %v6644_v7, %v1855_v32  ;;  %v1862_v35 = vmul.f32 %v6646_v33, %v1844_v25  ;;  %vm1868_vm4 = vweird.f32 %v6646_v33 }
 0x23c   : > { %6647 = vrsqrt.f32 %v1845_v34  ;;  %vm1869_vm6 = vmor %vm1867_vm5, %vm1868_vm4  ;;  %vm1877_vm8 = vweird.f32 %v1845_v34 }
 0x23d   : > { %v1860_v11 = vsel %vm1859_vm3, %v6644_v7, %v1856_v10  ;;  %v1863_v37 = vmul.f32 %v6646_v33, %v1862_v35 }
 0x23e   : > { %v1931_v39 = vmul.f32 %v1860_v11, %v7766_v51 }
 0x23f   : > { %v1864_v40 = vmul.f32 0.5, %v1863_v37  ;;  %v1826_v41 = vpop.xlane.xlu2 %1825 }
 0x240   : > { %v1942_v43 = vmul.f32 %v7817_v36, %v1931_v39  ;;  %v1838_v44 = vmul.f32 %v1826_v41, %v7762_v16 }
 0x241   : > { %v1865_v45 = vsub.f32 1.5, %v1864_v40 }
 0x242   : > { %v6648_v15 = vpop.eup %6647  ;;  %v1953_v46 = vadd.f32 %v7824_v38, %v1942_v43  ;;  %v1846_v47 = vadd.f32 1e-05, %v1838_v44 }
 0x243   : > { %v1866_v48 = vmul.f32 %v6646_v33, %v1865_v45  ;;  %v1872_v49 = vmul.f32 %v6648_v15, %v1845_v34  ;;  %vm1878_vm7 = vweird.f32 %v6648_v15 }
 0x244   : > { %1961 = vst [vmem:[%s7380_s15] sm:$0xff] %v1953_v46  ;;  %6649 = vrsqrt.f32 %v1846_v47  ;;  %vm1879_vm9 = vmor %vm1877_vm8, %vm1878_vm7  ;;  %vm1887_vm11 = vweird.f32 %v1846_v47 }
 0x245   : > { %v1870_v50 = vsel %vm1869_vm6, %v6646_v33, %v1866_v48  ;;  %v1873_v51 = vmul.f32 %v6648_v15, %v1872_v49 }
 0x246   : > { %v1932_v52 = vmul.f32 %v1870_v50, %v7772_v56 }
 0x247   : > { %v1874_v54 = vmul.f32 0.5, %v1873_v51  ;;  %v1828_v55 = vpop.xlane.xlu0 %1827 }
 0x248   : > { %v1943_v57 = vmul.f32 %v7817_v36, %v1932_v52  ;;  %v1839_v58 = vmul.f32 %v1828_v55, %v7762_v16 }
 0x249   : > { %v1875_v59 = vsub.f32 1.5, %v1874_v54 }
 0x24a   : > { %v6650_v60 = vpop.eup %6649  ;;  %v1954_v61 = vadd.f32 %v7824_v38, %v1943_v57  ;;  %v1847_v62 = vadd.f32 1e-05, %v1839_v58 }
 0x24b   : > { %v1876_v63 = vmul.f32 %v6648_v15, %v1875_v59  ;;  %v1882_v1 = vmul.f32 %v6650_v60, %v1846_v47  ;;  %vm1888_vm10 = vweird.f32 %v6650_v60 }
 0x24c   : > { %1962 = vst [vmem:[%s7380_s15 + $0x8] sm:$0xff] %v1954_v61  ;;  %6651 = vrsqrt.f32 %v1847_v62  ;;  %vm1889_vm12 = vmor %vm1887_vm11, %vm1888_vm10  ;;  %vm1897_vm14 = vweird.f32 %v1847_v62 }
 0x24d   : > { %v1880_v56 = vsel %vm1879_vm9, %v6648_v15, %v1876_v63  ;;  %v1883_v4 = vmul.f32 %v6650_v60, %v1882_v1 }
 0x24e   : > { %v1933_v5 = vmul.f32 %v1880_v56, %v7778_v31 }
 0x24f   : > { %v1884_v8 = vmul.f32 0.5, %v1883_v4  ;;  %v1830_v9 = vpop.xlane.xlu1 %1829 }
 0x250   : > { %v1944_v0 = vmul.f32 %v7817_v36, %v1933_v5  ;;  %v1840_v2 = vmul.f32 %v1830_v9, %v7762_v16 }
 0x251   : > { %v1885_v13 = vsub.f32 1.5, %v1884_v8 }
 0x252   : > { %v6652_v3 = vpop.eup %6651  ;;  %v1955_v17 = vadd.f32 %v7824_v38, %v1944_v0  ;;  %v1848_v18 = vadd.f32 1e-05, %v1840_v2 }
 0x253   : > { %v1886_v20 = vmul.f32 %v6650_v60, %v1885_v13  ;;  %v1892_v21 = vmul.f32 %v6652_v3, %v1847_v62  ;;  %vm1898_vm13 = vweird.f32 %v6652_v3 }
 0x254   : > { %1963 = vst [vmem:[%s7380_s15 + $0x10] sm:$0xff] %v1955_v17  ;;  %6653 = vrsqrt.f32 %v1848_v18  ;;  %vm1899_vm15 = vmor %vm1897_vm14, %vm1898_vm13  ;;  %vm1907_vm1 = vweird.f32 %v1848_v18 }
 0x255   : > { %v1890_v31 = vsel %vm1889_vm12, %v6650_v60, %v1886_v20  ;;  %v1893_v22 = vmul.f32 %v6652_v3, %v1892_v21 }
 0x256   : > { %v1934_v6 = vmul.f32 %v1890_v31, %v7784_v42 }
 0x257   : > { %v1894_v23 = vmul.f32 0.5, %v1893_v22  ;;  %v1832_v24 = vpop.xlane.xlu2 %1831 }
 0x258   : > { %v1945_v7 = vmul.f32 %v7817_v36, %v1934_v6  ;;  %v1841_v25 = vmul.f32 %v1832_v24, %v7762_v16 }
 0x259   : > { %v1895_v26 = vsub.f32 1.5, %v1894_v23 }
 0x25a   : > { %v6654_v27 = vpop.eup %6653  ;;  %v1956_v28 = vadd.f32 %v7824_v38, %v1945_v7  ;;  %v1849_v29 = vadd.f32 1e-05, %v1841_v25 }
 0x25b   : > { %v1896_v30 = vmul.f32 %v6652_v3, %v1895_v26  ;;  %v1902_v32 = vmul.f32 %v6654_v27, %v1848_v18  ;;  %vm1908_vm0 = vweird.f32 %v6654_v27 }
 0x25c   : > { %1964 = vst [vmem:[%s7380_s15 + $0x18] sm:$0xff] %v1956_v28  ;;  %6655 = vrsqrt.f32 %v1849_v29  ;;  %vm1909_vm2 = vmor %vm1907_vm1, %vm1908_vm0  ;;  %vm1917_vm4 = vweird.f32 %v1849_v29 }
 0x25d   : > { %v1900_v42 = vsel %vm1899_vm15, %v6652_v3, %v1896_v30  ;;  %v1903_v33 = vmul.f32 %v6654_v27, %v1902_v32 }
 0x25e   : > { %v1935_v34 = vmul.f32 %v1900_v42, %v7790_v53 }
 0x25f   : > { %v1904_v10 = vmul.f32 0.5, %v1903_v33  ;;  %v1834_v35 = vpop.xlane.xlu0 %1833 }
 0x260   : > { %v1946_v11 = vmul.f32 %v7817_v36, %v1935_v34  ;;  %v1842_v37 = vmul.f32 %v1834_v35, %v7762_v16 }
 0x261   : > { %v1905_v39 = vsub.f32 1.5, %v1904_v10 }
 0x262   : > { %v6656_v40 = vpop.eup %6655  ;;  %v1957_v41 = vadd.f32 %v7824_v38, %v1946_v11  ;;  %v1850_v43 = vadd.f32 1e-05, %v1842_v37 }
 0x263   : > { %v1906_v44 = vmul.f32 %v6654_v27, %v1905_v39  ;;  %v1912_v45 = vmul.f32 %v6656_v40, %v1849_v29  ;;  %vm1918_vm3 = vweird.f32 %v6656_v40 }
 0x264   : > { %1965 = vst [vmem:[%s7380_s15 + $0x20] sm:$0xff] %v1957_v41  ;;  %6657 = vrsqrt.f32 %v1850_v43  ;;  %vm1919_vm5 = vmor %vm1917_vm4, %vm1918_vm3  ;;  %vm1927_vm7 = vweird.f32 %v1850_v43 }
 0x265   : > { %v1910_v53 = vsel %vm1909_vm2, %v6654_v27, %v1906_v44  ;;  %v1913_v15 = vmul.f32 %v6656_v40, %v1912_v45 }
 0x266   : > { %v1936_v46 = vmul.f32 %v1910_v53, %v7795_v12 }
 0x267   : > { %v1914_v47 = vmul.f32 0.5, %v1913_v15 }
 0x268   : > { %v1947_v16 = vmul.f32 %v7817_v36, %v1936_v46 }
 0x269   : > { %v1915_v48 = vsub.f32 1.5, %v1914_v47 }
 0x26a   : > { %v6658_v49 = vpop.eup %6657  ;;  %v1958_v50 = vadd.f32 %v7824_v38, %v1947_v16 }
 0x26b   : > { %v1916_v51 = vmul.f32 %v6656_v40, %v1915_v48  ;;  %v1922_v52 = vmul.f32 %v6658_v49, %v1850_v43  ;;  %vm1928_vm6 = vweird.f32 %v6658_v49 }
 0x26c   : > { %1966 = vst [vmem:[%s7380_s15 + $0x28] sm:$0xff] %v1958_v50  ;;  %vm1929_vm8 = vmor %vm1927_vm7, %vm1928_vm6 }
 0x26d   : > { %v1920_v54 = vsel %vm1919_vm5, %v6656_v40, %v1916_v51  ;;  %v1923_v55 = vmul.f32 %v6658_v49, %v1922_v52 }
 0x26e   : > { %v1937_v57 = vmul.f32 %v1920_v54, %v7800_v14 }
 0x26f   : > { %v1924_v12 = vmul.f32 0.5, %v1923_v55 }
 0x270   : > { %v1948_v58 = vmul.f32 %v7817_v36, %v1937_v57 }
 0x271   : > { %v1925_v59 = vsub.f32 1.5, %v1924_v12 }
 0x272   : > { %v1959_v60 = vadd.f32 %v7824_v38, %v1948_v58 }
 0x273   : > { %v1926_v61 = vmul.f32 %v6658_v49, %v1925_v59 }
 0x274   : > { %1967 = vst [vmem:[%s7380_s15 + $0x30] sm:$0xff] %v1959_v60 }
 0x275   : > { %v1930_v62 = vsel %vm1929_vm8, %v6658_v49, %v1926_v61 }
 0x276   : > { %v1938_v63 = vmul.f32 %v1930_v62, %v7805_v19 }
 0x278   : > { %v1949_v1 = vmul.f32 %v7817_v36, %v1938_v63 }
 0x27a   : > { %v1960_v56 = vadd.f32 %v7824_v38, %v1949_v1 }
 0x27c   : > { %1968 = vst [vmem:[%s7380_s15 + $0x38] sm:$0xff] %v1960_v56 }
 0x27d PF: > { %v1973_v14 = vld [vmem:[%s7380_s15 + $0x20] sm:$0xff]  ;;  %v1971_v4 = vld [vmem:[%s7380_s15 + $0x10] sm:$0xff]  ;;  %v1974_v19 = vld [vmem:[%s7380_s15 + $0x28] sm:$0xff]  ;;  %v7082_v0 = vmov 128.0   ;;  %s10082_s3 = scalar_lea.vmem %s9990_s7, %s7307_s9  ;;  %s10083_s12 = scalar_lea.vmem %s9991_s8, %s7307_s9 }
 0x27e   : > { %v1969_v5 = vld [vmem:[%s7380_s15] sm:$0xff]  ;;  %1995 = vadd.xlane.f32.xlu2 %v1973_v14  ;;  %1991 = vadd.xlane.f32.xlu1 %v1971_v4  ;;  %v1972_v36 = vld [vmem:[%s7380_s15 + $0x18] sm:$0xff]  ;;  %v1970_v38 = vld [vmem:[%s7380_s15 + $0x8] sm:$0xff]  ;;  %6665 = vrcp.f32 %v7082_v0  ;;  %s10084_s0 = sld [smem:[#allocation14_spill]]  ;;  %s7083_s29 = smov 96  }
 0x27f   : > { %1987 = vadd.xlane.f32.xlu0 %v1969_v5  ;;  %v1975_v9 = vld [vmem:[%s7380_s15 + $0x30] sm:$0xff]  ;;  %v5997_v48 = vld [vmem:[%s7274_s5 + $0xa8] sm:$0xf]  ;;  %v6450_v50 = vld [vmem:[%s7274_s5 + $0xac] sm:$0xf]  ;;  %s10085_s28 = sld [smem:[#allocation24_spill]] }
 0x280   : > { %v6451_v49 = vld [vmem:[%s7274_s5 + $0xb0] sm:$0xf0]  ;;  %v5999_v52 = vld [vmem:[%s7274_s5 + $0xb4] sm:$0xf0]  ;;  %v6005_v54 = vld [vmem:[%s7274_s5 + $0xb0] sm:$0xf] }
 0x281   : > { %v5998_v51 = vor.u32 %v6451_v49, %v5997_v48  ;;  %v6452_v55 = vld [vmem:[%s7274_s5 + $0xb8] sm:$0xf0]  ;;  %v7919_v57 = vor.u32 %v6450_v50, %v5999_v52  ;;  %v5985_v58 = vld [vmem:[%s7274_s5 + $0x90] sm:$0xf]  ;;  %v6447_v60 = vld [vmem:[%s7274_s5 + $0x94] sm:$0xf] }
 0x282   : > { %v6006_v12 = vor.u32 %v6452_v55, %v6005_v54  ;;  %v6448_v59 = vld [vmem:[%s7274_s5 + $0x98] sm:$0xf0]  ;;  %v5987_v62 = vld [vmem:[%s7274_s5 + $0x9c] sm:$0xf0]  ;;  %v5993_v63 = vld [vmem:[%s7274_s5 + $0x98] sm:$0xf] }
 0x283   : > { %v1976_v8 = vld [vmem:[%s7380_s15 + $0x38] sm:$0xff]  ;;  %2348 = vmatpush.bf16.msra.mxu0 %v5998_v51  ;;  %6541 = vmatpush.bf16.msra.mxu1 %v7919_v57  ;;  %v5986_v61 = vor.u32 %v6448_v59, %v5985_v58  ;;  %v6449_v1 = vld [vmem:[%s7274_s5 + $0xa0] sm:$0xf0]  ;;  %v7928_v56 = vor.u32 %v6447_v60, %v5987_v62  ;;  %v5927_v58 = vld [vmem:[%s7274_s5 + $0x24] sm:$0xf0]  ;;  %s10087_s18 = sld [smem:[#allocation13_spill]] }
 0x284   : > { %v6666_v2 = vpop.eup %6665  ;;  %2406 = vmatpush.bf16.msra.mxu2 %v6006_v12  ;;  %v5925_v51 = vld [vmem:[%s7274_s5 + $0x18] sm:$0xf]  ;;  %v6433_v52 = vld [vmem:[%s7274_s5 + $0x20] sm:$0xf0]  ;;  %v6432_v54 = vld [vmem:[%s7274_s5 + $0x1c] sm:$0xf] }
 0x285   : > { %v2004_v13 = vmul.f32 128.0, %v6666_v2  ;;  %vm2008_vm9 = vweird.f32 %v6666_v2  ;;  %v5926_v12 = vor.u32 %v6433_v52, %v5925_v51  ;;  %v5933_v59 = vld [vmem:[%s7274_s5 + $0x20] sm:$0xf]  ;;  %v6434_v62 = vld [vmem:[%s7274_s5 + $0x28] sm:$0xf0]  ;;  %s10086_s17 = scalar_lea.vmem %s10085_s28, %s10084_s0  ;;  %s7084_s13 = smov 64  }
 0x286   : > { %1997 = vadd.xlane.f32.xlu2 %v1974_v19  ;;  %1993 = vadd.xlane.f32.xlu1 %v1972_v36  ;;  %s7085_s16 = smov 32   ;;  %s10089_s24 = sld [smem:[#allocation26_spill]] }
 0x287   : > { %1989 = vadd.xlane.f32.xlu0 %v1970_v38  ;;  %v2005_v3 = vsub.f32 1.0, %v2004_v13  ;;  %2349 = vmatpush.bf16.msra.mxu0 %v5986_v61  ;;  %v5961_v13 = vld [vmem:[%s7274_s5 + $0x60] sm:$0xf]  ;;  %v7978_v61 = vor.u32 %v6432_v54, %v5927_v58  ;;  %s10092_s19 = sld [smem:[#allocation27_spill]]  ;;  %p6375_p5 = scmp.ne.s32.totalorder %s7061_s27, 1 }
 0x288   : > { %6542 = vmatpush.bf16.msra.mxu1 %v7928_v56  ;;  %s10096_s26 = sld [smem:[#allocation30_spill]] }
 0x289   : > { %v2006_v17 = vmul.f32 %v6666_v2, %v2005_v3  ;;  %v6442_v3 = vld [vmem:[%s7274_s5 + $0x68] sm:$0xf0] }
 0x28b   : > { %v2007_v18 = vadd.f32 %v6666_v2, %v2006_v17  ;;  %v6441_v17 = vld [vmem:[%s7274_s5 + $0x64] sm:$0xf] }
 0x28c   : > { %s10090_s4 = scalar_lea.vmem %s10089_s24, %s7307_s9 }
 0x28d   : > { %v7871_v20 = vsel %vm2008_vm9, %v6666_v2, %v2007_v18  ;;  %v5962_v18 = vor.u32 %v6442_v3, %v5961_v13  ;;  %s10093_s28 = scalar_lea.vmem %s10092_s19, %s7307_s9 }
 0x28e   : > { %2001 = vadd.xlane.f32.xlu1 %v1976_v8 }
 0x28f   : > { %1999 = vadd.xlane.f32.xlu0 %v1975_v9 }
 0x2f1   : > { %v1996_v21 = vpop.xlane.xlu2 %1995  ;;  %v1992_v31 = vpop.xlane.xlu1 %1991 }
 0x2f2   : > { %v2012_v22 = vmul.f32 %v7871_v20, %v1992_v31  ;;  %v1988_v6 = vpop.xlane.xlu0 %1987  ;;  %v2014_v10 = vmul.f32 %v7871_v20, %v1996_v21  ;;  %v5963_v21 = vld [vmem:[%s7274_s5 + $0x6c] sm:$0xf0]  ;;  %v5969_v31 = vld [vmem:[%s7274_s5 + $0x68] sm:$0xf] }
 0x2f3   : > { %v2010_v23 = vmul.f32 %v7871_v20, %v1988_v6  ;;  %v7946_v6 = vor.u32 %v6441_v17, %v5963_v21 }
 0x2f4   : > { %v7875_v24 = vsub.f32 %v1971_v4, %v2012_v22  ;;  %v7899_v40 = vsub.f32 %v1973_v14, %v2014_v10  ;;  %v5994_v14 = vor.u32 %v6449_v1, %v5993_v63  ;;  %v5973_v4 = vld [vmem:[%s7274_s5 + $0x78] sm:$0xf]  ;;  %v6443_v22 = vld [vmem:[%s7274_s5 + $0x70] sm:$0xf0]  ;;  %v5934_v63 = vor.u32 %v6434_v62, %v5933_v59  ;;  %v5913_v1 = vld [vmem:[%s7274_s5] sm:$0xf] }
 0x2f5   : > { %v7877_v7 = vsub.f32 %v1969_v5, %v2010_v23  ;;  %v6445_v5 = vld [vmem:[%s7274_s5 + $0x80] sm:$0xf0]  ;;  %v5970_v23 = vor.u32 %v6443_v22, %v5969_v31 }
 0x2f6   : > { %v2028_v25 = vmul.f32 %v7875_v24, %v7875_v24  ;;  %v2030_v53 = vmul.f32 %v7899_v40, %v7899_v40  ;;  %2407 = vmatpush.bf16.msra.mxu2 %v5994_v14  ;;  %v6430_v14 = vld [vmem:[%s7274_s5 + $0x8] sm:$0xf0] }
 0x2f7   : > { %v2026_v26 = vmul.f32 %v7877_v7, %v7877_v7 }
 0x2f8   : > { %2038 = vadd.xlane.f32.xlu1 %v2028_v25  ;;  %v5949_v25 = vld [vmem:[%s7274_s5 + $0x48] sm:$0xf] }
 0x2f9   : > { %2034 = vadd.xlane.f32.xlu2 %v2026_v26  ;;  %v1998_v27 = vpop.xlane.xlu2 %1997  ;;  %v1994_v28 = vpop.xlane.xlu1 %1993  ;;  %v6439_v26 = vld [vmem:[%s7274_s5 + $0x50] sm:$0xf0] }
 0x2fa   : > { %v2015_v29 = vmul.f32 %v7871_v20, %v1998_v27  ;;  %v2013_v30 = vmul.f32 %v7871_v20, %v1994_v28  ;;  %v1990_v32 = vpop.xlane.xlu0 %1989  ;;  %v6438_v27 = vld [vmem:[%s7274_s5 + $0x4c] sm:$0xf]  ;;  %v5950_v28 = vor.u32 %v6439_v26, %v5949_v25 }
 0x2fb   : > { %v2011_v42 = vmul.f32 %v7871_v20, %v1990_v32  ;;  %v6440_v32 = vld [vmem:[%s7274_s5 + $0x58] sm:$0xf0] }
 0x2fc   : > { %v7886_v33 = vsub.f32 %v1974_v19, %v2015_v29  ;;  %v7888_v34 = vsub.f32 %v1972_v36, %v2013_v30  ;;  %v6444_v19 = vld [vmem:[%s7274_s5 + $0x7c] sm:$0xf]  ;;  %v5974_v36 = vor.u32 %v6445_v5, %v5973_v4  ;;  %v5951_v29 = vld [vmem:[%s7274_s5 + $0x54] sm:$0xf0]  ;;  %v5957_v30 = vld [vmem:[%s7274_s5 + $0x50] sm:$0xf]  ;;  %v5914_v5 = vor.u32 %v6430_v14, %v5913_v1 }
 0x2fd   : > { %v7891_v35 = vsub.f32 %v1970_v38, %v2011_v42  ;;  %v5975_v38 = vld [vmem:[%s7274_s5 + $0x84] sm:$0xf0]  ;;  %v7955_v42 = vor.u32 %v6438_v27, %v5951_v29  ;;  %v5958_v10 = vor.u32 %v6440_v32, %v5957_v30  ;;  %v6429_v4 = vld [vmem:[%s7274_s5 + $0x4] sm:$0xf] }
 0x2fe   : > { %v2031_v11 = vmul.f32 %v7886_v33, %v7886_v33  ;;  %v2029_v37 = vmul.f32 %v7888_v34, %v7888_v34  ;;  %v7937_v0 = vor.u32 %v6444_v19, %v5975_v38  ;;  %2350 = vmatpush.bf16.msra.mxu0 %v5974_v36  ;;  %v5915_v19 = vld [vmem:[%s7274_s5 + $0xc] sm:$0xf0]  ;;  %v5921_v36 = vld [vmem:[%s7274_s5 + $0x8] sm:$0xf]  ;;  %v6431_v38 = vld [vmem:[%s7274_s5 + $0x10] sm:$0xf0] }
 0x2ff   : > { %v2027_v39 = vmul.f32 %v7891_v35, %v7891_v35 }
 0x300   : > { %2044 = vadd.xlane.f32.xlu1 %v2031_v11  ;;  %6543 = vmatpush.bf16.msra.mxu1 %v7937_v0  ;;  %v5937_v11 = vld [vmem:[%s7274_s5 + $0x30] sm:$0xf] }
 0x301   : > { %2040 = vadd.xlane.f32.xlu2 %v2029_v37  ;;  %2036 = vadd.xlane.f32.xlu0 %v2027_v39  ;;  %v2002_v43 = vpop.xlane.xlu1 %2001  ;;  %v6436_v37 = vld [vmem:[%s7274_s5 + $0x38] sm:$0xf0]  ;;  %v6435_v39 = vld [vmem:[%s7274_s5 + $0x34] sm:$0xf] }
 0x302   : > { %v2000_v41 = vpop.xlane.xlu0 %1999  ;;  %v2017_v15 = vmul.f32 %v7871_v20, %v2002_v43  ;;  %2351 = vmatpush.bf16.msra.mxu0 %v5962_v18  ;;  %v5939_v43 = vld [vmem:[%s7274_s5 + $0x3c] sm:$0xf0] }
 0x303   : > { %v2016_v44 = vmul.f32 %v7871_v20, %v2000_v41  ;;  %v5938_v41 = vor.u32 %v6436_v37, %v5937_v11 }
 0x304   : > { %v7909_v47 = vsub.f32 %v1976_v8, %v2017_v15  ;;  %v5981_v8 = vld [vmem:[%s7274_s5 + $0x80] sm:$0xf]  ;;  %6544 = vmatpush.bf16.msra.mxu1 %v7946_v6 }
 0x305   : > { %v7902_v45 = vsub.f32 %v1975_v9, %v2016_v44  ;;  %v6446_v9 = vld [vmem:[%s7274_s5 + $0x88] sm:$0xf0]  ;;  %v5945_v44 = vld [vmem:[%s7274_s5 + $0x38] sm:$0xf] }
 0x306   : > { %v2033_v16 = vmul.f32 %v7909_v47, %v7909_v47  ;;  %v5982_v2 = vor.u32 %v6446_v9, %v5981_v8  ;;  %2352 = vmatpush.bf16.msra.mxu0 %v5950_v28  ;;  %v7990_v9 = vor.u32 %v6429_v4, %v5915_v19 }
 0x307   : > { %v2032_v46 = vmul.f32 %v7902_v45, %v7902_v45 }
 0x308   : > { %2408 = vmatpush.bf16.msra.mxu2 %v5982_v2  ;;  %6545 = vmatpush.bf16.msra.mxu1 %v7955_v42  ;;  %v5922_v2 = vor.u32 %v6431_v38, %v5921_v36 }
 0x309   : > { %2042 = vadd.xlane.f32.xlu0 %v2030_v53  ;;  %2046 = vadd.xlane.f32.xlu2 %v2032_v46  ;;  %v6437_v53 = vld [vmem:[%s7274_s5 + $0x40] sm:$0xf0]  ;;  %v7964_v46 = vor.u32 %v6435_v39, %v5939_v43  ;;  %s10088_s5 = sld [smem:[#allocation15_spill]] }
 0x30a   : > { %2353 = vmatpush.bf16.msra.mxu0 %v5938_v41 }
 0x30c   : > { %2409 = vmatpush.bf16.msra.mxu2 %v5970_v23  ;;  %6546 = vmatpush.bf16.msra.mxu1 %v7964_v46 }
 0x30e   : > { %2354 = vmatpush.bf16.msra.mxu0 %v5926_v12 }
 0x310   : > { %2410 = vmatpush.bf16.msra.mxu2 %v5958_v10  ;;  %6547 = vmatpush.bf16.msra.mxu1 %v7978_v61 }
 0x311   : > { %2048 = vadd.xlane.f32.xlu0 %v2033_v16  ;;  %v5946_v16 = vor.u32 %v6437_v53, %v5945_v44 }
 0x312   : > { %2355 = vmatpush.bf16.msra.mxu0 %v5914_v5 }
 0x314   : > { %2411 = vmatpush.bf16.msra.mxu2 %v5946_v16  ;;  %6548 = vmatpush.bf16.msra.mxu1 %v7990_v9 }
 0x316   : > { %2377 = vmatpush.bf16.msrb.mxu0 %v7919_v57 }
 0x318   : > { %2412 = vmatpush.bf16.msra.mxu2 %v5934_v63 }
 0x31a   : > { %2378 = vmatpush.bf16.msrb.mxu0 %v7928_v56 }
 0x31c   : > { %2413 = vmatpush.bf16.msra.mxu2 %v5922_v2 }
 0x31e   : > { %2379 = vmatpush.bf16.msrb.mxu0 %v7937_v0 }
 0x322   : > { %2380 = vmatpush.bf16.msrb.mxu0 %v7946_v6 }
 0x326   : > { %2381 = vmatpush.bf16.msrb.mxu0 %v7955_v42  ;;  %v8048_v42 = vld [vmem:[%s10082_s3] ss:$0 sm:$0xff]  ;;  %s10097_s3 = scalar_lea.vmem %s10096_s26, %s7352_s20 }
 0x32a   : > { %2382 = vmatpush.bf16.msrb.mxu0 %v7964_v46  ;;  %v8063_v46 = vld [vmem:[%s10083_s12] ss:$0 sm:$0xff]  ;;  %s10091_s12 = sld [smem:[#allocation16_spill]] }
 0x32e   : > { %2383 = vmatpush.bf16.msrb.mxu0 %v7978_v61 }
 0x332   : > { %2384 = vmatpush.bf16.msrb.mxu0 %v7990_v9 }
 0x36b   : > { %v2039_v15 = vpop.xlane.xlu1 %2038 }
 0x36c   : > { %v2052_v48 = vmul.f32 %v2039_v15, %v7871_v20  ;;  %v2035_v49 = vpop.xlane.xlu2 %2034 }
 0x36d   : > { %v2050_v50 = vmul.f32 %v2035_v49, %v7871_v20 }
 0x36e   : > { %v7972_v55 = vadd.f32 1e-05, %v2052_v48 }
 0x36f   : > { %v7976_v60 = vadd.f32 1e-05, %v2050_v50 }
 0x370   : > { %6667 = vrsqrt.f32 %v7972_v55  ;;  %vm2092_vm12 = vweird.f32 %v7972_v55 }
 0x371   : > { %6669 = vrsqrt.f32 %v7976_v60  ;;  %vm2072_vm14 = vweird.f32 %v7976_v60 }
 0x373   : > { %v2045_v8 = vpop.xlane.xlu1 %2044 }
 0x374   : > { %v2055_v13 = vmul.f32 %v2045_v8, %v7871_v20  ;;  %v2041_v3 = vpop.xlane.xlu2 %2040  ;;  %v2037_v17 = vpop.xlane.xlu0 %2036 }
 0x375   : > { %v2053_v18 = vmul.f32 %v2041_v3, %v7871_v20  ;;  %v2051_v21 = vmul.f32 %v2037_v17, %v7871_v20 }
 0x376   : > { %v6668_v31 = vpop.eup %6667  ;;  %v7997_v22 = vadd.f32 1e-05, %v2055_v13 }
 0x377   : > { %v6670_v23 = vpop.eup %6669  ;;  %v2087_v25 = vmul.f32 %v6668_v31, %v7972_v55  ;;  %v2061_v26 = vadd.f32 1e-05, %v2053_v18  ;;  %v8000_v27 = vadd.f32 1e-05, %v2051_v21  ;;  %vm2093_vm10 = vweird.f32 %v6668_v31 }
 0x378   : > { %v2067_v28 = vmul.f32 %v6670_v23, %v7976_v60  ;;  %6671 = vrsqrt.f32 %v7997_v22  ;;  %vm2073_vm11 = vweird.f32 %v6670_v23  ;;  %vm8018_vm13 = vmor %vm2092_vm12, %vm2093_vm10  ;;  %vm2122_vm6 = vweird.f32 %v7997_v22 }
 0x379   : > { %v2088_v29 = vmul.f32 %v6668_v31, %v2087_v25  ;;  %6673 = vrsqrt.f32 %v2061_v26  ;;  %vm8027_vm15 = vmor %vm2072_vm14, %vm2073_vm11  ;;  %vm2102_vm0 = vweird.f32 %v2061_v26  ;;  %vm2082_vm2 = vweird.f32 %v8000_v27 }
 0x37a   : > { %v2068_v30 = vmul.f32 %v6670_v23, %v2067_v28  ;;  %6675 = vrsqrt.f32 %v8000_v27 }
 0x37b   : > { %v2089_v57 = vmul.f32 0.5, %v2088_v29 }
 0x37c   : > { %v2069_v32 = vmul.f32 0.5, %v2068_v30  ;;  %v2047_v10 = vpop.xlane.xlu2 %2046  ;;  %v2043_v11 = vpop.xlane.xlu0 %2042 }
 0x37d   : > { %v2090_v37 = vsub.f32 1.5, %v2089_v57  ;;  %v2054_v39 = vmul.f32 %v2043_v11, %v7871_v20  ;;  %v2056_v53 = vmul.f32 %v2047_v10, %v7871_v20 }
 0x37e   : > { %v8008_v41 = vpop.eup %6671  ;;  %v2070_v43 = vsub.f32 1.5, %v2069_v32 }
 0x37f   : > { %v6674_v44 = vpop.eup %6673  ;;  %v2091_v15 = vmul.f32 %v6668_v31, %v2090_v37  ;;  %v2117_v16 = vmul.f32 %v8008_v41, %v7997_v22  ;;  %v8013_v49 = vadd.f32 1e-05, %v2054_v39  ;;  %v8023_v12 = vadd.f32 1e-05, %v2056_v53 }
 0x380   : > { %v6676_v56 = vpop.eup %6675  ;;  %v2097_v48 = vmul.f32 %v6674_v44, %v2061_v26  ;;  %v2071_v50 = vmul.f32 %v6670_v23, %v2070_v43  ;;  %vm2103_vm1 = vweird.f32 %v6674_v44  ;;  %vm2123_vm7 = vweird.f32 %v8008_v41 }
 0x381   : > { %v2077_v51 = vmul.f32 %v6676_v56, %v8000_v27  ;;  %v2095_v58 = vsel %vm8018_vm13, %v6668_v31, %v2091_v15  ;;  %v2118_v6 = vmul.f32 %v8008_v41, %v2117_v16  ;;  %6677 = vrsqrt.f32 %v8013_v49  ;;  %vm2104_vm4 = vmor %vm2102_vm0, %vm2103_vm1 }
 0x382   : > { %v2098_v0 = vmul.f32 %v6674_v44, %v2097_v48  ;;  %v2075_v63 = vsel %vm8027_vm15, %v6670_v23, %v2071_v50  ;;  %v2148_v4 = vmul.f32 %v2095_v58, %v7875_v24  ;;  %vm2083_vm3 = vweird.f32 %v6676_v56  ;;  %vm2124_vm9 = vmor %vm2122_vm6, %vm2123_vm7 }
 0x383   : > { %v2078_v54 = vmul.f32 %v6676_v56, %v2077_v51  ;;  %v2146_v36 = vmul.f32 %v2075_v63, %v7877_v7  ;;  %v2119_v38 = vmul.f32 0.5, %v2118_v6  ;;  %6679 = vrsqrt.f32 %v8023_v12  ;;  %vm2084_vm5 = vmor %vm2082_vm2, %vm2083_vm3 }
 0x384   : > { %v2099_v55 = vmul.f32 0.5, %v2098_v0  ;;  %v2049_v62 = vpop.xlane.xlu0 %2048  ;;  %v2159_v23 = vmul.f32 %v8048_v42, %v2148_v4  ;;  %vm2112_vm10 = vweird.f32 %v8013_v49  ;;  %vm2132_vm14 = vweird.f32 %v8023_v12 }
 0x385   : > { %v2079_v60 = vmul.f32 0.5, %v2078_v54  ;;  %v2057_v1 = vmul.f32 %v2049_v62, %v7871_v20  ;;  %v2120_v18 = vsub.f32 1.5, %v2119_v38  ;;  %v2157_v31 = vmul.f32 %v8048_v42, %v2146_v36 }
 0x386   : > { %v2100_v14 = vsub.f32 1.5, %v2099_v55  ;;  %v2170_v10 = vadd.f32 %v8063_v46, %v2159_v23  ;;  %vm2472_vm2 = vcmask 261120   ;;  %vm2526_vm3 = vcmask 523264  }
 0x387   : > { %v2080_v5 = vsub.f32 1.5, %v2079_v60  ;;  %v8039_v19 = vadd.f32 1e-05, %v2057_v1  ;;  %v6678_v24 = vpop.eup %6677  ;;  %v2121_v30 = vmul.f32 %v8008_v41, %v2120_v18  ;;  %v2168_v57 = vadd.f32 %v8063_v46, %v2157_v31 }
 0x388   : > { %v2101_v8 = vmul.f32 %v6674_v44, %v2100_v14  ;;  %v2107_v17 = vmul.f32 %v6678_v24, %v8013_v49  ;;  %vm2113_vm8 = vweird.f32 %v6678_v24 }
 0x389   : > { %v2081_v2 = vmul.f32 %v6676_v56, %v2080_v5  ;;  %6681 = vrsqrt.f32 %v8039_v19  ;;  %vm2114_vm11 = vmor %vm2112_vm10, %vm2113_vm8  ;;  %v2125_v53 = vsel %vm2124_vm9, %v8008_v41, %v2121_v30  ;;  %vm2142_vm12 = vweird.f32 %v8039_v19 }
 0x38a   : > { %v2105_v13 = vsel %vm2104_vm4, %v6674_v44, %v2101_v8  ;;  %v2108_v25 = vmul.f32 %v6678_v24, %v2107_v17  ;;  %v2151_v9 = vmul.f32 %v2125_v53, %v7886_v33 }
 0x38b   : > { %v2149_v7 = vmul.f32 %v2105_v13, %v7888_v34  ;;  %v2085_v3 = vsel %vm2084_vm5, %v6676_v56, %v2081_v2  ;;  %v6680_v34 = vpop.eup %6679 }
 0x38c   : > { %v2147_v21 = vmul.f32 %v2085_v3, %v7891_v35  ;;  %v2109_v35 = vmul.f32 0.5, %v2108_v25  ;;  %v2127_v61 = vmul.f32 %v6680_v34, %v8023_v12  ;;  %v2162_v49 = vmul.f32 %v8048_v42, %v2151_v9 }
 0x38d   : > { %v2160_v26 = vmul.f32 %v8048_v42, %v2149_v7  ;;  %vm2133_vm15 = vweird.f32 %v6680_v34 }
 0x38e   : > { %v2158_v27 = vmul.f32 %v8048_v42, %v2147_v21  ;;  %v2110_v11 = vsub.f32 1.5, %v2109_v35  ;;  %v2128_v56 = vmul.f32 %v6680_v34, %v2127_v61  ;;  %vm2134_vm1 = vmor %vm2132_vm14, %vm2133_vm15 }
 0x38f   : > { %v2171_v28 = vadd.f32 %v8063_v46, %v2160_v26  ;;  %v6682_v29 = vpop.eup %6681 }
 0x390   : > { %v2169_v32 = vadd.f32 %v8063_v46, %v2158_v27  ;;  %v2137_v22 = vmul.f32 %v6682_v29, %v8039_v19  ;;  %v2111_v43 = vmul.f32 %v6678_v24, %v2110_v11  ;;  %v2129_v50 = vmul.f32 0.5, %v2128_v56 }
 0x391   : > { %v2177_v39 = vpack.c.bf16 %v2171_v28, %v2170_v10  ;;  %vm2143_vm13 = vweird.f32 %v6682_v29 }
 0x392   : > { %v2176_v37 = vpack.c.bf16 %v2169_v32, %v2168_v57  ;;  %v2138_v44 = vmul.f32 %v6682_v29, %v2137_v22  ;;  %v2115_v15 = vsel %vm2114_vm11, %v6678_v24, %v2111_v43  ;;  %v2130_v52 = vsub.f32 1.5, %v2129_v50  ;;  %vm2144_vm0 = vmor %vm2142_vm12, %vm2143_vm13 }
 0x393   : > { %2390 = vmatmul.bf16.vlgmr.msra.gmra.mxu1 %v2177_v39  ;;  %v2150_v16 = vmul.f32 %v2115_v15, %v7899_v40  ;;  %v2173_v40 = vadd.f32 %v8063_v46, %v2162_v49 }
 0x394   : > { %2356 = vmatmul.bf16.vlgmr.msra.gmra.mxu0 %v2176_v37  ;;  %2414 = vmatmul.bf16.vlgmr.msra.gmra.mxu2 %v2176_v37  ;;  %v2139_v48 = vmul.f32 0.5, %v2138_v44  ;;  %v2131_v33 = vmul.f32 %v6680_v34, %v2130_v52 }
 0x395   : > { %v2161_v51 = vmul.f32 %v8048_v42, %v2150_v16 }
 0x396   : > { %v2140_v0 = vsub.f32 1.5, %v2139_v48  ;;  %v2135_v6 = vsel %vm2134_vm1, %v6680_v34, %v2131_v33 }
 0x397   : > { %v2172_v41 = vadd.f32 %v8063_v46, %v2161_v51  ;;  %v2152_v62 = vmul.f32 %v2135_v6, %v7902_v45  ;;  %v8100_v45 = vld [vmem:[%s10086_s17] sm:$0x7] }
 0x398   : > { %v2141_v54 = vmul.f32 %v6682_v29, %v2140_v0  ;;  %v2214_v3 = vperm.slane %v8100_v45, 0 }
 0x399   : > { %v2178_v58 = vpack.c.bf16 %v2173_v40, %v2172_v41  ;;  %v2163_v63 = vmul.f32 %v8048_v42, %v2152_v62 }
 0x39a   : > { %v2145_v59 = vsel %vm2144_vm0, %v6682_v29, %v2141_v54 }
 0x39b   : > { %v2153_v55 = vmul.f32 %v2145_v59, %v7909_v47  ;;  %v2174_v1 = vadd.f32 %v8063_v46, %v2163_v63  ;;  %v8103_v47 = vperm.slane %v8100_v45, 1 }
 0x39d   : > { %v2164_v12 = vmul.f32 %v8048_v42, %v2153_v55  ;;  %v2216_v55 = vperm.slane %v8100_v45, 2 }
 0x39f   : > { %v2175_v60 = vadd.f32 %v8063_v46, %v2164_v12 }
 0x3a1   : > { %v2179_v14 = vpack.c.bf16 %v2175_v60, %v2174_v1 }
 0x3a3   : > { %2395 = vmatmul.bf16.gmra.mxu1 %v2178_v58 }
 0x3a4   : > { %2361 = vmatmul.bf16.gmra.mxu0 %v2177_v39  ;;  %2419 = vmatmul.bf16.gmra.mxu2 %v2177_v39 }
 0x3b3   : > { %2400 = vmatmul.bf16.gmra.mxu1 %v2179_v14 }
 0x3b4   : > { %2366 = vmatmul.bf16.gmra.mxu0 %v2178_v58  ;;  %2424 = vmatmul.bf16.gmra.mxu2 %v2178_v58 }
 0x3c4   : > { %2371 = vmatmul.bf16.gmra.mxu0 %v2179_v14  ;;  %2429 = vmatmul.bf16.gmra.mxu2 %v2179_v14 }
 0x3d4   : > { %2385 = vmatmul.bf16.vlgmr.msrb.gmra.mxu0 %v2176_v37 }
 0x410   : > { %v2391_v5 = vpop.f32.mrf.mxu1 }
 0x411   : > { %v2357_v4 = vpop.f32.mrf.mxu0  ;;  %v2392_v8 = vadd.f32 %v2391_v5, %v8103_v47 }
 0x412   : > { %v2358_v56 = vadd.f32 %v2357_v4, %v2214_v3 }
 0x414   : > { %v2435_v51 = vmul.f32 0.17677669, %v2358_v56 }
 0x417   : > { %v8105_v19 = vpop.f32.mrf.mxu2 }
 0x418   : > { %v2393_v38 = vpop.f32.mrf.mxu1 }
 0x419   : > { %v2359_v36 = vpop.f32.mrf.mxu0  ;;  %v2394_v42 = vadd.f32 %v2393_v38, %v8103_v47 }
 0x41a   : > { %v2360_v39 = vadd.f32 %v2359_v36, %v2214_v3 }
 0x41b   : > { %v8109_v2 = vpack.c.bf16 %v2394_v42, %v2392_v8 }
 0x41c   : > { %v2436_v48 = vmul.f32 0.17677669, %v2360_v39  ;;  %v8197_v39 = vld [vmem:[%s10087_s18 + $0x10] sm:$0xff] }
 0x41d   : > { %2746 = vrot.lane.b32.xlu0 %v8109_v2, %s7083_s29  ;;  %v2489_v6 = vsel %vm2472_vm2, %v8109_v2, 0 }
 0x41e   : > { %v8136_v0 = vpack.c.bf16 %v2436_v48, %v2435_v51  ;;  %v8207_v51 = vld [vmem:[%s10087_s18 + $0x20] sm:$0xff] }
 0x41f   : > { %v8113_v24 = vpop.f32.mrf.mxu2 }
 0x420   : > { %v2396_v7 = vpop.f32.mrf.mxu1 }
 0x421   : > { %v2362_v13 = vpop.f32.mrf.mxu0  ;;  %v2397_v46 = vadd.f32 %v2396_v7, %v8103_v47 }
 0x422   : > { %v2363_v17 = vadd.f32 %v2362_v13, %v2214_v3  ;;  %v2418_v13 = vadd.f32 %v8113_v24, %v2216_v55 }
 0x424   : > { %v2437_v26 = vmul.f32 0.17677669, %v2363_v17  ;;  %v2416_v17 = vadd.f32 %v8105_v19, %v2216_v55 }
 0x427   : > { %v2420_v18 = vpop.f32.mrf.mxu2 }
 0x428   : > { %v2398_v31 = vpop.f32.mrf.mxu1  ;;  %v2421_v38 = vadd.f32 %v2420_v18, %v2216_v55 }
 0x429   : > { %v2364_v21 = vpop.f32.mrf.mxu0  ;;  %v2399_v25 = vadd.f32 %v2398_v31, %v8103_v47 }
 0x42a   : > { %v2365_v23 = vadd.f32 %v2364_v21, %v2214_v3  ;;  %v8168_v21 = vpack.c.bf16 %v2418_v13, %v2416_v17 }
 0x42b   : > { %v8118_v27 = vpack.c.bf16 %v2399_v25, %v2397_v46 }
 0x42c   : > { %v2438_v34 = vmul.f32 0.17677669, %v2365_v23 }
 0x42d   : > { %2748 = vrot.lane.b32.xlu2 %v8118_v27, %s7083_s29  ;;  %v2492_v49 = vsel %vm2472_vm2, %v8118_v27, 0 }
 0x42e   : > { %v8120_v35 = vpack.c.bf16 %v2438_v34, %v2437_v26 }
 0x42f   : > { %v2422_v28 = vpop.f32.mrf.mxu2 }
 0x430   : > { %2734 = vrot.lane.b32.xlu0 %v8120_v35, %s7083_s29  ;;  %v2401_v30 = vpop.f32.mrf.mxu1  ;;  %v2423_v5 = vadd.f32 %v2422_v28, %v2216_v55 }
 0x431   : > { %v2367_v29 = vpop.f32.mrf.mxu0  ;;  %v2402_v11 = vadd.f32 %v2401_v30, %v8103_v47  ;;  %v8187_v30 = vld [vmem:[%s10087_s18] sm:$0xff] }
 0x432   : > { %v2368_v57 = vadd.f32 %v2367_v29, %v2214_v3  ;;  %v8158_v7 = vpack.c.bf16 %v2423_v5, %v2421_v38 }
 0x434   : > { %v2439_v43 = vmul.f32 0.17677669, %v2368_v57 }
 0x437   : > { %v2425_v32 = vpop.f32.mrf.mxu2 }
 0x438   : > { %v2403_v61 = vpop.f32.mrf.mxu1  ;;  %v2426_v4 = vadd.f32 %v2425_v32, %v2216_v55 }
 0x439   : > { %v2369_v10 = vpop.f32.mrf.mxu0  ;;  %v2404_v37 = vadd.f32 %v2403_v61, %v8103_v47  ;;  %v8192_v61 = vld [vmem:[%s10087_s18 + $0x8] sm:$0xff] }
 0x43a   : > { %v2370_v22 = vadd.f32 %v2369_v10, %v2214_v3 }
 0x43b   : > { %v8128_v53 = vpack.c.bf16 %v2404_v37, %v2402_v11 }
 0x43c   : > { %v2440_v44 = vmul.f32 0.17677669, %v2370_v22 }
 0x43d   : > { %2750 = vrot.lane.b32.xlu1 %v8128_v53, %s7083_s29  ;;  %v2495_v16 = vsel %vm2472_vm2, %v8128_v53, 0 }
 0x43e   : > { %v8130_v15 = vpack.c.bf16 %v2440_v44, %v2439_v43  ;;  %2501 = vmatpush.bf16.xpose.msra.mxu3 %v2495_v16  ;;  %v8202_v16 = vld [vmem:[%s10087_s18 + $0x18] sm:$0xff] }
 0x43f   : > { %v2427_v9 = vpop.f32.mrf.mxu2 }
 0x440   : > { %v2428_v1 = vadd.f32 %v2427_v9, %v2216_v55 }
 0x441   : > { %v2372_v50 = vpop.f32.mrf.mxu0 }
 0x442   : > { %v2373_v52 = vadd.f32 %v2372_v50, %v2214_v3  ;;  %v8152_v36 = vpack.c.bf16 %v2428_v1, %v2426_v4 }
 0x444   : > { %v2441_v33 = vmul.f32 0.17677669, %v2373_v52 }
 0x445   : > { %2732 = vrot.lane.b32.xlu1 %v8136_v0, %s7083_s29 }
 0x446   : > { %2502 = vmatpush.bf16.xpose.msra.mxu3 %v2492_v49 }
 0x447   : > { %v2430_v41 = vpop.f32.mrf.mxu2 }
 0x448   : > { %v2431_v12 = vadd.f32 %v2430_v41, %v2216_v55 }
 0x449   : > { %v2374_v54 = vpop.f32.mrf.mxu0 }
 0x44a   : > { %v2375_v40 = vadd.f32 %v2374_v54, %v2214_v3  ;;  %v8212_v54 = vld [vmem:[%s10087_s18 + $0x28] sm:$0xff] }
 0x44c   : > { %v2442_v58 = vmul.f32 0.17677669, %v2375_v40 }
 0x44e   : > { %v8142_v59 = vpack.c.bf16 %v2442_v58, %v2441_v33  ;;  %2503 = vmatpush.bf16.xpose.msra.mxu3 %v2489_v6  ;;  %v8220_v6 = vld [vmem:[%s10087_s18 + $0x30] sm:$0xff] }
 0x44f   : > { %v2432_v62 = vpop.f32.mrf.mxu2 }
 0x450   : > { %2738 = vrot.lane.b32.xlu1 %v8142_v59, %s7083_s29  ;;  %v2433_v63 = vadd.f32 %v2432_v62, %v2216_v55 }
 0x451   : > { %v2386_v60 = vpop.f32.mrf.mxu0 }
 0x452   : > { %v8149_v14 = vpack.c.bf16 %v2433_v63, %v2431_v12  ;;  %v2387_v8 = vadd.f32 %v2386_v60, %v8103_v47  ;;  %v8228_v63 = vld [vmem:[%s10087_s18 + $0x38] sm:$0xff]  ;;  %s10094_s18 = sld [smem:[#allocation28_spill]] }
 0x454   : > { %2635 = vmatpush.bf16.msra.mxu0 %v8149_v14 }
 0x458   : > { %2636 = vmatpush.bf16.msra.mxu0 %v8152_v36 }
 0x459   : > { %v2388_v45 = vpop.f32.mrf.mxu0 }
 0x45a   : > { %v2389_v42 = vadd.f32 %v2388_v45, %v8103_v47 }
 0x45c   : > { %v8160_v3 = vpack.c.bf16 %v2389_v42, %v2387_v8  ;;  %2637 = vmatpush.bf16.msra.mxu0 %v8158_v7 }
 0x45e   : > { %2744 = vrot.lane.b32.xlu2 %v8160_v3, %s7083_s29  ;;  %v2486_v18 = vsel %vm2472_vm2, %v8160_v3, 0 }
 0x45f   : > { %2504 = vmatpush.bf16.xpose.msra.mxu3 %v2486_v18 }
 0x460   : > { %2638 = vmatpush.bf16.msra.mxu0 %v8168_v21 }
 0x466   : > { %6007 = vmatmul.msk.bf16.vlgmr.msra.gmra.mxu3 %vm2472_vm2, %v8136_v0 }
 0x476   : > { %6008 = vmatmul.msk.bf16.gmra.mxu3 %vm2472_vm2, %v8120_v35 }
 0x486   : > { %6009 = vmatmul.msk.bf16.gmra.mxu3 %vm2472_vm2, %v8130_v15 }
 0x487   : > { %v2749_v24 = vpop.permute.xlu2 %2748 }
 0x488   : > { %v2771_v31 = vsel %vm2472_vm2, %v2749_v24, 0 }
 0x48f   : > { %v2747_v46 = vpop.permute.xlu0 %2746 }
 0x490   : > { %v2768_v23 = vsel %vm2472_vm2, %v2747_v46, 0 }
 0x496   : > { %6010 = vmatmul.msk.bf16.gmra.mxu3 %vm2472_vm2, %v8142_v59 }
 0x4a2   : > { %v2735_v29 = vpop.permute.xlu0 %2734 }
 0x4af   : > { %v2751_v47 = vpop.permute.xlu1 %2750 }
 0x4b0   : > { %v2774_v19 = vsel %vm2472_vm2, %v2751_v47, 0 }
 0x4b1   : > { %2780 = vmatpush.bf16.xpose.msrb.mxu2 %v2774_v19  ;;  %6549 = vmatpush.bf16.xpose.msrb.mxu3 %v2774_v19 }
 0x4b7   : > { %v2733_v26 = vpop.permute.xlu1 %2732 }
 0x4b8   : > { %v2745_v25 = vpop.permute.xlu2 %2744 }
 0x4b9   : > { %2781 = vmatpush.bf16.xpose.msrb.mxu2 %v2771_v31  ;;  %6550 = vmatpush.bf16.xpose.msrb.mxu3 %v2771_v31  ;;  %v2765_v34 = vsel %vm2472_vm2, %v2745_v25, 0 }
 0x4c1   : > { %2782 = vmatpush.bf16.xpose.msrb.mxu2 %v2768_v23  ;;  %6551 = vmatpush.bf16.xpose.msrb.mxu3 %v2768_v23 }
 0x4c2   : > { %v2739_v28 = vpop.permute.xlu1 %2738 }
 0x4c9   : > { %2783 = vmatpush.bf16.xpose.msrb.mxu2 %v2765_v34  ;;  %6552 = vmatpush.bf16.xpose.msrb.mxu3 %v2765_v34 }
 0x4d0   : > { %6027 = vmatmul.msk.bf16.vlgmr.msrb.gmra.mxu2 %vm2472_vm2, %v2733_v26  ;;  %6030 = vmatmul.msk.bf16.vlgmr.msrb.gmra.mxu3 %vm2472_vm2, %v2739_v28 }
 0x4e0   : > { %6028 = vmatmul.msk.bf16.gmra.mxu2 %vm2472_vm2, %v2735_v29 }
 0x4e9   : > { %v2506_v57 = vpop.f32.mrf.mxu3 }
 0x4ea   : > { %v2507_v32 = vadd.f32 %v2506_v57, %v8187_v30 }
 0x4ec   : > { %v2527_v10 = vsel %vm2526_vm3, %v2507_v32, -inf }
 0x4ed   : > { %2528 = vmax.xlane.f32.xlu2 %v2527_v10 }
 0x4f1   : > { %v2508_v11 = vpop.f32.mrf.mxu3 }
 0x4f2   : > { %v2509_v22 = vadd.f32 %v2508_v11, %v8192_v61 }
 0x4f4   : > { %v2530_v37 = vsel %vm2526_vm3, %v2509_v22, -inf }
 0x4f5   : > { %2531 = vmax.xlane.f32.xlu1 %v2530_v37 }
 0x4f9   : > { %v2511_v43 = vpop.f32.mrf.mxu3 }
 0x4fa   : > { %v2512_v44 = vadd.f32 %v2511_v43, %v8197_v39 }
 0x4fc   : > { %v2533_v56 = vsel %vm2526_vm3, %v2512_v44, -inf }
 0x4fd   : > { %2534 = vmax.xlane.f32.xlu0 %v2533_v56 }
 0x501   : > { %v2513_v48 = vpop.f32.mrf.mxu3 }
 0x502   : > { %v2514_v9 = vadd.f32 %v2513_v48, %v8202_v16 }
 0x504   : > { %v2536_v50 = vsel %vm2526_vm3, %v2514_v9, -inf }
 0x505   : > { %2537 = vmax.xlane.f32.xlu2 %v2536_v50 }
 0x509   : > { %v2516_v49 = vpop.f32.mrf.mxu3 }
 0x50a   : > { %v2517_v52 = vadd.f32 %v2516_v49, %v8207_v51 }
 0x50c   : > { %v2539_v41 = vsel %vm2526_vm3, %v2517_v52, -inf }
 0x50d   : > { %2540 = vmax.xlane.f32.xlu1 %v2539_v41 }
 0x511   : > { %v2518_v40 = vpop.f32.mrf.mxu3 }
 0x512   : > { %v8215_v33 = vadd.f32 %v2518_v40, %v8212_v54 }
 0x514   : > { %v2542_v58 = vsel %vm2526_vm3, %v8215_v33, -inf }
 0x515   : > { %2543 = vmax.xlane.f32.xlu0 %v2542_v58 }
 0x519   : > { %v2521_v55 = vpop.f32.mrf.mxu3 }
 0x51a   : > { %v8223_v62 = vadd.f32 %v2521_v55, %v8220_v6 }
 0x51c   : > { %v2545_v12 = vsel %vm2526_vm3, %v8223_v62, -inf }
 0x51d   : > { %2546 = vmax.xlane.f32.xlu0 %v2545_v12 }
 0x521   : > { %v2523_v60 = vpop.f32.mrf.mxu3 }
 0x522   : > { %v8231_v1 = vadd.f32 %v2523_v60, %v8228_v63 }
 0x524   : > { %v2548_v4 = vsel %vm2526_vm3, %v8231_v1, -inf }
 0x525   : > { %2549 = vmax.xlane.f32.xlu2 %v2548_v4 }
 0x553   : > { %v2785_v5 = vpop.f32.mrf.mxu2 }
 0x554   : > { %v8236_v38 = vadd.f32 %v2785_v5, %v8187_v30 }
 0x556   : > { %v2805_v45 = vsel %vm2526_vm3, %v8236_v38, -inf }
 0x557   : > { %2806 = vmax.xlane.f32.xlu2 %v2805_v45 }
 0x55b   : > { %v2787_v8 = vpop.f32.mrf.mxu2 }
 0x55c   : > { %v8241_v42 = vadd.f32 %v2787_v8, %v8192_v61 }
 0x55e   : > { %v2808_v13 = vsel %vm2526_vm3, %v8241_v42, -inf }
 0x55f   : > { %2809 = vmax.xlane.f32.xlu1 %v2808_v13 }
 0x560   : > { %v2529_v17 = vpop.xlane.xlu2 %2528 }
 0x561   : > { %v2551_v18 = vsub.f32 %v2507_v32, %v2529_v17 }
 0x563   : > { %v2559_v47 = vmul.f32 1.442695, %v2551_v18  ;;  %v2790_v19 = vpop.f32.mrf.mxu2 }
 0x564   : > { %v8246_v24 = vadd.f32 %v2790_v19, %v8197_v39 }
 0x565   : > { %6683 = vpow2.f32 %v2559_v47 }
 0x566   : > { %v2811_v31 = vsel %vm2526_vm3, %v8246_v24, -inf }
 0x567   : > { %2812 = vmax.xlane.f32.xlu1 %v2811_v31 }
 0x568   : > { %v2532_v46 = vpop.xlane.xlu1 %2531 }
 0x569   : > { %v2552_v23 = vsub.f32 %v2509_v22, %v2532_v46 }
 0x56b   : > { %v8250_v25 = vpop.eup %6683  ;;  %v2561_v26 = vmul.f32 1.442695, %v2552_v23  ;;  %v2792_v34 = vpop.f32.mrf.mxu2 }
 0x56c   : > { %v2575_v28 = vsel %vm2526_vm3, %v8250_v25, 0.0  ;;  %v8255_v29 = vadd.f32 %v2792_v34, %v8202_v16 }
 0x56d   : > { %6685 = vpow2.f32 %v2561_v26  ;;  %2576 = vadd.xlane.f32.xlu2 %v2575_v28 }
 0x56e   : > { %v2814_v57 = vsel %vm2526_vm3, %v8255_v29, -inf }
 0x56f   : > { %2815 = vmax.xlane.f32.xlu0 %v2814_v57 }
 0x570   : > { %v2535_v32 = vpop.xlane.xlu0 %2534 }
 0x571   : > { %v2553_v10 = vsub.f32 %v2512_v44, %v2535_v32 }
 0x573   : > { %v8259_v11 = vpop.eup %6685  ;;  %v2563_v22 = vmul.f32 1.442695, %v2553_v10 }
 0x574   : > { %v2578_v37 = vsel %vm2526_vm3, %v8259_v11, 0.0 }
 0x575   : > { %6687 = vpow2.f32 %v2563_v22  ;;  %2579 = vadd.xlane.f32.xlu1 %v2578_v37 }
 0x578   : > { %v2538_v43 = vpop.xlane.xlu2 %2537 }
 0x579   : > { %v2554_v56 = vsub.f32 %v2514_v9, %v2538_v43 }
 0x57b   : > { %v8263_v48 = vpop.eup %6687  ;;  %v2565_v50 = vmul.f32 1.442695, %v2554_v56 }
 0x57c   : > { %v2581_v49 = vsel %vm2526_vm3, %v8263_v48, 0.0 }
 0x57d   : > { %6689 = vpow2.f32 %v2565_v50  ;;  %2582 = vadd.xlane.f32.xlu0 %v2581_v49 }
 0x580   : > { %v2541_v41 = vpop.xlane.xlu1 %2540 }
 0x581   : > { %v2555_v44 = vsub.f32 %v2517_v52, %v2541_v41 }
 0x583   : > { %v8267_v40 = vpop.eup %6689  ;;  %v2567_v58 = vmul.f32 1.442695, %v2555_v44 }
 0x584   : > { %v2584_v55 = vsel %vm2526_vm3, %v8267_v40, 0.0 }
 0x585   : > { %6691 = vpow2.f32 %v2567_v58  ;;  %2585 = vadd.xlane.f32.xlu2 %v2584_v55 }
 0x588   : > { %v2544_v12 = vpop.xlane.xlu0 %2543 }
 0x589   : > { %v2556_v9 = vsub.f32 %v8215_v33, %v2544_v12 }
 0x58b   : > { %v8272_v60 = vpop.eup %6691  ;;  %v2569_v4 = vmul.f32 1.442695, %v2556_v9 }
 0x58c   : > { %v2587_v5 = vsel %vm2526_vm3, %v8272_v60, 0.0 }
 0x58d   : > { %6693 = vpow2.f32 %v2569_v4  ;;  %2588 = vadd.xlane.f32.xlu2 %v2587_v5 }
 0x58e   : > { %2905 = vrot.lane.b32.xlu1 %v8152_v36, %s7083_s29 }
 0x590   : > { %v2547_v33 = vpop.xlane.xlu0 %2546 }
 0x591   : > { %2907 = vrot.lane.b32.xlu0 %v8149_v14, %s7083_s29  ;;  %v2557_v8 = vsub.f32 %v8223_v62, %v2547_v33 }
 0x593   : > { %v8280_v52 = vpop.eup %6693  ;;  %v2571_v13 = vmul.f32 1.442695, %v2557_v8 }
 0x594   : > { %v2590_v45 = vsel %vm2526_vm3, %v8280_v52, 0.0 }
 0x595   : > { %2591 = vadd.xlane.f32.xlu2 %v2590_v45  ;;  %6695 = vpow2.f32 %v2571_v13 }
 0x596   : > { %2901 = vrot.lane.b32.xlu1 %v8168_v21, %s7083_s29 }
 0x598   : > { %v8291_v47 = vpop.xlane.xlu2 %2549 }
 0x59b   : > { %v8287_v17 = vpop.eup %6695 }
 0x59c   : > { %v2593_v18 = vsel %vm2526_vm3, %v8287_v17, 0.0 }
 0x5c0   : > { %2594 = vadd.xlane.f32.xlu1 %v2593_v18  ;;  %v2558_v18 = vsub.f32 %v8231_v1, %v8291_v47 }
 0x5ca   : > { %v2807_v19 = vpop.xlane.xlu2 %2806 }
 0x5cb   : > { %v2829_v31 = vsub.f32 %v8236_v38, %v2807_v19 }
 0x5cd   : > { %v2837_v46 = vmul.f32 1.442695, %v2829_v31 }
 0x5cf   : > { %6697 = vpow2.f32 %v2837_v46 }
 0x5d2   : > { %v2810_v23 = vpop.xlane.xlu1 %2809 }
 0x5d3   : > { %v2830_v26 = vsub.f32 %v8241_v42, %v2810_v23 }
 0x5d5   : > { %v8295_v34 = vpop.eup %6697  ;;  %v2839_v62 = vmul.f32 1.442695, %v2830_v26 }
 0x5d6   : > { %v2853_v28 = vsel %vm2526_vm3, %v8295_v34, 0.0 }
 0x5d7   : > { %6699 = vpow2.f32 %v2839_v62  ;;  %2854 = vadd.xlane.f32.xlu2 %v2853_v28 }
 0x5d9   : > { %3033 = vrot.lane.b32.xlu1 %v8128_v53, %s7084_s13 }
 0x5da   : > { %v2813_v57 = vpop.xlane.xlu1 %2812 }
 0x5db   : > { %v2831_v38 = vsub.f32 %v8246_v24, %v2813_v57 }
 0x5dd   : > { %v8302_v32 = vpop.eup %6699  ;;  %v2841_v10 = vmul.f32 1.442695, %v2831_v38 }
 0x5de   : > { %v2856_v42 = vsel %vm2526_vm3, %v8302_v32, 0.0 }
 0x5df   : > { %6701 = vpow2.f32 %v2841_v10  ;;  %2857 = vadd.xlane.f32.xlu0 %v2856_v42  ;;  %v6456_v42 = vld [vmem:[%s10088_s5 + $0x18] sm:$0xff] }
 0x5e0   : > { %v2577_v37 = vpop.xlane.xlu2 %2576  ;;  %2988 = vmatpush.bf16.msrb.mxu0 %v6456_v42 }
 0x5e1   : > { %3029 = vrot.lane.b32.xlu1 %v8109_v2, %s7084_s13  ;;  %6703 = vrcp.f32 %v2577_v37 }
 0x5e2   : > { %v2816_v22 = vpop.xlane.xlu0 %2815 }
 0x5e3   : > { %v2832_v43 = vsub.f32 %v8255_v29, %v2816_v22 }
 0x5e5   : > { %v8309_v56 = vpop.eup %6701  ;;  %v2843_v50 = vmul.f32 1.442695, %v2832_v43 }
 0x5e6   : > { %v2859_v24 = vsel %vm2526_vm3, %v8309_v56, 0.0 }
 0x5e7   : > { %6705 = vpow2.f32 %v2843_v50  ;;  %2860 = vadd.xlane.f32.xlu0 %v2859_v24  ;;  %v6704_v41 = vpop.eup %6703 }
 0x5e8   : > { %v2580_v49 = vpop.xlane.xlu1 %2579  ;;  %v2607_v55 = vmul.f32 %v6704_v41, %v8250_v25 }
 0x5e9   : > { %6707 = vrcp.f32 %v2580_v49  ;;  %3027 = vrot.lane.b32.xlu1 %v8160_v3, %s7084_s13  ;;  %v6455_v49 = vld [vmem:[%s10088_s5 + $0x10] sm:$0xff] }
 0x5ea   : > { %2989 = vmatpush.bf16.msrb.mxu0 %v6455_v49 }
 0x5ed   : > { %v8315_v44 = vpop.eup %6705 }
 0x5ee   : > { %v2862_v29 = vsel %vm2526_vm3, %v8315_v44, 0.0 }
 0x5ef   : > { %v6708_v58 = vpop.eup %6707  ;;  %2903 = vrot.lane.b32.xlu2 %v8158_v7, %s7083_s29  ;;  %2863 = vadd.xlane.f32.xlu0 %v2862_v29 }
 0x5f0   : > { %v2608_v12 = vmul.f32 %v6708_v58, %v8259_v11  ;;  %v2583_v4 = vpop.xlane.xlu0 %2582 }
 0x5f1   : > { %3306 = vrot.lane.b32.xlu1 %v8160_v3, %s7085_s16  ;;  %6709 = vrcp.f32 %v2583_v4 }
 0x5f2   : > { %v2615_v9 = vpack.c.bf16 %v2608_v12, %v2607_v55 }
 0x5f4   : > { %6011 = vmatmul.msk.bf16.vlgmr.msra.gmra.mxu0 %vm2526_vm3, %v2615_v9 }
 0x5f7   : > { %v6710_v25 = vpop.eup %6709 }
 0x5f8   : > { %v2586_v5 = vpop.xlane.xlu2 %2585  ;;  %v2609_v33 = vmul.f32 %v6710_v25, %v8263_v48  ;;  %v2573_v48 = vmul.f32 1.442695, %v2558_v18 }
 0x5f9   : > { %6711 = vrcp.f32 %v2586_v5  ;;  %3300 = vrot.lane.b32.xlu1 %v8120_v35, %s7085_s16 }
 0x5ff   : > { %v6712_v11 = vpop.eup %6711 }
 0x600   : > { %v2589_v45 = vpop.xlane.xlu2 %2588  ;;  %v2610_v8 = vmul.f32 %v6712_v11, %v8267_v40  ;;  %v2906_v19 = vpop.permute.xlu1 %2905 }
 0x601   : > { %3025 = vrot.lane.b32.xlu1 %v8142_v59, %s7084_s13  ;;  %6713 = vrcp.f32 %v2589_v45 }
 0x602   : > { %v2616_v3 = vpack.c.bf16 %v2610_v8, %v2609_v33 }
 0x603   : > { %v2908_v13 = vpop.permute.xlu0 %2907  ;;  %2736 = vrot.lane.b32.xlu0 %v8130_v15, %s7083_s29 }
 0x604   : > { %6012 = vmatmul.msk.bf16.gmra.mxu0 %vm2526_vm3, %v2616_v3  ;;  %2929 = vmatpush.bf16.msra.mxu3 %v2908_v13 }
 0x607   : > { %v6714_v40 = vpop.eup %6713 }
 0x608   : > { %v2592_v31 = vpop.xlane.xlu2 %2591  ;;  %2930 = vmatpush.bf16.msra.mxu3 %v2906_v19  ;;  %v2611_v23 = vmul.f32 %v6714_v40, %v8272_v60  ;;  %v6453_v60 = vld [vmem:[%s10088_s5] sm:$0xff] }
 0x609   : > { %6715 = vrcp.f32 %v2592_v31 }
 0x60a   : > { %6717 = vpow2.f32 %v2573_v48 }
 0x60b   : > { %3312 = vrot.lane.b32.xlu0 %v8128_v53, %s7085_s16  ;;  %v6454_v53 = vld [vmem:[%s10088_s5 + $0x8] sm:$0xff] }
 0x60c   : > { %2694 = vmatpush.bf16.msrb.mxu1 %v6454_v53 }
 0x60f   : > { %v6716_v46 = vpop.eup %6715 }
 0x610   : > { %v2612_v26 = vmul.f32 %v6716_v46, %v8280_v52  ;;  %v8344_v1 = vpop.eup %6717  ;;  %2695 = vmatpush.bf16.msrb.mxu1 %v6453_v60 }
 0x611   : > { %v2596_v47 = vsel %vm2526_vm3, %v8344_v1, 0.0 }
 0x612   : > { %v2617_v62 = vpack.c.bf16 %v2612_v26, %v2611_v23 }
 0x613   : > { %3310 = vrot.lane.b32.xlu0 %v8118_v27, %s7085_s16 }
 0x614   : > { %6013 = vmatmul.msk.bf16.gmra.mxu0 %vm2526_vm3, %v2617_v62 }
 0x618   : > { %2597 = vadd.xlane.f32.xlu2 %v2596_v47 }
 0x61b   : > { %3308 = vrot.lane.b32.xlu0 %v8109_v2, %s7085_s16  ;;  %v2902_v2 = vpop.permute.xlu1 %2901 }
 0x623   : > { %3298 = vrot.lane.b32.xlu0 %v8136_v0, %s7085_s16 }
 0x62b   : > { %3023 = vrot.lane.b32.xlu0 %v8130_v15, %s7084_s13 }
 0x630   : > { %3031 = vrot.lane.b32.xlu2 %v8118_v27, %s7084_s13 }
 0x633   : > { %3304 = vrot.lane.b32.xlu0 %v8142_v59, %s7085_s16  ;;  %v2595_v52 = vpop.xlane.xlu1 %2594 }
 0x638   : > { %3019 = vrot.lane.b32.xlu2 %v8136_v0, %s7084_s13  ;;  %v2800_v0 = vpop.f32.mrf.mxu3 }
 0x640   : > { %3021 = vrot.lane.b32.xlu2 %v8120_v35, %s7084_s13  ;;  %v8368_v35 = vadd.f32 %v2800_v0, %v8220_v6 }
 0x642   : > { %v2823_v50 = vsel %vm2526_vm3, %v8368_v35, -inf }
 0x648   : > { %3302 = vrot.lane.b32.xlu2 %v8130_v15, %s7085_s16 }
 0x64a   : > { %v2855_v28 = vpop.xlane.xlu2 %2854 }
 0x64b   : > { %v3034_v57 = vpop.permute.xlu1 %3033  ;;  %6719 = vrcp.f32 %v2855_v28 }
 0x64c   : > { %v3057_v38 = vsel %vm2472_vm2, %v3034_v57, 0 }
 0x64d   : > { %3063 = vmatpush.bf16.xpose.msra.mxu1 %v3057_v38 }
 0x651   : > { %v6720_v10 = vpop.eup %6719 }
 0x652   : > { %v2904_v27 = vpop.permute.xlu2 %2903  ;;  %v2858_v59 = vpop.xlane.xlu0 %2857  ;;  %v2885_v15 = vmul.f32 %v6720_v10, %v8295_v34 }
 0x653   : > { %2931 = vmatpush.bf16.msra.mxu3 %v2904_v27  ;;  %6721 = vrcp.f32 %v2858_v59  ;;  %v3030_v45 = vpop.permute.xlu1 %3029 }
 0x654   : > { %v3051_v57 = vsel %vm2472_vm2, %v3030_v45, 0 }
 0x657   : > { %2932 = vmatpush.bf16.msra.mxu3 %v2902_v2 }
 0x659   : > { %v6722_v22 = vpop.eup %6721 }
 0x65a   : > { %v2886_v37 = vmul.f32 %v6722_v22, %v8302_v32  ;;  %v2861_v43 = vpop.xlane.xlu0 %2860 }
 0x65b   : > { %6553 = vmatpush.bf16.msrb.mxu3 %v6456_v42  ;;  %6723 = vrcp.f32 %v2861_v43  ;;  %v3028_v13 = vpop.permute.xlu1 %3027 }
 0x65c   : > { %v2893_v24 = vpack.c.bf16 %v2886_v37, %v2885_v15 }
 0x65d   : > { %2824 = vmax.xlane.f32.xlu0 %v2823_v50 }
 0x65e   : > { %6031 = vmatmul.msk.bf16.vlgmr.msra.gmra.mxu3 %vm2526_vm3, %v2893_v24 }
 0x65f   : > { %6554 = vmatpush.bf16.msrb.mxu3 %v6455_v49 }
 0x661   : > { %v6724_v58 = vpop.eup %6723 }
 0x662   : > { %v2864_v41 = vpop.xlane.xlu0 %2863  ;;  %v2887_v32 = vmul.f32 %v6724_v58, %v8309_v56 }
 0x663   : > { %6725 = vrcp.f32 %v2864_v41  ;;  %v3307_v47 = vpop.permute.xlu1 %3306 }
 0x664   : > { %6727 = vrcp.f32 %v2595_v52  ;;  %v3327_v2 = vsel %vm2472_vm2, %v3307_v47, 0 }
 0x669   : > { %v6726_v34 = vpop.eup %6725 }
 0x66a   : > { %v2888_v29 = vmul.f32 %v6726_v34, %v8315_v44  ;;  %v6728_v48 = vpop.eup %6727 }
 0x66b   : > { %v2613_v26 = vmul.f32 %v6728_v48, %v8287_v17  ;;  %v3048_v17 = vsel %vm2472_vm2, %v3028_v13, 0 }
 0x66c   : > { %v2894_v55 = vpack.c.bf16 %v2888_v29, %v2887_v32 }
 0x66e   : > { %6032 = vmatmul.msk.bf16.gmra.mxu3 %vm2526_vm3, %v2894_v55 }
 0x671   : > { %v2640_v12 = vpop.f32.mrf.mxu0 }
 0x675   : > { %v2737_v9 = vpop.permute.xlu0 %2736 }
 0x676   : > { %6029 = vmatmul.msk.bf16.gmra.mxu2 %vm2472_vm2, %v2737_v9 }
 0x679   : > { %v2642_v4 = vpop.f32.mrf.mxu0 }
 0x67a   : > { %v2660_v5 = vpack.c.bf16 %v2642_v4, %v2640_v12 }
 0x67c   : > { %6023 = vmatmul.msk.bf16.vlgmr.msrb.gmra.mxu1 %vm2472_vm2, %v2660_v5 }
 0x67d   : > { %v3313_v25 = vpop.permute.xlu0 %3312 }
 0x67e   : > { %v3336_v11 = vsel %vm2472_vm2, %v3313_v25, 0  ;;  %v3301_v25 = vpop.permute.xlu1 %3300 }
 0x67f   : > { %3342 = vmatpush.bf16.xpose.msra.mxu0 %v3336_v11 }
 0x681   : > { %v2645_v33 = vpop.f32.mrf.mxu0 }
 0x685   : > { %v3311_v56 = vpop.permute.xlu0 %3310 }
 0x686   : > { %v3333_v44 = vsel %vm2472_vm2, %v3311_v56, 0 }
 0x687   : > { %3343 = vmatpush.bf16.xpose.msra.mxu0 %v3333_v44  ;;  %v3026_v44 = vpop.permute.xlu1 %3025 }
 0x689   : > { %v2647_v8 = vpop.f32.mrf.mxu0 }
 0x68a   : > { %v2661_v3 = vpack.c.bf16 %v2647_v8, %v2645_v33 }
 0x68b   : > { %v2598_v18 = vpop.xlane.xlu2 %2597 }
 0x68c   : > { %6024 = vmatmul.msk.bf16.gmra.mxu1 %vm2472_vm2, %v2661_v3  ;;  %6729 = vrcp.f32 %v2598_v18 }
 0x68d   : > { %v3309_v19 = vpop.permute.xlu0 %3308 }
 0x68e   : > { %v3330_v31 = vsel %vm2472_vm2, %v3309_v19, 0 }
 0x68f   : > { %3344 = vmatpush.bf16.xpose.msra.mxu0 %v3330_v31 }
 0x691   : > { %v2650_v40 = vpop.f32.mrf.mxu0 }
 0x692   : > { %v6730_v46 = vpop.eup %6729 }
 0x693   : > { %v3032_v23 = vpop.permute.xlu2 %3031  ;;  %v2614_v62 = vmul.f32 %v6730_v46, %v8344_v1  ;;  %v2802_v1 = vpop.f32.mrf.mxu3 }
 0x694   : > { %v3054_v53 = vsel %vm2472_vm2, %v3032_v23, 0  ;;  %v2803_v34 = vadd.f32 %v2802_v1, %v8228_v63 }
 0x695   : > { %3064 = vmatpush.bf16.xpose.msra.mxu1 %v3054_v53  ;;  %v2618_v60 = vpack.c.bf16 %v2614_v62, %v2613_v26  ;;  %v3299_v38 = vpop.permute.xlu0 %3298 }
 0x696   : > { %v2826_v12 = vsel %vm2526_vm3, %v2803_v34, -inf }
 0x697   : > { %6014 = vmatmul.msk.bf16.gmra.mxu0 %vm2526_vm3, %v2618_v60 }
 0x698   : > { %3345 = vmatpush.bf16.xpose.msra.mxu0 %v3327_v2 }
 0x699   : > { %v2652_v52 = vpop.f32.mrf.mxu0 }
 0x69a   : > { %v2662_v28 = vpack.c.bf16 %v2652_v52, %v2650_v40 }
 0x69b   : > { %v3020_v5 = vpop.permute.xlu2 %3019 }
 0x69c   : > { %6025 = vmatmul.msk.bf16.gmra.mxu1 %vm2472_vm2, %v2662_v28 }
 0x69d   : > { %3065 = vmatpush.bf16.xpose.msra.mxu1 %v3051_v57  ;;  %v3024_v59 = vpop.permute.xlu0 %3023 }
 0x6a3   : > { %v3022_v33 = vpop.permute.xlu2 %3021 }
 0x6a5   : > { %3066 = vmatpush.bf16.xpose.msra.mxu1 %v3048_v17  ;;  %v3305_v42 = vpop.permute.xlu0 %3304 }
 0x6ab   : > { %v3303_v56 = vpop.permute.xlu2 %3302 }
 0x6d0   : > { %v2825_v15 = vpop.xlane.xlu0 %2824 }
 0x6d1   : > { %v2835_v24 = vsub.f32 %v8368_v35, %v2825_v15 }
 0x6d3   : > { %v2849_v58 = vmul.f32 1.442695, %v2835_v24 }
 0x6d5   : > { %6731 = vpow2.f32 %v2849_v58 }
 0x6db   : > { %v8403_v35 = vpop.eup %6731 }
 0x6dc   : > { %v2871_v9 = vsel %vm2526_vm3, %v8403_v35, 0.0 }
 0x6e1   : > { %v2934_v27 = vpop.f32.mrf.mxu3 }
 0x6e9   : > { %v2936_v0 = vpop.f32.mrf.mxu3 }
 0x6ea   : > { %v2954_v10 = vpack.c.bf16 %v2936_v0, %v2934_v27 }
 0x6ec   : > { %6043 = vmatmul.msk.bf16.vlgmr.msrb.gmra.mxu0 %vm2472_vm2, %v2954_v10 }
 0x6f1   : > { %v2939_v22 = vpop.f32.mrf.mxu3 }
 0x6f9   : > { %v2795_v37 = vpop.f32.mrf.mxu2  ;;  %v2941_v50 = vpop.f32.mrf.mxu3 }
 0x6fa   : > { %v2796_v43 = vadd.f32 %v2795_v37, %v8207_v51  ;;  %v2955_v49 = vpack.c.bf16 %v2941_v50, %v2939_v22  ;;  %v2697_v8 = vpop.f32.mrf.mxu1 }
 0x6fc   : > { %v2817_v41 = vsel %vm2526_vm3, %v2796_v43, -inf  ;;  %6044 = vmatmul.msk.bf16.gmra.mxu0 %vm2472_vm2, %v2955_v49 }
 0x6fd   : > { %2818 = vmax.xlane.f32.xlu2 %v2817_v41 }
 0x701   : > { %v2797_v32 = vpop.f32.mrf.mxu2 }
 0x702   : > { %v2798_v29 = vadd.f32 %v2797_v32, %v8212_v54  ;;  %v8434_v19 = vpop.f32.mrf.mxu1 }
 0x704   : > { %v2820_v55 = vsel %vm2526_vm3, %v2798_v29, -inf }
 0x705   : > { %2821 = vmax.xlane.f32.xlu1 %v2820_v55  ;;  %2827 = vmax.xlane.f32.xlu2 %v2826_v12 }
 0x70a   : > { %v2702_v23 = vpop.f32.mrf.mxu1 }
 0x70c   : > { %6067 = vmatmul.msk.bf16.vlgmr.msra.gmra.mxu0 %vm2472_vm2, %v3299_v38 }
 0x70d   : > { %2872 = vadd.xlane.f32.xlu1 %v2871_v9 }
 0x712   : > { %v8445_v1 = vpop.f32.mrf.mxu1 }
 0x714   : > { %v2655_v4 = vpop.f32.mrf.mxu0 }
 0x71a   : > { %v8455_v22 = vpop.f32.mrf.mxu1 }
 0x71c   : > { %v2657_v11 = vpop.f32.mrf.mxu0  ;;  %6068 = vmatmul.msk.bf16.gmra.mxu0 %vm2472_vm2, %v3301_v25 }
 0x71d   : > { %v2663_v45 = vpack.c.bf16 %v2657_v11, %v2655_v4  ;;  %3465 = vrot.lane.b32.xlu2 %v8149_v14, %s7085_s16 }
 0x71f   : > { %6026 = vmatmul.msk.bf16.gmra.mxu1 %vm2472_vm2, %v2663_v45 }
 0x722   : > { %v8461_v50 = vpop.f32.mrf.mxu1 }
 0x725   : > { %3180 = vrot.lane.b32.xlu2 %v8168_v21, %s7084_s13 }
 0x726   : > { %3186 = vrot.lane.b32.xlu1 %v8149_v14, %s7084_s13  ;;  %v8429_v14 = vld [vmem:[%s10090_s4] ss:$0 sm:$0xff] }
 0x727   : > { %v2720_v3 = vadd.f32 %v8429_v14, %v2697_v8  ;;  %v2722_v62 = vadd.f32 %v8429_v14, %v2702_v23 }
 0x72c   : > { %6069 = vmatmul.msk.bf16.gmra.mxu0 %vm2472_vm2, %v3303_v56 }
 0x72d   : > { %3463 = vrot.lane.b32.xlu2 %v8152_v36, %s7085_s16 }
 0x72f   : > { %6047 = vmatmul.msk.bf16.vlgmr.msra.gmra.mxu1 %vm2472_vm2, %v3020_v5 }
 0x73c   : > { %6070 = vmatmul.msk.bf16.gmra.mxu0 %vm2472_vm2, %v3305_v42 }
 0x73f   : > { %6048 = vmatmul.msk.bf16.gmra.mxu1 %vm2472_vm2, %v3022_v33 }
 0x74f   : > { %6049 = vmatmul.msk.bf16.gmra.mxu1 %vm2472_vm2, %v3024_v59 }
 0x75f   : > { %6050 = vmatmul.msk.bf16.gmra.mxu1 %vm2472_vm2, %v3026_v44 }
 0x769   : > { %v2991_v13 = vpop.f32.mrf.mxu0 }
 0x76a   : > { %v8432_v18 = vadd.f32 %v2991_v13, %v2720_v3 }
 0x770   : > { %v2819_v31 = vpop.xlane.xlu2 %2818 }
 0x771   : > { %v2833_v48 = vsub.f32 %v2796_v43, %v2819_v31  ;;  %v8436_v40 = vpop.f32.mrf.mxu0 }
 0x773   : > { %v2845_v46 = vmul.f32 1.442695, %v2833_v48 }
 0x775   : > { %6733 = vpow2.f32 %v2845_v46 }
 0x778   : > { %v2828_v26 = vpop.xlane.xlu2 %2827  ;;  %v2822_v47 = vpop.xlane.xlu1 %2821 }
 0x779   : > { %v2836_v53 = vsub.f32 %v2803_v34, %v2828_v26  ;;  %v2996_v60 = vpop.f32.mrf.mxu0  ;;  %v2834_v57 = vsub.f32 %v2798_v29, %v2822_v47 }
 0x77a   : > { %v8441_v28 = vadd.f32 %v2996_v60, %v2722_v62 }
 0x77b   : > { %v8439_v2 = vpop.eup %6733  ;;  %v2851_v52 = vmul.f32 1.442695, %v2836_v53  ;;  %v2847_v38 = vmul.f32 1.442695, %v2834_v57 }
 0x77c   : > { %v2865_v17 = vsel %vm2526_vm3, %v8439_v2, 0.0 }
 0x77d   : > { %2866 = vadd.xlane.f32.xlu1 %v2865_v17  ;;  %6735 = vpow2.f32 %v2851_v52 }
 0x77e   : > { %6737 = vpow2.f32 %v2847_v38 }
 0x780   : > { %v3466_v27 = vpop.permute.xlu2 %3465  ;;  %v8459_v37 = vpop.xlane.xlu1 %2872 }
 0x781   : > { %3487 = vmatpush.bf16.msrb.mxu1 %v3466_v27  ;;  %v8477_v4 = vpop.f32.mrf.mxu0 }
 0x783   : > { %v8447_v59 = vpop.eup %6735 }
 0x784   : > { %v2874_v0 = vsel %vm2526_vm3, %v8447_v59, 0.0  ;;  %v8453_v42 = vpop.eup %6737 }
 0x785   : > { %2875 = vadd.xlane.f32.xlu0 %v2874_v0  ;;  %v2868_v15 = vsel %vm2526_vm3, %v8453_v42, 0.0 }
 0x788   : > { %v8451_v10 = vpop.permute.xlu2 %3180 }
 0x789   : > { %v3347_v45 = vpop.f32.mrf.mxu0 }
 0x78a   : > { %v8499_v26 = vadd.f32 %v3347_v45, %v8187_v30 }
 0x78c   : > { %v3367_v47 = vsel %vm2526_vm3, %v8499_v26, -inf }
 0x78d   : > { %2869 = vadd.xlane.f32.xlu0 %v2868_v15 }
 0x790   : > { %v3464_v43 = vpop.permute.xlu2 %3463 }
 0x791   : > { %3488 = vmatpush.bf16.msrb.mxu1 %v3464_v43  ;;  %v3349_v56 = vpop.f32.mrf.mxu0 }
 0x792   : > { %v8502_v62 = vadd.f32 %v3349_v56, %v8192_v61 }
 0x794   : > { %v3370_v52 = vsel %vm2526_vm3, %v8502_v62, -inf }
 0x798   : > { %v3187_v24 = vpop.permute.xlu1 %3186 }
 0x799   : > { %3208 = vmatpush.bf16.msra.mxu2 %v3187_v24  ;;  %v3352_v31 = vpop.f32.mrf.mxu0 }
 0x79a   : > { %v8512_v57 = vadd.f32 %v3352_v31, %v8197_v39 }
 0x79c   : > { %v8463_v49 = vpop.f32.mrf.mxu1  ;;  %v3373_v17 = vsel %vm2526_vm3, %v8512_v57, -inf }
 0x7a1   : > { %v3354_v23 = vpop.f32.mrf.mxu0 }
 0x7a4   : > { %v8465_v41 = vpop.f32.mrf.mxu1 }
 0x7a9   : > { %v3357_v53 = vpop.f32.mrf.mxu0 }
 0x7aa   : > { %v8527_v0 = vadd.f32 %v3357_v53, %v8207_v51 }
 0x7ac   : > { %v3068_v58 = vpop.f32.mrf.mxu1 }
 0x7ad   : > { %v8468_v34 = vadd.f32 %v3068_v58, %v8187_v30  ;;  %v3379_v58 = vsel %vm2526_vm3, %v8527_v0, -inf }
 0x7af   : > { %v3088_v32 = vsel %vm2526_vm3, %v8468_v34, -inf }
 0x7b0   : > { %3089 = vmax.xlane.f32.xlu1 %v3088_v32 }
 0x7b1   : > { %v3359_v15 = vpop.f32.mrf.mxu0 }
 0x7b2   : > { %v8532_v24 = vadd.f32 %v3359_v15, %v8212_v54 }
 0x7b4   : > { %v3070_v29 = vpop.f32.mrf.mxu1 }
 0x7b5   : > { %v8473_v55 = vadd.f32 %v3070_v29, %v8192_v61  ;;  %v8517_v61 = vadd.f32 %v3354_v23, %v8202_v16  ;;  %v3382_v29 = vsel %vm2526_vm3, %v8532_v24, -inf }
 0x7b7   : > { %v3091_v12 = vsel %vm2526_vm3, %v8473_v55, -inf }
 0x7b8   : > { %3092 = vmax.xlane.f32.xlu0 %v3091_v12 }
 0x7bc   : > { %v3073_v9 = vpop.f32.mrf.mxu1 }
 0x7bd   : > { %v8507_v60 = vadd.f32 %v3073_v9, %v8197_v39  ;;  %v3376_v39 = vsel %vm2526_vm3, %v8517_v61, -inf }
 0x7bf   : > { %v3094_v30 = vsel %vm2526_vm3, %v8507_v60, -inf }
 0x7c4   : > { %v3075_v5 = vpop.f32.mrf.mxu1 }
 0x7c5   : > { %v8480_v25 = vadd.f32 %v3075_v5, %v8202_v16 }
 0x7c7   : > { %v3097_v11 = vsel %vm2526_vm3, %v8480_v25, -inf }
 0x7c8   : > { %3098 = vmax.xlane.f32.xlu2 %v3097_v11 }
 0x7c9   : > { %3182 = vrot.lane.b32.xlu1 %v8158_v7, %s7084_s13 }
 0x7cc   : > { %3184 = vrot.lane.b32.xlu0 %v8152_v36, %s7084_s13  ;;  %v3078_v33 = vpop.f32.mrf.mxu1  ;;  %s10095_s13 = scalar_lea.vmem %s10094_s18, %s7307_s9 }
 0x7cd   : > { %v8522_v38 = vadd.f32 %v3078_v33, %v8207_v51 }
 0x7cf   : > { %v3100_v16 = vsel %vm2526_vm3, %v8522_v38, -inf }
 0x7d4   : > { %v3080_v44 = vpop.f32.mrf.mxu1 }
 0x7d5   : > { %v8489_v8 = vadd.f32 %v3080_v44, %v8212_v54 }
 0x7d7   : > { %v3103_v3 = vsel %vm2526_vm3, %v8489_v8, -inf }
 0x7d8   : > { %3104 = vmax.xlane.f32.xlu2 %v3103_v3 }
 0x7dc   : > { %v3083_v13 = vpop.f32.mrf.mxu1 }
 0x7dd   : > { %v8537_v32 = vadd.f32 %v3083_v13, %v8220_v6 }
 0x7df   : > { %v3106_v12 = vsel %vm2526_vm3, %v8537_v32, -inf }
 0x7e4   : > { %v3085_v48 = vpop.f32.mrf.mxu1 }
 0x7e5   : > { %v8494_v46 = vadd.f32 %v3085_v48, %v8228_v63 }
 0x7e7   : > { %v3109_v36 = vsel %vm2526_vm3, %v8494_v46, -inf }
 0x7e8   : > { %3110 = vmax.xlane.f32.xlu2 %v3109_v36 }
 0x7f0   : > { %3368 = vmax.xlane.f32.xlu2 %v3367_v47  ;;  %v2867_v43 = vpop.xlane.xlu1 %2866 }
 0x7f1   : > { %6739 = vrcp.f32 %v2867_v43 }
 0x7f3   : > { %3371 = vmax.xlane.f32.xlu1 %v3370_v52 }
 0x7f6   : > { %3095 = vmax.xlane.f32.xlu0 %v3094_v30 }
 0x7f7   : > { %v6740_v54 = vpop.eup %6739 }
 0x7f8   : > { %3374 = vmax.xlane.f32.xlu2 %v3373_v17  ;;  %v2876_v27 = vpop.xlane.xlu0 %2875  ;;  %v2889_v5 = vmul.f32 %v6740_v54, %v8439_v2 }
 0x7fb   : > { %3377 = vmax.xlane.f32.xlu1 %v3376_v39 }
 0x7fe   : > { %3101 = vmax.xlane.f32.xlu0 %v3100_v16 }
 0x800   : > { %3380 = vmax.xlane.f32.xlu2 %v3379_v58  ;;  %v2870_v51 = vpop.xlane.xlu0 %2869 }
 0x801   : > { %6741 = vrcp.f32 %v2870_v51 }
 0x802   : > { %6743 = vrcp.f32 %v2876_v27 }
 0x803   : > { %3383 = vmax.xlane.f32.xlu1 %v3382_v29  ;;  %6745 = vrcp.f32 %v8459_v37 }
 0x806   : > { %3107 = vmax.xlane.f32.xlu0 %v3106_v12 }
 0x807   : > { %v6742_v9 = vpop.eup %6741 }
 0x808   : > { %v2890_v11 = vmul.f32 %v6742_v9, %v8453_v42  ;;  %v6744_v33 = vpop.eup %6743 }
 0x809   : > { %v6746_v56 = vpop.eup %6745  ;;  %v2892_v44 = vmul.f32 %v6744_v33, %v8447_v59  ;;  %v3362_v59 = vpop.f32.mrf.mxu0 }
 0x80a   : > { %v2895_v45 = vpack.c.bf16 %v2890_v11, %v2889_v5  ;;  %v2891_v3 = vmul.f32 %v6746_v56, %v8403_v35 }
 0x80c   : > { %6033 = vmatmul.msk.bf16.gmra.mxu3 %vm2526_vm3, %v2895_v45  ;;  %v2896_v13 = vpack.c.bf16 %v2892_v44, %v2891_v3 }
 0x811   : > { %v3364_v30 = vpop.f32.mrf.mxu0 }
 0x812   : > { %v8566_v27 = vadd.f32 %v3364_v30, %v8228_v63 }
 0x814   : > { %v3388_v39 = vsel %vm2526_vm3, %v8566_v27, -inf }
 0x81c   : > { %6034 = vmatmul.msk.bf16.gmra.mxu3 %vm2526_vm3, %v2896_v13 }
 0x823   : > { %v3090_v31 = vpop.xlane.xlu1 %3089 }
 0x824   : > { %v3112_v2 = vsub.f32 %v8468_v34, %v3090_v31  ;;  %v8561_v34 = vadd.f32 %v3362_v59, %v8220_v6 }
 0x826   : > { %v3120_v48 = vmul.f32 1.442695, %v3112_v2 }
 0x828   : > { %6747 = vpow2.f32 %v3120_v48 }
 0x82b   : > { %v3093_v42 = vpop.xlane.xlu0 %3092 }
 0x82c   : > { %v3113_v23 = vsub.f32 %v8473_v55, %v3093_v42  ;;  %v3385_v55 = vsel %vm2526_vm3, %v8561_v34, -inf }
 0x82e   : > { %v8552_v36 = vpop.eup %6747  ;;  %v3122_v37 = vmul.f32 1.442695, %v3113_v23 }
 0x82f   : > { %v3136_v47 = vsel %vm2526_vm3, %v8552_v36, 0.0 }
 0x830   : > { %6749 = vpow2.f32 %v3122_v37  ;;  %3137 = vadd.xlane.f32.xlu0 %v3136_v47 }
 0x836   : > { %v8556_v35 = vpop.eup %6749 }
 0x837   : > { %v3139_v53 = vsel %vm2526_vm3, %v8556_v35, 0.0 }
 0x838   : > { %3140 = vadd.xlane.f32.xlu2 %v3139_v53 }
 0x83b   : > { %v3183_v17 = vpop.permute.xlu1 %3182  ;;  %v3099_v6 = vpop.xlane.xlu2 %3098 }
 0x83e   : > { %v3185_v52 = vpop.permute.xlu0 %3184 }
 0x83f   : > { %3209 = vmatpush.bf16.msra.mxu2 %v3185_v52 }
 0x840   : > { %3386 = vmax.xlane.f32.xlu2 %v3385_v55 }
 0x843   : > { %3210 = vmatpush.bf16.msra.mxu2 %v3183_v17 }
 0x847   : > { %3211 = vmatpush.bf16.msra.mxu2 %v8451_v10 }
 0x848   : > { %3389 = vmax.xlane.f32.xlu2 %v3388_v39 }
 0x84b   : > { %v8571_v15 = vpop.xlane.xlu2 %3104 }
 0x85b   : > { %v8573_v43 = vpop.xlane.xlu2 %3110 }
 0x860   : > { %3461 = vrot.lane.b32.xlu2 %v8158_v7, %s7085_s16 }
 0x863   : > { %v3369_v63 = vpop.xlane.xlu2 %3368 }
 0x864   : > { %v3391_v12 = vsub.f32 %v8499_v26, %v3369_v63  ;;  %v3115_v26 = vsub.f32 %v8480_v25, %v3099_v6 }
 0x866   : > { %v3372_v16 = vpop.xlane.xlu1 %3371  ;;  %v3399_v9 = vmul.f32 1.442695, %v3391_v12  ;;  %v3126_v3 = vmul.f32 1.442695, %v3115_v26  ;;  %v3119_v12 = vsub.f32 %v8494_v46, %v8573_v43 }
 0x867   : > { %v3392_v58 = vsub.f32 %v8502_v62, %v3372_v16 }
 0x869   : > { %v3401_v51 = vmul.f32 1.442695, %v3392_v58  ;;  %v3096_v29 = vpop.xlane.xlu0 %3095 }
 0x86a   : > { %v3114_v10 = vsub.f32 %v8507_v60, %v3096_v29 }
 0x86b   : > { %6751 = vpow2.f32 %v3401_v51  ;;  %v3375_v56 = vpop.xlane.xlu2 %3374 }
 0x86c   : > { %v3124_v54 = vmul.f32 1.442695, %v3114_v10  ;;  %v3393_v13 = vsub.f32 %v8512_v57, %v3375_v56 }
 0x86e   : > { %6753 = vpow2.f32 %v3124_v54  ;;  %v3403_v48 = vmul.f32 1.442695, %v3393_v13  ;;  %v3378_v42 = vpop.xlane.xlu1 %3377 }
 0x86f   : > { %6755 = vpow2.f32 %v3399_v9  ;;  %v3394_v37 = vsub.f32 %v8517_v61, %v3378_v42 }
 0x871   : > { %v8580_v5 = vpop.eup %6751  ;;  %v3102_v11 = vpop.xlane.xlu0 %3101  ;;  %v3405_v59 = vmul.f32 1.442695, %v3394_v37 }
 0x872   : > { %v3418_v7 = vsel %vm2526_vm3, %v8580_v5, 0.0  ;;  %v3116_v62 = vsub.f32 %v8522_v38, %v3102_v11 }
 0x873   : > { %3419 = vadd.xlane.f32.xlu1 %v3418_v7  ;;  %v3117_v7 = vsub.f32 %v8489_v8, %v8571_v15 }
 0x874   : > { %v8584_v45 = vpop.eup %6753  ;;  %v3128_v33 = vmul.f32 1.442695, %v3116_v62 }
 0x875   : > { %v3142_v60 = vsel %vm2526_vm3, %v8584_v45, 0.0  ;;  %v8590_v44 = vpop.eup %6755 }
 0x876   : > { %3143 = vadd.xlane.f32.xlu0 %v3142_v60  ;;  %6757 = vpow2.f32 %v3128_v33  ;;  %v3415_v2 = vsel %vm2526_vm3, %v8590_v44, 0.0  ;;  %v3384_v16 = vpop.xlane.xlu1 %3383  ;;  %v3130_v60 = vmul.f32 1.442695, %v3117_v7 }
 0x877   : > { %6759 = vpow2.f32 %v3126_v3 }
 0x878   : > { %6761 = vpow2.f32 %v3403_v48 }
 0x879   : > { %v3108_v31 = vpop.xlane.xlu0 %3107 }
 0x87a   : > { %v3118_v38 = vsub.f32 %v8537_v32, %v3108_v31  ;;  %v3381_v32 = vpop.xlane.xlu2 %3380 }
 0x87b   : > { %v3395_v55 = vsub.f32 %v8527_v0, %v3381_v32  ;;  %v3396_v0 = vsub.f32 %v8532_v24, %v3384_v16  ;;  %v3134_v24 = vmul.f32 1.442695, %v3119_v12 }
 0x87c   : > { %v8596_v23 = vpop.eup %6757  ;;  %v3132_v25 = vmul.f32 1.442695, %v3118_v38 }
 0x87d   : > { %v8599_v47 = vpop.eup %6759  ;;  %v3148_v57 = vsel %vm2526_vm3, %v8596_v23, 0.0  ;;  %v3407_v17 = vmul.f32 1.442695, %v3395_v55  ;;  %v3409_v63 = vmul.f32 1.442695, %v3396_v0 }
 0x87e   : > { %3416 = vadd.xlane.f32.xlu0 %v3415_v2  ;;  %6763 = vpow2.f32 %v3132_v25  ;;  %v3145_v53 = vsel %vm2526_vm3, %v8599_v47, 0.0  ;;  %v8605_v52 = vpop.eup %6761 }
 0x87f   : > { %6765 = vpow2.f32 %v3405_v59  ;;  %v3421_v30 = vsel %vm2526_vm3, %v8605_v52, 0.0 }
 0x880   : > { %6767 = vpow2.f32 %v3407_v17 }
 0x881   : > { %6769 = vpow2.f32 %v3409_v63 }
 0x882   : > { %6771 = vpow2.f32 %v3134_v24 }
 0x884   : > { %v8610_v61 = vpop.eup %6763 }
 0x885   : > { %v3154_v6 = vsel %vm2526_vm3, %v8610_v61, 0.0  ;;  %v8616_v58 = vpop.eup %6765 }
 0x886   : > { %3149 = vadd.xlane.f32.xlu0 %v3148_v57  ;;  %v8621_v10 = vpop.eup %6767 }
 0x887   : > { %v3427_v54 = vsel %vm2526_vm3, %v8621_v10, 0.0  ;;  %v8628_v11 = vpop.eup %6769 }
 0x888   : > { %v3430_v62 = vsel %vm2526_vm3, %v8628_v11, 0.0  ;;  %v8634_v33 = vpop.eup %6771 }
 0x889   : > { %3146 = vadd.xlane.f32.xlu2 %v3145_v53  ;;  %v3157_v8 = vsel %vm2526_vm3, %v8634_v33, 0.0 }
 0x88c   : > { %3459 = vrot.lane.b32.xlu1 %v8168_v21, %s7085_s16  ;;  %v3424_v21 = vsel %vm2526_vm3, %v8616_v58, 0.0 }
 0x88e   : > { %3422 = vadd.xlane.f32.xlu0 %v3421_v30 }
 0x88f   : > { %v2944_v39 = vpop.f32.mrf.mxu3 }
 0x891   : > { %3155 = vadd.xlane.f32.xlu2 %v3154_v6 }
 0x896   : > { %3425 = vadd.xlane.f32.xlu0 %v3424_v21 }
 0x897   : > { %v2946_v51 = vpop.f32.mrf.mxu3 }
 0x898   : > { %v2956_v29 = vpack.c.bf16 %v2946_v51, %v2944_v39 }
 0x89a   : > { %6045 = vmatmul.msk.bf16.vlgmr.msrb.gmra.mxu3 %vm2472_vm2, %v2956_v29 }
 0x89e   : > { %3428 = vadd.xlane.f32.xlu0 %v3427_v54 }
 0x89f   : > { %v2949_v9 = vpop.f32.mrf.mxu3 }
 0x8a3   : > { %v3138_v26 = vpop.xlane.xlu0 %3137 }
 0x8a4   : > { %6773 = vrcp.f32 %v3138_v26 }
 0x8a5   : > { %6775 = vpow2.f32 %v3130_v60 }
 0x8a6   : > { %3431 = vadd.xlane.f32.xlu0 %v3430_v62 }
 0x8a7   : > { %v2951_v46 = vpop.f32.mrf.mxu3 }
 0x8a8   : > { %v2957_v43 = vpack.c.bf16 %v2951_v46, %v2949_v9 }
 0x8aa   : > { %6046 = vmatmul.msk.bf16.gmra.mxu3 %vm2472_vm2, %v2957_v43  ;;  %v6774_v15 = vpop.eup %6773 }
 0x8ab   : > { %v3141_v56 = vpop.xlane.xlu2 %3140  ;;  %v8639_v3 = vpop.eup %6775  ;;  %v3168_v31 = vmul.f32 %v6774_v15, %v8552_v36 }
 0x8ac   : > { %6777 = vrcp.f32 %v3141_v56  ;;  %v3151_v25 = vsel %vm2526_vm3, %v8639_v3, 0.0 }
 0x8ae   : > { %3158 = vadd.xlane.f32.xlu0 %v3157_v8 }
 0x8b2   : > { %v6778_v13 = vpop.eup %6777 }
 0x8b3   : > { %v3169_v2 = vmul.f32 %v6778_v13, %v8556_v35  ;;  %v3387_v38 = vpop.xlane.xlu2 %3386 }
 0x8b4   : > { %v3397_v48 = vsub.f32 %v8561_v34, %v3387_v38 }
 0x8b5   : > { %v3176_v42 = vpack.c.bf16 %v3169_v2, %v3168_v31  ;;  %v6458_v31 = vld [vmem:[%s10088_s5 + $0x28] sm:$0xff] }
 0x8b6   : > { %v3411_v37 = vmul.f32 1.442695, %v3397_v48  ;;  %3152 = vadd.xlane.f32.xlu1 %v3151_v25  ;;  %3267 = vmatpush.bf16.msra.mxu3 %v6458_v31  ;;  %v6457_v48 = vld [vmem:[%s10088_s5 + $0x20] sm:$0xff]  ;;  %v6460_v25 = vld [vmem:[%s10088_s5 + $0x38] sm:$0xff] }
 0x8b7   : > { %6051 = vmatmul.msk.bf16.vlgmr.msra.gmra.mxu2 %vm2526_vm3, %v3176_v42 }
 0x8b8   : > { %6779 = vpow2.f32 %v3411_v37  ;;  %3546 = vmatpush.bf16.msrb.mxu2 %v6460_v25  ;;  %v2726_v37 = vadd.f32 %v8429_v14, %v8463_v49 }
 0x8ba   : > { %3268 = vmatpush.bf16.msra.mxu3 %v6457_v48 }
 0x8bb   : > { %v3390_v57 = vpop.xlane.xlu2 %3389 }
 0x8bc   : > { %v3398_v59 = vsub.f32 %v8566_v27, %v3390_v57 }
 0x8be   : > { %v8648_v53 = vpop.eup %6779  ;;  %v3413_v36 = vmul.f32 1.442695, %v3398_v59 }
 0x8bf   : > { %v3433_v35 = vsel %vm2526_vm3, %v8648_v53, 0.0 }
 0x8c0   : > { %6781 = vpow2.f32 %v3413_v36  ;;  %3434 = vadd.xlane.f32.xlu2 %v3433_v35 }
 0x8c3   : > { %v3462_v34 = vpop.permute.xlu2 %3461 }
 0x8c4   : > { %3489 = vmatpush.bf16.msrb.mxu1 %v3462_v34 }
 0x8c6   : > { %v8652_v32 = vpop.eup %6781 }
 0x8c7   : > { %v3436_v55 = vsel %vm2526_vm3, %v8652_v32, 0.0 }
 0x8c8   : > { %3437 = vadd.xlane.f32.xlu0 %v3436_v55 }
 0x8e6   : > { %v3420_v39 = vpop.xlane.xlu1 %3419 }
 0x8e9   : > { %v3144_v30 = vpop.xlane.xlu0 %3143 }
 0x8f1   : > { %v3417_v17 = vpop.xlane.xlu0 %3416 }
 0x8f2   : > { %6783 = vrcp.f32 %v3417_v17 }
 0x8f3   : > { %6785 = vrcp.f32 %v3420_v39 }
 0x8f4   : > { %6787 = vrcp.f32 %v3144_v30 }
 0x8f8   : > { %v6784_v27 = vpop.eup %6783 }
 0x8f9   : > { %v3150_v6 = vpop.xlane.xlu0 %3149  ;;  %v6786_v16 = vpop.eup %6785  ;;  %v3447_v0 = vmul.f32 %v6784_v27, %v8590_v44 }
 0x8fa   : > { %v3448_v63 = vmul.f32 %v6786_v16, %v8580_v5  ;;  %v6788_v12 = vpop.eup %6787 }
 0x8fb   : > { %v3170_v9 = vmul.f32 %v6788_v12, %v8584_v45 }
 0x8fc   : > { %v3147_v21 = vpop.xlane.xlu2 %3146  ;;  %v3455_v29 = vpack.c.bf16 %v3448_v63, %v3447_v0 }
 0x8fd   : > { %6789 = vrcp.f32 %v3147_v21 }
 0x8fe   : > { %v3460_v51 = vpop.permute.xlu1 %3459 }
 0x8ff   : > { %3490 = vmatpush.bf16.msrb.mxu1 %v3460_v51 }
 0x901   : > { %v3423_v54 = vpop.xlane.xlu0 %3422 }
 0x902   : > { %6071 = vmatmul.msk.bf16.vlgmr.msrb.gmra.mxu1 %vm2526_vm3, %v3455_v29  ;;  %6791 = vrcp.f32 %v3423_v54 }
 0x903   : > { %v6790_v24 = vpop.eup %6789 }
 0x904   : > { %v3171_v7 = vmul.f32 %v6790_v24, %v8599_v47  ;;  %v2724_v47 = vadd.f32 %v8429_v14, %v8455_v22  ;;  %v3156_v59 = vpop.xlane.xlu2 %3155  ;;  %v6459_v24 = vld [vmem:[%s10088_s5 + $0x30] sm:$0xff] }
 0x905   : > { %3547 = vmatpush.bf16.msrb.mxu2 %v6459_v24 }
 0x906   : > { %v3177_v62 = vpack.c.bf16 %v3171_v7, %v3170_v9 }
 0x908   : > { %6052 = vmatmul.msk.bf16.gmra.mxu2 %vm2526_vm3, %v3177_v62  ;;  %v6792_v5 = vpop.eup %6791 }
 0x909   : > { %v3426_v44 = vpop.xlane.xlu0 %3425  ;;  %v3449_v26 = vmul.f32 %v6792_v5, %v8605_v52 }
 0x90a   : > { %6793 = vrcp.f32 %v3426_v44 }
 0x910   : > { %v6794_v60 = vpop.eup %6793 }
 0x911   : > { %v3450_v46 = vmul.f32 %v6794_v60, %v8616_v58  ;;  %v3429_v43 = vpop.xlane.xlu0 %3428 }
 0x912   : > { %6795 = vrcp.f32 %v3429_v43 }
 0x913   : > { %v3456_v56 = vpack.c.bf16 %v3450_v46, %v3449_v26 }
 0x915   : > { %6072 = vmatmul.msk.bf16.gmra.mxu1 %vm2526_vm3, %v3456_v56 }
 0x918   : > { %v6796_v8 = vpop.eup %6795 }
 0x919   : > { %v3432_v45 = vpop.xlane.xlu0 %3431  ;;  %v3451_v58 = vmul.f32 %v6796_v8, %v8621_v10 }
 0x91a   : > { %6797 = vrcp.f32 %v3432_v45 }
 0x91b   : > { %6799 = vrcp.f32 %v3150_v6 }
 0x91d   : > { %v3001_v15 = vpop.f32.mrf.mxu3 }
 0x91e   : > { %v8667_v13 = vadd.f32 %v3001_v15, %v2724_v47 }
 0x920   : > { %v6798_v52 = vpop.eup %6797 }
 0x921   : > { %v3452_v2 = vmul.f32 %v6798_v52, %v8628_v11  ;;  %v6800_v57 = vpop.eup %6799  ;;  %v3159_v55 = vpop.xlane.xlu0 %3158 }
 0x922   : > { %v3172_v35 = vmul.f32 %v6800_v57, %v8596_v23  ;;  %v6955_v57 = vld [vmem:[%s7380_s15] sm:$0xff] }
 0x923   : > { %v3457_v38 = vpack.c.bf16 %v3452_v2, %v3451_v58 }
 0x925   : > { %6073 = vmatmul.msk.bf16.gmra.mxu1 %vm2526_vm3, %v3457_v38  ;;  %v8674_v42 = vpop.f32.mrf.mxu3 }
 0x929   : > { %v3153_v22 = vpop.xlane.xlu1 %3152 }
 0x92a   : > { %6801 = vrcp.f32 %v3153_v22 }
 0x92b   : > { %6803 = vrcp.f32 %v3159_v55 }
 0x92c   : > { %6805 = vrcp.f32 %v3156_v59 }
 0x92d   : > { %v3006_v10 = vpop.f32.mrf.mxu3 }
 0x92e   : > { %v8679_v11 = vadd.f32 %v3006_v10, %v2726_v37  ;;  %v2721_v37 = vadd.f32 %v8429_v14, %v8434_v19 }
 0x930   : > { %v6802_v36 = vpop.eup %6801 }
 0x931   : > { %v3173_v34 = vmul.f32 %v6802_v36, %v8639_v3  ;;  %v6804_v27 = vpop.eup %6803  ;;  %v3012_v36 = vadd.f32 %v8436_v40, %v2721_v37  ;;  %v6957_v40 = vld [vmem:[%s7380_s15 + $0x10] sm:$0xff] }
 0x932   : > { %v6806_v6 = vpop.eup %6805  ;;  %v3175_v16 = vmul.f32 %v6804_v27, %v8634_v33  ;;  %v2723_v27 = vadd.f32 %v8429_v14, %v8445_v1 }
 0x933   : > { %v3178_v30 = vpack.c.bf16 %v3173_v34, %v3172_v35  ;;  %v3435_v17 = vpop.xlane.xlu2 %3434  ;;  %v3174_v23 = vmul.f32 %v6806_v6, %v8610_v61 }
 0x934   : > { %6807 = vrcp.f32 %v3435_v17 }
 0x935   : > { %6053 = vmatmul.msk.bf16.gmra.mxu2 %vm2526_vm3, %v3178_v30  ;;  %v3179_v12 = vpack.c.bf16 %v3175_v16, %v3174_v23  ;;  %v3008_v2 = vpop.f32.mrf.mxu3  ;;  %v6956_v30 = vld [vmem:[%s7380_s15 + $0x8] sm:$0xff] }
 0x93a   : > { %v3213_v39 = vpop.f32.mrf.mxu2  ;;  %v6808_v0 = vpop.eup %6807 }
 0x93b   : > { %v3438_v49 = vpop.xlane.xlu0 %3437  ;;  %v3453_v63 = vmul.f32 %v6808_v0, %v8648_v53  ;;  %v3014_v0 = vadd.f32 %v8477_v4, %v2723_v27  ;;  %v6959_v4 = vld [vmem:[%s7380_s15 + $0x20] sm:$0xff] }
 0x93c   : > { %6809 = vrcp.f32 %v3438_v49 }
 0x942   : > { %v6810_v3 = vpop.eup %6809  ;;  %v3215_v21 = vpop.f32.mrf.mxu2 }
 0x943   : > { %v3454_v51 = vmul.f32 %v6810_v3, %v8652_v32  ;;  %v3233_v29 = vpack.c.bf16 %v3215_v21, %v3213_v39 }
 0x945   : > { %6054 = vmatmul.msk.bf16.gmra.mxu2 %vm2526_vm3, %v3179_v12  ;;  %6063 = vmatmul.msk.bf16.vlgmr.msra.gmra.mxu3 %vm2472_vm2, %v3233_v29  ;;  %v3458_v54 = vpack.c.bf16 %v3454_v51, %v3453_v63  ;;  %v6958_v63 = vld [vmem:[%s7380_s15 + $0x18] sm:$0xff] }
 0x947   : > { %6074 = vmatmul.msk.bf16.gmra.mxu1 %vm2526_vm3, %v3458_v54  ;;  %v2725_v54 = vadd.f32 %v8429_v14, %v8461_v50 }
 0x97f   : > { %v3492_v33 = vpop.f32.mrf.mxu1 }
 0x987   : > { %v3494_v9 = vpop.f32.mrf.mxu1 }
 0x988   : > { %v3512_v61 = vpack.c.bf16 %v3494_v9, %v3492_v33  ;;  %v3016_v33 = vadd.f32 %v8674_v42, %v2725_v54 }
 0x98a   : > { %6083 = vmatmul.msk.bf16.vlgmr.msrb.gmra.mxu2 %vm2472_vm2, %v3512_v61 }
 0x98b   : > { %v3218_v7 = vpop.f32.mrf.mxu2 }
 0x992   : > { %v3497_v53 = vpop.f32.mrf.mxu1 }
 0x993   : > { %v3220_v62 = vpop.f32.mrf.mxu2 }
 0x994   : > { %v3234_v32 = vpack.c.bf16 %v3220_v62, %v3218_v7  ;;  %v6960_v62 = vld [vmem:[%s7380_s15 + $0x28] sm:$0xff] }
 0x996   : > { %6064 = vmatmul.msk.bf16.gmra.mxu3 %vm2472_vm2, %v3234_v32 }
 0x99a   : > { %v3499_v44 = vpop.f32.mrf.mxu1 }
 0x99b   : > { %v3513_v5 = vpack.c.bf16 %v3499_v44, %v3497_v53 }
 0x99d   : > { %6084 = vmatmul.msk.bf16.gmra.mxu2 %vm2472_vm2, %v3513_v5 }
 0x9a2   : > { %v3502_v60 = vpop.f32.mrf.mxu1 }
 0x9aa   : > { %v3504_v26 = vpop.f32.mrf.mxu1 }
 0x9ab   : > { %v3514_v46 = vpack.c.bf16 %v3504_v26, %v3502_v60  ;;  %v6961_v60 = vld [vmem:[%s7380_s15 + $0x30] sm:$0xff] }
 0x9ad   : > { %6085 = vmatmul.msk.bf16.gmra.mxu2 %vm2472_vm2, %v3514_v46  ;;  %v2727_v46 = vadd.f32 %v8429_v14, %v8465_v41  ;;  %v6962_v14 = vld [vmem:[%s7380_s15 + $0x38] sm:$0xff] }
 0x9b8   : > { %v3223_v43 = vpop.f32.mrf.mxu2 }
 0x9c0   : > { %v3225_v56 = vpop.f32.mrf.mxu2 }
 0x9c1   : > { %v3235_v45 = vpack.c.bf16 %v3225_v56, %v3223_v43 }
 0x9c3   : > { %6065 = vmatmul.msk.bf16.gmra.mxu3 %vm2472_vm2, %v3235_v45  ;;  %v3018_v45 = vadd.f32 %v3008_v2, %v2727_v46  ;;  %v6486_v46 = vld [vmem:[%s10091_s12 + $0xcc] sm:$0xf] }
 0x9c4   : > { %v3507_v47 = vpop.f32.mrf.mxu1 }
 0x9c8   : > { %v3228_v8 = vpop.f32.mrf.mxu2  ;;  %v3270_v38 = vpop.f32.mrf.mxu3 }
 0x9c9   : > { %v3290_v48 = vadd.f32 %v3270_v38, %v8432_v18 }
 0x9cc   : > { %v3509_v15 = vpop.f32.mrf.mxu1 }
 0x9cd   : > { %v3515_v31 = vpack.c.bf16 %v3509_v15, %v3507_v47 }
 0x9cf   : > { %6086 = vmatmul.msk.bf16.gmra.mxu2 %vm2472_vm2, %v3515_v31 }
 0x9d0   : > { %v3230_v52 = vpop.f32.mrf.mxu2  ;;  %v3272_v59 = vpop.f32.mrf.mxu3 }
 0x9d1   : > { %v3236_v58 = vpack.c.bf16 %v3230_v52, %v3228_v8  ;;  %v3291_v35 = vadd.f32 %v3272_v59, %v3012_v36 }
 0x9d3   : > { %6066 = vmatmul.msk.bf16.gmra.mxu3 %vm2472_vm2, %v3236_v58 }
 0xa0d   : > { %v3549_v25 = vpop.f32.mrf.mxu2 }
 0xa0e   : > { %v3569_v22 = vadd.f32 %v3549_v25, %v3290_v48 }
 0xa10   : > { %v8703_v10 = vadd.f32 %v6955_v57, %v3569_v22 }
 0xa12   : > { %3587 = vadd.xlane.f32.xlu2 %v8703_v10 }
 0xa15   : > { %v3551_v34 = vpop.f32.mrf.mxu2 }
 0xa16   : > { %v3570_v55 = vadd.f32 %v3551_v34, %v3291_v35 }
 0xa18   : > { %v8708_v18 = vadd.f32 %v6956_v30, %v3570_v55 }
 0xa19   : > { %v3275_v17 = vpop.f32.mrf.mxu3 }
 0xa1a   : > { %3589 = vadd.xlane.f32.xlu0 %v8708_v18  ;;  %v3292_v19 = vadd.f32 %v3275_v17, %v8441_v28 }
 0xa20   : > { %v3554_v39 = vpop.f32.mrf.mxu2 }
 0xa21   : > { %v3571_v49 = vadd.f32 %v3554_v39, %v3292_v19  ;;  %v3277_v16 = vpop.f32.mrf.mxu3 }
 0xa22   : > { %v3293_v23 = vadd.f32 %v3277_v16, %v3014_v0 }
 0xa23   : > { %v8715_v6 = vadd.f32 %v6957_v40, %v3571_v49 }
 0xa25   : > { %3591 = vadd.xlane.f32.xlu2 %v8715_v6 }
 0xa28   : > { %v3556_v3 = vpop.f32.mrf.mxu2 }
 0xa29   : > { %v3572_v21 = vadd.f32 %v3556_v3, %v3293_v23  ;;  %v6201_v3 = vld [vmem:[%s10091_s12 + $0xe0] sm:$0xf] }
 0xa2b   : > { %v8720_v28 = vadd.f32 %v6958_v63, %v3572_v21  ;;  %v6491_v21 = vld [vmem:[%s10091_s12 + $0xec] sm:$0xf0]  ;;  %v6489_v63 = vld [vmem:[%s10091_s12 + $0xe4] sm:$0xf] }
 0xa2d   : > { %3593 = vadd.xlane.f32.xlu1 %v8720_v28 }
 0xa30   : > { %v3559_v51 = vpop.f32.mrf.mxu2 }
 0xa38   : > { %v3561_v7 = vpop.f32.mrf.mxu2 }
 0xa46   : > { %v3280_v1 = vpop.f32.mrf.mxu3 }
 0xa47   : > { %v3294_v29 = vadd.f32 %v3280_v1, %v8667_v13  ;;  %v6203_v1 = vld [vmem:[%s10091_s12 + $0xf0] sm:$0xf0] }
 0xa48   : > { %v6206_v54 = vor.u32 %v6489_v63, %v6203_v1  ;;  %v6473_v63 = vld [vmem:[%s10091_s12 + $0x64] sm:$0xf]  ;;  %v6139_v1 = vld [vmem:[%s10091_s12 + $0x70] sm:$0xf0] }
 0xa49   : > { %v3573_v12 = vadd.f32 %v3559_v51, %v3294_v29  ;;  %v6202_v51 = vor.u32 %v6491_v21, %v6201_v3  ;;  %v6209_v29 = vld [vmem:[%s10091_s12 + $0xe8] sm:$0xf]  ;;  %v6137_v3 = vld [vmem:[%s10091_s12 + $0x60] sm:$0xf]  ;;  %v6475_v21 = vld [vmem:[%s10091_s12 + $0x6c] sm:$0xf0] }
 0xa4a   : > { %4004 = vmatpush.bf16.msrb.mxu0 %v6206_v54  ;;  %v6142_v54 = vor.u32 %v6473_v63, %v6139_v1 }
 0xa4b   : > { %v8727_v24 = vadd.f32 %v6959_v4, %v3573_v12  ;;  %v6492_v12 = vld [vmem:[%s10091_s12 + $0xf4] sm:$0xf0]  ;;  %3975 = vmatpush.bf16.msrb.mxu3 %v6202_v51  ;;  %v6138_v51 = vor.u32 %v6475_v21, %v6137_v3  ;;  %v6462_v3 = vld [vmem:[%s10091_s12 + $0xc] sm:$0xf]  ;;  %v6099_v21 = vld [vmem:[%s10091_s12 + $0x18] sm:$0xf0] }
 0xa4c   : > { %v6210_v4 = vor.u32 %v6492_v12, %v6209_v29  ;;  %v6145_v29 = vld [vmem:[%s10091_s12 + $0x68] sm:$0xf]  ;;  %v6476_v12 = vld [vmem:[%s10091_s12 + $0x74] sm:$0xf0]  ;;  %v6102_v63 = vor.u32 %v6462_v3, %v6099_v21 }
 0xa4d   : > { %3595 = vadd.xlane.f32.xlu0 %v8727_v24 }
 0xa4e   : > { %v3282_v9 = vpop.f32.mrf.mxu3  ;;  %4033 = vmatpush.bf16.msra.mxu1 %v6210_v4  ;;  %v6146_v4 = vor.u32 %v6476_v12, %v6145_v29 }
 0xa4f   : > { %v3295_v61 = vadd.f32 %v3282_v9, %v3016_v33  ;;  %v6490_v33 = vld [vmem:[%s10091_s12 + $0xec] sm:$0xf]  ;;  %v6211_v9 = vld [vmem:[%s10091_s12 + $0xf8] sm:$0xf0] }
 0xa51   : > { %v3574_v53 = vadd.f32 %v3561_v7, %v3295_v61  ;;  %v6214_v61 = vor.u32 %v6490_v33, %v6211_v9  ;;  %v6185_v7 = vld [vmem:[%s10091_s12 + $0xc0] sm:$0xf]  ;;  %v6474_v33 = vld [vmem:[%s10091_s12 + $0x6c] sm:$0xf]  ;;  %v6147_v9 = vld [vmem:[%s10091_s12 + $0x78] sm:$0xf0] }
 0xa52   : > { %v3564_v44 = vpop.f32.mrf.mxu2 }
 0xa53   : > { %v8732_v32 = vadd.f32 %v6960_v62, %v3574_v53  ;;  %v6487_v53 = vld [vmem:[%s10091_s12 + $0xcc] sm:$0xf0]  ;;  %v6485_v62 = vld [vmem:[%s10091_s12 + $0xc4] sm:$0xf]  ;;  %4062 = vmatpush.bf16.msra.mxu2 %v6214_v61  ;;  %v6150_v61 = vor.u32 %v6474_v33, %v6147_v9 }
 0xa55   : > { %3597 = vadd.xlane.f32.xlu2 %v8732_v32 }
 0xa56   : > { %v3285_v13 = vpop.f32.mrf.mxu3 }
 0xa57   : > { %v3296_v50 = vadd.f32 %v3285_v13, %v8679_v11  ;;  %v6186_v13 = vor.u32 %v6487_v53, %v6185_v7  ;;  %v6121_v7 = vld [vmem:[%s10091_s12 + $0x40] sm:$0xf]  ;;  %v6471_v53 = vld [vmem:[%s10091_s12 + $0x4c] sm:$0xf0] }
 0xa59   : > { %v3575_v5 = vadd.f32 %v3564_v44, %v3296_v50  ;;  %v6187_v50 = vld [vmem:[%s10091_s12 + $0xd0] sm:$0xf0]  ;;  %v6193_v44 = vld [vmem:[%s10091_s12 + $0xc8] sm:$0xf]  ;;  %3976 = vmatpush.bf16.msrb.mxu3 %v6186_v13  ;;  %v6122_v13 = vor.u32 %v6471_v53, %v6121_v7 }
 0xa5a   : > { %v3566_v15 = vpop.f32.mrf.mxu2 }
 0xa5b   : > { %v8737_v26 = vadd.f32 %v6961_v60, %v3575_v5  ;;  %v6488_v5 = vld [vmem:[%s10091_s12 + $0xd4] sm:$0xf0]  ;;  %v6190_v60 = vor.u32 %v6485_v62, %v6187_v50  ;;  %v6469_v62 = vld [vmem:[%s10091_s12 + $0x44] sm:$0xf]  ;;  %v6123_v50 = vld [vmem:[%s10091_s12 + $0x50] sm:$0xf0] }
 0xa5d   : > { %3599 = vadd.xlane.f32.xlu2 %v8737_v26  ;;  %4005 = vmatpush.bf16.msrb.mxu0 %v6190_v60  ;;  %v6126_v60 = vor.u32 %v6469_v62, %v6123_v50 }
 0xa5e   : > { %v3287_v56 = vpop.f32.mrf.mxu3 }
 0xa5f   : > { %v3297_v11 = vadd.f32 %v3287_v56, %v3018_v45  ;;  %v6169_v45 = vld [vmem:[%s10091_s12 + $0xa0] sm:$0xf] }
 0xa61   : > { %v3576_v52 = vadd.f32 %v3566_v15, %v3297_v11  ;;  %v6483_v11 = vld [vmem:[%s10091_s12 + $0xac] sm:$0xf0] }
 0xa62   : > { %v6170_v15 = vor.u32 %v6483_v11, %v6169_v45  ;;  %v6105_v11 = vld [vmem:[%s10091_s12 + $0x20] sm:$0xf] }
 0xa63   : > { %v8753_v41 = vadd.f32 %v6962_v14, %v3576_v52  ;;  %v6177_v52 = vld [vmem:[%s10091_s12 + $0xa8] sm:$0xf] }
 0xa64   : > { %3977 = vmatpush.bf16.msrb.mxu3 %v6170_v15  ;;  %v6465_v15 = vld [vmem:[%s10091_s12 + $0x24] sm:$0xf] }
 0xa85   : > { %v3588_v42 = vpop.xlane.xlu2 %3587 }
 0xa86   : > { %v3603_v43 = vmul.f32 %v3588_v42, %v7871_v20  ;;  %v6194_v42 = vor.u32 %v6488_v5, %v6193_v44  ;;  %v6129_v44 = vld [vmem:[%s10091_s12 + $0x48] sm:$0xf]  ;;  %v6472_v5 = vld [vmem:[%s10091_s12 + $0x54] sm:$0xf0] }
 0xa88   : > { %v8744_v47 = vsub.f32 %v8703_v10, %v3603_v43  ;;  %v6195_v43 = vld [vmem:[%s10091_s12 + $0xd8] sm:$0xf0]  ;;  %4034 = vmatpush.bf16.msra.mxu1 %v6194_v42  ;;  %v6130_v42 = vor.u32 %v6472_v5, %v6129_v44 }
 0xa89   : > { %v6198_v56 = vor.u32 %v6486_v46, %v6195_v43  ;;  %v6470_v46 = vld [vmem:[%s10091_s12 + $0x4c] sm:$0xf]  ;;  %v6131_v43 = vld [vmem:[%s10091_s12 + $0x58] sm:$0xf0] }
 0xa8a   : > { %v3619_v8 = vmul.f32 %v8744_v47, %v8744_v47 }
 0xa8b   : > { %4063 = vmatpush.bf16.msra.mxu2 %v6198_v56  ;;  %v6134_v56 = vor.u32 %v6470_v46, %v6131_v43 }
 0xa8c   : > { %3627 = vadd.xlane.f32.xlu1 %v3619_v8  ;;  %v6481_v8 = vld [vmem:[%s10091_s12 + $0xa4] sm:$0xf] }
 0xa8d   : > { %v3590_v31 = vpop.xlane.xlu0 %3589 }
 0xa8e   : > { %v3604_v58 = vmul.f32 %v3590_v31, %v7871_v20  ;;  %v6171_v31 = vld [vmem:[%s10091_s12 + $0xb0] sm:$0xf0] }
 0xa8f   : > { %v6174_v14 = vor.u32 %v6481_v8, %v6171_v31  ;;  %v6467_v8 = vld [vmem:[%s10091_s12 + $0x2c] sm:$0xf0] }
 0xa90   : > { %v8750_v38 = vsub.f32 %v8708_v18, %v3604_v58  ;;  %v6484_v58 = vld [vmem:[%s10091_s12 + $0xb4] sm:$0xf0] }
 0xa91   : > { %4006 = vmatpush.bf16.msrb.mxu0 %v6174_v14  ;;  %v6113_v14 = vld [vmem:[%s10091_s12 + $0x28] sm:$0xf] }
 0xa92   : > { %v3620_v2 = vmul.f32 %v8750_v38, %v8750_v38 }
 0xa94   : > { %3601 = vadd.xlane.f32.xlu1 %v8753_v41  ;;  %3629 = vadd.xlane.f32.xlu0 %v3620_v2  ;;  %v6178_v2 = vor.u32 %v6484_v58, %v6177_v52  ;;  %v6106_v52 = vor.u32 %v6467_v8, %v6105_v11  ;;  %v6107_v58 = vld [vmem:[%s10091_s12 + $0x30] sm:$0xf0]  ;;  %v8866_v11 = vld [vmem:[%s10093_s28] ss:$0 sm:$0xff] }
 0xa96   : > { %4035 = vmatpush.bf16.msra.mxu1 %v6178_v2  ;;  %v6468_v2 = vld [vmem:[%s10091_s12 + $0x34] sm:$0xf0] }
 0xa98   : > { %v3592_v48 = vpop.xlane.xlu2 %3591 }
 0xa99   : > { %v3605_v25 = vmul.f32 %v3592_v48, %v7871_v20  ;;  %v6482_v48 = vld [vmem:[%s10091_s12 + $0xac] sm:$0xf] }
 0xa9b   : > { %v8760_v22 = vsub.f32 %v8715_v6, %v3605_v25  ;;  %v6179_v25 = vld [vmem:[%s10091_s12 + $0xb8] sm:$0xf0] }
 0xa9d   : > { %v3621_v37 = vmul.f32 %v8760_v22, %v8760_v22 }
 0xa9f   : > { %3631 = vadd.xlane.f32.xlu0 %v3621_v37  ;;  %v6182_v37 = vor.u32 %v6482_v48, %v6179_v25  ;;  %v6110_v48 = vor.u32 %v6465_v15, %v6107_v58  ;;  %v6114_v25 = vor.u32 %v6468_v2, %v6113_v14 }
 0xaa0   : > { %v3594_v57 = vpop.xlane.xlu1 %3593 }
 0xaa1   : > { %v3606_v59 = vmul.f32 %v3594_v57, %v7871_v20  ;;  %v6153_v57 = vld [vmem:[%s10091_s12 + $0x80] sm:$0xf]  ;;  %4064 = vmatpush.bf16.msra.mxu2 %v6182_v37  ;;  %v6466_v37 = vld [vmem:[%s10091_s12 + $0x2c] sm:$0xf] }
 0xaa3   : > { %v8766_v36 = vsub.f32 %v8720_v28, %v3606_v59  ;;  %v6479_v59 = vld [vmem:[%s10091_s12 + $0x8c] sm:$0xf0] }
 0xaa5   : > { %v3622_v35 = vmul.f32 %v8766_v36, %v8766_v36 }
 0xaa7   : > { %3633 = vadd.xlane.f32.xlu2 %v3622_v35  ;;  %v6477_v35 = vld [vmem:[%s10091_s12 + $0x84] sm:$0xf] }
 0xac0   : > { %v3596_v34 = vpop.xlane.xlu0 %3595 }
 0xac1   : > { %v3607_v55 = vmul.f32 %v3596_v34, %v7871_v20  ;;  %v6154_v34 = vor.u32 %v6479_v59, %v6153_v57  ;;  %v6115_v57 = vld [vmem:[%s10091_s12 + $0x38] sm:$0xf0] }
 0xac3   : > { %v8772_v30 = vsub.f32 %v8727_v24, %v3607_v55  ;;  %v6155_v55 = vld [vmem:[%s10091_s12 + $0x90] sm:$0xf0]  ;;  %3978 = vmatpush.bf16.msrb.mxu3 %v6154_v34  ;;  %v6089_v34 = vld [vmem:[%s10091_s12] sm:$0xf] }
 0xac5   : > { %v3623_v17 = vmul.f32 %v8772_v30, %v8772_v30 }
 0xac7   : > { %3635 = vadd.xlane.f32.xlu1 %v3623_v17  ;;  %v6161_v17 = vld [vmem:[%s10091_s12 + $0x88] sm:$0xf]  ;;  %3979 = vmatpush.bf16.msrb.mxu3 %v6138_v51 }
 0xac8   : > { %v3598_v19 = vpop.xlane.xlu2 %3597 }
 0xac9   : > { %v3608_v39 = vmul.f32 %v3598_v19, %v7871_v20  ;;  %v6480_v19 = vld [vmem:[%s10091_s12 + $0x94] sm:$0xf0] }
 0xacb   : > { %v8778_v49 = vsub.f32 %v8732_v32, %v3608_v39  ;;  %v6158_v39 = vor.u32 %v6477_v35, %v6155_v55  ;;  %3980 = vmatpush.bf16.msrb.mxu3 %v6122_v13  ;;  %v6118_v35 = vor.u32 %v6466_v37, %v6115_v57  ;;  %v6463_v55 = vld [vmem:[%s10091_s12 + $0xc] sm:$0xf0] }
 0xacd   : > { %v3624_v27 = vmul.f32 %v8778_v49, %v8778_v49  ;;  %4007 = vmatpush.bf16.msrb.mxu0 %v6158_v39  ;;  %v6091_v39 = vld [vmem:[%s10091_s12 + $0x10] sm:$0xf0] }
 0xacf   : > { %3637 = vadd.xlane.f32.xlu0 %v3624_v27  ;;  %v6162_v27 = vor.u32 %v6480_v19, %v6161_v17  ;;  %3981 = vmatpush.bf16.msrb.mxu3 %v6106_v52  ;;  %v6461_v17 = vld [vmem:[%s10091_s12 + $0x4] sm:$0xf]  ;;  %v6090_v19 = vor.u32 %v6463_v55, %v6089_v34 }
 0xad0   : > { %v3600_v40 = vpop.xlane.xlu2 %3599 }
 0xad1   : > { %v3609_v16 = vmul.f32 %v3600_v40, %v7871_v20  ;;  %v6478_v40 = vld [vmem:[%s10091_s12 + $0x8c] sm:$0xf]  ;;  %4036 = vmatpush.bf16.msra.mxu1 %v6162_v27  ;;  %4008 = vmatpush.bf16.msrb.mxu0 %v6142_v54  ;;  %v6097_v27 = vld [vmem:[%s10091_s12 + $0x8] sm:$0xf] }
 0xad3   : > { %v8784_v0 = vsub.f32 %v8737_v26, %v3609_v16  ;;  %v6163_v16 = vld [vmem:[%s10091_s12 + $0x98] sm:$0xf0]  ;;  %3982 = vmatpush.bf16.msrb.mxu3 %v6090_v19 }
 0xad5   : > { %v3625_v23 = vmul.f32 %v8784_v0, %v8784_v0  ;;  %4037 = vmatpush.bf16.msra.mxu1 %v6146_v4  ;;  %4009 = vmatpush.bf16.msrb.mxu0 %v6126_v60 }
 0xad7   : > { %3639 = vadd.xlane.f32.xlu2 %v3625_v23  ;;  %v6166_v23 = vor.u32 %v6478_v40, %v6163_v16  ;;  %v6464_v40 = vld [vmem:[%s10091_s12 + $0x14] sm:$0xf0]  ;;  %v6094_v16 = vor.u32 %v6461_v17, %v6091_v39 }
 0xad9   : > { %4065 = vmatpush.bf16.msra.mxu2 %v6166_v23  ;;  %4038 = vmatpush.bf16.msra.mxu1 %v6130_v42  ;;  %v6098_v23 = vor.u32 %v6464_v40, %v6097_v27 }
 0xada   : > { %4010 = vmatpush.bf16.msrb.mxu0 %v6110_v48  ;;  %v8875_v48 = vld [vmem:[%s10095_s13] ss:$0 sm:$0xff] }
 0xadd   : > { %4066 = vmatpush.bf16.msra.mxu2 %v6150_v61  ;;  %4039 = vmatpush.bf16.msra.mxu1 %v6114_v25 }
 0xade   : > { %4011 = vmatpush.bf16.msrb.mxu0 %v6094_v16 }
 0xae1   : > { %4067 = vmatpush.bf16.msra.mxu2 %v6134_v56  ;;  %4040 = vmatpush.bf16.msra.mxu1 %v6098_v23 }
 0xae5   : > { %4068 = vmatpush.bf16.msra.mxu2 %v6118_v35 }
 0xae9   : > { %4069 = vmatpush.bf16.msra.mxu2 %v6102_v63 }
 0xaff   : > { %v3628_v45 = vpop.xlane.xlu1 %3627 }
 0xb00   : > { %v3643_v31 = vmul.f32 %v3628_v45, %v7871_v20 }
 0xb02   : > { %v3651_v59 = vadd.f32 1e-05, %v3643_v31 }
 0xb04   : > { %6811 = vrsqrt.f32 %v3651_v59  ;;  %vm3665_vm5 = vweird.f32 %v3651_v59 }
 0xb07   : > { %v3602_v51 = vpop.xlane.xlu1 %3601  ;;  %v3630_v1 = vpop.xlane.xlu0 %3629 }
 0xb08   : > { %v3610_v29 = vmul.f32 %v3602_v51, %v7871_v20  ;;  %v3644_v12 = vmul.f32 %v3630_v1, %v7871_v20 }
 0xb0a   : > { %v6812_v54 = vpop.eup %6811  ;;  %v8856_v4 = vsub.f32 %v8753_v41, %v3610_v29  ;;  %v3652_v33 = vadd.f32 1e-05, %v3644_v12 }
 0xb0b   : > { %v3660_v9 = vmul.f32 %v6812_v54, %v3651_v59  ;;  %vm3666_vm4 = vweird.f32 %v6812_v54 }
 0xb0c   : > { %6813 = vrsqrt.f32 %v3652_v33  ;;  %v3626_v61 = vmul.f32 %v8856_v4, %v8856_v4  ;;  %vm3667_vm6 = vmor %vm3665_vm5, %vm3666_vm4  ;;  %vm3675_vm8 = vweird.f32 %v3652_v33 }
 0xb0d   : > { %v3661_v7 = vmul.f32 %v6812_v54, %v3660_v9 }
 0xb0e   : > { %3641 = vadd.xlane.f32.xlu1 %v3626_v61 }
 0xb0f   : > { %v3662_v53 = vmul.f32 0.5, %v3661_v7 }
 0xb11   : > { %v3663_v62 = vsub.f32 1.5, %v3662_v53 }
 0xb12   : > { %v6814_v13 = vpop.eup %6813  ;;  %v3632_v50 = vpop.xlane.xlu0 %3631 }
 0xb13   : > { %v3664_v44 = vmul.f32 %v6812_v54, %v3663_v62  ;;  %v3670_v5 = vmul.f32 %v6814_v13, %v3652_v33  ;;  %v3645_v60 = vmul.f32 %v3632_v50, %v7871_v20  ;;  %vm3676_vm7 = vweird.f32 %v6814_v13 }
 0xb14   : > { %vm3677_vm9 = vmor %vm3675_vm8, %vm3676_vm7 }
 0xb15   : > { %v3671_v42 = vmul.f32 %v6814_v13, %v3670_v5  ;;  %v3653_v46 = vadd.f32 1e-05, %v3645_v60  ;;  %v3668_v43 = vsel %vm3667_vm6, %v6812_v54, %v3664_v44 }
 0xb16   : > { %v3739_v8 = vmul.f32 %v3668_v43, %v8744_v47 }
 0xb17   : > { %v3672_v56 = vmul.f32 0.5, %v3671_v42  ;;  %6815 = vrsqrt.f32 %v3653_v46  ;;  %vm3685_vm11 = vweird.f32 %v3653_v46 }
 0xb18   : > { %v3750_v25 = vmul.f32 %v8866_v11, %v3739_v8 }
 0xb19   : > { %v3673_v45 = vsub.f32 1.5, %v3672_v56 }
 0xb1a   : > { %v3634_v15 = vpop.xlane.xlu2 %3633  ;;  %v3761_v35 = vadd.f32 %v8875_v48, %v3750_v25 }
 0xb1b   : > { %v3674_v31 = vmul.f32 %v6814_v13, %v3673_v45  ;;  %v3646_v52 = vmul.f32 %v3634_v15, %v7871_v20 }
 0xb1d   : > { %v6816_v58 = vpop.eup %6815  ;;  %v3678_v14 = vsel %vm3677_vm9, %v6814_v13, %v3674_v31  ;;  %v3654_v2 = vadd.f32 1e-05, %v3646_v52 }
 0xb1e   : > { %v3740_v37 = vmul.f32 %v3678_v14, %v8750_v38  ;;  %v3680_v47 = vmul.f32 %v6816_v58, %v3653_v46  ;;  %vm3686_vm10 = vweird.f32 %v6816_v58 }
 0xb1f   : > { %6817 = vrsqrt.f32 %v3654_v2  ;;  %vm3687_vm12 = vmor %vm3685_vm11, %vm3686_vm10  ;;  %vm3695_vm14 = vweird.f32 %v3654_v2 }
 0xb20   : > { %v3751_v57 = vmul.f32 %v8866_v11, %v3740_v37  ;;  %v3681_v59 = vmul.f32 %v6816_v58, %v3680_v47 }
 0xb22   : > { %v3762_v34 = vadd.f32 %v8875_v48, %v3751_v57  ;;  %v3682_v55 = vmul.f32 0.5, %v3681_v59 }
 0xb24   : > { %v3683_v17 = vsub.f32 1.5, %v3682_v55  ;;  %v3769_v19 = vpack.c.bf16 %v3762_v34, %v3761_v35 }
 0xb25   : > { %v6818_v39 = vpop.eup %6817 }
 0xb26   : > { %v3684_v27 = vmul.f32 %v6816_v58, %v3683_v17  ;;  %v3690_v40 = vmul.f32 %v6818_v39, %v3654_v2  ;;  %3983 = vmatmul.bf16.vlgmr.msrb.gmra.mxu3 %v3769_v19  ;;  %4012 = vmatmul.bf16.vlgmr.msrb.gmra.mxu0 %v3769_v19  ;;  %vm3696_vm13 = vweird.f32 %v6818_v39 }
 0xb27   : > { %4041 = vmatmul.bf16.vlgmr.msra.gmra.mxu1 %v3769_v19  ;;  %4070 = vmatmul.bf16.vlgmr.msra.gmra.mxu2 %v3769_v19  ;;  %vm3697_vm15 = vmor %vm3695_vm14, %vm3696_vm13 }
 0xb28   : > { %v3691_v38 = vmul.f32 %v6818_v39, %v3690_v40  ;;  %v3688_v16 = vsel %vm3687_vm12, %v6816_v58, %v3684_v27 }
 0xb29   : > { %v3741_v21 = vmul.f32 %v3688_v16, %v8760_v22 }
 0xb2a   : > { %v3692_v23 = vmul.f32 0.5, %v3691_v38 }
 0xb2b   : > { %v3752_v29 = vmul.f32 %v8866_v11, %v3741_v21 }
 0xb2c   : > { %v3693_v3 = vsub.f32 1.5, %v3692_v23 }
 0xb2d   : > { %v3763_v54 = vadd.f32 %v8875_v48, %v3752_v29 }
 0xb2e   : > { %v3694_v63 = vmul.f32 %v6818_v39, %v3693_v3 }
 0xb30   : > { %v3698_v51 = vsel %vm3697_vm15, %v6818_v39, %v3694_v63 }
 0xb31   : > { %v3742_v1 = vmul.f32 %v3698_v51, %v8766_v36 }
 0xb33   : > { %v3753_v12 = vmul.f32 %v8866_v11, %v3742_v1 }
 0xb35   : > { %v3764_v33 = vadd.f32 %v8875_v48, %v3753_v12 }
 0xb37   : > { %v3770_v9 = vpack.c.bf16 %v3764_v33, %v3763_v54 }
 0xb39   : > { %3988 = vmatmul.bf16.gmra.mxu3 %v3770_v9  ;;  %4017 = vmatmul.bf16.gmra.mxu0 %v3770_v9 }
 0xb3a   : > { %4046 = vmatmul.bf16.gmra.mxu1 %v3770_v9  ;;  %4075 = vmatmul.bf16.gmra.mxu2 %v3770_v9  ;;  %v3636_v22 = vpop.xlane.xlu1 %3635 }
 0xb3b   : > { %v3647_v61 = vmul.f32 %v3636_v22, %v7871_v20 }
 0xb3d   : > { %v3655_v7 = vadd.f32 1e-05, %v3647_v61 }
 0xb3f   : > { %6819 = vrsqrt.f32 %v3655_v7  ;;  %vm3705_vm1 = vweird.f32 %v3655_v7 }
 0xb42   : > { %v3638_v53 = vpop.xlane.xlu0 %3637 }
 0xb43   : > { %v3648_v36 = vmul.f32 %v3638_v53, %v7871_v20 }
 0xb45   : > { %v6820_v62 = vpop.eup %6819  ;;  %v3656_v13 = vadd.f32 1e-05, %v3648_v36  ;;  %v6516_v36 = vld [vmem:[%s7361_s14 + $0xb8] sm:$0xff] }
 0xb46   : > { %v3700_v50 = vmul.f32 %v6820_v62, %v3655_v7  ;;  %vm3706_vm0 = vweird.f32 %v6820_v62  ;;  %5097 = vmatpush.bf16.msrb.mxu1 %v6516_v36 }
 0xb47   : > { %6821 = vrsqrt.f32 %v3656_v13  ;;  %vm3707_vm2 = vmor %vm3705_vm1, %vm3706_vm0  ;;  %vm3715_vm4 = vweird.f32 %v3656_v13 }
 0xb48   : > { %v3701_v44 = vmul.f32 %v6820_v62, %v3700_v50 }
 0xb4a   : > { %v3702_v5 = vmul.f32 0.5, %v3701_v44 }
 0xb4c   : > { %v3703_v60 = vsub.f32 1.5, %v3702_v5 }
 0xb4d   : > { %v6822_v42 = vpop.eup %6821 }
 0xb4e   : > { %v3704_v46 = vmul.f32 %v6820_v62, %v3703_v60  ;;  %v3710_v43 = vmul.f32 %v6822_v42, %v3656_v13  ;;  %vm3716_vm3 = vweird.f32 %v6822_v42  ;;  %v6507_v60 = vld [vmem:[%s7361_s14 + $0x70] sm:$0xff] }
 0xb4f   : > { %vm3717_vm5 = vmor %vm3715_vm4, %vm3716_vm3 }
 0xb50   : > { %v3711_v56 = vmul.f32 %v6822_v42, %v3710_v43  ;;  %v3708_v45 = vsel %vm3707_vm2, %v6820_v62, %v3704_v46 }
 0xb51   : > { %v3743_v31 = vmul.f32 %v3708_v45, %v8772_v30  ;;  %v3640_v30 = vpop.xlane.xlu2 %3639 }
 0xb52   : > { %v3712_v8 = vmul.f32 0.5, %v3711_v56  ;;  %v3649_v59 = vmul.f32 %v3640_v30, %v7871_v20 }
 0xb53   : > { %v3754_v2 = vmul.f32 %v8866_v11, %v3743_v31 }
 0xb54   : > { %v3713_v15 = vsub.f32 1.5, %v3712_v8  ;;  %v3657_v35 = vadd.f32 1e-05, %v3649_v59  ;;  %v6506_v59 = vld [vmem:[%s7361_s14 + $0x68] sm:$0xff] }
 0xb55   : > { %v3765_v37 = vadd.f32 %v8875_v48, %v3754_v2  ;;  %v6524_v2 = vld [vmem:[%s7361_s14 + $0xf8] sm:$0xff] }
 0xb56   : > { %v3714_v52 = vmul.f32 %v6822_v42, %v3713_v15  ;;  %6823 = vrsqrt.f32 %v3657_v35  ;;  %vm3725_vm7 = vweird.f32 %v3657_v35  ;;  %5126 = vmatpush.bf16.msrb.mxu2 %v6524_v2  ;;  %v6522_v2 = vld [vmem:[%s7361_s14 + $0xe8] sm:$0xff] }
 0xb58   : > { %v3718_v58 = vsel %vm3717_vm5, %v6822_v42, %v3714_v52  ;;  %v6515_v42 = vld [vmem:[%s7361_s14 + $0xb0] sm:$0xff] }
 0xb59   : > { %v3744_v14 = vmul.f32 %v3718_v58, %v8778_v49  ;;  %5098 = vmatpush.bf16.msrb.mxu1 %v6515_v42 }
 0xb5b   : > { %v3755_v25 = vmul.f32 %v8866_v11, %v3744_v14  ;;  %v6500_v14 = vld [vmem:[%s7361_s14 + $0x38] sm:$0xff] }
 0xb5c   : > { %v6824_v34 = vpop.eup %6823  ;;  %5039 = vmatpush.bf16.msra.mxu3 %v6500_v14 }
 0xb5d   : > { %v3766_v47 = vadd.f32 %v8875_v48, %v3755_v25  ;;  %v3720_v49 = vmul.f32 %v6824_v34, %v3657_v35  ;;  %vm3726_vm6 = vweird.f32 %v6824_v34  ;;  %v6514_v35 = vld [vmem:[%s7361_s14 + $0xa8] sm:$0xff] }
 0xb5e   : > { %vm3727_vm8 = vmor %vm3725_vm7, %vm3726_vm6  ;;  %5099 = vmatpush.bf16.msrb.mxu1 %v6514_v35 }
 0xb5f   : > { %v3771_v57 = vpack.c.bf16 %v3766_v47, %v3765_v37  ;;  %v3721_v55 = vmul.f32 %v6824_v34, %v3720_v49 }
 0xb61   : > { %3993 = vmatmul.bf16.gmra.mxu3 %v3771_v57  ;;  %4022 = vmatmul.bf16.gmra.mxu0 %v3771_v57  ;;  %v3722_v27 = vmul.f32 0.5, %v3721_v55 }
 0xb62   : > { %4051 = vmatmul.bf16.gmra.mxu1 %v3771_v57  ;;  %4080 = vmatmul.bf16.gmra.mxu2 %v3771_v57 }
 0xb63   : > { %v3723_v40 = vsub.f32 1.5, %v3722_v27 }
 0xb65   : > { %v3724_v16 = vmul.f32 %v6824_v34, %v3723_v40 }
 0xb67   : > { %v3728_v21 = vsel %vm3727_vm8, %v6824_v34, %v3724_v16 }
 0xb68   : > { %v3745_v1 = vmul.f32 %v3728_v21, %v8784_v0  ;;  %v3805_v0 = vld [vmem:[%s10097_s3] sm:$0xf] }
 0xb69   : > { %v8909_v53 = vperm.slane %v3805_v0, 1  ;;  %v8922_v5 = vperm.slane %v3805_v0, 0  ;;  %v8927_v43 = vperm.slane %v3805_v0, 3  ;;  %v6505_v21 = vld [vmem:[%s7361_s14 + $0x60] sm:$0xff] }
 0xb6a   : > { %v3756_v33 = vmul.f32 %v8866_v11, %v3745_v1 }
 0xb6c   : > { %v3767_v22 = vadd.f32 %v8875_v48, %v3756_v33 }
 0xb81   : > { %v3642_v17 = vpop.xlane.xlu1 %3641 }
 0xb82   : > { %v3650_v19 = vmul.f32 %v3642_v17, %v7871_v20 }
 0xb84   : > { %v3658_v39 = vadd.f32 1e-05, %v3650_v19  ;;  %v6499_v19 = vld [vmem:[%s7361_s14 + $0x30] sm:$0xff] }
 0xb85   : > { %5040 = vmatpush.bf16.msra.mxu3 %v6499_v19 }
 0xb86   : > { %6825 = vrsqrt.f32 %v3658_v39  ;;  %vm3735_vm10 = vweird.f32 %v3658_v39 }
 0xb8c   : > { %v6826_v38 = vpop.eup %6825 }
 0xb8d   : > { %v3730_v23 = vmul.f32 %v6826_v38, %v3658_v39  ;;  %vm3736_vm9 = vweird.f32 %v6826_v38  ;;  %v6523_v39 = vld [vmem:[%s7361_s14 + $0xf0] sm:$0xff] }
 0xb8e   : > { %vm3737_vm11 = vmor %vm3735_vm10, %vm3736_vm9  ;;  %5127 = vmatpush.bf16.msrb.mxu2 %v6523_v39 }
 0xb8f   : > { %v3731_v3 = vmul.f32 %v6826_v38, %v3730_v23 }
 0xb91   : > { %v3732_v63 = vmul.f32 0.5, %v3731_v3 }
 0xb92   : > { %5128 = vmatpush.bf16.msrb.mxu2 %v6522_v2 }
 0xb93   : > { %v3733_v51 = vsub.f32 1.5, %v3732_v63  ;;  %v6513_v63 = vld [vmem:[%s7361_s14 + $0xa0] sm:$0xff] }
 0xb94   : > { %5100 = vmatpush.bf16.msrb.mxu1 %v6513_v63 }
 0xb95   : > { %v3734_v29 = vmul.f32 %v6826_v38, %v3733_v51 }
 0xb97   : > { %v3738_v12 = vsel %vm3737_vm11, %v6826_v38, %v3734_v29 }
 0xb98   : > { %v3746_v54 = vmul.f32 %v3738_v12, %v8856_v4  ;;  %v8911_v4 = vperm.slane %v3805_v0, 2 }
 0xb9a   : > { %v3757_v9 = vmul.f32 %v8866_v11, %v3746_v54  ;;  %v6508_v11 = vld [vmem:[%s7361_s14 + $0x78] sm:$0xff] }
 0xb9b   : > { %5068 = vmatpush.bf16.msra.mxu0 %v6508_v11 }
 0xb9c   : > { %v3768_v61 = vadd.f32 %v8875_v48, %v3757_v9 }
 0xb9e   : > { %v3772_v7 = vpack.c.bf16 %v3768_v61, %v3767_v22 }
 0xb9f   : > { %5069 = vmatpush.bf16.msra.mxu0 %v6507_v60 }
 0xba0   : > { %3998 = vmatmul.bf16.gmra.mxu3 %v3772_v7  ;;  %4027 = vmatmul.bf16.gmra.mxu0 %v3772_v7 }
 0xba1   : > { %4056 = vmatmul.bf16.gmra.mxu1 %v3772_v7  ;;  %4085 = vmatmul.bf16.gmra.mxu2 %v3772_v7 }
 0xba3   : > { %v4013_v62 = vpop.f32.mrf.mxu0  ;;  %5070 = vmatpush.bf16.msra.mxu0 %v6506_v59  ;;  %v6512_v59 = vld [vmem:[%s7361_s14 + $0x98] sm:$0xff] }
 0xba4   : > { %v8916_v48 = vadd.f32 %v4013_v62, %v8909_v53  ;;  %v4042_v13 = vpop.f32.mrf.mxu1  ;;  %5101 = vmatpush.bf16.msrb.mxu1 %v6512_v59 }
 0xba5   : > { %v8919_v50 = vadd.f32 %v4042_v13, %v8911_v4 }
 0xba6   : > { %v6216_v44 = vmul.f32 -1.702, %v8916_v48 }
 0xba7   : > { %v6217_v46 = vmul.f32 -1.702, %v8919_v50  ;;  %5071 = vmatpush.bf16.msra.mxu0 %v6505_v21  ;;  %v6496_v21 = vld [vmem:[%s7361_s14 + $0x18] sm:$0xff] }
 0xba8   : > { %v4157_v56 = vmul.f32 1.442695, %v6216_v44 }
 0xba9   : > { %v4159_v45 = vmul.f32 1.442695, %v6217_v46  ;;  %v3984_v8 = vpop.f32.mrf.mxu3 }
 0xbaa   : > { %6827 = vpow2.f32 %v4157_v56  ;;  %v8930_v15 = vadd.f32 %v3984_v8, %v8922_v5  ;;  %v4071_v31 = vpop.f32.mrf.mxu2  ;;  %v6498_v8 = vld [vmem:[%s7361_s14 + $0x28] sm:$0xff] }
 0xbab   : > { %6829 = vpow2.f32 %v4159_v45  ;;  %v8933_v52 = vadd.f32 %v4071_v31, %v8927_v43  ;;  %v4015_v58 = vpop.f32.mrf.mxu0  ;;  %5041 = vmatpush.bf16.msra.mxu3 %v6498_v8 }
 0xbac   : > { %v6215_v25 = vmul.f32 -1.702, %v8930_v15  ;;  %v8939_v37 = vadd.f32 %v4015_v58, %v8909_v53  ;;  %v4044_v47 = vpop.f32.mrf.mxu1 }
 0xbad   : > { %v6218_v57 = vmul.f32 -1.702, %v8933_v52  ;;  %v8943_v30 = vadd.f32 %v4044_v47, %v8911_v4  ;;  %v6503_v47 = vld [vmem:[%s7361_s14 + $0x50] sm:$0xff] }
 0xbae   : > { %v4155_v34 = vmul.f32 1.442695, %v6215_v25  ;;  %v6220_v49 = vmul.f32 -1.702, %v8939_v37 }
 0xbaf   : > { %v4161_v55 = vmul.f32 1.442695, %v6218_v57  ;;  %v6221_v17 = vmul.f32 -1.702, %v8943_v30  ;;  %v6504_v57 = vld [vmem:[%s7361_s14 + $0x58] sm:$0xff] }
 0xbb0   : > { %v6828_v27 = vpop.eup %6827  ;;  %6831 = vpow2.f32 %v4155_v34  ;;  %v4165_v40 = vmul.f32 1.442695, %v6220_v49  ;;  %5072 = vmatpush.bf16.msra.mxu0 %v6504_v57 }
 0xbb1   : > { %v6830_v38 = vpop.eup %6829  ;;  %v8951_v16 = vadd.f32 1.0, %v6828_v27  ;;  %6833 = vpow2.f32 %v4161_v55  ;;  %v4167_v23 = vmul.f32 1.442695, %v6221_v17  ;;  %v3986_v3 = vpop.f32.mrf.mxu3 }
 0xbb2   : > { %v8955_v51 = vadd.f32 1.0, %v6830_v38  ;;  %6835 = vpow2.f32 %v4165_v40  ;;  %v8958_v1 = vadd.f32 %v3986_v3, %v8922_v5  ;;  %v4073_v61 = vpop.f32.mrf.mxu2  ;;  %v6497_v40 = vld [vmem:[%s7361_s14 + $0x20] sm:$0xff] }
 0xbb3   : > { %6837 = vrcp.f32 %v8951_v16  ;;  %v4275_v62 = vand.u32 2147483647, %v8951_v16  ;;  %v4277_v44 = vand.u32 2147483648, %v8951_v16  ;;  %v8980_v42 = vadd.f32 %v4073_v61, %v8927_v43  ;;  %v6521_v38 = vld [vmem:[%s7361_s14 + $0xe0] sm:$0xff]  ;;  %5042 = vmatpush.bf16.msra.mxu3 %v6497_v40 }
 0xbb4   : > { %6839 = vrcp.f32 %v8955_v51  ;;  %v6219_v29 = vmul.f32 -1.702, %v8958_v1  ;;  %vm4271_vm12 = vweird.f32 %v8951_v16  ;;  %v4290_v56 = vand.u32 2147483647, %v8955_v51  ;;  %5129 = vmatpush.bf16.msrb.mxu2 %v6521_v38  ;;  %5073 = vmatpush.bf16.msra.mxu0 %v6503_v47  ;;  %v6519_v47 = vld [vmem:[%s7361_s14 + $0xd0] sm:$0xff] }
 0xbb5   : > { %6841 = vpow2.f32 %v4167_v23  ;;  %v4292_v58 = vand.u32 2147483648, %v8955_v51  ;;  %vm8992_vm13 = vcmp.eq.f32.partialorder %v4275_v62, 8.507059e+37  ;;  %vm4286_vm14 = vweird.f32 %v8955_v51 }
 0xbb6   : > { %v6832_v12 = vpop.eup %6831  ;;  %v4163_v7 = vmul.f32 1.442695, %v6219_v29  ;;  %v4278_v34 = vor.u32 1.1754944e-38, %v4277_v44  ;;  %v6222_v55 = vmul.f32 -1.702, %v8980_v42  ;;  %v4018_v17 = vpop.f32.mrf.mxu0  ;;  %vm9015_vm1 = vcmp.eq.f32.partialorder %v4290_v56, 8.507059e+37 }
 0xbb7   : > { %v6834_v54 = vpop.eup %6833  ;;  %v8963_v33 = vadd.f32 1.0, %v6832_v12  ;;  %v4047_v19 = vpop.f32.mrf.mxu1  ;;  %v4293_v63 = vor.u32 1.1754944e-38, %v4292_v58  ;;  %5043 = vmatpush.bf16.msra.mxu3 %v6496_v21 }
 0xbb8   : > { %v6836_v9 = vpop.eup %6835  ;;  %v8965_v22 = vadd.f32 1.0, %v6834_v54  ;;  %v9033_v61 = vadd.f32 %v4047_v19, %v8911_v4  ;;  %v4169_v44 = vmul.f32 1.442695, %v6222_v55 }
 0xbb9   : > { %v8967_v0 = vpop.eup %6837  ;;  %6843 = vrcp.f32 %v8963_v33  ;;  %v8984_v45 = vadd.f32 1.0, %v6836_v9  ;;  %vm4256_vm3 = vweird.f32 %v8963_v33  ;;  %v9030_v9 = vadd.f32 %v4018_v17, %v8909_v53 }
 0xbba   : > { %v8970_v11 = vpop.eup %6839  ;;  %v4267_v36 = vmul.f32 %v8967_v0, %v8951_v16  ;;  %6845 = vrcp.f32 %v8965_v22  ;;  %vm4272_vm15 = vweird.f32 %v8967_v0  ;;  %v4260_v62 = vand.u32 2147483647, %v8963_v33 }
 0xbbb   : > { %v6842_v13 = vpop.eup %6841  ;;  %v4282_v60 = vmul.f32 %v8970_v11, %v8955_v51  ;;  %6847 = vpow2.f32 %v4163_v7  ;;  %vm4287_vm0 = vweird.f32 %v8970_v11  ;;  %v4335_v29 = vand.u32 2147483647, %v8984_v45  ;;  %vm9024_vm2 = vmor %vm4271_vm12, %vm4272_vm15 }
 0xbbc   : > { %v4268_v46 = vsub.f32 1.0, %v4267_v36  ;;  %v8988_v14 = vadd.f32 1.0, %v6842_v13  ;;  %6849 = vrcp.f32 %v8984_v45  ;;  %vm9042_vm4 = vmor %vm4286_vm14, %vm4287_vm0  ;;  %v4262_v13 = vand.u32 2147483648, %v8963_v33 }
 0xbbd   : > { %v4283_v31 = vsub.f32 1.0, %v4282_v60  ;;  %v4337_v56 = vand.u32 2147483648, %v8984_v45  ;;  %vm4331_vm6 = vweird.f32 %v8984_v45  ;;  %vm9063_vm7 = vcmp.eq.f32.partialorder %v4335_v29, 8.507059e+37 }
 0xbbe   : > { %v4269_v25 = vmul.f32 %v8967_v0, %v4268_v46  ;;  %6851 = vrcp.f32 %v8988_v14  ;;  %v4350_v2 = vand.u32 2147483647, %v8988_v14  ;;  %vm4346_vm8 = vweird.f32 %v8988_v14 }
 0xbbf   : > { %v9000_v35 = vpop.eup %6843  ;;  %v4284_v49 = vmul.f32 %v8970_v11, %v4283_v31  ;;  %vm4261_vm0 = vcmp.eq.f32.partialorder %v4260_v62, 8.507059e+37  ;;  %v6493_v62 = vld [vmem:[%s7361_s14] sm:$0xff] }
 0xbc0   : > { %v4270_v39 = vadd.f32 %v8967_v0, %v4269_v25  ;;  %v4252_v27 = vmul.f32 %v9000_v35, %v8963_v33  ;;  %v9012_v23 = vpop.eup %6845  ;;  %vm4257_vm5 = vweird.f32 %v9000_v35  ;;  %v4352_v25 = vand.u32 2147483648, %v8988_v14 }
 0xbc1   : > { %v4285_v3 = vadd.f32 %v8970_v11, %v4284_v49  ;;  %v6848_v7 = vpop.eup %6847  ;;  %v9056_v51 = vmul.f32 %v9012_v23, %v8965_v22  ;;  %vm9101_vm10 = vmor %vm4256_vm3, %vm4257_vm5  ;;  %vm9106_vm12 = vcmp.eq.f32.partialorder %v4350_v2, 8.507059e+37  ;;  %v6225_v2 = vmul.f32 -1.702, %v9033_v61 }
 0xbc2   : > { %v4253_v54 = vsub.f32 1.0, %v4252_v27  ;;  %v4274_v36 = vsel %vm9024_vm2, %v8967_v0, %v4270_v39  ;;  %v9048_v60 = vpop.eup %6849  ;;  %v9073_v57 = vadd.f32 1.0, %v6848_v7  ;;  %v4338_v39 = vor.u32 1.1754944e-38, %v4337_v56  ;;  %v4076_v7 = vpop.f32.mrf.mxu2  ;;  %v6510_v56 = vld [vmem:[%s7361_s14 + $0x88] sm:$0xff] }
 0xbc3   : > { %v4289_v0 = vsel %vm9042_vm4, %v8970_v11, %v4285_v3  ;;  %v4327_v8 = vmul.f32 %v9048_v60, %v8984_v45  ;;  %v4279_v58 = vsel %vm8992_vm13, %v4278_v34, %v4274_v36  ;;  %v6511_v34 = vld [vmem:[%s7361_s14 + $0x90] sm:$0xff]  ;;  %v4298_v19 = vsub.f32 1.0, %v9056_v51  ;;  %v3989_v3 = vpop.f32.mrf.mxu3  ;;  %v4020_v36 = vpop.f32.mrf.mxu0 }
 0xbc4   : > { %v4254_v46 = vmul.f32 %v9000_v35, %v4253_v54  ;;  %v9067_v11 = vpop.eup %6851  ;;  %v4294_v59 = vsel %vm9015_vm1, %v4293_v63, %v4289_v0  ;;  %6853 = vrcp.f32 %v9073_v57  ;;  %v9088_v27 = vmul.f32 %v4279_v58, %v8916_v48  ;;  %5102 = vmatpush.bf16.msrb.mxu1 %v6511_v34  ;;  %v6520_v63 = vld [vmem:[%s7361_s14 + $0xd8] sm:$0xff]  ;;  %v6495_v45 = vld [vmem:[%s7361_s14 + $0x10] sm:$0xff] }
 0xbc5   : > { %v4328_v55 = vsub.f32 1.0, %v4327_v8  ;;  %v4342_v17 = vmul.f32 %v9067_v11, %v8988_v14  ;;  %vm4332_vm9 = vweird.f32 %v9048_v60  ;;  %v9095_v29 = vmul.f32 %v4294_v59, %v8919_v50  ;;  %5130 = vmatpush.bf16.msrb.mxu2 %v6520_v63  ;;  %5044 = vmatpush.bf16.msra.mxu3 %v6495_v45  ;;  %v6501_v14 = vld [vmem:[%s7361_s14 + $0x40] sm:$0xff] }
 0xbc6   : > { %v9078_v49 = vadd.f32 %v9000_v35, %v4254_v46  ;;  %vm4347_vm11 = vweird.f32 %v9067_v11  ;;  %v4353_v54 = vor.u32 1.1754944e-38, %v4352_v25  ;;  %6855 = vpow2.f32 %v4169_v44  ;;  %v6502_v46 = vld [vmem:[%s7361_s14 + $0x48] sm:$0xff]  ;;  %vm4333_vm13 = vmor %vm4331_vm6, %vm4332_vm9 }
 0xbc7   : > { %v4329_v40 = vmul.f32 %v9048_v60, %v4328_v55  ;;  %v4343_v38 = vsub.f32 1.0, %v4342_v17  ;;  %v4320_v8 = vand.u32 2147483647, %v9073_v57  ;;  %v6224_v58 = vmul.f32 -1.702, %v9030_v9  ;;  %5074 = vmatpush.bf16.msra.mxu0 %v6502_v46  ;;  %vm4348_vm14 = vmor %vm4346_vm8, %vm4347_vm11 }
 0xbc8   : > { %v4259_v50 = vsel %vm9101_vm10, %v9000_v35, %v9078_v49  ;;  %v9126_v25 = vadd.f32 %v3989_v3, %v8922_v5  ;;  %v9131_v55 = vadd.f32 %v4076_v7, %v8927_v43  ;;  %v9134_v17 = vadd.f32 %v4020_v36, %v8909_v53  ;;  %5103 = vmatpush.bf16.msrb.mxu1 %v6510_v56 }
 0xbc9   : > { %v4330_v16 = vadd.f32 %v9048_v60, %v4329_v40  ;;  %v4344_v0 = vmul.f32 %v9067_v11, %v4343_v38  ;;  %v4175_v38 = vmul.f32 1.442695, %v6225_v2  ;;  %v4322_v31 = vand.u32 2147483648, %v9073_v57  ;;  %5131 = vmatpush.bf16.msrb.mxu2 %v6519_v47  ;;  %v6494_v2 = vld [vmem:[%s7361_s14 + $0x8] sm:$0xff] }
 0xbca   : > { %v9138_v34 = vpop.eup %6853  ;;  %v6223_v3 = vmul.f32 -1.702, %v9126_v25  ;;  %5045 = vmatpush.bf16.msra.mxu3 %v6494_v2  ;;  %vm4316_vm1 = vweird.f32 %v9073_v57  ;;  %v4305_v51 = vand.u32 2147483647, %v8965_v22  ;;  %vm4321_vm3 = vcmp.eq.f32.partialorder %v4320_v8, 8.507059e+37 }
 0xbcb   : > { %v4334_v44 = vsel %vm4333_vm13, %v9048_v60, %v4330_v16  ;;  %v4345_v59 = vadd.f32 %v9067_v11, %v4344_v0  ;;  %v4173_v60 = vmul.f32 1.442695, %v6224_v58  ;;  %v4312_v7 = vmul.f32 %v9138_v34, %v9073_v57  ;;  %v4049_v0 = vpop.f32.mrf.mxu1  ;;  %5075 = vmatpush.bf16.msra.mxu0 %v6501_v14 }
 0xbcc   : > { %v4339_v40 = vsel %vm9063_vm7, %v4338_v39, %v4334_v44  ;;  %v6509_v39 = vld [vmem:[%s7361_s14 + $0x80] sm:$0xff]  ;;  %v4171_v16 = vmul.f32 1.442695, %v6223_v3  ;;  %v6518_v44 = vld [vmem:[%s7361_s14 + $0xc8] sm:$0xff]  ;;  %vm4317_vm15 = vweird.f32 %v9138_v34  ;;  %vm4302_vm4 = vweird.f32 %v9012_v23 }
 0xbcd   : > { %v4736_v21 = vmul.f32 %v4339_v40, %v8939_v37  ;;  %v4349_v63 = vsel %vm4348_vm14, %v9067_v11, %v4345_v59  ;;  %6857 = vpow2.f32 %v4173_v60  ;;  %v6226_v37 = vmul.f32 -1.702, %v9131_v55  ;;  %v6856_v11 = vpop.eup %6855  ;;  %5104 = vmatpush.bf16.msrb.mxu1 %v6509_v39  ;;  %5132 = vmatpush.bf16.msrb.mxu2 %v6518_v44  ;;  %v6517_v3 = vld [vmem:[%s7361_s14 + $0xc0] sm:$0xff]  ;;  %vm4318_vm2 = vmor %vm4316_vm1, %vm4317_vm15 }
 0xbce   : > { %v4354_v36 = vsel %vm9106_vm12, %v4353_v54, %v4349_v63  ;;  %v4313_v58 = vsub.f32 1.0, %v4312_v7  ;;  %6859 = vpow2.f32 %v4175_v38  ;;  %v9162_v59 = vadd.f32 1.0, %v6856_v11  ;;  %5046 = vmatpush.bf16.msra.mxu3 %v6493_v62 }
 0xbcf   : > { %v4764_v46 = vpack.c.bf16 %v4736_v21, %v9088_v27  ;;  %v4737_v56 = vmul.f32 %v4354_v36, %v8943_v30  ;;  %v4177_v12 = vmul.f32 1.442695, %v6226_v37  ;;  %v6228_v54 = vmul.f32 -1.702, %v9134_v17 }
 0xbd0   : > { %v4314_v47 = vmul.f32 %v9138_v34, %v4313_v58  ;;  %6861 = vpow2.f32 %v4171_v16  ;;  %v9168_v30 = vadd.f32 %v4049_v0, %v8911_v4  ;;  %v4263_v27 = vor.u32 1.1754944e-38, %v4262_v13 }
 0xbd1   : > { %v4765_v45 = vpack.c.bf16 %v4737_v56, %v9095_v29  ;;  %v4299_v40 = vmul.f32 %v9012_v23, %v4298_v19  ;;  %6863 = vrcp.f32 %v9162_v59  ;;  %v3991_v29 = vpop.f32.mrf.mxu3  ;;  %5076 = vmatmul.bf16.vlgmr.msra.gmra.mxu0 %v4764_v46  ;;  %v4181_v38 = vmul.f32 1.442695, %v6228_v54  ;;  %5133 = vmatpush.bf16.msrb.mxu2 %v6517_v3 }
 0xbd2   : > { %v4315_v60 = vadd.f32 %v9138_v34, %v4314_v47  ;;  %6865 = vpow2.f32 %v4177_v12  ;;  %v4264_v13 = vsel %vm4261_vm0, %v4263_v27, %v4259_v50  ;;  %v4323_v19 = vor.u32 1.1754944e-38, %v4322_v31  ;;  %v4078_v27 = vpop.f32.mrf.mxu2 }
 0xbd3   : > { %5105 = vmatmul.bf16.vlgmr.msrb.gmra.mxu1 %v4765_v45  ;;  %v6858_v33 = vpop.eup %6857  ;;  %v6229_v21 = vmul.f32 -1.702, %v9168_v30  ;;  %v9197_v48 = vadd.f32 %v3991_v29, %v8922_v5  ;;  %6867 = vpow2.f32 %v4181_v38  ;;  %v4731_v31 = vmul.f32 %v4264_v13, %v8930_v15 }
 0xbd4   : > { %v6860_v63 = vpop.eup %6859  ;;  %v4319_v7 = vsel %vm4318_vm2, %v9138_v34, %v4315_v60  ;;  %v9194_v14 = vadd.f32 1.0, %v6858_v33  ;;  %v4300_v34 = vadd.f32 %v9012_v23, %v4299_v40  ;;  %v4307_v39 = vand.u32 2147483648, %v8965_v22 }
 0xbd5   : > { %v4324_v35 = vsel %vm4321_vm3, %v4323_v19, %v4319_v7  ;;  %v9200_v49 = vadd.f32 1.0, %v6860_v63  ;;  %v4183_v36 = vmul.f32 1.442695, %v6229_v21  ;;  %vm4301_vm5 = vweird.f32 %v8965_v22 }
 0xbd6   : > { %v6862_v50 = vpop.eup %6861  ;;  %v4735_v57 = vmul.f32 %v4324_v35, %v8958_v1  ;;  %6869 = vrcp.f32 %v9194_v14  ;;  %v6227_v15 = vmul.f32 -1.702, %v9197_v48  ;;  %vm9213_vm6 = vmor %vm4301_vm5, %vm4302_vm4  ;;  %vm9222_vm7 = vcmp.eq.f32.partialorder %v4305_v51, 8.507059e+37 }
 0xbd7   : > { %v6864_v8 = vpop.eup %6863  ;;  %6871 = vrcp.f32 %v9200_v49  ;;  %v9217_v11 = vadd.f32 1.0, %v6862_v50  ;;  %v4304_v46 = vsel %vm9213_vm6, %v9012_v23, %v4300_v34  ;;  %v4367_v58 = vand.u32 2147483648, %v9162_v59 }
 0xbd8   : > { %v6866_v16 = vpop.eup %6865  ;;  %v4763_v37 = vpack.c.bf16 %v4735_v57, %v4731_v31  ;;  %v4357_v0 = vmul.f32 %v6864_v8, %v9162_v59  ;;  %v4308_v44 = vor.u32 1.1754944e-38, %v4307_v39  ;;  %v4365_v12 = vand.u32 2147483647, %v9162_v59 }
 0xbd9   : > { %v6868_v2 = vpop.eup %6867  ;;  %v9228_v54 = vadd.f32 1.0, %v6866_v16  ;;  %6873 = vpow2.f32 %v4183_v36  ;;  %vm4362_vm8 = vweird.f32 %v6864_v8  ;;  %v4179_v23 = vmul.f32 1.442695, %v6227_v15 }
 0xbda   : > { %v4358_v22 = vsub.f32 1.0, %v4357_v0  ;;  %5047 = vmatmul.bf16.vlgmr.msra.gmra.mxu3 %v4763_v37  ;;  %6875 = vrcp.f32 %v9217_v11  ;;  %v4309_v29 = vsel %vm9222_vm7, %v4308_v44, %v4304_v46  ;;  %vm4361_vm9 = vweird.f32 %v9162_v59 }
 0xbdb   : > { %v4368_v62 = vor.u32 1.1754944e-38, %v4367_v58  ;;  %vm4363_vm10 = vmor %vm4361_vm9, %vm4362_vm8  ;;  %6877 = vrcp.f32 %v9228_v54  ;;  %v9243_v13 = vadd.f32 1.0, %v6868_v2  ;;  %v9246_v51 = vadd.f32 %v4078_v27, %v8927_v43 }
 0xbdc   : > { %v9230_v45 = vpop.eup %6869  ;;  %v4359_v47 = vmul.f32 %v6864_v8, %v4358_v22  ;;  %vm4366_vm11 = vcmp.eq.f32.partialorder %v4365_v12, 8.507059e+37  ;;  %6879 = vpow2.f32 %v4179_v23  ;;  %v4734_v50 = vmul.f32 %v4309_v29, %v8933_v52 }
 0xbdd   : > { %v9233_v40 = vpop.eup %6871  ;;  %v4387_v60 = vmul.f32 %v9230_v45, %v9194_v14  ;;  %6881 = vrcp.f32 %v9243_v13  ;;  %v4395_v34 = vand.u32 2147483647, %v9194_v14  ;;  %v4397_v57 = vand.u32 2147483648, %v9194_v14 }
 0xbde   : > { %v4360_v38 = vadd.f32 %v6864_v8, %v4359_v47  ;;  %v4402_v3 = vmul.f32 %v9233_v40, %v9200_v49  ;;  %v4412_v39 = vand.u32 2147483648, %v9200_v49  ;;  %v6230_v36 = vmul.f32 -1.702, %v9246_v51 }
 0xbdf   : > { %v4388_v33 = vsub.f32 1.0, %v4387_v60  ;;  %v6874_v21 = vpop.eup %6873  ;;  %vm4392_vm12 = vweird.f32 %v9230_v45  ;;  %vm4391_vm13 = vweird.f32 %v9194_v14  ;;  %vm9268_vm14 = vcmp.eq.f32.partialorder %v4395_v34, 8.507059e+37 }
 0xbe0   : > { %v4364_v19 = vsel %vm4363_vm10, %v6864_v8, %v4360_v38  ;;  %v4403_v7 = vsub.f32 1.0, %v4402_v3  ;;  %v9250_v35 = vpop.eup %6875  ;;  %v4023_v8 = vpop.f32.mrf.mxu0  ;;  %v9266_v15 = vadd.f32 1.0, %v6874_v21  ;;  %v4398_v56 = vor.u32 1.1754944e-38, %v4397_v57  ;;  %vm9274_vm0 = vmor %vm4391_vm13, %vm4392_vm12 }
 0xbe1   : > { %v4369_v63 = vsel %vm4366_vm11, %v4368_v62, %v4364_v19  ;;  %v4389_v59 = vmul.f32 %v9230_v45, %v4388_v33  ;;  %v9260_v0 = vpop.eup %6877  ;;  %vm4406_vm15 = vweird.f32 %v9200_v49  ;;  %v4410_v22 = vand.u32 2147483647, %v9200_v49 }
 0xbe2   : > { %v4738_v31 = vmul.f32 %v4369_v63, %v8980_v42  ;;  %v4404_v52 = vmul.f32 %v9233_v40, %v4403_v7  ;;  %v4372_v42 = vmul.f32 %v9250_v35, %v9217_v11  ;;  %v6880_v1 = vpop.eup %6879  ;;  %v9278_v2 = vor.u32 1.1754944e-38, %v4412_v39  ;;  %v4052_v7 = vpop.f32.mrf.mxu1 }
 0xbe3   : > { %v4390_v37 = vadd.f32 %v9230_v45, %v4389_v59  ;;  %v6882_v58 = vpop.eup %6881  ;;  %v4380_v44 = vand.u32 2147483647, %v9217_v11  ;;  %v4382_v12 = vand.u32 2147483648, %v9217_v11  ;;  %v4185_v47 = vmul.f32 1.442695, %v6230_v36 }
 0xbe4   : > { %v4766_v16 = vpack.c.bf16 %v4738_v31, %v4734_v50  ;;  %vm4407_vm1 = vweird.f32 %v9233_v40  ;;  %v9288_v27 = vmul.f32 %v9260_v0, %v9228_v54  ;;  %v4447_v29 = vmul.f32 %v6882_v58, %v9243_v13  ;;  %v3994_v50 = vpop.f32.mrf.mxu3 }
 0xbe5   : > { %v4394_v23 = vsel %vm9274_vm0, %v9230_v45, %v4390_v37  ;;  %v4405_v60 = vadd.f32 %v9233_v40, %v4404_v52  ;;  %v4373_v38 = vsub.f32 1.0, %v4372_v42  ;;  %v4455_v62 = vand.u32 2147483647, %v9243_v13  ;;  %vm9309_vm2 = vmor %vm4406_vm15, %vm4407_vm1  ;;  %v4081_v39 = vpop.f32.mrf.mxu2 }
 0xbe6   : > { %5134 = vmatmul.bf16.vlgmr.msrb.gmra.mxu2 %v4766_v16  ;;  %6883 = vrcp.f32 %v9266_v15  ;;  %v4425_v3 = vand.u32 2147483647, %v9228_v54  ;;  %v4448_v33 = vsub.f32 1.0, %v4447_v29  ;;  %v9295_v19 = vadd.f32 1.0, %v6880_v1 }
 0xbe7   : > { %v9298_v45 = vadd.f32 %v4023_v8, %v8909_v53  ;;  %v4399_v21 = vsel %vm9268_vm14, %v4398_v56, %v4394_v23  ;;  %v9302_v63 = vor.u32 1.1754944e-38, %v4382_v12  ;;  %v4457_v59 = vand.u32 2147483648, %v9243_v13 }
 0xbe8   : > { %6885 = vpow2.f32 %v4185_v47  ;;  %vm9313_vm3 = vcmp.eq.f32.partialorder %v4410_v22, 8.507059e+37  ;;  %v4418_v57 = vsub.f32 1.0, %v9288_v27  ;;  %v4449_v8 = vmul.f32 %v6882_v58, %v4448_v33  ;;  %v4025_v36 = vpop.f32.mrf.mxu0 }
 0xbe9   : > { %vm4451_vm4 = vweird.f32 %v9243_v13  ;;  %vm4452_vm5 = vweird.f32 %v6882_v58  ;;  %v4409_v49 = vsel %vm9309_vm2, %v9233_v40, %v4405_v60  ;;  %v4374_v16 = vmul.f32 %v9250_v35, %v4373_v38 }
 0xbea   : > { %vm9323_vm6 = vcmp.eq.f32.partialorder %v4455_v62, 8.507059e+37  ;;  %6887 = vrcp.f32 %v9295_v19  ;;  %v4740_v52 = vmul.f32 %v4399_v21, %v9030_v9  ;;  %v4450_v42 = vadd.f32 %v6882_v58, %v4449_v8  ;;  %vm4453_vm7 = vmor %vm4451_vm4, %vm4452_vm5 }
 0xbeb   : > { %v6232_v13 = vmul.f32 -1.702, %v9298_v45  ;;  %v9331_v1 = vadd.f32 %v4052_v7, %v8911_v4  ;;  %v4458_v56 = vor.u32 1.1754944e-38, %v4457_v59  ;;  %v9334_v40 = vadd.f32 %v3994_v50, %v8922_v5 }
 0xbec   : > { %v6884_v46 = vpop.eup %6883  ;;  %v9337_v22 = vadd.f32 %v4081_v39, %v8927_v43  ;;  %v9340_v14 = vadd.f32 %v4025_v36, %v8909_v53  ;;  %v4454_v12 = vsel %vm4453_vm7, %v6882_v58, %v4450_v42  ;;  %v4470_v47 = vand.u32 2147483647, %v9266_v15 }
 0xbed   : > { %v4462_v9 = vmul.f32 %v6884_v46, %v9266_v15  ;;  %v4472_v23 = vand.u32 2147483648, %v9266_v15  ;;  %v4459_v29 = vsel %vm9323_vm6, %v4458_v56, %v4454_v12  ;;  %v4189_v60 = vmul.f32 1.442695, %v6232_v13 }
 0xbee   : > { %v6886_v27 = vpop.eup %6885  ;;  %v6233_v38 = vmul.f32 -1.702, %v9331_v1  ;;  %v6231_v62 = vmul.f32 -1.702, %v9334_v40  ;;  %vm4376_vm8 = vweird.f32 %v9217_v11  ;;  %v4744_v33 = vmul.f32 %v4459_v29, %v9134_v17 }
 0xbef   : > { %v4463_v58 = vsub.f32 1.0, %v4462_v9  ;;  %v9351_v21 = vadd.f32 1.0, %v6886_v27  ;;  %v6234_v59 = vmul.f32 -1.702, %v9337_v22  ;;  %6889 = vpow2.f32 %v4189_v60 }
 0xbf0   : > { %v9354_v7 = vpop.eup %6887  ;;  %v4191_v50 = vmul.f32 1.442695, %v6233_v38  ;;  %v4187_v31 = vmul.f32 1.442695, %v6231_v62  ;;  %v6236_v8 = vmul.f32 -1.702, %v9340_v14  ;;  %vm4467_vm9 = vweird.f32 %v6884_v46 }
 0xbf1   : > { %v4464_v39 = vmul.f32 %v6884_v46, %v4463_v58  ;;  %v4432_v36 = vmul.f32 %v9354_v7, %v9295_v19  ;;  %6891 = vrcp.f32 %v9351_v21  ;;  %v4414_v17 = vsel %vm9313_vm3, %v9278_v2, %v4409_v49 }
 0xbf2   : > { %vm4377_vm10 = vweird.f32 %v9250_v35  ;;  %vm4466_vm11 = vweird.f32 %v9266_v15  ;;  %6893 = vpow2.f32 %v4191_v50  ;;  %vm4421_vm12 = vweird.f32 %v9228_v54 }
 0xbf3   : > { %v4465_v37 = vadd.f32 %v6884_v46, %v4464_v39  ;;  %v4433_v42 = vsub.f32 1.0, %v4432_v36  ;;  %v4768_v13 = vpack.c.bf16 %v4744_v33, %v4740_v52  ;;  %6895 = vpow2.f32 %v4187_v31  ;;  %vm4468_vm13 = vmor %vm4466_vm11, %vm4467_vm9 }
 0xbf4   : > { %v4419_v56 = vmul.f32 %v9260_v0, %v4418_v57  ;;  %v4473_v12 = vor.u32 1.1754944e-38, %v4472_v23  ;;  %v4193_v9 = vmul.f32 1.442695, %v6234_v59  ;;  %v4197_v27 = vmul.f32 1.442695, %v6236_v8  ;;  %vm9381_vm0 = vmor %vm4376_vm8, %vm4377_vm10 }
 0xbf5   : > { %v9368_v34 = vadd.f32 %v9250_v35, %v4374_v16  ;;  %v4469_v2 = vsel %vm4468_vm13, %v6884_v46, %v4465_v37  ;;  %vm4471_vm14 = vcmp.eq.f32.partialorder %v4470_v47, 8.507059e+37  ;;  %v4434_v15 = vmul.f32 %v9354_v7, %v4433_v42  ;;  %5081 = vmatmul.bf16.gmra.mxu0 %v4768_v13  ;;  %v6890_v49 = vpop.eup %6889  ;;  %v4054_v16 = vpop.f32.mrf.mxu1 }
 0xbf6   : > { %vm4422_vm15 = vweird.f32 %v9260_v0  ;;  %v4427_v52 = vand.u32 2147483648, %v9228_v54  ;;  %v4474_v29 = vsel %vm4471_vm14, %v4473_v12, %v4469_v2  ;;  %6897 = vpow2.f32 %v4193_v9 }
 0xbf7   : > { %v6892_v57 = vpop.eup %6891  ;;  %v4741_v23 = vmul.f32 %v4414_v17, %v9033_v61  ;;  %v4745_v60 = vmul.f32 %v4474_v29, %v9168_v30  ;;  %v9375_v38 = vadd.f32 1.0, %v6890_v49  ;;  %6899 = vpow2.f32 %v4197_v27  ;;  %vm9420_vm5 = vmor %vm4421_vm12, %vm4422_vm15 }
 0xbf8   : > { %v6894_v46 = vpop.eup %6893  ;;  %vm9387_vm1 = vcmp.eq.f32.partialorder %v4380_v44, 8.507059e+37  ;;  %v4420_v61 = vadd.f32 %v9260_v0, %v4419_v56  ;;  %v4435_v30 = vadd.f32 %v9354_v7, %v4434_v15  ;;  %vm4437_vm2 = vweird.f32 %v9354_v7  ;;  %v3996_v15 = vpop.f32.mrf.mxu3 }
 0xbf9   : > { %v4477_v33 = vmul.f32 %v6892_v57, %v9351_v21  ;;  %v6896_v58 = vpop.eup %6895  ;;  %v4379_v59 = vsel %vm9381_vm0, %v9250_v35, %v9368_v34  ;;  %v4440_v11 = vand.u32 2147483647, %v9295_v19  ;;  %v4442_v44 = vand.u32 2147483648, %v9295_v19 }
 0xbfa   : > { %6901 = vrcp.f32 %v9375_v38  ;;  %vm4436_vm3 = vweird.f32 %v9295_v19  ;;  %v9403_v31 = vadd.f32 1.0, %v6894_v46  ;;  %v9406_v8 = vadd.f32 %v4054_v16, %v8911_v4 }
 0xbfb   : > { %v4478_v50 = vsub.f32 1.0, %v4477_v33  ;;  %vm9408_vm4 = vmor %vm4436_vm3, %vm4437_vm2  ;;  %v4485_v35 = vand.u32 2147483647, %v9351_v21  ;;  %v4487_v36 = vand.u32 2147483648, %v9351_v21  ;;  %v4769_v17 = vpack.c.bf16 %v4745_v60, %v4741_v23 }
 0xbfc   : > { %v9414_v37 = vadd.f32 1.0, %v6896_v58  ;;  %v6898_v42 = vpop.eup %6897  ;;  %v4439_v13 = vsel %vm9408_vm4, %v9354_v7, %v4435_v30  ;;  %vm4482_vm6 = vweird.f32 %v6892_v57  ;;  %6903 = vrcp.f32 %v9403_v31 }
 0xbfd   : > { %v4479_v56 = vmul.f32 %v6892_v57, %v4478_v50  ;;  %v6900_v12 = vpop.eup %6899  ;;  %v4424_v9 = vsel %vm9420_vm5, %v9260_v0, %v4420_v61  ;;  %vm4441_vm7 = vcmp.eq.f32.partialorder %v4440_v11, 8.507059e+37  ;;  %v4443_v27 = vor.u32 1.1754944e-38, %v4442_v44  ;;  %5110 = vmatmul.bf16.gmra.mxu1 %v4769_v17 }
 0xbfe   : > { %6905 = vrcp.f32 %v9414_v37  ;;  %vm4481_vm8 = vweird.f32 %v9351_v21  ;;  %v9433_v2 = vadd.f32 1.0, %v6898_v42  ;;  %v6237_v7 = vmul.f32 -1.702, %v9406_v8 }
 0xbff   : > { %v4480_v34 = vadd.f32 %v6892_v57, %v4479_v56  ;;  %v4428_v29 = vor.u32 1.1754944e-38, %v4427_v52  ;;  %v4444_v23 = vsel %vm4441_vm7, %v4443_v27, %v4439_v13  ;;  %vm4483_vm9 = vmor %vm4481_vm8, %vm4482_vm6  ;;  %v4488_v0 = vor.u32 1.1754944e-38, %v4487_v36 }
 0xc00   : > { %v9436_v49 = vpop.eup %6901  ;;  %v9439_v60 = vadd.f32 1.0, %v6900_v12  ;;  %vm4426_vm10 = vcmp.eq.f32.partialorder %v4425_v3, 8.507059e+37  ;;  %vm4486_vm11 = vcmp.eq.f32.partialorder %v4485_v35, 8.507059e+37  ;;  %v4384_v46 = vsel %vm9387_vm1, %v9302_v63, %v4379_v59 }
 0xc01   : > { %v4484_v16 = vsel %vm4483_vm9, %v6892_v57, %v4480_v34  ;;  %v4507_v21 = vmul.f32 %v9436_v49, %v9375_v38  ;;  %v4429_v47 = vsel %vm4426_vm10, %v4428_v29, %v4424_v9  ;;  %v9449_v61 = vadd.f32 %v3996_v15, %v8922_v5  ;;  %v4083_v57 = vpop.f32.mrf.mxu2 }
 0xc02   : > { %v4489_v52 = vsel %vm4486_vm11, %v4488_v0, %v4484_v16  ;;  %v9451_v30 = vpop.eup %6903  ;;  %v4743_v33 = vmul.f32 %v4444_v23, %v9197_v48  ;;  %6907 = vrcp.f32 %v9433_v2  ;;  %v4199_v3 = vmul.f32 1.442695, %v6237_v7 }
 0xc03   : > { %v4508_v54 = vsub.f32 1.0, %v4507_v21  ;;  %v4746_v11 = vmul.f32 %v4489_v52, %v9246_v51  ;;  %v4522_v63 = vmul.f32 %v9451_v30, %v9403_v31  ;;  %6909 = vrcp.f32 %v9439_v60 }
 0xc04   : > { %v9455_v58 = vpop.eup %6905  ;;  %v4739_v62 = vmul.f32 %v4384_v46, %v9126_v25  ;;  %v4515_v59 = vand.u32 2147483647, %v9375_v38  ;;  %v4517_v48 = vand.u32 2147483648, %v9375_v38  ;;  %v4742_v50 = vmul.f32 %v4429_v47, %v9131_v55 }
 0xc05   : > { %v4492_v44 = vmul.f32 %v9455_v58, %v9414_v37  ;;  %v6235_v39 = vmul.f32 -1.702, %v9449_v61  ;;  %v9469_v51 = vadd.f32 %v4083_v57, %v8927_v43  ;;  %v4509_v35 = vmul.f32 %v9436_v49, %v4508_v54 }
 0xc06   : > { %v4523_v36 = vsub.f32 1.0, %v4522_v63  ;;  %6911 = vpow2.f32 %v4199_v3  ;;  %v4767_v17 = vpack.c.bf16 %v4743_v33, %v4739_v62  ;;  %v4770_v42 = vpack.c.bf16 %v4746_v11, %v4742_v50 }
 0xc07   : > { %v4493_v25 = vsub.f32 1.0, %v4492_v44  ;;  %vm4511_vm12 = vweird.f32 %v9375_v38  ;;  %vm9475_vm13 = vcmp.eq.f32.partialorder %v4515_v59, 8.507059e+37  ;;  %v4518_v55 = vor.u32 1.1754944e-38, %v4517_v48 }
 0xc08   : > { %v9472_v19 = vpop.eup %6907  ;;  %5052 = vmatmul.bf16.gmra.mxu3 %v4767_v17  ;;  %vm4526_vm14 = vweird.f32 %v9403_v31  ;;  %v4530_v12 = vand.u32 2147483647, %v9403_v31  ;;  %5139 = vmatmul.bf16.gmra.mxu2 %v4770_v42  ;;  %v4195_v9 = vmul.f32 1.442695, %v6235_v39  ;;  %v6238_v27 = vmul.f32 -1.702, %v9469_v51 }
 0xc09   : > { %v6910_v56 = vpop.eup %6909  ;;  %v4510_v34 = vadd.f32 %v9436_v49, %v4509_v35  ;;  %vm4512_vm15 = vweird.f32 %v9436_v49  ;;  %v4524_v7 = vmul.f32 %v9451_v30, %v4523_v36  ;;  %v4494_v29 = vmul.f32 %v9455_v58, %v4493_v25 }
 0xc0a   : > { %v4567_v15 = vmul.f32 %v6910_v56, %v9439_v60  ;;  %v4537_v23 = vmul.f32 %v9472_v19, %v9433_v2  ;;  %6913 = vpow2.f32 %v4195_v9  ;;  %v4201_v0 = vmul.f32 1.442695, %v6238_v27  ;;  %vm9494_vm1 = vmor %vm4511_vm12, %vm4512_vm15 }
 0xc0b   : > { %vm4527_vm0 = vweird.f32 %v9451_v30  ;;  %v4532_v21 = vand.u32 2147483648, %v9403_v31  ;;  %v4502_v46 = vand.u32 2147483648, %v9414_v37  ;;  %vm4497_vm2 = vweird.f32 %v9455_v58 }
 0xc0c   : > { %v6912_v16 = vpop.eup %6911  ;;  %v4568_v47 = vsub.f32 1.0, %v4567_v15  ;;  %v4577_v33 = vand.u32 2147483648, %v9439_v60  ;;  %6915 = vpow2.f32 %v4201_v0  ;;  %v4514_v3 = vsel %vm9494_vm1, %v9436_v49, %v4510_v34  ;;  %vm9513_vm4 = vmor %vm4526_vm14, %vm4527_vm0 }
 0xc0d   : > { %v9500_v54 = vadd.f32 1.0, %v6912_v16  ;;  %vm4572_vm3 = vweird.f32 %v6910_v56  ;;  %v4575_v11 = vand.u32 2147483647, %v9439_v60  ;;  %v4525_v38 = vadd.f32 %v9451_v30, %v4524_v7 }
 0xc0e   : > { %v4569_v57 = vmul.f32 %v6910_v56, %v4568_v47  ;;  %v4495_v63 = vadd.f32 %v9455_v58, %v4494_v29  ;;  %v4538_v62 = vsub.f32 1.0, %v4537_v23  ;;  %vm4496_vm5 = vweird.f32 %v9414_v37 }
 0xc0f   : > { %6917 = vrcp.f32 %v9500_v54  ;;  %v4500_v49 = vand.u32 2147483647, %v9414_v37  ;;  %vm4571_vm6 = vweird.f32 %v9439_v60  ;;  %v4519_v50 = vsel %vm9475_vm13, %v4518_v55, %v4514_v3  ;;  %vm9529_vm9 = vmor %vm4496_vm5, %vm4497_vm2 }
 0xc10   : > { %v4570_v48 = vadd.f32 %v6910_v56, %v4569_v57  ;;  %v6914_v44 = vpop.eup %6913  ;;  %vm9522_vm7 = vcmp.eq.f32.partialorder %v4530_v12, 8.507059e+37  ;;  %v4533_v31 = vor.u32 1.1754944e-38, %v4532_v21  ;;  %vm4573_vm8 = vmor %vm4571_vm6, %vm4572_vm3  ;;  %v4578_v35 = vor.u32 1.1754944e-38, %v4577_v33 }
 0xc11   : > { %v4503_v37 = vor.u32 1.1754944e-38, %v4502_v46  ;;  %vm4576_vm10 = vcmp.eq.f32.partialorder %v4575_v11, 8.507059e+37  ;;  %v9533_v17 = vadd.f32 1.0, %v6914_v44  ;;  %v4529_v42 = vsel %vm9513_vm4, %v9451_v30, %v4525_v38 }
 0xc12   : > { %v4574_v60 = vsel %vm4573_vm8, %v6910_v56, %v4570_v48  ;;  %v6916_v25 = vpop.eup %6915  ;;  %v4499_v13 = vsel %vm9529_vm9, %v9455_v58, %v4495_v63  ;;  %v4539_v55 = vmul.f32 %v9472_v19, %v4538_v62  ;;  %v4748_v9 = vmul.f32 %v4519_v50, %v9298_v45 }
 0xc13   : > { %v4579_v12 = vsel %vm4576_vm10, %v4578_v35, %v4574_v60  ;;  %v4547_v27 = vand.u32 2147483648, %v9433_v2  ;;  %6919 = vrcp.f32 %v9533_v17  ;;  %vm4501_vm11 = vcmp.eq.f32.partialorder %v4500_v49, 8.507059e+37 }
 0xc14   : > { %v4752_v56 = vmul.f32 %v4579_v12, %v9340_v14  ;;  %vm4541_vm12 = vweird.f32 %v9433_v2  ;;  %v4545_v30 = vand.u32 2147483647, %v9433_v2  ;;  %v9548_v7 = vadd.f32 1.0, %v6916_v25 }
 0xc15   : > { %v6918_v34 = vpop.eup %6917  ;;  %v4534_v58 = vsel %vm9522_vm7, %v4533_v31, %v4529_v42  ;;  %v4504_v15 = vsel %vm4501_vm11, %v4503_v37, %v4499_v13  ;;  %v9554_v23 = vadd.f32 %v9472_v19, %v4539_v55  ;;  %vm4542_vm13 = vweird.f32 %v9472_v19 }
 0xc16   : > { %v4582_v45 = vmul.f32 %v6918_v34, %v9500_v54  ;;  %v4772_v29 = vpack.c.bf16 %v4752_v56, %v4748_v9  ;;  %v4590_v14 = vand.u32 2147483647, %v9500_v54  ;;  %6921 = vrcp.f32 %v9548_v7  ;;  %vm9577_vm14 = vmor %vm4541_vm12, %vm4542_vm13 }
 0xc17   : > { %v9559_v16 = vor.u32 1.1754944e-38, %v4547_v27  ;;  %v4592_v46 = vand.u32 2147483648, %v9500_v54  ;;  %v4749_v33 = vmul.f32 %v4534_v58, %v9331_v1  ;;  %v9567_v3 = vmul.f32 %v4504_v15, %v9334_v40 }
 0xc18   : > { %v4583_v21 = vsub.f32 1.0, %v4582_v45  ;;  %5086 = vmatmul.bf16.gmra.mxu0 %v4772_v29  ;;  %v4562_v57 = vand.u32 2147483648, %v9533_v17  ;;  %vm4586_vm15 = vweird.f32 %v9500_v54  ;;  %vm4587_vm0 = vweird.f32 %v6918_v34 }
 0xc19   : > { %v6920_v38 = vpop.eup %6919  ;;  %v4544_v40 = vsel %vm9577_vm14, %v9472_v19, %v9554_v23  ;;  %vm9587_vm1 = vcmp.eq.f32.partialorder %v4590_v14, 8.507059e+37  ;;  %vm9593_vm2 = vcmp.eq.f32.partialorder %v4545_v30, 8.507059e+37  ;;  %v4593_v44 = vor.u32 1.1754944e-38, %v4592_v46  ;;  %vm4588_vm4 = vmor %vm4586_vm15, %vm4587_vm0 }
 0xc1a   : > { %v4584_v62 = vmul.f32 %v6918_v34, %v4583_v21  ;;  %v4552_v2 = vmul.f32 %v6920_v38, %v9533_v17  ;;  %vm4556_vm3 = vweird.f32 %v9533_v17  ;;  %v4560_v31 = vand.u32 2147483647, %v9533_v17 }
 0xc1b   : > { %v4563_v35 = vor.u32 1.1754944e-38, %v4562_v57  ;;  %vm4557_vm5 = vweird.f32 %v6920_v38  ;;  %v4605_v56 = vand.u32 2147483647, %v9548_v7  ;;  %v4607_v58 = vand.u32 2147483648, %v9548_v7 }
 0xc1c   : > { %v4585_v54 = vadd.f32 %v6918_v34, %v4584_v62  ;;  %v6922_v39 = vpop.eup %6921  ;;  %v4553_v19 = vsub.f32 1.0, %v4552_v2  ;;  %vm4558_vm7 = vmor %vm4556_vm3, %vm4557_vm5  ;;  %vm4561_vm8 = vcmp.eq.f32.partialorder %v4560_v31, 8.507059e+37  ;;  %vm4601_vm9 = vweird.f32 %v9548_v7 }
 0xc1d   : > { %v4028_v0 = vpop.f32.mrf.mxu0  ;;  %v4597_v25 = vmul.f32 %v6922_v39, %v9548_v7  ;;  %vm4602_vm6 = vweird.f32 %v6922_v39  ;;  %vm4606_vm11 = vcmp.eq.f32.partialorder %v4605_v56, 8.507059e+37 }
 0xc1e   : > { %v9563_v47 = vadd.f32 %v4028_v0, %v8909_v53  ;;  %v4057_v52 = vpop.f32.mrf.mxu1  ;;  %v4589_v60 = vsel %vm4588_vm4, %v6918_v34, %v4585_v54  ;;  %v4554_v13 = vmul.f32 %v6920_v38, %v4553_v19  ;;  %vm4603_vm10 = vmor %vm4601_vm9, %vm4602_vm6 }
 0xc1f   : > { %v9571_v11 = vadd.f32 %v4057_v52, %v8911_v4  ;;  %v4594_v42 = vsel %vm9587_vm1, %v4593_v44, %v4589_v60  ;;  %v4598_v27 = vsub.f32 1.0, %v4597_v25 }
 0xc20   : > { %v6240_v1 = vmul.f32 -1.702, %v9563_v47  ;;  %v4753_v9 = vmul.f32 %v4594_v42, %v9406_v8  ;;  %v4555_v30 = vadd.f32 %v6920_v38, %v4554_v13 }
 0xc21   : > { %v6241_v49 = vmul.f32 -1.702, %v9571_v11  ;;  %v4599_v29 = vmul.f32 %v6922_v39, %v4598_v27 }
 0xc22   : > { %v4205_v50 = vmul.f32 1.442695, %v6240_v1  ;;  %v4773_v23 = vpack.c.bf16 %v4753_v9, %v4749_v33  ;;  %v4559_v0 = vsel %vm4558_vm7, %v6920_v38, %v4555_v30  ;;  %v4549_v33 = vsel %vm9593_vm2, %v9559_v16, %v4544_v40 }
 0xc23   : > { %v4207_v36 = vmul.f32 1.442695, %v6241_v49  ;;  %v3999_v37 = vpop.f32.mrf.mxu3  ;;  %v4564_v52 = vsel %vm4561_vm8, %v4563_v35, %v4559_v0  ;;  %v4600_v57 = vadd.f32 %v6922_v39, %v4599_v29  ;;  %v4608_v38 = vor.u32 1.1754944e-38, %v4607_v58 }
 0xc24   : > { %6923 = vpow2.f32 %v4205_v50  ;;  %v9603_v55 = vadd.f32 %v3999_v37, %v8922_v5  ;;  %v4086_v12 = vpop.f32.mrf.mxu2  ;;  %5115 = vmatmul.bf16.gmra.mxu1 %v4773_v23  ;;  %v4750_v48 = vmul.f32 %v4549_v33, %v9337_v22 }
 0xc25   : > { %6925 = vpow2.f32 %v4207_v36  ;;  %v9608_v34 = vadd.f32 %v4086_v12, %v8927_v43  ;;  %v4030_v45 = vpop.f32.mrf.mxu0  ;;  %v4604_v7 = vsel %vm4603_vm10, %v6922_v39, %v4600_v57 }
 0xc26   : > { %v6239_v15 = vmul.f32 -1.702, %v9603_v55  ;;  %v9617_v14 = vadd.f32 %v4030_v45, %v8909_v53  ;;  %v4751_v53 = vmul.f32 %v4564_v52, %v9449_v61  ;;  %v4609_v2 = vsel %vm4606_vm11, %v4608_v38, %v4604_v7  ;;  %v4059_v54 = vpop.f32.mrf.mxu1 }
 0xc27   : > { %v6242_v8 = vmul.f32 -1.702, %v9608_v34  ;;  %v4754_v16 = vmul.f32 %v4609_v2, %v9469_v51  ;;  %v9635_v44 = vadd.f32 %v4059_v54, %v8911_v4 }
 0xc28   : > { %v4203_v21 = vmul.f32 1.442695, %v6239_v15  ;;  %v6244_v17 = vmul.f32 -1.702, %v9617_v14  ;;  %v4771_v49 = vpack.c.bf16 %v4751_v53, %v9567_v3 }
 0xc29   : > { %v4209_v63 = vmul.f32 1.442695, %v6242_v8  ;;  %v4774_v40 = vpack.c.bf16 %v4754_v16, %v4750_v48  ;;  %v6245_v51 = vmul.f32 -1.702, %v9635_v44 }
 0xc2a   : > { %v6924_v46 = vpop.eup %6923  ;;  %6927 = vpow2.f32 %v4203_v21  ;;  %v4213_v59 = vmul.f32 1.442695, %v6244_v17  ;;  %5057 = vmatmul.bf16.gmra.mxu3 %v4771_v49 }
 0xc2b   : > { %v6926_v62 = vpop.eup %6925  ;;  %v9626_v1 = vadd.f32 1.0, %v6924_v46  ;;  %5144 = vmatmul.bf16.gmra.mxu2 %v4774_v40  ;;  %v4001_v3 = vpop.f32.mrf.mxu3  ;;  %v4215_v13 = vmul.f32 1.442695, %v6245_v51 }
 0xc2c   : > { %v9632_v61 = vadd.f32 1.0, %v6926_v62  ;;  %v9643_v36 = vadd.f32 %v4001_v3, %v8922_v5  ;;  %v4088_v37 = vpop.f32.mrf.mxu2 }
 0xc2d   : > { %6929 = vrcp.f32 %v9626_v1  ;;  %v9650_v12 = vadd.f32 %v4088_v37, %v8927_v43  ;;  %vm4631_vm13 = vweird.f32 %v9626_v1  ;;  %v4635_v21 = vand.u32 2147483647, %v9626_v1 }
 0xc2e   : > { %6931 = vpow2.f32 %v4209_v63  ;;  %v6243_v9 = vmul.f32 -1.702, %v9643_v36  ;;  %v4637_v46 = vand.u32 2147483648, %v9626_v1  ;;  %v4650_v53 = vand.u32 2147483647, %v9632_v61 }
 0xc2f   : > { %6933 = vpow2.f32 %v4213_v59  ;;  %v6246_v30 = vmul.f32 -1.702, %v9650_v12  ;;  %vm4636_vm0 = vcmp.eq.f32.partialorder %v4635_v21, 8.507059e+37  ;;  %vm4646_vm3 = vweird.f32 %v9632_v61 }
 0xc30   : > { %v6928_v50 = vpop.eup %6927  ;;  %6935 = vrcp.f32 %v9632_v61  ;;  %v4211_v56 = vmul.f32 1.442695, %v6243_v9  ;;  %v4638_v49 = vor.u32 1.1754944e-38, %v4637_v46  ;;  %vm9693_vm7 = vcmp.eq.f32.partialorder %v4650_v53, 8.507059e+37 }
 0xc31   : > { %v9640_v35 = vadd.f32 1.0, %v6928_v50  ;;  %v4217_v29 = vmul.f32 1.442695, %v6246_v30 }
 0xc33   : > { %v6930_v39 = vpop.eup %6929  ;;  %6937 = vrcp.f32 %v9640_v35  ;;  %vm4616_vm8 = vweird.f32 %v9640_v35 }
 0xc34   : > { %v6932_v19 = vpop.eup %6931  ;;  %v4627_v22 = vmul.f32 %v6930_v39, %v9626_v1  ;;  %vm4632_vm12 = vweird.f32 %v6930_v39 }
 0xc35   : > { %v6934_v31 = vpop.eup %6933  ;;  %v9645_v4 = vadd.f32 1.0, %v6932_v19  ;;  %vm9667_vm14 = vmor %vm4631_vm13, %vm4632_vm12 }
 0xc36   : > { %v9647_v60 = vpop.eup %6935  ;;  %v4628_v25 = vsub.f32 1.0, %v4627_v22  ;;  %v4248_v42 = vadd.f32 1.0, %v6934_v31 }
 0xc37   : > { %v4642_v5 = vmul.f32 %v9647_v60, %v9632_v61  ;;  %vm4647_vm1 = vweird.f32 %v9647_v60  ;;  %vm4661_vm9 = vweird.f32 %v9645_v4  ;;  %v4665_v21 = vand.u32 2147483647, %v9645_v4 }
 0xc38   : > { %6939 = vrcp.f32 %v4248_v42  ;;  %v4629_v27 = vmul.f32 %v6930_v39, %v4628_v25  ;;  %v4695_v38 = vand.u32 2147483647, %v4248_v42  ;;  %v4697_v1 = vand.u32 2147483648, %v4248_v42  ;;  %vm9689_vm6 = vmor %vm4646_vm3, %vm4647_vm1 }
 0xc39   : > { %6941 = vrcp.f32 %v9645_v4  ;;  %v9658_v58 = vpop.eup %6937  ;;  %v4643_v15 = vsub.f32 1.0, %v4642_v5  ;;  %vm4691_vm2 = vweird.f32 %v4248_v42 }
 0xc3a   : > { %6943 = vpow2.f32 %v4215_v13  ;;  %v4630_v45 = vadd.f32 %v6930_v39, %v4629_v27  ;;  %v4612_v52 = vmul.f32 %v9658_v58, %v9640_v35  ;;  %v4698_v19 = vor.u32 1.1754944e-38, %v4697_v1 }
 0xc3b   : > { %6945 = vpow2.f32 %v4211_v56  ;;  %v4644_v63 = vmul.f32 %v9647_v60, %v4643_v15  ;;  %vm4696_vm5 = vcmp.eq.f32.partialorder %v4695_v38, 8.507059e+37  ;;  %v4620_v27 = vand.u32 2147483647, %v9640_v35 }
 0xc3c   : > { %6947 = vpow2.f32 %v4217_v29  ;;  %v4634_v33 = vsel %vm9667_vm14, %v6930_v39, %v4630_v45  ;;  %v4613_v54 = vsub.f32 1.0, %v4612_v52  ;;  %v4652_v39 = vand.u32 2147483648, %v9632_v61 }
 0xc3d   : > { %v4645_v48 = vadd.f32 %v9647_v60, %v4644_v63  ;;  %v4639_v3 = vsel %vm4636_vm0, %v4638_v49, %v4634_v33  ;;  %v4622_v15 = vand.u32 2147483648, %v9640_v35  ;;  %vm4617_vm10 = vweird.f32 %v9658_v58 }
 0xc3e   : > { %v6940_v43 = vpop.eup %6939  ;;  %v4614_v25 = vmul.f32 %v9658_v58, %v4613_v54  ;;  %v4756_v9 = vmul.f32 %v4639_v3, %v9563_v47  ;;  %v4653_v30 = vor.u32 1.1754944e-38, %v4652_v39  ;;  %vm9716_vm11 = vcmp.eq.f32.partialorder %v4620_v27, 8.507059e+37  ;;  %vm9727_vm13 = vmor %vm4616_vm8, %vm4617_vm10 }
 0xc3f   : > { %v9660_v23 = vpop.eup %6941  ;;  %v4687_v8 = vmul.f32 %v6940_v43, %v4248_v42  ;;  %vm4692_vm15 = vweird.f32 %v6940_v43  ;;  %v4649_v5 = vsel %vm9689_vm6, %v9647_v60, %v4645_v48  ;;  %v4623_v57 = vor.u32 1.1754944e-38, %v4622_v15 }
 0xc40   : > { %v6944_v0 = vpop.eup %6943  ;;  %v4657_v59 = vmul.f32 %v9660_v23, %v9645_v4  ;;  %vm4693_vm4 = vmor %vm4691_vm2, %vm4692_vm15  ;;  %v4654_v60 = vsel %vm9693_vm7, %v4653_v30, %v4649_v5  ;;  %v4615_v29 = vadd.f32 %v9658_v58, %v4614_v25  ;;  %vm4662_vm14 = vweird.f32 %v9660_v23 }
 0xc41   : > { %v4688_v17 = vsub.f32 1.0, %v4687_v8  ;;  %v9672_v62 = vadd.f32 1.0, %v6944_v0  ;;  %v6946_v7 = vpop.eup %6945  ;;  %v4757_v33 = vmul.f32 %v4654_v60, %v9571_v11  ;;  %v4667_v1 = vand.u32 2147483648, %v9645_v4  ;;  %vm9742_vm2 = vmor %vm4661_vm9, %vm4662_vm14 }
 0xc42   : > { %v9682_v40 = vadd.f32 1.0, %v6946_v7  ;;  %v6948_v50 = vpop.eup %6947  ;;  %v4658_v22 = vsub.f32 1.0, %v4657_v59  ;;  %v4619_v59 = vsel %vm9727_vm13, %v9658_v58, %v4615_v29  ;;  %vm4666_vm8 = vcmp.eq.f32.partialorder %v4665_v21, 8.507059e+37 }
 0xc43   : > { %v4689_v2 = vmul.f32 %v6940_v43, %v4688_v17  ;;  %6949 = vrcp.f32 %v9672_v62  ;;  %v9698_v42 = vadd.f32 1.0, %v6948_v50  ;;  %v4710_v46 = vand.u32 2147483647, %v9672_v62 }
 0xc44   : > { %6951 = vrcp.f32 %v9682_v40  ;;  %v4659_v45 = vmul.f32 %v9660_v23, %v4658_v22  ;;  %v4712_v52 = vand.u32 2147483648, %v9672_v62  ;;  %vm4706_vm15 = vweird.f32 %v9672_v62 }
 0xc45   : > { %v4690_v16 = vadd.f32 %v6940_v43, %v4689_v2  ;;  %6953 = vrcp.f32 %v9698_v42  ;;  %vm4711_vm1 = vcmp.eq.f32.partialorder %v4710_v46, 8.507059e+37  ;;  %v4682_v49 = vand.u32 2147483648, %v9682_v40 }
 0xc46   : > { %v4660_v38 = vadd.f32 %v9660_v23, %v4659_v45  ;;  %v4713_v35 = vor.u32 1.1754944e-38, %v4712_v52  ;;  %v4680_v58 = vand.u32 2147483647, %v9682_v40  ;;  %v4725_v25 = vand.u32 2147483647, %v9698_v42 }
 0xc47   : > { %v4694_v51 = vsel %vm4693_vm4, %v6940_v43, %v4690_v16  ;;  %vm4676_vm4 = vweird.f32 %v9682_v40  ;;  %v4683_v31 = vor.u32 1.1754944e-38, %v4682_v49  ;;  %vm4721_vm9 = vweird.f32 %v9698_v42 }
 0xc48   : > { %v4699_v61 = vsel %vm4696_vm5, %v4698_v19, %v4694_v51  ;;  %v4664_v3 = vsel %vm9742_vm2, %v9660_v23, %v4660_v38  ;;  %v4727_v51 = vand.u32 2147483648, %v9698_v42  ;;  %vm4681_vm7 = vcmp.eq.f32.partialorder %v4680_v58, 8.507059e+37 }
 0xc49   : > { %v6950_v13 = vpop.eup %6949  ;;  %v4760_v56 = vmul.f32 %v4699_v61, %v9617_v14  ;;  %v4668_v61 = vor.u32 1.1754944e-38, %v4667_v1 }
 0xc4a   : > { %v4702_v43 = vmul.f32 %v6950_v13, %v9672_v62  ;;  %v6952_v8 = vpop.eup %6951  ;;  %vm4707_vm12 = vweird.f32 %v6950_v13  ;;  %v4624_v62 = vsel %vm9716_vm11, %v4623_v57, %v4619_v59  ;;  %vm4726_vm11 = vcmp.eq.f32.partialorder %v4725_v25, 8.507059e+37 }
 0xc4b   : > { %v4776_v47 = vpack.c.bf16 %v4760_v56, %v4756_v9  ;;  %v4672_v17 = vmul.f32 %v6952_v8, %v9682_v40  ;;  %v6954_v7 = vpop.eup %6953  ;;  %vm4708_vm0 = vmor %vm4706_vm15, %vm4707_vm12  ;;  %vm4677_vm3 = vweird.f32 %v6952_v8  ;;  %v4669_v40 = vsel %vm4666_vm8, %v4668_v61, %v4664_v3 }
 0xc4c   : > { %v4703_v14 = vsub.f32 1.0, %v4702_v43  ;;  %v4717_v54 = vmul.f32 %v6954_v7, %v9698_v42  ;;  %vm4678_vm5 = vmor %vm4676_vm4, %vm4677_vm3  ;;  %vm4722_vm6 = vweird.f32 %v6954_v7  ;;  %v4728_v56 = vor.u32 1.1754944e-38, %v4727_v51  ;;  %v9766_v42 = vld [vmem:[%s1091_s2] ss:$0 sm:$0xff] }
 0xc4d   : > { %5091 = vmatmul.bf16.gmra.mxu0 %v4776_v47  ;;  %v4673_v11 = vsub.f32 1.0, %v4672_v17  ;;  %vm4723_vm10 = vmor %vm4721_vm9, %vm4722_vm6  ;;  %v4758_v45 = vmul.f32 %v4669_v40, %v9608_v34 }
 0xc4e   : > { %v4704_v63 = vmul.f32 %v6950_v13, %v4703_v14  ;;  %v4718_v19 = vsub.f32 1.0, %v4717_v54  ;;  %v5077_v29 = vpop.f32.mrf.mxu0 }
 0xc4f   : > { %v4674_v50 = vmul.f32 %v6952_v8, %v4673_v11 }
 0xc50   : > { %v4705_v2 = vadd.f32 %v6950_v13, %v4704_v63  ;;  %v4719_v37 = vmul.f32 %v6954_v7, %v4718_v19 }
 0xc51   : > { %v4675_v22 = vadd.f32 %v6952_v8, %v4674_v50 }
 0xc52   : > { %v4709_v16 = vsel %vm4708_vm0, %v6950_v13, %v4705_v2  ;;  %v4720_v5 = vadd.f32 %v6954_v7, %v4719_v37 }
 0xc53   : > { %v4714_v39 = vsel %vm4711_vm1, %v4713_v35, %v4709_v16  ;;  %v4679_v13 = vsel %vm4678_vm5, %v6952_v8, %v4675_v22  ;;  %v5106_v8 = vpop.f32.mrf.mxu1 }
 0xc54   : > { %v4761_v4 = vmul.f32 %v4714_v39, %v9635_v44  ;;  %v4684_v23 = vsel %vm4681_vm7, %v4683_v31, %v4679_v13  ;;  %v4755_v44 = vmul.f32 %v4624_v62, %v9603_v55  ;;  %v4724_v30 = vsel %vm4723_vm10, %v6954_v7, %v4720_v5 }
 0xc55   : > { %v4759_v27 = vmul.f32 %v4684_v23, %v9643_v36  ;;  %v4729_v15 = vsel %vm4726_vm11, %v4728_v56, %v4724_v30 }
 0xc56   : > { %v4777_v9 = vpack.c.bf16 %v4761_v4, %v4757_v33  ;;  %v4762_v47 = vmul.f32 %v4729_v15, %v9650_v12  ;;  %v5079_v12 = vpop.f32.mrf.mxu0 }
 0xc57   : > { %v4775_v43 = vpack.c.bf16 %v4759_v27, %v4755_v44 }
 0xc58   : > { %5120 = vmatmul.bf16.gmra.mxu1 %v4777_v9  ;;  %v4778_v55 = vpack.c.bf16 %v4762_v47, %v4758_v45 }
 0xc59   : > { %5062 = vmatmul.bf16.gmra.mxu3 %v4775_v43 }
 0xc5a   : > { %5149 = vmatmul.bf16.gmra.mxu2 %v4778_v55 }
 0xc5b   : > { %v5108_v17 = vpop.f32.mrf.mxu1 }
 0xc5d   : > { %v5048_v36 = vpop.f32.mrf.mxu3 }
 0xc5e   : > { %v5049_v60 = vadd.f32 %v9766_v42, %v5048_v36 }
 0xc60   : > { %v5078_v14 = vadd.f32 %v5077_v29, %v5049_v60 }
 0xc62   : > { %v5107_v21 = vadd.f32 %v5106_v8, %v5078_v14 }
 0xc65   : > { %v5050_v0 = vpop.f32.mrf.mxu3 }
 0xc66   : > { %v5051_v34 = vadd.f32 %v9766_v42, %v5050_v0 }
 0xc68   : > { %v5080_v57 = vadd.f32 %v5079_v12, %v5051_v34 }
 0xc69   : > { %v5135_v46 = vpop.f32.mrf.mxu2 }
 0xc6a   : > { %v5136_v52 = vadd.f32 %v5135_v46, %v5107_v21  ;;  %v5109_v33 = vadd.f32 %v5108_v17, %v5080_v57 }
 0xc6c   : > { %v9771_v63 = vadd.f32 %v5136_v52, %v8703_v10 }
 0xc71   : > { %v5137_v53 = vpop.f32.mrf.mxu2 }
 0xc72   : > { %v5138_v38 = vadd.f32 %v5137_v53, %v5109_v33  ;;  %v5082_v7 = vpop.f32.mrf.mxu0 }
 0xc74   : > { %v9774_v1 = vadd.f32 %v5138_v38, %v8708_v18 }
 0xc7a   : > { %v5111_v11 = vpop.f32.mrf.mxu1  ;;  %v5084_v58 = vpop.f32.mrf.mxu0 }
 0xc82   : > { %v5113_v3 = vpop.f32.mrf.mxu1 }
 0xc8b   : > { %v5053_v59 = vpop.f32.mrf.mxu3  ;;  %v5140_v49 = vpop.f32.mrf.mxu2 }
 0xc8c   : > { %v5054_v2 = vadd.f32 %v9766_v42, %v5053_v59 }
 0xc8e   : > { %v5083_v35 = vadd.f32 %v5082_v7, %v5054_v2 }
 0xc90   : > { %v5112_v54 = vadd.f32 %v5111_v11, %v5083_v35 }
 0xc92   : > { %v5141_v48 = vadd.f32 %v5140_v49, %v5112_v54 }
 0xc93   : > { %v5055_v16 = vpop.f32.mrf.mxu3  ;;  %v5142_v39 = vpop.f32.mrf.mxu2 }
 0xc94   : > { %v9778_v10 = vadd.f32 %v5141_v48, %v8715_v6  ;;  %v5056_v50 = vadd.f32 %v9766_v42, %v5055_v16 }
 0xc95   : > { %v5087_v22 = vpop.f32.mrf.mxu0 }
 0xc96   : > { %v5085_v62 = vadd.f32 %v5084_v58, %v5056_v50 }
 0xc98   : > { %v5114_v18 = vadd.f32 %v5113_v3, %v5085_v62 }
 0xc9a   : > { %v5143_v19 = vadd.f32 %v5142_v39, %v5114_v18 }
 0xc9c   : > { %v9782_v4 = vadd.f32 %v5143_v19, %v8720_v28 }
 0xc9d   : > { %v5089_v44 = vpop.f32.mrf.mxu0 }
 0xca1   : > { %v5116_v37 = vpop.f32.mrf.mxu1 }
 0xca9   : > { %v5118_v27 = vpop.f32.mrf.mxu1 }
 0xcad   : > { %v5058_v51 = vpop.f32.mrf.mxu3 }
 0xcae   : > { %v5059_v31 = vadd.f32 %v9766_v42, %v5058_v51  ;;  %v5145_v61 = vpop.f32.mrf.mxu2 }
 0xcb0   : > { %v5088_v25 = vadd.f32 %v5087_v22, %v5059_v31 }
 0xcb2   : > { %v5117_v6 = vadd.f32 %v5116_v37, %v5088_v25 }
 0xcb4   : > { %v5146_v13 = vadd.f32 %v5145_v61, %v5117_v6 }
 0xcb5   : > { %v5060_v9 = vpop.f32.mrf.mxu3 }
 0xcb6   : > { %v9786_v23 = vadd.f32 %v5146_v13, %v8727_v24  ;;  %v5061_v5 = vadd.f32 %v9766_v42, %v5060_v9  ;;  %v5147_v56 = vpop.f32.mrf.mxu2 }
 0xcb8   : > { %v5090_v40 = vadd.f32 %v5089_v44, %v5061_v5 }
 0xcba   : > { %v5119_v28 = vadd.f32 %v5118_v27, %v5090_v40 }
 0xcbc   : > { %v5148_v30 = vadd.f32 %v5147_v56, %v5119_v28 }
 0xcbe   : > { %v9790_v15 = vadd.f32 %v5148_v30, %v8732_v32 }
 0xcca   : > { %v5092_v43 = vpop.f32.mrf.mxu0 }
 0xcd2   : > { %v5094_v21 = vpop.f32.mrf.mxu0 }
 0xcd5   : > { %v5121_v55 = vpop.f32.mrf.mxu1 }
 0xcdc   : > { %v5063_v45 = vpop.f32.mrf.mxu3 }
 0xcdd   : > { %v5064_v47 = vadd.f32 %v9766_v42, %v5063_v45  ;;  %v5150_v60 = vpop.f32.mrf.mxu2  ;;  %v5123_v12 = vpop.f32.mrf.mxu1 }
 0xcdf   : > { %v5093_v36 = vadd.f32 %v5092_v43, %v5064_v47 }
 0xce1   : > { %v5122_v24 = vadd.f32 %v5121_v55, %v5093_v36 }
 0xce3   : > { %v5151_v29 = vadd.f32 %v5150_v60, %v5122_v24 }
 0xce4   : > { %v5065_v14 = vpop.f32.mrf.mxu3 }
 0xce5   : > { %v9794_v8 = vadd.f32 %v5151_v29, %v8737_v26  ;;  %v5066_v0 = vadd.f32 %v9766_v42, %v5065_v14  ;;  %v5152_v46 = vpop.f32.mrf.mxu2 }
 0xce7   : > { %v5095_v34 = vadd.f32 %v5094_v21, %v5066_v0 }
 0xce9   : > { %v5124_v32 = vadd.f32 %v5123_v12, %v5095_v34  ;;  %5166 = sbr.rel (%p6375_p5) target bundleno = 3602 (0xe12), region = 124 }
 0xceb   : > { %v5153_v52 = vadd.f32 %v5152_v46, %v5124_v32 }
 0xced   : > { %v9798_v57 = vadd.f32 %v5153_v52, %v8753_v41 }
 0xcee   : > { %5177 = vadd.xlane.f32.xlu2 %v9786_v23  ;;  %5173 = vadd.xlane.f32.xlu1 %v9778_v10 }
 0xcef   : > { %5169 = vadd.xlane.f32.xlu0 %v9771_v63 }
 0xcf6   : > { %5179 = vadd.xlane.f32.xlu2 %v9790_v15  ;;  %5175 = vadd.xlane.f32.xlu1 %v9782_v4 }
 0xcf7   : > { %5171 = vadd.xlane.f32.xlu0 %v9774_v1 }
 0xcfe   : > { %5183 = vadd.xlane.f32.xlu1 %v9798_v57 }
 0xcff   : > { %5181 = vadd.xlane.f32.xlu0 %v9794_v8 }
 0xd61   : > { %v5178_v26 = vpop.xlane.xlu2 %5177  ;;  %v5174_v41 = vpop.xlane.xlu1 %5173 }
 0xd62   : > { %v5187_v42 = vmul.f32 %v5174_v41, %v7871_v20  ;;  %v5170_v17 = vpop.xlane.xlu0 %5169  ;;  %v5189_v58 = vmul.f32 %v5178_v26, %v7871_v20 }
 0xd63   : > { %v5185_v33 = vmul.f32 %v5170_v17, %v7871_v20 }
 0xd64   : > { %v9812_v53 = vsub.f32 %v9778_v10, %v5187_v42  ;;  %v9841_v19 = vsub.f32 %v9786_v23, %v5189_v58 }
 0xd65   : > { %v9815_v38 = vsub.f32 %v9771_v63, %v5185_v33 }
 0xd66   : > { %v5203_v7 = vmul.f32 %v9812_v53, %v9812_v53  ;;  %v5205_v25 = vmul.f32 %v9841_v19, %v9841_v19 }
 0xd67   : > { %v5201_v59 = vmul.f32 %v9815_v38, %v9815_v38 }
 0xd68   : > { %5213 = vadd.xlane.f32.xlu1 %v5203_v7 }
 0xd69   : > { %5209 = vadd.xlane.f32.xlu2 %v5201_v59  ;;  %v5180_v2 = vpop.xlane.xlu2 %5179  ;;  %v5176_v11 = vpop.xlane.xlu1 %5175 }
 0xd6a   : > { %v5190_v35 = vmul.f32 %v5180_v2, %v7871_v20  ;;  %v5188_v49 = vmul.f32 %v5176_v11, %v7871_v20  ;;  %v5172_v54 = vpop.xlane.xlu0 %5171 }
 0xd6b   : > { %v5186_v48 = vmul.f32 %v5172_v54, %v7871_v20 }
 0xd6c   : > { %v9825_v16 = vsub.f32 %v9790_v15, %v5190_v35  ;;  %v9828_v50 = vsub.f32 %v9782_v4, %v5188_v49 }
 0xd6d   : > { %v9832_v62 = vsub.f32 %v9774_v1, %v5186_v48  ;;  %v9878_v48 = vld [vmem:[%s1094_s23] ss:$0 sm:$0xff] }
 0xd6e   : > { %v5206_v3 = vmul.f32 %v9825_v16, %v9825_v16  ;;  %v5204_v18 = vmul.f32 %v9828_v50, %v9828_v50 }
 0xd6f   : > { %v5202_v39 = vmul.f32 %v9832_v62, %v9832_v62 }
 0xd70   : > { %5219 = vadd.xlane.f32.xlu1 %v5206_v3 }
 0xd71   : > { %5215 = vadd.xlane.f32.xlu2 %v5204_v18  ;;  %5211 = vadd.xlane.f32.xlu0 %v5202_v39  ;;  %v5184_v51 = vpop.xlane.xlu1 %5183 }
 0xd72   : > { %v5182_v22 = vpop.xlane.xlu0 %5181  ;;  %v5192_v61 = vmul.f32 %v5184_v51, %v7871_v20 }
 0xd73   : > { %v5191_v31 = vmul.f32 %v5182_v22, %v7871_v20 }
 0xd74   : > { %v9853_v13 = vsub.f32 %v9798_v57, %v5192_v61 }
 0xd75   : > { %v9845_v37 = vsub.f32 %v9794_v8, %v5191_v31 }
 0xd76   : > { %v5208_v9 = vmul.f32 %v9853_v13, %v9853_v13 }
 0xd77   : > { %v5207_v6 = vmul.f32 %v9845_v37, %v9845_v37 }
 0xd79   : > { %5217 = vadd.xlane.f32.xlu0 %v5205_v25  ;;  %5221 = vadd.xlane.f32.xlu2 %v5207_v6  ;;  %v9890_v25 = vld [vmem:[%s1097_s10] ss:$0 sm:$0xff] }
 0xd81   : > { %5223 = vadd.xlane.f32.xlu0 %v5208_v9 }
 0xddb   : > { %v5214_v5 = vpop.xlane.xlu1 %5213 }
 0xddc   : > { %v5227_v44 = vmul.f32 %v5214_v5, %v7871_v20  ;;  %v5210_v40 = vpop.xlane.xlu2 %5209 }
 0xddd   : > { %v5225_v27 = vmul.f32 %v5210_v40, %v7871_v20 }
 0xdde   : > { %v5235_v28 = vadd.f32 1e-05, %v5227_v44 }
 0xddf   : > { %v5233_v56 = vadd.f32 1e-05, %v5225_v27 }
 0xde0   : > { %6965 = vrsqrt.f32 %v5235_v28  ;;  %vm5267_vm12 = vweird.f32 %v5235_v28 }
 0xde1   : > { %6967 = vrsqrt.f32 %v5233_v56  ;;  %vm5247_vm0 = vweird.f32 %v5233_v56 }
 0xde3   : > { %v5220_v30 = vpop.xlane.xlu1 %5219 }
 0xde4   : > { %v5230_v43 = vmul.f32 %v5220_v30, %v7871_v20  ;;  %v5216_v45 = vpop.xlane.xlu2 %5215  ;;  %v5212_v47 = vpop.xlane.xlu0 %5211 }
 0xde5   : > { %v5228_v55 = vmul.f32 %v5216_v45, %v7871_v20  ;;  %v5226_v36 = vmul.f32 %v5212_v47, %v7871_v20 }
 0xde6   : > { %v6966_v60 = vpop.eup %6965  ;;  %v5238_v24 = vadd.f32 1e-05, %v5230_v43 }
 0xde7   : > { %v6968_v29 = vpop.eup %6967  ;;  %v5262_v14 = vmul.f32 %v6966_v60, %v5235_v28  ;;  %v9862_v0 = vadd.f32 1e-05, %v5228_v55  ;;  %v9864_v21 = vadd.f32 1e-05, %v5226_v36  ;;  %vm5268_vm13 = vweird.f32 %v6966_v60 }
 0xde8   : > { %v5242_v34 = vmul.f32 %v6968_v29, %v5233_v56  ;;  %6969 = vrsqrt.f32 %v5238_v24  ;;  %vm5248_vm14 = vweird.f32 %v6968_v29  ;;  %vm5269_vm15 = vmor %vm5267_vm12, %vm5268_vm13  ;;  %vm5297_vm2 = vweird.f32 %v5238_v24 }
 0xde9   : > { %v5263_v12 = vmul.f32 %v6966_v60, %v5262_v14  ;;  %6971 = vrsqrt.f32 %v9862_v0  ;;  %vm5249_vm1 = vmor %vm5247_vm0, %vm5248_vm14  ;;  %vm5277_vm4 = vweird.f32 %v9862_v0  ;;  %vm5257_vm9 = vweird.f32 %v9864_v21 }
 0xdea   : > { %v5243_v32 = vmul.f32 %v6968_v29, %v5242_v34  ;;  %6973 = vrsqrt.f32 %v9864_v21 }
 0xdeb   : > { %v5264_v46 = vmul.f32 0.5, %v5263_v12 }
 0xdec   : > { %v5244_v52 = vmul.f32 0.5, %v5243_v32  ;;  %v5222_v26 = vpop.xlane.xlu2 %5221  ;;  %v5218_v41 = vpop.xlane.xlu0 %5217 }
 0xded   : > { %v5265_v42 = vsub.f32 1.5, %v5264_v46  ;;  %v5231_v17 = vmul.f32 %v5222_v26, %v7871_v20  ;;  %v5229_v33 = vmul.f32 %v5218_v41, %v7871_v20 }
 0xdee   : > { %v6970_v7 = vpop.eup %6969  ;;  %v5245_v59 = vsub.f32 1.5, %v5244_v52 }
 0xdef   : > { %v6972_v2 = vpop.eup %6971  ;;  %v5266_v11 = vmul.f32 %v6966_v60, %v5265_v42  ;;  %v5292_v35 = vmul.f32 %v6970_v7, %v5238_v24  ;;  %v9870_v49 = vadd.f32 1e-05, %v5231_v17  ;;  %v9881_v18 = vadd.f32 1e-05, %v5229_v33 }
 0xdf0   : > { %v6974_v54 = vpop.eup %6973  ;;  %v5246_v58 = vmul.f32 %v6968_v29, %v5245_v59  ;;  %v5272_v3 = vmul.f32 %v6972_v2, %v9862_v0  ;;  %vm5298_vm3 = vweird.f32 %v6970_v7  ;;  %vm5278_vm6 = vweird.f32 %v6972_v2 }
 0xdf1   : > { %v5270_v39 = vsel %vm5269_vm15, %v6966_v60, %v5266_v11  ;;  %v5293_v22 = vmul.f32 %v6970_v7, %v5292_v35  ;;  %v5252_v51 = vmul.f32 %v6974_v54, %v9864_v21  ;;  %6975 = vrsqrt.f32 %v9870_v49  ;;  %vm9901_vm5 = vmor %vm5297_vm2, %vm5298_vm3 }
 0xdf2   : > { %v5323_v31 = vmul.f32 %v5270_v39, %v9812_v53  ;;  %v5250_v61 = vsel %vm5249_vm1, %v6968_v29, %v5246_v58  ;;  %v5273_v6 = vmul.f32 %v6972_v2, %v5272_v3  ;;  %6977 = vrsqrt.f32 %v9881_v18  ;;  %vm5279_vm8 = vmor %vm5277_vm4, %vm5278_vm6 }
 0xdf3   : > { %v5321_v9 = vmul.f32 %v5250_v61, %v9815_v38  ;;  %v5294_v5 = vmul.f32 0.5, %v5293_v22  ;;  %v5253_v44 = vmul.f32 %v6974_v54, %v5252_v51  ;;  %vm5258_vm7 = vweird.f32 %v6974_v54 }
 0xdf4   : > { %v5334_v40 = vmul.f32 %v9878_v48, %v5323_v31  ;;  %v5274_v27 = vmul.f32 0.5, %v5273_v6  ;;  %v5224_v53 = vpop.xlane.xlu0 %5223  ;;  %vm5259_vm10 = vmor %vm5257_vm9, %vm5258_vm7  ;;  %vm5307_vm11 = vweird.f32 %v9870_v49  ;;  %vm5287_vm15 = vweird.f32 %v9881_v18 }
 0xdf5   : > { %v5332_v28 = vmul.f32 %v9878_v48, %v5321_v9  ;;  %v5295_v56 = vsub.f32 1.5, %v5294_v5  ;;  %v5254_v30 = vmul.f32 0.5, %v5253_v44  ;;  %v5232_v43 = vmul.f32 %v5224_v53, %v7871_v20 }
 0xdf6   : > { %v5345_v38 = vadd.f32 %v9890_v25, %v5334_v40  ;;  %v5275_v47 = vsub.f32 1.5, %v5274_v27 }
 0xdf7   : > { %v5343_v55 = vadd.f32 %v9890_v25, %v5332_v28  ;;  %v5296_v36 = vmul.f32 %v6970_v7, %v5295_v56  ;;  %v5255_v60 = vsub.f32 1.5, %v5254_v30  ;;  %v5240_v29 = vadd.f32 1e-05, %v5232_v43  ;;  %v6976_v14 = vpop.eup %6975 }
 0xdf8   : > { %5353 = vst [vmem:[%s7380_s15 + $0x10] sm:$0xff] %v5345_v38  ;;  %v5276_v34 = vmul.f32 %v6972_v2, %v5275_v47  ;;  %v5302_v12 = vmul.f32 %v6976_v14, %v9870_v49  ;;  %v6978_v32 = vpop.eup %6977  ;;  %vm5308_vm12 = vweird.f32 %v6976_v14 }
 0xdf9   : > { %5351 = vst [vmem:[%s7380_s15] sm:$0xff] %v5343_v55  ;;  %v5300_v20 = vsel %vm9901_vm5, %v6970_v7, %v5296_v36  ;;  %v5256_v24 = vmul.f32 %v6974_v54, %v5255_v60  ;;  %6979 = vrsqrt.f32 %v5240_v29  ;;  %v5282_v0 = vmul.f32 %v6978_v32, %v9881_v18  ;;  %vm5309_vm14 = vmor %vm5307_vm11, %vm5308_vm12 }
 0xdfa   : > { %v5326_v46 = vmul.f32 %v5300_v20, %v9825_v16  ;;  %v5280_v52 = vsel %vm5279_vm8, %v6972_v2, %v5276_v34  ;;  %v5303_v42 = vmul.f32 %v6976_v14, %v5302_v12  ;;  %vm5288_vm13 = vweird.f32 %v6978_v32 }
 0xdfb   : > { %v5324_v26 = vmul.f32 %v5280_v52, %v9828_v50  ;;  %v5260_v41 = vsel %vm5259_vm10, %v6974_v54, %v5256_v24  ;;  %v5283_v16 = vmul.f32 %v6978_v32, %v5282_v0  ;;  %vm5289_vm0 = vmor %vm5287_vm15, %vm5288_vm13  ;;  %vm5317_vm2 = vweird.f32 %v5240_v29 }
 0xdfc   : > { %v5337_v17 = vmul.f32 %v9878_v48, %v5326_v46  ;;  %v5322_v21 = vmul.f32 %v5260_v41, %v9832_v62  ;;  %v5304_v7 = vmul.f32 0.5, %v5303_v42 }
 0xdfd   : > { %v5335_v33 = vmul.f32 %v9878_v48, %v5324_v26  ;;  %v5284_v35 = vmul.f32 0.5, %v5283_v16 }
 0xdfe   : > { %v5348_v59 = vadd.f32 %v9890_v25, %v5337_v17  ;;  %v5333_v2 = vmul.f32 %v9878_v48, %v5322_v21  ;;  %v5305_v11 = vsub.f32 1.5, %v5304_v7 }
 0xdff   : > { %v5346_v50 = vadd.f32 %v9890_v25, %v5335_v33  ;;  %v6980_v54 = vpop.eup %6979  ;;  %v5285_v3 = vsub.f32 1.5, %v5284_v35 }
 0xe00   : > { %5356 = vst [vmem:[%s7380_s15 + $0x28] sm:$0xff] %v5348_v59  ;;  %v5344_v62 = vadd.f32 %v9890_v25, %v5333_v2  ;;  %v5306_v58 = vmul.f32 %v6976_v14, %v5305_v11  ;;  %v5312_v39 = vmul.f32 %v6980_v54, %v5240_v29  ;;  %vm5318_vm1 = vweird.f32 %v6980_v54 }
 0xe01   : > { %5354 = vst [vmem:[%s7380_s15 + $0x18] sm:$0xff] %v5346_v50  ;;  %v5286_v51 = vmul.f32 %v6978_v32, %v5285_v3  ;;  %vm5319_vm3 = vmor %vm5317_vm2, %vm5318_vm1 }
 0xe02   : > { %5352 = vst [vmem:[%s7380_s15 + $0x8] sm:$0xff] %v5344_v62  ;;  %v5310_v22 = vsel %vm5309_vm14, %v6976_v14, %v5306_v58  ;;  %v5313_v49 = vmul.f32 %v6980_v54, %v5312_v39 }
 0xe03   : > { %v5327_v31 = vmul.f32 %v5310_v22, %v9845_v37  ;;  %v5290_v61 = vsel %vm5289_vm0, %v6978_v32, %v5286_v51 }
 0xe04   : > { %v5314_v6 = vmul.f32 0.5, %v5313_v49  ;;  %v5325_v5 = vmul.f32 %v5290_v61, %v9841_v19 }
 0xe05   : > { %v5338_v9 = vmul.f32 %v9878_v48, %v5327_v31 }
 0xe06   : > { %v5315_v44 = vsub.f32 1.5, %v5314_v6  ;;  %v5336_v27 = vmul.f32 %v9878_v48, %v5325_v5 }
 0xe07   : > { %v5349_v40 = vadd.f32 %v9890_v25, %v5338_v9 }
 0xe08   : > { %v5316_v53 = vmul.f32 %v6980_v54, %v5315_v44  ;;  %v5347_v37 = vadd.f32 %v9890_v25, %v5336_v27 }
 0xe09   : > { %5357 = vst [vmem:[%s7380_s15 + $0x30] sm:$0xff] %v5349_v40 }
 0xe0a   : > { %v5320_v18 = vsel %vm5319_vm3, %v6980_v54, %v5316_v53  ;;  %5355 = vst [vmem:[%s7380_s15 + $0x20] sm:$0xff] %v5347_v37 }
 0xe0b   : > { %v5328_v28 = vmul.f32 %v5320_v18, %v9853_v13 }
 0xe0d   : > { %v5339_v56 = vmul.f32 %v9878_v48, %v5328_v28 }
 0xe0f   : > { %v5350_v19 = vadd.f32 %v9890_v25, %v5339_v56 }
 0xe11   : > { %5358 = vst [vmem:[%s7380_s15 + $0x38] sm:$0xff] %v5350_v19 }
 0xe12 PF: > { %p6376_p6 = scmp.ge.s32.totalorder %s7061_s27, 1 }
 0xe14   : > { %5362 = sbr.rel (%p6376_p6) target bundleno = 3617 (0xe21), region = 128 }
 0xe19   : > { %5363 = vst [vmem:[%s7380_s15] sm:$0xff] %v9771_v63 }
 0xe1a   : > { %5364 = vst [vmem:[%s7380_s15 + $0x8] sm:$0xff] %v9774_v1 }
 0xe1b   : > { %5365 = vst [vmem:[%s7380_s15 + $0x10] sm:$0xff] %v9778_v10 }
 0xe1c   : > { %5366 = vst [vmem:[%s7380_s15 + $0x18] sm:$0xff] %v9782_v4 }
 0xe1d   : > { %5367 = vst [vmem:[%s7380_s15 + $0x20] sm:$0xff] %v9786_v23 }
 0xe1e   : > { %5368 = vst [vmem:[%s7380_s15 + $0x28] sm:$0xff] %v9790_v15 }
 0xe1f   : > { %5369 = vst [vmem:[%s7380_s15 + $0x30] sm:$0xff] %v9794_v8 }
 0xe20   : > { %5370 = vst [vmem:[%s7380_s15 + $0x38] sm:$0xff] %v9798_v57 }
 0xe21 PF: > { %s10167_s10 = sld [smem:[#allocation9_spill]] }
 0xe22   : > { %s10168_s2 = sld [smem:[#allocation5_spill]] }
 0xe23   : > { %s10169_s25 = sld [smem:[#allocation6_spill]] }
 0xe24   : > { %s10170_s26 = sld [smem:[#allocation12_spill]] }
 0xe25   : > { %s10171_s27 = sld [smem:[#allocation7_spill]] }
 0xe26   : > { %s10172_s3 = sld [smem:[#allocation8_spill]] }
 0xe27   : > { %s34_s0 = sadd.s32 1, %s10167_s10   ;;  %s10173_s28 = sld [smem:[#allocation10_spill]] }
 0xe28   : > { %p31_p7 = scmp.ge.s32.totalorder %s34_s0, 6   ;;  %s10174_s29 = sld [smem:[#allocation11_spill]] }
 0xe2a   :  { %33 = sbr.rel (!%p31_p7) target bundleno = 25 (0x19), region = 212 }
 0xe2f   :  { %5392 = vsyncpa [#allocation3], 1 }
 0xe30   :  { %5394 = vsyncpa [#allocation3 + $0x1], 1 }

</bundles_post_ra>
